<compile_context>
chip_gen: v7x
topology: tpu7x:2x2x1
jax: 0.10.0
libtpu: 0.0.40
codegen_flags: <defaults>
</compile_context>

<pallas_src>
import numpy as np
import jax
import jax.numpy as jnp
from jax.experimental import pallas as pl
from jax.experimental.pallas import tpu as pltpu

# ------------------------------ configuration ------------------------------
IMG = 32            # image_size (scaled down from 400)
PATCH = 4           # swin patch size
EMBED = 32          # embed dim (scaled down from 128)
DEPTHS = (2, 2)     # blocks per stage (scaled down from (2, 2, 18, 2))
HEADS = (2, 4)
WS = 4              # window size (scaled down from 7)
MLP_RATIO = 4
NUM_CLASSES = 5
BATCH = 2
CP = 128            # lane-dense padded class dim for decoder/upsample
DEC_HIDDEN = 256
EPS = 1e-5

F32 = jnp.float32
BF16 = jnp.bfloat16


# ------------------------- numpy-only constant helpers ---------------------
# (pure numpy so they never touch tracers -> no TracerArrayConversionError)

def relative_position_index(ws):
    coords = np.stack(np.meshgrid(np.arange(ws), np.arange(ws), indexing="ij"))
    flat = coords.reshape(2, -1)
    rel = flat[:, :, None] - flat[:, None, :]
    rel = rel.transpose(1, 2, 0).astype(np.int64)
    rel[:, :, 0] += ws - 1
    rel[:, :, 1] += ws - 1
    rel[:, :, 0] *= 2 * ws - 1
    return jnp.asarray(rel.sum(-1), jnp.int32)                    # (T, T)


def shifted_window_mask(H, W, ws, shift):
    """Shift-window attention mask, built entirely in numpy. (nW, T, T)."""
    img = np.zeros((H, W), np.float32)
    cnt = 0
    for hs in (slice(0, -ws), slice(-ws, -shift), slice(-shift, None)):
        for wsl in (slice(0, -ws), slice(-ws, -shift), slice(-shift, None)):
            img[hs, wsl] = cnt
            cnt += 1
    mw = img.reshape(H // ws, ws, W // ws, ws).transpose(0, 2, 1, 3)
    mw = mw.reshape(-1, ws * ws)
    diff = mw[:, None, :] - mw[:, :, None]
    return jnp.asarray(np.where(diff != 0, -100.0, 0.0).astype(np.float32))


def bilinear_matrix(out_size, in_size):
    """PyTorch nn.Upsample(mode='bilinear', align_corners=False) 1-D matrix."""
    scale = in_size / out_size
    dst = np.arange(out_size, dtype=np.float64)
    src = np.maximum((dst + 0.5) * scale - 0.5, 0.0)
    x0 = np.minimum(np.floor(src).astype(np.int64), in_size - 1)
    x1 = np.minimum(x0 + 1, in_size - 1)
    lam = src - x0
    m = np.zeros((out_size, in_size), np.float32)
    m[np.arange(out_size), x0] += (1.0 - lam)
    m[np.arange(out_size), x1] += lam
    return m                                                      # numpy (out, in)


def conv_valid_masks(B, Hf, Wf):
    """Per-tap validity mask for 3x3 same-pad conv on row-flattened NHWC. (9,N,1)."""
    masks = np.zeros((9, B * Hf * Wf, 1), np.float32)
    t = 0
    for dh in (-1, 0, 1):
        for dw in (-1, 0, 1):
            v = np.zeros((B, Hf, Wf), np.float32)
            for hh in range(Hf):
                for ww in range(Wf):
                    if 0 <= hh + dh < Hf and 0 <= ww + dw < Wf:
                        v[:, hh, ww] = 1.0
            masks[t] = v.reshape(-1, 1)
            t += 1
    return jnp.asarray(masks)


# ------------------------------ JAX glue ------------------------------------

def window_partition(x, ws):
    B, H, W, C = x.shape
    x = x.reshape(B, H // ws, ws, W // ws, ws, C)
    return jnp.transpose(x, (0, 1, 3, 2, 4, 5)).reshape(-1, ws * ws, C)


def window_reverse(windows, ws, B, H, W):
    C = windows.shape[-1]
    x = windows.reshape(B, H // ws, W // ws, ws, ws, C)
    return jnp.transpose(x, (0, 1, 3, 2, 4, 5)).reshape(B, H, W, C)


# ------------------------------ Pallas kernels ------------------------------

def _patch_embed_kernel():
    def kernel(col_ref, w_ref, b_ref, g_ref, be_ref, o_ref):
        h = jnp.dot(col_ref[...].astype(BF16), w_ref[...].astype(BF16),
                    preferred_element_type=F32) + b_ref[...]
        mu = jnp.mean(h, axis=-1, keepdims=True)
        var = jnp.mean((h - mu) ** 2, axis=-1, keepdims=True)
        o_ref[...] = (h - mu) * jax.lax.rsqrt(var + EPS) * g_ref[...] + be_ref[...]
    return kernel


def _merge_kernel():
    def kernel(x_ref, g_ref, b_ref, w_ref, o_ref):
        x = x_ref[...]
        mu = jnp.mean(x, axis=-1, keepdims=True)
        var = jnp.mean((x - mu) ** 2, axis=-1, keepdims=True)
        xn = (x - mu) * jax.lax.rsqrt(var + EPS) * g_ref[...] + b_ref[...]
        o_ref[...] = jnp.dot(xn.astype(BF16), w_ref[...].astype(BF16),
                             preferred_element_type=F32)
    return kernel


def _block_kernel(nW, T, C, nH, Dh, scale):
    """Full Swin block for ONE image (nW windows): attention + MLP fused."""
    def kernel(win_ref, ln1g_ref, ln1b_ref, qkvw_ref, qkvb_ref, relb_ref,
               mask_ref, projw_ref, projb_ref, ln2g_ref, ln2b_ref,
               fc1w_ref, fc1b_ref, fc2w_ref, fc2b_ref, o_ref):
        xw = win_ref[...]                                 # (nW, T, C)
        x2 = xw.reshape(nW * T, C)

        # ---- LN1 (f32) ----
        mu = jnp.mean(x2, axis=-1, keepdims=True)
        var = jnp.mean((x2 - mu) ** 2, axis=-1, keepdims=True)
        xn = (x2 - mu) * jax.lax.rsqrt(var + EPS) * ln1g_ref[...] + ln1b_ref[...]
        xnb = xn.astype(BF16)

        mask = mask_ref[...]                              # (nW, T, T)
        acc = jnp.zeros((nW * T, C), F32)
        for hd in range(nH):                              # static unroll over heads
            q = jnp.dot(xnb, qkvw_ref[0, hd].astype(BF16),
                        preferred_element_type=F32) + qkvb_ref[0, hd]
            k = jnp.dot(xnb, qkvw_ref[1, hd].astype(BF16),
                        preferred_element_type=F32) + qkvb_ref[1, hd]
            v = jnp.dot(xnb, qkvw_ref[2, hd].astype(BF16),
                        preferred_element_type=F32) + qkvb_ref[2, hd]
            q3 = q.reshape(nW, T, Dh)
            k3 = k.reshape(nW, T, Dh)
            v3 = v.reshape(nW, T, Dh)
            s = jnp.einsum('wqd,wkd->wqk', q3.astype(BF16), k3.astype(BF16),
                           preferred_element_type=F32) * scale
            s = s + relb_ref[hd] + mask                   # rel-pos bias + shift mask
            mmax = jnp.max(s, axis=-1, keepdims=True)
            pexp = jnp.exp(s - mmax)
            pexp = pexp * pl.reciprocal(jnp.sum(pexp, axis=-1, keepdims=True),
                                        approx=True)
            oh = jnp.einsum('wqk,wkd->wqd', pexp.astype(BF16), v3.astype(BF16),
                            preferred_element_type=F32)   # (nW, T, Dh)
            acc = acc + jnp.dot(oh.reshape(nW * T, Dh).astype(BF16),
                                projw_ref[hd].astype(BF16),
                                preferred_element_type=F32)

        x_attn = x2 + acc + projb_ref[...]                # attention residual

        # ---- LN2 + MLP + residual ----
        mu2 = jnp.mean(x_attn, axis=-1, keepdims=True)
        var2 = jnp.mean((x_attn - mu2) ** 2, axis=-1, keepdims=True)
        yn = (x_attn - mu2) * jax.lax.rsqrt(var2 + EPS) * ln2g_ref[...] + ln2b_ref[...]
        hmid = jnp.dot(yn.astype(BF16), fc1w_ref[...].astype(BF16),
                       preferred_element_type=F32) + fc1b_ref[...]
        # TODO(synk): PyTorch nn.GELU defaults to exact erf; tanh approximation used here.
        hmid = jax.nn.gelu(hmid, approximate=True)
        y = jnp.dot(hmid.astype(BF16), fc2w_ref[...].astype(BF16),
                    preferred_element_type=F32) + fc2b_ref[...]
        o_ref[...] = (x_attn + y).reshape(nW, T, C)
    return kernel


def _decoder_kernel(B, Hf, Wf, C):
    """final LN + Conv3x3(pad=1)+ReLU + Conv1x1 (padded to CP lanes) + bilinear up."""
    N = B * Hf * Wf
    P = Hf * Wf
    PADR = max(8, Wf + 1)                                 # aligned zero-pad rows

    def kernel(feat_ref, g_ref, b_ref, d1w_ref, d1b_ref, vmask_ref,
               d2w_ref, d2b_ref, m_ref, o_ref, pad_ref):
        x = feat_ref[...]                                 # (N, C)
        mu = jnp.mean(x, axis=-1, keepdims=True)
        var = jnp.mean((x - mu) ** 2, axis=-1, keepdims=True)
        xn = (x - mu) * jax.lax.rsqrt(var + EPS) * g_ref[...] + b_ref[...]

        # zero-padded, VMEM-resident row buffer (no 9x im2col blowup in HBM)
        pad_ref[...] = jnp.zeros(pad_ref.shape, F32)
        pad_ref[PADR:PADR + N, :] = xn

        acc = jnp.zeros((N, DEC_HIDDEN), F32)
        t = 0
        for dh in (-1, 0, 1):
            for dw in (-1, 0, 1):
                off = PADR + dh * Wf + dw
                shifted = pad_ref[off:off + N, :] * vmask_ref[t]
                acc = acc + jnp.dot(shifted.astype(BF16), d1w_ref[t].astype(BF16),
                                    preferred_element_type=F32)
                t += 1
        hid = jnp.maximum(acc + d1b_ref[...], 0.0)                     # ReLU
        logits = jnp.dot(hid.astype(BF16), d2w_ref[...].astype(BF16),
                         preferred_element_type=F32) + d2b_ref[...]    # (N, CP)

        m = m_ref[...]                                                 # (OH*OW, P)
        for bi in range(B):
            o_ref[bi] = jnp.dot(m, logits[bi * P:(bi + 1) * P, :],
                                preferred_element_type=F32)
    return kernel


# ------------------------------ parameter init -----------------------------

def init_params(seed=0):
    key = [jax.random.PRNGKey(seed)]

    def nxt():
        key[0], sub = jax.random.split(key[0])
        return sub

    def wi(shape, std=0.02):
        return jax.random.normal(nxt(), shape, F32) * std

    def init_block(dim, heads, ws):
        return dict(
            norm1_g=jnp.ones((dim,)), norm1_b=jnp.zeros((dim,)),
            qkv_w=wi((dim, 3 * dim)), qkv_b=jnp.zeros((3 * dim,)),
            rel_table=wi(((2 * ws - 1) ** 2, heads)),
            proj_w=wi((dim, dim)), proj_b=jnp.zeros((dim,)),
            norm2_g=jnp.ones((dim,)), norm2_b=jnp.zeros((dim,)),
            fc1_w=wi((dim, MLP_RATIO * dim)), fc1_b=jnp.zeros((MLP_RATIO * dim,)),
            fc2_w=wi((MLP_RATIO * dim, dim)), fc2_b=jnp.zeros((dim,)),
        )

    p = {}
    p["patch_w"] = wi((PATCH * PATCH * 3, EMBED))
    p["patch_b"] = jnp.zeros((EMBED,))
    p["patch_norm_g"] = jnp.ones((EMBED,))
    p["patch_norm_b"] = jnp.zeros((EMBED,))
    p["stages"] = []
    dim = EMBED
    for si, (depth, heads) in enumerate(zip(DEPTHS, HEADS)):
        stage = dict(blocks=[init_block(dim, heads, WS) for _ in range(depth)])
        if si < len(DEPTHS) - 1:
            stage["merge_norm_g"] = jnp.ones((4 * dim,))
            stage["merge_norm_b"] = jnp.zeros((4 * dim,))
            stage["merge_w"] = wi((4 * dim, 2 * dim))
            dim *= 2
        p["stages"].append(stage)
    p["final_norm_g"] = jnp.ones((dim,))
    p["final_norm_b"] = jnp.zeros((dim,))
    # decoder: Conv2d(dim, 256, 3, pad=1) -> ReLU -> Conv2d(256, num_classes, 1)
    p["dec1_w"] = wi((9, dim, DEC_HIDDEN))
    p["dec1_b"] = jnp.zeros((DEC_HIDDEN,))
    p["dec2_w"] = wi((DEC_HIDDEN, NUM_CLASSES))
    p["dec2_b"] = jnp.zeros((NUM_CLASSES,))
    return p


# ------------------------------ forward pass -------------------------------

def swin_block(x, bp, heads, ws, shift):
    B, H, W, C = x.shape
    nW = (H // ws) * (W // ws)
    T = ws * ws
    Dh = C // heads
    scale = float(Dh) ** -0.5

    xs = jnp.roll(x, (-shift, -shift), axis=(1, 2)) if shift > 0 else x
    win = window_partition(xs, ws)                                   # (B*nW, T, C)

    rel = bp["rel_table"][relative_position_index(ws)]               # (T, T, nH)
    rel = jnp.transpose(rel, (2, 0, 1)).astype(F32)                  # (nH, T, T)
    if shift > 0:
        mask = shifted_window_mask(H, W, ws, shift)                  # (nW, T, T)
    else:
        mask = jnp.zeros((nW, T, T), F32)

    qkv_w = bp["qkv_w"].reshape(C, 3, heads, Dh).transpose(1, 2, 0, 3)  # (3,nH,C,Dh)
    qkv_b = bp["qkv_b"].reshape(3, heads, 1, Dh)
    proj_w = bp["proj_w"].reshape(heads, Dh, C)

    def const_spec(shp):
        return pl.BlockSpec(shp, lambda b, _s=len(shp): (0,) * _s)

    out_win = pl.pallas_call(
        _block_kernel(nW, T, C, heads, Dh, scale),
        out_shape=jax.ShapeDtypeStruct((B * nW, T, C), F32),
        grid=(B,),
        in_specs=[
            pl.BlockSpec((nW, T, C), lambda b: (b, 0, 0)),           # windows of image b
            const_spec((1, C)), const_spec((1, C)),                  # LN1
            const_spec((3, heads, C, Dh)), const_spec((3, heads, 1, Dh)),
            const_spec((heads, T, T)),                               # rel-pos bias
            const_spec((nW, T, T)),                                  # shift mask
            const_spec((heads, Dh, C)), const_spec((1, C)),          # proj
            const_spec((1, C)), const_spec((1, C)),                  # LN2
            const_spec((C, MLP_RATIO * C)), const_spec((1, MLP_RATIO * C)),
            const_spec((MLP_RATIO * C, C)), const_spec((1, C)),
        ],
        out_specs=pl.BlockSpec((nW, T, C), lambda b: (b, 0, 0)),
        compiler_params=pltpu.CompilerParams(dimension_semantics=("parallel",)),
    )(win,
      bp["norm1_g"].reshape(1, C), bp["norm1_b"].reshape(1, C),
      qkv_w, qkv_b, rel, mask, proj_w, bp["proj_b"].reshape(1, C),
      bp["norm2_g"].reshape(1, C), bp["norm2_b"].reshape(1, C),
      bp["fc1_w"], bp["fc1_b"].reshape(1, MLP_RATIO * C),
      bp["fc2_w"], bp["fc2_b"].reshape(1, C))

    y = window_reverse(out_win, ws, B, H, W)
    if shift > 0:
        y = jnp.roll(y, (shift, shift), axis=(1, 2))
    return y                                                         # residuals applied in-kernel


def patch_merging(x, stage):
    B, H, W, C = x.shape
    xc = jnp.concatenate(
        [x[:, 0::2, 0::2, :], x[:, 1::2, 0::2, :],
         x[:, 0::2, 1::2, :], x[:, 1::2, 1::2, :]], axis=-1)         # (B, H/2, W/2, 4C)
    N = B * (H // 2) * (W // 2)
    xr = pl.pallas_call(
        _merge_kernel(),
        out_shape=jax.ShapeDtypeStruct((N, 2 * C), F32),
    )(xc.reshape(N, 4 * C),
      stage["merge_norm_g"].reshape(1, 4 * C),
      stage["merge_norm_b"].reshape(1, 4 * C),
      stage["merge_w"])
    return xr.reshape(B, H // 2, W // 2, 2 * C)


def backbone_fwd(x_nchw, p):
    B = x_nchw.shape[0]
    x = jnp.transpose(x_nchw, (0, 2, 3, 1))                          # NHWC
    _, H, W, Cin = x.shape
    ph, pw = H // PATCH, W // PATCH
    # patch embed: 4x4 stride-4 conv as unfold + fused (matmul + LN) kernel
    cols = x.reshape(B, ph, PATCH, pw, PATCH, Cin)
    cols = jnp.transpose(cols, (0, 1, 3, 2, 4, 5)).reshape(B * ph * pw,
                                                           PATCH * PATCH * Cin)
    tok = pl.pallas_call(
        _patch_embed_kernel(),
        out_shape=jax.ShapeDtypeStruct((B * ph * pw, EMBED), F32),
    )(cols, p["patch_w"], p["patch_b"].reshape(1, EMBED),
      p["patch_norm_g"].reshape(1, EMBED), p["patch_norm_b"].reshape(1, EMBED))
    x = tok.reshape(B, ph, pw, EMBED)

    for si, stage in enumerate(p["stages"]):
        H_, W_ = x.shape[1], x.shape[2]
        ws = min(WS, H_, W_)
        for bi, bp in enumerate(stage["blocks"]):
            shift = 0 if (bi % 2 == 0 or ws >= min(H_, W_)) else ws // 2
            x = swin_block(x, bp, HEADS[si], ws, shift)
        if "merge_w" in stage:
            x = patch_merging(x, stage)
    return x        # pre-final-norm NHWC feature (final LN fused into decoder kernel)


def decoder_upsample(feat, p):
    B, Hf, Wf, C = feat.shape
    N = B * Hf * Wf
    OHW = IMG * IMG
    PADR = max(8, Wf + 1)

    feat2 = feat.reshape(N, C)
    d2w = jnp.pad(p["dec2_w"], ((0, 0), (0, CP - NUM_CLASSES)))
    d2b = jnp.pad(p["dec2_b"], ((0, CP - NUM_CLASSES),)).reshape(1, CP)
    M = jnp.asarray(np.kron(bilinear_matrix(IMG, Hf), bilinear_matrix(IMG, Wf)))

    out = pl.pallas_call(
        _decoder_kernel(B, Hf, Wf, C),
        out_shape=jax.ShapeDtypeStruct((B, OHW, CP), F32),
        scratch_shapes=[pltpu.VMEM((N + 2 * PADR, C), F32)],
    )(feat2,
      p["final_norm_g"].reshape(1, C), p["final_norm_b"].reshape(1, C),
      p["dec1_w"], p["dec1_b"].reshape(1, DEC_HIDDEN),
      conv_valid_masks(B, Hf, Wf),
      d2w, d2b, M)

    out = out.reshape(B, IMG, IMG, CP)[..., :NUM_CLASSES]
    return jnp.transpose(out, (0, 3, 1, 2))                          # NCHW


def swin_forward(x_nchw, p):
    feat = backbone_fwd(x_nchw, p)      # NHWC feature (== permute(0,3,1,2) target)
    return decoder_upsample(feat, p)    # NCHW [B, num_classes, IMG, IMG]


# ----------------------------------- main -----------------------------------

if __name__ == "__main__":
    params = init_params(seed=0)
    x = jax.random.normal(jax.random.PRNGKey(0), (BATCH, 3, IMG, IMG), F32)
    fwd = jax.jit(lambda inp: swin_forward(inp, params))
    out = fwd(x)
    jax.block_until_ready(out)
    assert out.shape == (BATCH, NUM_CLASSES, IMG, IMG), out.shape
    assert bool(jnp.all(jnp.isfinite(out)))
    print("KERNEL_OK")
</pallas_src>

<mosaic_0001>
module attributes {stable_mosaic.version = 11 : i64} {
  func.func @kernel(%arg0: memref<128x48xf32, #tpu.memory_space<vmem>>, %arg1: memref<48x32xf32, #tpu.memory_space<vmem>>, %arg2: memref<1x32xf32, #tpu.memory_space<vmem>>, %arg3: memref<1x32xf32, #tpu.memory_space<vmem>>, %arg4: memref<1x32xf32, #tpu.memory_space<vmem>>, %arg5: memref<128x32xf32, #tpu.memory_space<vmem>>) attributes {dimension_semantics = [], scalar_prefetch = 0 : i64, scratch_operands = 0 : i64, tpu.core_type = #tpu.core_type<tc>} {
    %c0 = arith.constant 0 : index
    %c0_0 = arith.constant 0 : index
    %0 = vector.load %arg0[%c0, %c0_0] : memref<128x48xf32, #tpu.memory_space<vmem>>, vector<128x48xf32>
    %1 = arith.truncf %0 : vector<128x48xf32> to vector<128x48xbf16>
    %c0_1 = arith.constant 0 : index
    %c0_2 = arith.constant 0 : index
    %2 = vector.load %arg1[%c0_1, %c0_2] : memref<48x32xf32, #tpu.memory_space<vmem>>, vector<48x32xf32>
    %3 = arith.truncf %2 : vector<48x32xf32> to vector<48x32xbf16>
    %cst = arith.constant dense<0.000000e+00> : vector<128x32xf32>
    %4 = tpu.matmul %1, %3, %cst {dimension_numbers = #tpu.dot_dimension_numbers<[1], [0], [0], [1], [0, 0, 1, 1], [], []>} : vector<128x48xbf16>, vector<48x32xbf16>, vector<128x32xf32> -> vector<128x32xf32>
    %c0_3 = arith.constant 0 : index
    %c0_4 = arith.constant 0 : index
    %5 = vector.load %arg2[%c0_3, %c0_4] : memref<1x32xf32, #tpu.memory_space<vmem>>, vector<1x32xf32>
    %6 = vector.broadcast %5 : vector<1x32xf32> to vector<128x32xf32>
    %7 = arith.addf %4, %6 : vector<128x32xf32>
    %cst_5 = arith.constant dense<0.000000e+00> : vector<128xf32>
    %8 = vector.multi_reduction <add>, %7, %cst_5 [1] : vector<128x32xf32> to vector<128xf32>
    %9 = vector.shape_cast %8 : vector<128xf32> to vector<128x1xf32>
    %cst_6 = arith.constant 3.200000e+01 : f32
    %10 = vector.broadcast %cst_6 : f32 to vector<128x1xf32>
    %11 = arith.divf %9, %10 : vector<128x1xf32>
    %12 = vector.broadcast %11 : vector<128x1xf32> to vector<128x32xf32>
    %13 = arith.subf %7, %12 : vector<128x32xf32>
    %14 = arith.mulf %13, %13 : vector<128x32xf32>
    %cst_7 = arith.constant dense<0.000000e+00> : vector<128xf32>
    %15 = vector.multi_reduction <add>, %14, %cst_7 [1] : vector<128x32xf32> to vector<128xf32>
    %16 = vector.shape_cast %15 : vector<128xf32> to vector<128x1xf32>
    %cst_8 = arith.constant 3.200000e+01 : f32
    %17 = vector.broadcast %cst_8 : f32 to vector<128x1xf32>
    %18 = arith.divf %16, %17 : vector<128x1xf32>
    %19 = vector.broadcast %11 : vector<128x1xf32> to vector<128x32xf32>
    %20 = arith.subf %7, %19 : vector<128x32xf32>
    %cst_9 = arith.constant 9.99999974E-6 : f32
    %21 = vector.broadcast %cst_9 : f32 to vector<128x1xf32>
    %22 = arith.addf %18, %21 : vector<128x1xf32>
    %23 = math.rsqrt %22 : vector<128x1xf32>
    %24 = vector.broadcast %23 : vector<128x1xf32> to vector<128x32xf32>
    %25 = arith.mulf %20, %24 : vector<128x32xf32>
    %c0_10 = arith.constant 0 : index
    %c0_11 = arith.constant 0 : index
    %26 = vector.load %arg3[%c0_10, %c0_11] : memref<1x32xf32, #tpu.memory_space<vmem>>, vector<1x32xf32>
    %27 = vector.broadcast %26 : vector<1x32xf32> to vector<128x32xf32>
    %28 = arith.mulf %25, %27 : vector<128x32xf32>
    %c0_12 = arith.constant 0 : index
    %c0_13 = arith.constant 0 : index
    %29 = vector.load %arg4[%c0_12, %c0_13] : memref<1x32xf32, #tpu.memory_space<vmem>>, vector<1x32xf32>
    %30 = vector.broadcast %29 : vector<1x32xf32> to vector<128x32xf32>
    %31 = arith.addf %28, %30 : vector<128x32xf32>
    %c0_14 = arith.constant 0 : index
    %c0_15 = arith.constant 0 : index
    %32 = vector.load %arg5[%c0_14, %c0_15] : memref<128x32xf32, #tpu.memory_space<vmem>>, vector<128x32xf32>
    tpu.vector_store %arg5[%c0_14, %c0_15], %31 {strides = array<i32>} : memref<128x32xf32, #tpu.memory_space<vmem>>, vector<128x32xf32>,
    return
  }
}

module attributes {stable_mosaic.version = 11 : i64} {
  func.func @kernel(%arg0: i32, %arg1: memref<4x16x32xf32, #tpu.memory_space<vmem>>, %arg2: memref<1x32xf32, #tpu.memory_space<vmem>>, %arg3: memref<1x32xf32, #tpu.memory_space<vmem>>, %arg4: memref<3x2x32x16xf32, #tpu.memory_space<vmem>>, %arg5: memref<3x2x1x16xf32, #tpu.memory_space<vmem>>, %arg6: memref<2x16x16xf32, #tpu.memory_space<vmem>>, %arg7: memref<4x16x16xf32, #tpu.memory_space<vmem>>, %arg8: memref<2x16x32xf32, #tpu.memory_space<vmem>>, %arg9: memref<1x32xf32, #tpu.memory_space<vmem>>, %arg10: memref<1x32xf32, #tpu.memory_space<vmem>>, %arg11: memref<1x32xf32, #tpu.memory_space<vmem>>, %arg12: memref<32x128xf32, #tpu.memory_space<vmem>>, %arg13: memref<1x128xf32, #tpu.memory_space<vmem>>, %arg14: memref<128x32xf32, #tpu.memory_space<vmem>>, %arg15: memref<1x32xf32, #tpu.memory_space<vmem>>, %arg16: memref<4x16x32xf32, #tpu.memory_space<vmem>>) attributes {dimension_semantics = [#tpu.dimension_semantics<parallel>], iteration_bounds = array<i64: 2>, scalar_prefetch = 0 : i64, scratch_operands = 0 : i64, tpu.core_type = #tpu.core_type<tc>, window_params = [{transform_indices = @transform_0, window_bounds = array<i64: 4, 16, 32>}, {pipeline_mode = #tpu.pipeline_mode<synchronous>, transform_indices = @transform_1, window_bounds = array<i64: 1, 32>}, {pipeline_mode = #tpu.pipeline_mode<synchronous>, transform_indices = @transform_2, window_bounds = array<i64: 1, 32>}, {pipeline_mode = #tpu.pipeline_mode<synchronous>, transform_indices = @transform_3, window_bounds = array<i64: 3, 2, 32, 16>}, {pipeline_mode = #tpu.pipeline_mode<synchronous>, transform_indices = @transform_4, window_bounds = array<i64: 3, 2, 1, 16>}, {pipeline_mode = #tpu.pipeline_mode<synchronous>, transform_indices = @transform_5, window_bounds = array<i64: 2, 16, 16>}, {pipeline_mode = #tpu.pipeline_mode<synchronous>, transform_indices = @transform_6, window_bounds = array<i64: 4, 16, 16>}, {pipeline_mode = #tpu.pipeline_mode<synchronous>, transform_indices = @transform_7, window_bounds = array<i64: 2, 16, 32>}, {pipeline_mode = #tpu.pipeline_mode<synchronous>, transform_indices = @transform_8, window_bounds = array<i64: 1, 32>}, {pipeline_mode = #tpu.pipeline_mode<synchronous>, transform_indices = @transform_9, window_bounds = array<i64: 1, 32>}, {pipeline_mode = #tpu.pipeline_mode<synchronous>, transform_indices = @transform_10, window_bounds = array<i64: 1, 32>}, {pipeline_mode = #tpu.pipeline_mode<synchronous>, transform_indices = @transform_11, window_bounds = array<i64: 32, 128>}, {pipeline_mode = #tpu.pipeline_mode<synchronous>, transform_indices = @transform_12, window_bounds = array<i64: 1, 128>}, {pipeline_mode = #tpu.pipeline_mode<synchronous>, transform_indices = @transform_13, window_bounds = array<i64: 128, 32>}, {pipeline_mode = #tpu.pipeline_mode<synchronous>, transform_indices = @transform_14, window_bounds = array<i64: 1, 32>}, {transform_indices = @transform_15, window_bounds = array<i64: 4, 16, 32>}]} {
    %c0 = arith.constant 0 : index
    %c0_0 = arith.constant 0 : index
    %c0_1 = arith.constant 0 : index
    %0 = vector.load %arg1[%c0, %c0_0, %c0_1] : memref<4x16x32xf32, #tpu.memory_space<vmem>>, vector<4x16x32xf32>
    %1 = vector.shape_cast %0 : vector<4x16x32xf32> to vector<64x32xf32>
    %cst = arith.constant dense<0.000000e+00> : vector<64xf32>
    %2 = vector.multi_reduction <add>, %1, %cst [1] : vector<64x32xf32> to vector<64xf32>
    %3 = vector.shape_cast %2 : vector<64xf32> to vector<64x1xf32>
    %cst_2 = arith.constant 3.200000e+01 : f32
    %4 = vector.broadcast %cst_2 : f32 to vector<64x1xf32>
    %5 = arith.divf %3, %4 : vector<64x1xf32>
    %6 = vector.broadcast %5 : vector<64x1xf32> to vector<64x32xf32>
    %7 = arith.subf %1, %6 : vector<64x32xf32>
    %8 = arith.mulf %7, %7 : vector<64x32xf32>
    %cst_3 = arith.constant dense<0.000000e+00> : vector<64xf32>
    %9 = vector.multi_reduction <add>, %8, %cst_3 [1] : vector<64x32xf32> to vector<64xf32>
    %10 = vector.shape_cast %9 : vector<64xf32> to vector<64x1xf32>
    %cst_4 = arith.constant 3.200000e+01 : f32
    %11 = vector.broadcast %cst_4 : f32 to vector<64x1xf32>
    %12 = arith.divf %10, %11 : vector<64x1xf32>
    %13 = vector.broadcast %5 : vector<64x1xf32> to vector<64x32xf32>
    %14 = arith.subf %1, %13 : vector<64x32xf32>
    %cst_5 = arith.constant 9.99999974E-6 : f32
    %15 = vector.broadcast %cst_5 : f32 to vector<64x1xf32>
    %16 = arith.addf %12, %15 : vector<64x1xf32>
    %17 = math.rsqrt %16 : vector<64x1xf32>
    %18 = vector.broadcast %17 : vector<64x1xf32> to vector<64x32xf32>
    %19 = arith.mulf %14, %18 : vector<64x32xf32>
    %c0_6 = arith.constant 0 : index
    %c0_7 = arith.constant 0 : index
    %20 = vector.load %arg2[%c0_6, %c0_7] : memref<1x32xf32, #tpu.memory_space<vmem>>, vector<1x32xf32>
    %21 = vector.broadcast %20 : vector<1x32xf32> to vector<64x32xf32>
    %22 = arith.mulf %19, %21 : vector<64x32xf32>
    %c0_8 = arith.constant 0 : index
    %c0_9 = arith.constant 0 : index
    %23 = vector.load %arg3[%c0_8, %c0_9] : memref<1x32xf32, #tpu.memory_space<vmem>>, vector<1x32xf32>
    %24 = vector.broadcast %23 : vector<1x32xf32> to vector<64x32xf32>
    %25 = arith.addf %22, %24 : vector<64x32xf32>
    %26 = arith.truncf %25 : vector<64x32xf32> to vector<64x32xbf16>
    %c0_10 = arith.constant 0 : index
    %c0_11 = arith.constant 0 : index
    %c0_12 = arith.constant 0 : index
    %27 = vector.load %arg7[%c0_10, %c0_11, %c0_12] : memref<4x16x16xf32, #tpu.memory_space<vmem>>, vector<4x16x16xf32>
    %cst_13 = arith.constant 0.000000e+00 : f32
    %28 = vector.broadcast %cst_13 : f32 to vector<64x32xf32>
    %c0_14 = arith.constant 0 : index
    %c0_15 = arith.constant 0 : index
    %c0_16 = arith.constant 0 : index
    %c0_17 = arith.constant 0 : index
    %29 = vector.load %arg4[%c0_14, %c0_15, %c0_16, %c0_17] : memref<3x2x32x16xf32, #tpu.memory_space<vmem>>, vector<1x1x32x16xf32>
    %30 = vector.shape_cast %29 : vector<1x1x32x16xf32> to vector<32x16xf32>
    %31 = arith.truncf %30 : vector<32x16xf32> to vector<32x16xbf16>
    %cst_18 = arith.constant dense<0.000000e+00> : vector<64x16xf32>
    %32 = tpu.matmul %26, %31, %cst_18 {dimension_numbers = #tpu.dot_dimension_numbers<[1], [0], [0], [1], [0, 0, 1, 1], [], []>} : vector<64x32xbf16>, vector<32x16xbf16>, vector<64x16xf32> -> vector<64x16xf32>
    %c0_19 = arith.constant 0 : index
    %c0_20 = arith.constant 0 : index
    %c0_21 = arith.constant 0 : index
    %c0_22 = arith.constant 0 : index
    %33 = vector.load %arg5[%c0_19, %c0_20, %c0_21, %c0_22] : memref<3x2x1x16xf32, #tpu.memory_space<vmem>>, vector<1x1x1x16xf32>
    %34 = vector.shape_cast %33 : vector<1x1x1x16xf32> to vector<1x16xf32>
    %35 = vector.broadcast %34 : vector<1x16xf32> to vector<64x16xf32>
    %36 = arith.addf %32, %35 : vector<64x16xf32>
    %c1 = arith.constant 1 : index
    %c0_23 = arith.constant 0 : index
    %c0_24 = arith.constant 0 : index
    %c0_25 = arith.constant 0 : index
    %37 = vector.load %arg4[%c1, %c0_23, %c0_24, %c0_25] : memref<3x2x32x16xf32, #tpu.memory_space<vmem>>, vector<1x1x32x16xf32>
    %38 = vector.shape_cast %37 : vector<1x1x32x16xf32> to vector<32x16xf32>
    %39 = arith.truncf %38 : vector<32x16xf32> to vector<32x16xbf16>
    %cst_26 = arith.constant dense<0.000000e+00> : vector<64x16xf32>
    %40 = tpu.matmul %26, %39, %cst_26 {dimension_numbers = #tpu.dot_dimension_numbers<[1], [0], [0], [1], [0, 0, 1, 1], [], []>} : vector<64x32xbf16>, vector<32x16xbf16>, vector<64x16xf32> -> vector<64x16xf32>
    %c1_27 = arith.constant 1 : index
    %c0_28 = arith.constant 0 : index
    %c0_29 = arith.constant 0 : index
    %c0_30 = arith.constant 0 : index
    %41 = vector.load %arg5[%c1_27, %c0_28, %c0_29, %c0_30] : memref<3x2x1x16xf32, #tpu.memory_space<vmem>>, vector<1x1x1x16xf32>
    %42 = vector.shape_cast %41 : vector<1x1x1x16xf32> to vector<1x16xf32>
    %43 = vector.broadcast %42 : vector<1x16xf32> to vector<64x16xf32>
    %44 = arith.addf %40, %43 : vector<64x16xf32>
    %c2 = arith.constant 2 : index
    %c0_31 = arith.constant 0 : index
    %c0_32 = arith.constant 0 : index
    %c0_33 = arith.constant 0 : index
    %45 = vector.load %arg4[%c2, %c0_31, %c0_32, %c0_33] : memref<3x2x32x16xf32, #tpu.memory_space<vmem>>, vector<1x1x32x16xf32>
    %46 = vector.shape_cast %45 : vector<1x1x32x16xf32> to vector<32x16xf32>
    %47 = arith.truncf %46 : vector<32x16xf32> to vector<32x16xbf16>
    %cst_34 = arith.constant dense<0.000000e+00> : vector<64x16xf32>
    %48 = tpu.matmul %26, %47, %cst_34 {dimension_numbers = #tpu.dot_dimension_numbers<[1], [0], [0], [1], [0, 0, 1, 1], [], []>} : vector<64x32xbf16>, vector<32x16xbf16>, vector<64x16xf32> -> vector<64x16xf32>
    %c2_35 = arith.constant 2 : index
    %c0_36 = arith.constant 0 : index
    %c0_37 = arith.constant 0 : index
    %c0_38 = arith.constant 0 : index
    %49 = vector.load %arg5[%c2_35, %c0_36, %c0_37, %c0_38] : memref<3x2x1x16xf32, #tpu.memory_space<vmem>>, vector<1x1x1x16xf32>
    %50 = vector.shape_cast %49 : vector<1x1x1x16xf32> to vector<1x16xf32>
    %51 = vector.broadcast %50 : vector<1x16xf32> to vector<64x16xf32>
    %52 = arith.addf %48, %51 : vector<64x16xf32>
    %53 = vector.shape_cast %36 : vector<64x16xf32> to vector<4x16x16xf32>
    %54 = vector.shape_cast %44 : vector<64x16xf32> to vector<4x16x16xf32>
    %55 = vector.shape_cast %52 : vector<64x16xf32> to vector<4x16x16xf32>
    %56 = arith.truncf %53 : vector<4x16x16xf32> to vector<4x16x16xbf16>
    %57 = arith.truncf %54 : vector<4x16x16xf32> to vector<4x16x16xbf16>
    "tpu.trace_start"() <{level = 10 : i32, message = "wqd,wkd->wqk"}> : () -> ()
    %cst_39 = arith.constant dense<0.000000e+00> : vector<4x16x16xf32>
    %58 = tpu.matmul %56, %57, %cst_39 {dimension_numbers = #tpu.dot_dimension_numbers<[2], [2], [1], [1], [0, 0, 0, 1, 1, 1], [0], [0]>} : vector<4x16x16xbf16>, vector<4x16x16xbf16>, vector<4x16x16xf32> -> vector<4x16x16xf32>
    "tpu.trace_stop"() : () -> ()
    %cst_40 = arith.constant 2.500000e-01 : f32
    %59 = vector.broadcast %cst_40 : f32 to vector<4x16x16xf32>
    %60 = arith.mulf %58, %59 : vector<4x16x16xf32>
    %c0_41 = arith.constant 0 : index
    %c0_42 = arith.constant 0 : index
    %c0_43 = arith.constant 0 : index
    %61 = vector.load %arg6[%c0_41, %c0_42, %c0_43] : memref<2x16x16xf32, #tpu.memory_space<vmem>>, vector<1x16x16xf32>
    %62 = vector.shape_cast %61 : vector<1x16x16xf32> to vector<16x16xf32>
    %63 = vector.shape_cast %62 : vector<16x16xf32> to vector<1x16x16xf32>
    %64 = vector.broadcast %63 : vector<1x16x16xf32> to vector<4x16x16xf32>
    %65 = arith.addf %60, %64 : vector<4x16x16xf32>
    %66 = arith.addf %65, %27 : vector<4x16x16xf32>
    %cst_44 = arith.constant dense<0xFF800000> : vector<4x16xf32>
    %67 = vector.multi_reduction <maximumf>, %66, %cst_44 [2] : vector<4x16x16xf32> to vector<4x16xf32>
    %68 = vector.shape_cast %67 : vector<4x16xf32> to vector<4x16x1xf32>
    %69 = vector.broadcast %68 : vector<4x16x1xf32> to vector<4x16x16xf32>
    %70 = arith.subf %66, %69 : vector<4x16x16xf32>
    %71 = math.exp %70 : vector<4x16x16xf32>
    %cst_45 = arith.constant dense<0.000000e+00> : vector<4x16xf32>
    %72 = vector.multi_reduction <add>, %71, %cst_45 [2] : vector<4x16x16xf32> to vector<4x16xf32>
    %73 = vector.shape_cast %72 : vector<4x16xf32> to vector<4x16x1xf32>
    %74 = tpu.reciprocal %73 {approx = true} : vector<4x16x1xf32> -> vector<4x16x1xf32>
    %75 = vector.broadcast %74 : vector<4x16x1xf32> to vector<4x16x16xf32>
    %76 = arith.mulf %71, %75 : vector<4x16x16xf32>
    %77 = arith.truncf %76 : vector<4x16x16xf32> to vector<4x16x16xbf16>
    %78 = arith.truncf %55 : vector<4x16x16xf32> to vector<4x16x16xbf16>
    "tpu.trace_start"() <{level = 10 : i32, message = "wqk,wkd->wqd"}> : () -> ()
    %cst_46 = arith.constant dense<0.000000e+00> : vector<4x16x16xf32>
    %79 = tpu.matmul %77, %78, %cst_46 {dimension_numbers = #tpu.dot_dimension_numbers<[2], [1], [1], [2], [0, 0, 0, 1, 1, 2], [0], [0]>} : vector<4x16x16xbf16>, vector<4x16x16xbf16>, vector<4x16x16xf32> -> vector<4x16x16xf32>
    "tpu.trace_stop"() : () -> ()
    %80 = vector.shape_cast %79 : vector<4x16x16xf32> to vector<64x16xf32>
    %81 = arith.truncf %80 : vector<64x16xf32> to vector<64x16xbf16>
    %c0_47 = arith.constant 0 : index
    %c0_48 = arith.constant 0 : index
    %c0_49 = arith.constant 0 : index
    %82 = vector.load %arg8[%c0_47, %c0_48, %c0_49] : memref<2x16x32xf32, #tpu.memory_space<vmem>>, vector<1x16x32xf32>
    %83 = vector.shape_cast %82 : vector<1x16x32xf32> to vector<16x32xf32>
    %84 = arith.truncf %83 : vector<16x32xf32> to vector<16x32xbf16>
    %cst_50 = arith.constant dense<0.000000e+00> : vector<64x32xf32>
    %85 = tpu.matmul %81, %84, %cst_50 {dimension_numbers = #tpu.dot_dimension_numbers<[1], [0], [0], [1], [0, 0, 1, 1], [], []>} : vector<64x16xbf16>, vector<16x32xbf16>, vector<64x32xf32> -> vector<64x32xf32>
    %86 = arith.addf %28, %85 : vector<64x32xf32>
    %c0_51 = arith.constant 0 : index
    %c1_52 = arith.constant 1 : index
    %c0_53 = arith.constant 0 : index
    %c0_54 = arith.constant 0 : index
    %87 = vector.load %arg4[%c0_51, %c1_52, %c0_53, %c0_54] : memref<3x2x32x16xf32, #tpu.memory_space<vmem>>, vector<1x1x32x16xf32>
    %88 = vector.shape_cast %87 : vector<1x1x32x16xf32> to vector<32x16xf32>
    %89 = arith.truncf %88 : vector<32x16xf32> to vector<32x16xbf16>
    %cst_55 = arith.constant dense<0.000000e+00> : vector<64x16xf32>
    %90 = tpu.matmul %26, %89, %cst_55 {dimension_numbers = #tpu.dot_dimension_numbers<[1], [0], [0], [1], [0, 0, 1, 1], [], []>} : vector<64x32xbf16>, vector<32x16xbf16>, vector<64x16xf32> -> vector<64x16xf32>
    %c0_56 = arith.constant 0 : index
    %c1_57 = arith.constant 1 : index
    %c0_58 = arith.constant 0 : index
    %c0_59 = arith.constant 0 : index
    %91 = vector.load %arg5[%c0_56, %c1_57, %c0_58, %c0_59] : memref<3x2x1x16xf32, #tpu.memory_space<vmem>>, vector<1x1x1x16xf32>
    %92 = vector.shape_cast %91 : vector<1x1x1x16xf32> to vector<1x16xf32>
    %93 = vector.broadcast %92 : vector<1x16xf32> to vector<64x16xf32>
    %94 = arith.addf %90, %93 : vector<64x16xf32>
    %c1_60 = arith.constant 1 : index
    %c1_61 = arith.constant 1 : index
    %c0_62 = arith.constant 0 : index
    %c0_63 = arith.constant 0 : index
    %95 = vector.load %arg4[%c1_60, %c1_61, %c0_62, %c0_63] : memref<3x2x32x16xf32, #tpu.memory_space<vmem>>, vector<1x1x32x16xf32>
    %96 = vector.shape_cast %95 : vector<1x1x32x16xf32> to vector<32x16xf32>
    %97 = arith.truncf %96 : vector<32x16xf32> to vector<32x16xbf16>
    %cst_64 = arith.constant dense<0.000000e+00> : vector<64x16xf32>
    %98 = tpu.matmul %26, %97, %cst_64 {dimension_numbers = #tpu.dot_dimension_numbers<[1], [0], [0], [1], [0, 0, 1, 1], [], []>} : vector<64x32xbf16>, vector<32x16xbf16>, vector<64x16xf32> -> vector<64x16xf32>
    %c1_65 = arith.constant 1 : index
    %c1_66 = arith.constant 1 : index
    %c0_67 = arith.constant 0 : index
    %c0_68 = arith.constant 0 : index
    %99 = vector.load %arg5[%c1_65, %c1_66, %c0_67, %c0_68] : memref<3x2x1x16xf32, #tpu.memory_space<vmem>>, vector<1x1x1x16xf32>
    %100 = vector.shape_cast %99 : vector<1x1x1x16xf32> to vector<1x16xf32>
    %101 = vector.broadcast %100 : vector<1x16xf32> to vector<64x16xf32>
    %102 = arith.addf %98, %101 : vector<64x16xf32>
    %c2_69 = arith.constant 2 : index
    %c1_70 = arith.constant 1 : index
    %c0_71 = arith.constant 0 : index
    %c0_72 = arith.constant 0 : index
    %103 = vector.load %arg4[%c2_69, %c1_70, %c0_71, %c0_72] : memref<3x2x32x16xf32, #tpu.memory_space<vmem>>, vector<1x1x32x16xf32>
    %104 = vector.shape_cast %103 : vector<1x1x32x16xf32> to vector<32x16xf32>
    %105 = arith.truncf %104 : vector<32x16xf32> to vector<32x16xbf16>
    %cst_73 = arith.constant dense<0.000000e+00> : vector<64x16xf32>
    %106 = tpu.matmul %26, %105, %cst_73 {dimension_numbers = #tpu.dot_dimension_numbers<[1], [0], [0], [1], [0, 0, 1, 1], [], []>} : vector<64x32xbf16>, vector<32x16xbf16>, vector<64x16xf32> -> vector<64x16xf32>
    %c2_74 = arith.constant 2 : index
    %c1_75 = arith.constant 1 : index
    %c0_76 = arith.constant 0 : index
    %c0_77 = arith.constant 0 : index
    %107 = vector.load %arg5[%c2_74, %c1_75, %c0_76, %c0_77] : memref<3x2x1x16xf32, #tpu.memory_space<vmem>>, vector<1x1x1x16xf32>
    %108 = vector.shape_cast %107 : vector<1x1x1x16xf32> to vector<1x16xf32>
    %109 = vector.broadcast %108 : vector<1x16xf32> to vector<64x16xf32>
    %110 = arith.addf %106, %109 : vector<64x16xf32>
    %111 = vector.shape_cast %94 : vector<64x16xf32> to vector<4x16x16xf32>
    %112 = vector.shape_cast %102 : vector<64x16xf32> to vector<4x16x16xf32>
    %113 = vector.shape_cast %110 : vector<64x16xf32> to vector<4x16x16xf32>
    %114 = arith.truncf %111 : vector<4x16x16xf32> to vector<4x16x16xbf16>
    %115 = arith.truncf %112 : vector<4x16x16xf32> to vector<4x16x16xbf16>
    "tpu.trace_start"() <{level = 10 : i32, message = "wqd,wkd->wqk"}> : () -> ()
    %cst_78 = arith.constant dense<0.000000e+00> : vector<4x16x16xf32>
    %116 = tpu.matmul %114, %115, %cst_78 {dimension_numbers = #tpu.dot_dimension_numbers<[2], [2], [1], [1], [0, 0, 0, 1, 1, 1], [0], [0]>} : vector<4x16x16xbf16>, vector<4x16x16xbf16>, vector<4x16x16xf32> -> vector<4x16x16xf32>
    "tpu.trace_stop"() : () -> ()
    %cst_79 = arith.constant 2.500000e-01 : f32
    %117 = vector.broadcast %cst_79 : f32 to vector<4x16x16xf32>
    %118 = arith.mulf %116, %117 : vector<4x16x16xf32>
    %c1_80 = arith.constant 1 : index
    %c0_81 = arith.constant 0 : index
    %c0_82 = arith.constant 0 : index
    %119 = vector.load %arg6[%c1_80, %c0_81, %c0_82] : memref<2x16x16xf32, #tpu.memory_space<vmem>>, vector<1x16x16xf32>
    %120 = vector.shape_cast %119 : vector<1x16x16xf32> to vector<16x16xf32>
    %121 = vector.shape_cast %120 : vector<16x16xf32> to vector<1x16x16xf32>
    %122 = vector.broadcast %121 : vector<1x16x16xf32> to vector<4x16x16xf32>
    %123 = arith.addf %118, %122 : vector<4x16x16xf32>
    %124 = arith.addf %123, %27 : vector<4x16x16xf32>
    %cst_83 = arith.constant dense<0xFF800000> : vector<4x16xf32>
    %125 = vector.multi_reduction <maximumf>, %124, %cst_83 [2] : vector<4x16x16xf32> to vector<4x16xf32>
    %126 = vector.shape_cast %125 : vector<4x16xf32> to vector<4x16x1xf32>
    %127 = vector.broadcast %126 : vector<4x16x1xf32> to vector<4x16x16xf32>
    %128 = arith.subf %124, %127 : vector<4x16x16xf32>
    %129 = math.exp %128 : vector<4x16x16xf32>
    %cst_84 = arith.constant dense<0.000000e+00> : vector<4x16xf32>
    %130 = vector.multi_reduction <add>, %129, %cst_84 [2] : vector<4x16x16xf32> to vector<4x16xf32>
    %131 = vector.shape_cast %130 : vector<4x16xf32> to vector<4x16x1xf32>
    %132 = tpu.reciprocal %131 {approx = true} : vector<4x16x1xf32> -> vector<4x16x1xf32>
    %133 = vector.broadcast %132 : vector<4x16x1xf32> to vector<4x16x16xf32>
    %134 = arith.mulf %129, %133 : vector<4x16x16xf32>
    %135 = arith.truncf %134 : vector<4x16x16xf32> to vector<4x16x16xbf16>
    %136 = arith.truncf %113 : vector<4x16x16xf32> to vector<4x16x16xbf16>
    "tpu.trace_start"() <{level = 10 : i32, message = "wqk,wkd->wqd"}> : () -> ()
    %cst_85 = arith.constant dense<0.000000e+00> : vector<4x16x16xf32>
    %137 = tpu.matmul %135, %136, %cst_85 {dimension_numbers = #tpu.dot_dimension_numbers<[2], [1], [1], [2], [0, 0, 0, 1, 1, 2], [0], [0]>} : vector<4x16x16xbf16>, vector<4x16x16xbf16>, vector<4x16x16xf32> -> vector<4x16x16xf32>
    "tpu.trace_stop"() : () -> ()
    %138 = vector.shape_cast %137 : vector<4x16x16xf32> to vector<64x16xf32>
    %139 = arith.truncf %138 : vector<64x16xf32> to vector<64x16xbf16>
    %c1_86 = arith.constant 1 : index
    %c0_87 = arith.constant 0 : index
    %c0_88 = arith.constant 0 : index
    %140 = vector.load %arg8[%c1_86, %c0_87, %c0_88] : memref<2x16x32xf32, #tpu.memory_space<vmem>>, vector<1x16x32xf32>
    %141 = vector.shape_cast %140 : vector<1x16x32xf32> to vector<16x32xf32>
    %142 = arith.truncf %141 : vector<16x32xf32> to vector<16x32xbf16>
    %cst_89 = arith.constant dense<0.000000e+00> : vector<64x32xf32>
    %143 = tpu.matmul %139, %142, %cst_89 {dimension_numbers = #tpu.dot_dimension_numbers<[1], [0], [0], [1], [0, 0, 1, 1], [], []>} : vector<64x16xbf16>, vector<16x32xbf16>, vector<64x32xf32> -> vector<64x32xf32>
    %144 = arith.addf %86, %143 : vector<64x32xf32>
    %145 = arith.addf %1, %144 : vector<64x32xf32>
    %c0_90 = arith.constant 0 : index
    %c0_91 = arith.constant 0 : index
    %146 = vector.load %arg9[%c0_90, %c0_91] : memref<1x32xf32, #tpu.memory_space<vmem>>, vector<1x32xf32>
    %147 = vector.broadcast %146 : vector<1x32xf32> to vector<64x32xf32>
    %148 = arith.addf %145, %147 : vector<64x32xf32>
    %cst_92 = arith.constant dense<0.000000e+00> : vector<64xf32>
    %149 = vector.multi_reduction <add>, %148, %cst_92 [1] : vector<64x32xf32> to vector<64xf32>
    %150 = vector.shape_cast %149 : vector<64xf32> to vector<64x1xf32>
    %cst_93 = arith.constant 3.200000e+01 : f32
    %151 = vector.broadcast %cst_93 : f32 to vector<64x1xf32>
    %152 = arith.divf %150, %151 : vector<64x1xf32>
    %153 = vector.broadcast %152 : vector<64x1xf32> to vector<64x32xf32>
    %154 = arith.subf %148, %153 : vector<64x32xf32>
    %155 = arith.mulf %154, %154 : vector<64x32xf32>
    %cst_94 = arith.constant dense<0.000000e+00> : vector<64xf32>
    %156 = vector.multi_reduction <add>, %155, %cst_94 [1] : vector<64x32xf32> to vector<64xf32>
    %157 = vector.shape_cast %156 : vector<64xf32> to vector<64x1xf32>
    %cst_95 = arith.constant 3.200000e+01 : f32
    %158 = vector.broadcast %cst_95 : f32 to vector<64x1xf32>
    %159 = arith.divf %157, %158 : vector<64x1xf32>
    %160 = vector.broadcast %152 : vector<64x1xf32> to vector<64x32xf32>
    %161 = arith.subf %148, %160 : vector<64x32xf32>
    %cst_96 = arith.constant 9.99999974E-6 : f32
    %162 = vector.broadcast %cst_96 : f32 to vector<64x1xf32>
    %163 = arith.addf %159, %162 : vector<64x1xf32>
    %164 = math.rsqrt %163 : vector<64x1xf32>
    %165 = vector.broadcast %164 : vector<64x1xf32> to vector<64x32xf32>
    %166 = arith.mulf %161, %165 : vector<64x32xf32>
    %c0_97 = arith.constant 0 : index
    %c0_98 = arith.constant 0 : index
    %167 = vector.load %arg10[%c0_97, %c0_98] : memref<1x32xf32, #tpu.memory_space<vmem>>, vector<1x32xf32>
    %168 = vector.broadcast %167 : vector<1x32xf32> to vector<64x32xf32>
    %169 = arith.mulf %166, %168 : vector<64x32xf32>
    %c0_99 = arith.constant 0 : index
    %c0_100 = arith.constant 0 : index
    %170 = vector.load %arg11[%c0_99, %c0_100] : memref<1x32xf32, #tpu.memory_space<vmem>>, vector<1x32xf32>
    %171 = vector.broadcast %170 : vector<1x32xf32> to vector<64x32xf32>
    %172 = arith.addf %169, %171 : vector<64x32xf32>
    %173 = arith.truncf %172 : vector<64x32xf32> to vector<64x32xbf16>
    %c0_101 = arith.constant 0 : index
    %c0_102 = arith.constant 0 : index
    %174 = vector.load %arg12[%c0_101, %c0_102] : memref<32x128xf32, #tpu.memory_space<vmem>>, vector<32x128xf32>
    %175 = arith.truncf %174 : vector<32x128xf32> to vector<32x128xbf16>
    %cst_103 = arith.constant dense<0.000000e+00> : vector<64x128xf32>
    %176 = tpu.matmul %173, %175, %cst_103 {dimension_numbers = #tpu.dot_dimension_numbers<[1], [0], [0], [1], [0, 0, 1, 1], [], []>} : vector<64x32xbf16>, vector<32x128xbf16>, vector<64x128xf32> -> vector<64x128xf32>
    %c0_104 = arith.constant 0 : index
    %c0_105 = arith.constant 0 : index
    %177 = vector.load %arg13[%c0_104, %c0_105] : memref<1x128xf32, #tpu.memory_space<vmem>>, vector<1x128xf32>
    %178 = vector.broadcast %177 : vector<1x128xf32> to vector<64x128xf32>
    %179 = arith.addf %176, %178 : vector<64x128xf32>
    %180 = arith.mulf %179, %179 : vector<64x128xf32>
    %181 = arith.mulf %179, %180 : vector<64x128xf32>
    %cst_106 = arith.constant 4.471500e-02 : f32
    %182 = vector.broadcast %cst_106 : f32 to vector<64x128xf32>
    %183 = arith.mulf %182, %181 : vector<64x128xf32>
    %184 = arith.addf %179, %183 : vector<64x128xf32>
    %cst_107 = arith.constant 0.797884583 : f32
    %185 = vector.broadcast %cst_107 : f32 to vector<64x128xf32>
    %186 = arith.mulf %185, %184 : vector<64x128xf32>
    %187 = math.tanh %186 : vector<64x128xf32>
    %cst_108 = arith.constant 1.000000e+00 : f32
    %188 = vector.broadcast %cst_108 : f32 to vector<64x128xf32>
    %189 = arith.addf %188, %187 : vector<64x128xf32>
    %cst_109 = arith.constant 5.000000e-01 : f32
    %190 = vector.broadcast %cst_109 : f32 to vector<64x128xf32>
    %191 = arith.mulf %190, %189 : vector<64x128xf32>
    %192 = arith.mulf %179, %191 : vector<64x128xf32>
    %193 = arith.truncf %192 : vector<64x128xf32> to vector<64x128xbf16>
    %c0_110 = arith.constant 0 : index
    %c0_111 = arith.constant 0 : index
    %194 = vector.load %arg14[%c0_110, %c0_111] : memref<128x32xf32, #tpu.memory_space<vmem>>, vector<128x32xf32>
    %195 = arith.truncf %194 : vector<128x32xf32> to vector<128x32xbf16>
    %cst_112 = arith.constant dense<0.000000e+00> : vector<64x32xf32>
    %196 = tpu.matmul %193, %195, %cst_112 {dimension_numbers = #tpu.dot_dimension_numbers<[1], [0], [0], [1], [0, 0, 1, 1], [], []>} : vector<64x128xbf16>, vector<128x32xbf16>, vector<64x32xf32> -> vector<64x32xf32>
    %c0_113 = arith.constant 0 : index
    %c0_114 = arith.constant 0 : index
    %197 = vector.load %arg15[%c0_113, %c0_114] : memref<1x32xf32, #tpu.memory_space<vmem>>, vector<1x32xf32>
    %198 = vector.broadcast %197 : vector<1x32xf32> to vector<64x32xf32>
    %199 = arith.addf %196, %198 : vector<64x32xf32>
    %200 = arith.addf %148, %199 : vector<64x32xf32>
    %201 = vector.shape_cast %200 : vector<64x32xf32> to vector<4x16x32xf32>
    %c0_115 = arith.constant 0 : index
    %c0_116 = arith.constant 0 : index
    %c0_117 = arith.constant 0 : index
    %202 = vector.load %arg16[%c0_115, %c0_116, %c0_117] : memref<4x16x32xf32, #tpu.memory_space<vmem>>, vector<4x16x32xf32>
    tpu.vector_store %arg16[%c0_115, %c0_116, %c0_117], %201 {strides = array<i32>} : memref<4x16x32xf32, #tpu.memory_space<vmem>>, vector<4x16x32xf32>,
    return
  }
  func.func @transform_0(%arg0: i32) -> (i32, i32, i32) {
    %c0_i32 = arith.constant 0 : i32
    %c0_i32_0 = arith.constant 0 : i32
    %c0_i32_1 = arith.constant 0 : i32
    return %arg0, %c0_i32, %c0_i32_0 : i32, i32, i32
  }
  func.func @transform_1(%arg0: i32) -> (i32, i32) {
    %c0_i32 = arith.constant 0 : i32
    %c0_i32_0 = arith.constant 0 : i32
    %c0_i32_1 = arith.constant 0 : i32
    return %c0_i32, %c0_i32_0 : i32, i32
  }
  func.func @transform_2(%arg0: i32) -> (i32, i32) {
    %c0_i32 = arith.constant 0 : i32
    %c0_i32_0 = arith.constant 0 : i32
    %c0_i32_1 = arith.constant 0 : i32
    return %c0_i32, %c0_i32_0 : i32, i32
  }
  func.func @transform_3(%arg0: i32) -> (i32, i32, i32, i32) {
    %c0_i32 = arith.constant 0 : i32
    %c0_i32_0 = arith.constant 0 : i32
    %c0_i32_1 = arith.constant 0 : i32
    %c0_i32_2 = arith.constant 0 : i32
    %c0_i32_3 = arith.constant 0 : i32
    return %c0_i32, %c0_i32_0, %c0_i32_1, %c0_i32_2 : i32, i32, i32, i32
  }
  func.func @transform_4(%arg0: i32) -> (i32, i32, i32, i32) {
    %c0_i32 = arith.constant 0 : i32
    %c0_i32_0 = arith.constant 0 : i32
    %c0_i32_1 = arith.constant 0 : i32
    %c0_i32_2 = arith.constant 0 : i32
    %c0_i32_3 = arith.constant 0 : i32
    return %c0_i32, %c0_i32_0, %c0_i32_1, %c0_i32_2 : i32, i32, i32, i32
  }
  func.func @transform_5(%arg0: i32) -> (i32, i32, i32) {
    %c0_i32 = arith.constant 0 : i32
    %c0_i32_0 = arith.constant 0 : i32
    %c0_i32_1 = arith.constant 0 : i32
    %c0_i32_2 = arith.constant 0 : i32
    return %c0_i32, %c0_i32_0, %c0_i32_1 : i32, i32, i32
  }
  func.func @transform_6(%arg0: i32) -> (i32, i32, i32) {
    %c0_i32 = arith.constant 0 : i32
    %c0_i32_0 = arith.constant 0 : i32
    %c0_i32_1 = arith.constant 0 : i32
    %c0_i32_2 = arith.constant 0 : i32
    return %c0_i32, %c0_i32_0, %c0_i32_1 : i32, i32, i32
  }
  func.func @transform_7(%arg0: i32) -> (i32, i32, i32) {
    %c0_i32 = arith.constant 0 : i32
    %c0_i32_0 = arith.constant 0 : i32
    %c0_i32_1 = arith.constant 0 : i32
    %c0_i32_2 = arith.constant 0 : i32
    return %c0_i32, %c0_i32_0, %c0_i32_1 : i32, i32, i32
  }
  func.func @transform_8(%arg0: i32) -> (i32, i32) {
    %c0_i32 = arith.constant 0 : i32
    %c0_i32_0 = arith.constant 0 : i32
    %c0_i32_1 = arith.constant 0 : i32
    return %c0_i32, %c0_i32_0 : i32, i32
  }
  func.func @transform_9(%arg0: i32) -> (i32, i32) {
    %c0_i32 = arith.constant 0 : i32
    %c0_i32_0 = arith.constant 0 : i32
    %c0_i32_1 = arith.constant 0 : i32
    return %c0_i32, %c0_i32_0 : i32, i32
  }
  func.func @transform_10(%arg0: i32) -> (i32, i32) {
    %c0_i32 = arith.constant 0 : i32
    %c0_i32_0 = arith.constant 0 : i32
    %c0_i32_1 = arith.constant 0 : i32
    return %c0_i32, %c0_i32_0 : i32, i32
  }
  func.func @transform_11(%arg0: i32) -> (i32, i32) {
    %c0_i32 = arith.constant 0 : i32
    %c0_i32_0 = arith.constant 0 : i32
    %c0_i32_1 = arith.constant 0 : i32
    return %c0_i32, %c0_i32_0 : i32, i32
  }
  func.func @transform_12(%arg0: i32) -> (i32, i32) {
    %c0_i32 = arith.constant 0 : i32
    %c0_i32_0 = arith.constant 0 : i32
    %c0_i32_1 = arith.constant 0 : i32
    return %c0_i32, %c0_i32_0 : i32, i32
  }
  func.func @transform_13(%arg0: i32) -> (i32, i32) {
    %c0_i32 = arith.constant 0 : i32
    %c0_i32_0 = arith.constant 0 : i32
    %c0_i32_1 = arith.constant 0 : i32
    return %c0_i32, %c0_i32_0 : i32, i32
  }
  func.func @transform_14(%arg0: i32) -> (i32, i32) {
    %c0_i32 = arith.constant 0 : i32
    %c0_i32_0 = arith.constant 0 : i32
    %c0_i32_1 = arith.constant 0 : i32
    return %c0_i32, %c0_i32_0 : i32, i32
  }
  func.func @transform_15(%arg0: i32) -> (i32, i32, i32) {
    %c0_i32 = arith.constant 0 : i32
    %c0_i32_0 = arith.constant 0 : i32
    %c0_i32_1 = arith.constant 0 : i32
    return %arg0, %c0_i32, %c0_i32_0 : i32, i32, i32
  }
}

module attributes {stable_mosaic.version = 11 : i64} {
  func.func @kernel(%arg0: memref<32x128xf32, #tpu.memory_space<vmem>>, %arg1: memref<1x128xf32, #tpu.memory_space<vmem>>, %arg2: memref<1x128xf32, #tpu.memory_space<vmem>>, %arg3: memref<128x64xf32, #tpu.memory_space<vmem>>, %arg4: memref<32x64xf32, #tpu.memory_space<vmem>>) attributes {dimension_semantics = [], scalar_prefetch = 0 : i64, scratch_operands = 0 : i64, tpu.core_type = #tpu.core_type<tc>} {
    %c0 = arith.constant 0 : index
    %c0_0 = arith.constant 0 : index
    %0 = vector.load %arg0[%c0, %c0_0] : memref<32x128xf32, #tpu.memory_space<vmem>>, vector<32x128xf32>
    %cst = arith.constant dense<0.000000e+00> : vector<32xf32>
    %1 = vector.multi_reduction <add>, %0, %cst [1] : vector<32x128xf32> to vector<32xf32>
    %2 = vector.shape_cast %1 : vector<32xf32> to vector<32x1xf32>
    %cst_1 = arith.constant 1.280000e+02 : f32
    %3 = vector.broadcast %cst_1 : f32 to vector<32x1xf32>
    %4 = arith.divf %2, %3 : vector<32x1xf32>
    %5 = vector.broadcast %4 : vector<32x1xf32> to vector<32x128xf32>
    %6 = arith.subf %0, %5 : vector<32x128xf32>
    %7 = arith.mulf %6, %6 : vector<32x128xf32>
    %cst_2 = arith.constant dense<0.000000e+00> : vector<32xf32>
    %8 = vector.multi_reduction <add>, %7, %cst_2 [1] : vector<32x128xf32> to vector<32xf32>
    %9 = vector.shape_cast %8 : vector<32xf32> to vector<32x1xf32>
    %cst_3 = arith.constant 1.280000e+02 : f32
    %10 = vector.broadcast %cst_3 : f32 to vector<32x1xf32>
    %11 = arith.divf %9, %10 : vector<32x1xf32>
    %12 = vector.broadcast %4 : vector<32x1xf32> to vector<32x128xf32>
    %13 = arith.subf %0, %12 : vector<32x128xf32>
    %cst_4 = arith.constant 9.99999974E-6 : f32
    %14 = vector.broadcast %cst_4 : f32 to vector<32x1xf32>
    %15 = arith.addf %11, %14 : vector<32x1xf32>
    %16 = math.rsqrt %15 : vector<32x1xf32>
    %17 = vector.broadcast %16 : vector<32x1xf32> to vector<32x128xf32>
    %18 = arith.mulf %13, %17 : vector<32x128xf32>
    %c0_5 = arith.constant 0 : index
    %c0_6 = arith.constant 0 : index
    %19 = vector.load %arg1[%c0_5, %c0_6] : memref<1x128xf32, #tpu.memory_space<vmem>>, vector<1x128xf32>
    %20 = vector.broadcast %19 : vector<1x128xf32> to vector<32x128xf32>
    %21 = arith.mulf %18, %20 : vector<32x128xf32>
    %c0_7 = arith.constant 0 : index
    %c0_8 = arith.constant 0 : index
    %22 = vector.load %arg2[%c0_7, %c0_8] : memref<1x128xf32, #tpu.memory_space<vmem>>, vector<1x128xf32>
    %23 = vector.broadcast %22 : vector<1x128xf32> to vector<32x128xf32>
    %24 = arith.addf %21, %23 : vector<32x128xf32>
    %25 = arith.truncf %24 : vector<32x128xf32> to vector<32x128xbf16>
    %c0_9 = arith.constant 0 : index
    %c0_10 = arith.constant 0 : index
    %26 = vector.load %arg3[%c0_9, %c0_10] : memref<128x64xf32, #tpu.memory_space<vmem>>, vector<128x64xf32>
    %27 = arith.truncf %26 : vector<128x64xf32> to vector<128x64xbf16>
    %cst_11 = arith.constant dense<0.000000e+00> : vector<32x64xf32>
    %28 = tpu.matmul %25, %27, %cst_11 {dimension_numbers = #tpu.dot_dimension_numbers<[1], [0], [0], [1], [0, 0, 1, 1], [], []>} : vector<32x128xbf16>, vector<128x64xbf16>, vector<32x64xf32> -> vector<32x64xf32>
    %c0_12 = arith.constant 0 : index
    %c0_13 = arith.constant 0 : index
    %29 = vector.load %arg4[%c0_12, %c0_13] : memref<32x64xf32, #tpu.memory_space<vmem>>, vector<32x64xf32>
    tpu.vector_store %arg4[%c0_12, %c0_13], %28 {strides = array<i32>} : memref<32x64xf32, #tpu.memory_space<vmem>>, vector<32x64xf32>,
    return
  }
}

module attributes {stable_mosaic.version = 11 : i64} {
  func.func @kernel(%arg0: i32, %arg1: memref<1x16x64xf32, #tpu.memory_space<vmem>>, %arg2: memref<1x64xf32, #tpu.memory_space<vmem>>, %arg3: memref<1x64xf32, #tpu.memory_space<vmem>>, %arg4: memref<3x4x64x16xf32, #tpu.memory_space<vmem>>, %arg5: memref<3x4x1x16xf32, #tpu.memory_space<vmem>>, %arg6: memref<4x16x16xf32, #tpu.memory_space<vmem>>, %arg7: memref<1x16x16xf32, #tpu.memory_space<vmem>>, %arg8: memref<4x16x64xf32, #tpu.memory_space<vmem>>, %arg9: memref<1x64xf32, #tpu.memory_space<vmem>>, %arg10: memref<1x64xf32, #tpu.memory_space<vmem>>, %arg11: memref<1x64xf32, #tpu.memory_space<vmem>>, %arg12: memref<64x256xf32, #tpu.memory_space<vmem>>, %arg13: memref<1x256xf32, #tpu.memory_space<vmem>>, %arg14: memref<256x64xf32, #tpu.memory_space<vmem>>, %arg15: memref<1x64xf32, #tpu.memory_space<vmem>>, %arg16: memref<1x16x64xf32, #tpu.memory_space<vmem>>) attributes {dimension_semantics = [#tpu.dimension_semantics<parallel>], iteration_bounds = array<i64: 2>, scalar_prefetch = 0 : i64, scratch_operands = 0 : i64, tpu.core_type = #tpu.core_type<tc>, window_params = [{transform_indices = @transform_0, window_bounds = array<i64: 1, 16, 64>}, {pipeline_mode = #tpu.pipeline_mode<synchronous>, transform_indices = @transform_1, window_bounds = array<i64: 1, 64>}, {pipeline_mode = #tpu.pipeline_mode<synchronous>, transform_indices = @transform_2, window_bounds = array<i64: 1, 64>}, {pipeline_mode = #tpu.pipeline_mode<synchronous>, transform_indices = @transform_3, window_bounds = array<i64: 3, 4, 64, 16>}, {pipeline_mode = #tpu.pipeline_mode<synchronous>, transform_indices = @transform_4, window_bounds = array<i64: 3, 4, 1, 16>}, {pipeline_mode = #tpu.pipeline_mode<synchronous>, transform_indices = @transform_5, window_bounds = array<i64: 4, 16, 16>}, {pipeline_mode = #tpu.pipeline_mode<synchronous>, transform_indices = @transform_6, window_bounds = array<i64: 1, 16, 16>}, {pipeline_mode = #tpu.pipeline_mode<synchronous>, transform_indices = @transform_7, window_bounds = array<i64: 4, 16, 64>}, {pipeline_mode = #tpu.pipeline_mode<synchronous>, transform_indices = @transform_8, window_bounds = array<i64: 1, 64>}, {pipeline_mode = #tpu.pipeline_mode<synchronous>, transform_indices = @transform_9, window_bounds = array<i64: 1, 64>}, {pipeline_mode = #tpu.pipeline_mode<synchronous>, transform_indices = @transform_10, window_bounds = array<i64: 1, 64>}, {pipeline_mode = #tpu.pipeline_mode<synchronous>, transform_indices = @transform_11, window_bounds = array<i64: 64, 256>}, {pipeline_mode = #tpu.pipeline_mode<synchronous>, transform_indices = @transform_12, window_bounds = array<i64: 1, 256>}, {pipeline_mode = #tpu.pipeline_mode<synchronous>, transform_indices = @transform_13, window_bounds = array<i64: 256, 64>}, {pipeline_mode = #tpu.pipeline_mode<synchronous>, transform_indices = @transform_14, window_bounds = array<i64: 1, 64>}, {transform_indices = @transform_15, window_bounds = array<i64: 1, 16, 64>}]} {
    %c0 = arith.constant 0 : index
    %c0_0 = arith.constant 0 : index
    %c0_1 = arith.constant 0 : index
    %0 = vector.load %arg1[%c0, %c0_0, %c0_1] : memref<1x16x64xf32, #tpu.memory_space<vmem>>, vector<1x16x64xf32>
    %1 = vector.shape_cast %0 : vector<1x16x64xf32> to vector<16x64xf32>
    %cst = arith.constant dense<0.000000e+00> : vector<16xf32>
    %2 = vector.multi_reduction <add>, %1, %cst [1] : vector<16x64xf32> to vector<16xf32>
    %3 = vector.shape_cast %2 : vector<16xf32> to vector<16x1xf32>
    %cst_2 = arith.constant 6.400000e+01 : f32
    %4 = vector.broadcast %cst_2 : f32 to vector<16x1xf32>
    %5 = arith.divf %3, %4 : vector<16x1xf32>
    %6 = vector.broadcast %5 : vector<16x1xf32> to vector<16x64xf32>
    %7 = arith.subf %1, %6 : vector<16x64xf32>
    %8 = arith.mulf %7, %7 : vector<16x64xf32>
    %cst_3 = arith.constant dense<0.000000e+00> : vector<16xf32>
    %9 = vector.multi_reduction <add>, %8, %cst_3 [1] : vector<16x64xf32> to vector<16xf32>
    %10 = vector.shape_cast %9 : vector<16xf32> to vector<16x1xf32>
    %cst_4 = arith.constant 6.400000e+01 : f32
    %11 = vector.broadcast %cst_4 : f32 to vector<16x1xf32>
    %12 = arith.divf %10, %11 : vector<16x1xf32>
    %13 = vector.broadcast %5 : vector<16x1xf32> to vector<16x64xf32>
    %14 = arith.subf %1, %13 : vector<16x64xf32>
    %cst_5 = arith.constant 9.99999974E-6 : f32
    %15 = vector.broadcast %cst_5 : f32 to vector<16x1xf32>
    %16 = arith.addf %12, %15 : vector<16x1xf32>
    %17 = math.rsqrt %16 : vector<16x1xf32>
    %18 = vector.broadcast %17 : vector<16x1xf32> to vector<16x64xf32>
    %19 = arith.mulf %14, %18 : vector<16x64xf32>
    %c0_6 = arith.constant 0 : index
    %c0_7 = arith.constant 0 : index
    %20 = vector.load %arg2[%c0_6, %c0_7] : memref<1x64xf32, #tpu.memory_space<vmem>>, vector<1x64xf32>
    %21 = vector.broadcast %20 : vector<1x64xf32> to vector<16x64xf32>
    %22 = arith.mulf %19, %21 : vector<16x64xf32>
    %c0_8 = arith.constant 0 : index
    %c0_9 = arith.constant 0 : index
    %23 = vector.load %arg3[%c0_8, %c0_9] : memref<1x64xf32, #tpu.memory_space<vmem>>, vector<1x64xf32>
    %24 = vector.broadcast %23 : vector<1x64xf32> to vector<16x64xf32>
    %25 = arith.addf %22, %24 : vector<16x64xf32>
    %26 = arith.truncf %25 : vector<16x64xf32> to vector<16x64xbf16>
    %c0_10 = arith.constant 0 : index
    %c0_11 = arith.constant 0 : index
    %c0_12 = arith.constant 0 : index
    %27 = vector.load %arg7[%c0_10, %c0_11, %c0_12] : memref<1x16x16xf32, #tpu.memory_space<vmem>>, vector<1x16x16xf32>
    %cst_13 = arith.constant 0.000000e+00 : f32
    %28 = vector.broadcast %cst_13 : f32 to vector<16x64xf32>
    %c0_14 = arith.constant 0 : index
    %c0_15 = arith.constant 0 : index
    %c0_16 = arith.constant 0 : index
    %c0_17 = arith.constant 0 : index
    %29 = vector.load %arg4[%c0_14, %c0_15, %c0_16, %c0_17] : memref<3x4x64x16xf32, #tpu.memory_space<vmem>>, vector<1x1x64x16xf32>
    %30 = vector.shape_cast %29 : vector<1x1x64x16xf32> to vector<64x16xf32>
    %31 = arith.truncf %30 : vector<64x16xf32> to vector<64x16xbf16>
    %cst_18 = arith.constant dense<0.000000e+00> : vector<16x16xf32>
    %32 = tpu.matmul %26, %31, %cst_18 {dimension_numbers = #tpu.dot_dimension_numbers<[1], [0], [0], [1], [0, 0, 1, 1], [], []>} : vector<16x64xbf16>, vector<64x16xbf16>, vector<16x16xf32> -> vector<16x16xf32>
    %c0_19 = arith.constant 0 : index
    %c0_20 = arith.constant 0 : index
    %c0_21 = arith.constant 0 : index
    %c0_22 = arith.constant 0 : index
    %33 = vector.load %arg5[%c0_19, %c0_20, %c0_21, %c0_22] : memref<3x4x1x16xf32, #tpu.memory_space<vmem>>, vector<1x1x1x16xf32>
    %34 = vector.shape_cast %33 : vector<1x1x1x16xf32> to vector<1x16xf32>
    %35 = vector.broadcast %34 : vector<1x16xf32> to vector<16x16xf32>
    %36 = arith.addf %32, %35 : vector<16x16xf32>
    %c1 = arith.constant 1 : index
    %c0_23 = arith.constant 0 : index
    %c0_24 = arith.constant 0 : index
    %c0_25 = arith.constant 0 : index
    %37 = vector.load %arg4[%c1, %c0_23, %c0_24, %c0_25] : memref<3x4x64x16xf32, #tpu.memory_space<vmem>>, vector<1x1x64x16xf32>
    %38 = vector.shape_cast %37 : vector<1x1x64x16xf32> to vector<64x16xf32>
    %39 = arith.truncf %38 : vector<64x16xf32> to vector<64x16xbf16>
    %cst_26 = arith.constant dense<0.000000e+00> : vector<16x16xf32>
    %40 = tpu.matmul %26, %39, %cst_26 {dimension_numbers = #tpu.dot_dimension_numbers<[1], [0], [0], [1], [0, 0, 1, 1], [], []>} : vector<16x64xbf16>, vector<64x16xbf16>, vector<16x16xf32> -> vector<16x16xf32>
    %c1_27 = arith.constant 1 : index
    %c0_28 = arith.constant 0 : index
    %c0_29 = arith.constant 0 : index
    %c0_30 = arith.constant 0 : index
    %41 = vector.load %arg5[%c1_27, %c0_28, %c0_29, %c0_30] : memref<3x4x1x16xf32, #tpu.memory_space<vmem>>, vector<1x1x1x16xf32>
    %42 = vector.shape_cast %41 : vector<1x1x1x16xf32> to vector<1x16xf32>
    %43 = vector.broadcast %42 : vector<1x16xf32> to vector<16x16xf32>
    %44 = arith.addf %40, %43 : vector<16x16xf32>
    %c2 = arith.constant 2 : index
    %c0_31 = arith.constant 0 : index
    %c0_32 = arith.constant 0 : index
    %c0_33 = arith.constant 0 : index
    %45 = vector.load %arg4[%c2, %c0_31, %c0_32, %c0_33] : memref<3x4x64x16xf32, #tpu.memory_space<vmem>>, vector<1x1x64x16xf32>
    %46 = vector.shape_cast %45 : vector<1x1x64x16xf32> to vector<64x16xf32>
    %47 = arith.truncf %46 : vector<64x16xf32> to vector<64x16xbf16>
    %cst_34 = arith.constant dense<0.000000e+00> : vector<16x16xf32>
    %48 = tpu.matmul %26, %47, %cst_34 {dimension_numbers = #tpu.dot_dimension_numbers<[1], [0], [0], [1], [0, 0, 1, 1], [], []>} : vector<16x64xbf16>, vector<64x16xbf16>, vector<16x16xf32> -> vector<16x16xf32>
    %c2_35 = arith.constant 2 : index
    %c0_36 = arith.constant 0 : index
    %c0_37 = arith.constant 0 : index
    %c0_38 = arith.constant 0 : index
    %49 = vector.load %arg5[%c2_35, %c0_36, %c0_37, %c0_38] : memref<3x4x1x16xf32, #tpu.memory_space<vmem>>, vector<1x1x1x16xf32>
    %50 = vector.shape_cast %49 : vector<1x1x1x16xf32> to vector<1x16xf32>
    %51 = vector.broadcast %50 : vector<1x16xf32> to vector<16x16xf32>
    %52 = arith.addf %48, %51 : vector<16x16xf32>
    %53 = vector.shape_cast %36 : vector<16x16xf32> to vector<1x16x16xf32>
    %54 = vector.shape_cast %44 : vector<16x16xf32> to vector<1x16x16xf32>
    %55 = vector.shape_cast %52 : vector<16x16xf32> to vector<1x16x16xf32>
    %56 = arith.truncf %53 : vector<1x16x16xf32> to vector<1x16x16xbf16>
    %57 = arith.truncf %54 : vector<1x16x16xf32> to vector<1x16x16xbf16>
    "tpu.trace_start"() <{level = 10 : i32, message = "wqd,wkd->wqk"}> : () -> ()
    %cst_39 = arith.constant dense<0.000000e+00> : vector<1x16x16xf32>
    %58 = tpu.matmul %56, %57, %cst_39 {dimension_numbers = #tpu.dot_dimension_numbers<[2], [2], [1], [1], [0, 0, 0, 1, 1, 1], [0], [0]>} : vector<1x16x16xbf16>, vector<1x16x16xbf16>, vector<1x16x16xf32> -> vector<1x16x16xf32>
    "tpu.trace_stop"() : () -> ()
    %cst_40 = arith.constant 2.500000e-01 : f32
    %59 = vector.broadcast %cst_40 : f32 to vector<1x16x16xf32>
    %60 = arith.mulf %58, %59 : vector<1x16x16xf32>
    %c0_41 = arith.constant 0 : index
    %c0_42 = arith.constant 0 : index
    %c0_43 = arith.constant 0 : index
    %61 = vector.load %arg6[%c0_41, %c0_42, %c0_43] : memref<4x16x16xf32, #tpu.memory_space<vmem>>, vector<1x16x16xf32>
    %62 = vector.shape_cast %61 : vector<1x16x16xf32> to vector<16x16xf32>
    %63 = vector.shape_cast %62 : vector<16x16xf32> to vector<1x16x16xf32>
    %64 = arith.addf %60, %63 : vector<1x16x16xf32>
    %65 = arith.addf %64, %27 : vector<1x16x16xf32>
    %cst_44 = arith.constant dense<0xFF800000> : vector<1x16xf32>
    %66 = vector.multi_reduction <maximumf>, %65, %cst_44 [2] : vector<1x16x16xf32> to vector<1x16xf32>
    %67 = vector.shape_cast %66 : vector<1x16xf32> to vector<1x16x1xf32>
    %68 = vector.broadcast %67 : vector<1x16x1xf32> to vector<1x16x16xf32>
    %69 = arith.subf %65, %68 : vector<1x16x16xf32>
    %70 = math.exp %69 : vector<1x16x16xf32>
    %cst_45 = arith.constant dense<0.000000e+00> : vector<1x16xf32>
    %71 = vector.multi_reduction <add>, %70, %cst_45 [2] : vector<1x16x16xf32> to vector<1x16xf32>
    %72 = vector.shape_cast %71 : vector<1x16xf32> to vector<1x16x1xf32>
    %73 = tpu.reciprocal %72 {approx = true} : vector<1x16x1xf32> -> vector<1x16x1xf32>
    %74 = vector.broadcast %73 : vector<1x16x1xf32> to vector<1x16x16xf32>
    %75 = arith.mulf %70, %74 : vector<1x16x16xf32>
    %76 = arith.truncf %75 : vector<1x16x16xf32> to vector<1x16x16xbf16>
    %77 = arith.truncf %55 : vector<1x16x16xf32> to vector<1x16x16xbf16>
    "tpu.trace_start"() <{level = 10 : i32, message = "wqk,wkd->wqd"}> : () -> ()
    %cst_46 = arith.constant dense<0.000000e+00> : vector<1x16x16xf32>
    %78 = tpu.matmul %76, %77, %cst_46 {dimension_numbers = #tpu.dot_dimension_numbers<[2], [1], [1], [2], [0, 0, 0, 1, 1, 2], [0], [0]>} : vector<1x16x16xbf16>, vector<1x16x16xbf16>, vector<1x16x16xf32> -> vector<1x16x16xf32>
    "tpu.trace_stop"() : () -> ()
    %79 = vector.shape_cast %78 : vector<1x16x16xf32> to vector<16x16xf32>
    %80 = arith.truncf %79 : vector<16x16xf32> to vector<16x16xbf16>
    %c0_47 = arith.constant 0 : index
    %c0_48 = arith.constant 0 : index
    %c0_49 = arith.constant 0 : index
    %81 = vector.load %arg8[%c0_47, %c0_48, %c0_49] : memref<4x16x64xf32, #tpu.memory_space<vmem>>, vector<1x16x64xf32>
    %82 = vector.shape_cast %81 : vector<1x16x64xf32> to vector<16x64xf32>
    %83 = arith.truncf %82 : vector<16x64xf32> to vector<16x64xbf16>
    %cst_50 = arith.constant dense<0.000000e+00> : vector<16x64xf32>
    %84 = tpu.matmul %80, %83, %cst_50 {dimension_numbers = #tpu.dot_dimension_numbers<[1], [0], [0], [1], [0, 0, 1, 1], [], []>} : vector<16x16xbf16>, vector<16x64xbf16>, vector<16x64xf32> -> vector<16x64xf32>
    %85 = arith.addf %28, %84 : vector<16x64xf32>
    %c0_51 = arith.constant 0 : index
    %c1_52 = arith.constant 1 : index
    %c0_53 = arith.constant 0 : index
    %c0_54 = arith.constant 0 : index
    %86 = vector.load %arg4[%c0_51, %c1_52, %c0_53, %c0_54] : memref<3x4x64x16xf32, #tpu.memory_space<vmem>>, vector<1x1x64x16xf32>
    %87 = vector.shape_cast %86 : vector<1x1x64x16xf32> to vector<64x16xf32>
    %88 = arith.truncf %87 : vector<64x16xf32> to vector<64x16xbf16>
    %cst_55 = arith.constant dense<0.000000e+00> : vector<16x16xf32>
    %89 = tpu.matmul %26, %88, %cst_55 {dimension_numbers = #tpu.dot_dimension_numbers<[1], [0], [0], [1], [0, 0, 1, 1], [], []>} : vector<16x64xbf16>, vector<64x16xbf16>, vector<16x16xf32> -> vector<16x16xf32>
    %c0_56 = arith.constant 0 : index
    %c1_57 = arith.constant 1 : index
    %c0_58 = arith.constant 0 : index
    %c0_59 = arith.constant 0 : index
    %90 = vector.load %arg5[%c0_56, %c1_57, %c0_58, %c0_59] : memref<3x4x1x16xf32, #tpu.memory_space<vmem>>, vector<1x1x1x16xf32>
    %91 = vector.shape_cast %90 : vector<1x1x1x16xf32> to vector<1x16xf32>
    %92 = vector.broadcast %91 : vector<1x16xf32> to vector<16x16xf32>
    %93 = arith.addf %89, %92 : vector<16x16xf32>
    %c1_60 = arith.constant 1 : index
    %c1_61 = arith.constant 1 : index
    %c0_62 = arith.constant 0 : index
    %c0_63 = arith.constant 0 : index
    %94 = vector.load %arg4[%c1_60, %c1_61, %c0_62, %c0_63] : memref<3x4x64x16xf32, #tpu.memory_space<vmem>>, vector<1x1x64x16xf32>
    %95 = vector.shape_cast %94 : vector<1x1x64x16xf32> to vector<64x16xf32>
    %96 = arith.truncf %95 : vector<64x16xf32> to vector<64x16xbf16>
    %cst_64 = arith.constant dense<0.000000e+00> : vector<16x16xf32>
    %97 = tpu.matmul %26, %96, %cst_64 {dimension_numbers = #tpu.dot_dimension_numbers<[1], [0], [0], [1], [0, 0, 1, 1], [], []>} : vector<16x64xbf16>, vector<64x16xbf16>, vector<16x16xf32> -> vector<16x16xf32>
    %c1_65 = arith.constant 1 : index
    %c1_66 = arith.constant 1 : index
    %c0_67 = arith.constant 0 : index
    %c0_68 = arith.constant 0 : index
    %98 = vector.load %arg5[%c1_65, %c1_66, %c0_67, %c0_68] : memref<3x4x1x16xf32, #tpu.memory_space<vmem>>, vector<1x1x1x16xf32>
    %99 = vector.shape_cast %98 : vector<1x1x1x16xf32> to vector<1x16xf32>
    %100 = vector.broadcast %99 : vector<1x16xf32> to vector<16x16xf32>
    %101 = arith.addf %97, %100 : vector<16x16xf32>
    %c2_69 = arith.constant 2 : index
    %c1_70 = arith.constant 1 : index
    %c0_71 = arith.constant 0 : index
    %c0_72 = arith.constant 0 : index
    %102 = vector.load %arg4[%c2_69, %c1_70, %c0_71, %c0_72] : memref<3x4x64x16xf32, #tpu.memory_space<vmem>>, vector<1x1x64x16xf32>
    %103 = vector.shape_cast %102 : vector<1x1x64x16xf32> to vector<64x16xf32>
    %104 = arith.truncf %103 : vector<64x16xf32> to vector<64x16xbf16>
    %cst_73 = arith.constant dense<0.000000e+00> : vector<16x16xf32>
    %105 = tpu.matmul %26, %104, %cst_73 {dimension_numbers = #tpu.dot_dimension_numbers<[1], [0], [0], [1], [0, 0, 1, 1], [], []>} : vector<16x64xbf16>, vector<64x16xbf16>, vector<16x16xf32> -> vector<16x16xf32>
    %c2_74 = arith.constant 2 : index
    %c1_75 = arith.constant 1 : index
    %c0_76 = arith.constant 0 : index
    %c0_77 = arith.constant 0 : index
    %106 = vector.load %arg5[%c2_74, %c1_75, %c0_76, %c0_77] : memref<3x4x1x16xf32, #tpu.memory_space<vmem>>, vector<1x1x1x16xf32>
    %107 = vector.shape_cast %106 : vector<1x1x1x16xf32> to vector<1x16xf32>
    %108 = vector.broadcast %107 : vector<1x16xf32> to vector<16x16xf32>
    %109 = arith.addf %105, %108 : vector<16x16xf32>
    %110 = vector.shape_cast %93 : vector<16x16xf32> to vector<1x16x16xf32>
    %111 = vector.shape_cast %101 : vector<16x16xf32> to vector<1x16x16xf32>
    %112 = vector.shape_cast %109 : vector<16x16xf32> to vector<1x16x16xf32>
    %113 = arith.truncf %110 : vector<1x16x16xf32> to vector<1x16x16xbf16>
    %114 = arith.truncf %111 : vector<1x16x16xf32> to vector<1x16x16xbf16>
    "tpu.trace_start"() <{level = 10 : i32, message = "wqd,wkd->wqk"}> : () -> ()
    %cst_78 = arith.constant dense<0.000000e+00> : vector<1x16x16xf32>
    %115 = tpu.matmul %113, %114, %cst_78 {dimension_numbers = #tpu.dot_dimension_numbers<[2], [2], [1], [1], [0, 0, 0, 1, 1, 1], [0], [0]>} : vector<1x16x16xbf16>, vector<1x16x16xbf16>, vector<1x16x16xf32> -> vector<1x16x16xf32>
    "tpu.trace_stop"() : () -> ()
    %cst_79 = arith.constant 2.500000e-01 : f32
    %116 = vector.broadcast %cst_79 : f32 to vector<1x16x16xf32>
    %117 = arith.mulf %115, %116 : vector<1x16x16xf32>
    %c1_80 = arith.constant 1 : index
    %c0_81 = arith.constant 0 : index
    %c0_82 = arith.constant 0 : index
    %118 = vector.load %arg6[%c1_80, %c0_81, %c0_82] : memref<4x16x16xf32, #tpu.memory_space<vmem>>, vector<1x16x16xf32>
    %119 = vector.shape_cast %118 : vector<1x16x16xf32> to vector<16x16xf32>
    %120 = vector.shape_cast %119 : vector<16x16xf32> to vector<1x16x16xf32>
    %121 = arith.addf %117, %120 : vector<1x16x16xf32>
    %122 = arith.addf %121, %27 : vector<1x16x16xf32>
    %cst_83 = arith.constant dense<0xFF800000> : vector<1x16xf32>
    %123 = vector.multi_reduction <maximumf>, %122, %cst_83 [2] : vector<1x16x16xf32> to vector<1x16xf32>
    %124 = vector.shape_cast %123 : vector<1x16xf32> to vector<1x16x1xf32>
    %125 = vector.broadcast %124 : vector<1x16x1xf32> to vector<1x16x16xf32>
    %126 = arith.subf %122, %125 : vector<1x16x16xf32>
    %127 = math.exp %126 : vector<1x16x16xf32>
    %cst_84 = arith.constant dense<0.000000e+00> : vector<1x16xf32>
    %128 = vector.multi_reduction <add>, %127, %cst_84 [2] : vector<1x16x16xf32> to vector<1x16xf32>
    %129 = vector.shape_cast %128 : vector<1x16xf32> to vector<1x16x1xf32>
    %130 = tpu.reciprocal %129 {approx = true} : vector<1x16x1xf32> -> vector<1x16x1xf32>
    %131 = vector.broadcast %130 : vector<1x16x1xf32> to vector<1x16x16xf32>
    %132 = arith.mulf %127, %131 : vector<1x16x16xf32>
    %133 = arith.truncf %132 : vector<1x16x16xf32> to vector<1x16x16xbf16>
    %134 = arith.truncf %112 : vector<1x16x16xf32> to vector<1x16x16xbf16>
    "tpu.trace_start"() <{level = 10 : i32, message = "wqk,wkd->wqd"}> : () -> ()
    %cst_85 = arith.constant dense<0.000000e+00> : vector<1x16x16xf32>
    %135 = tpu.matmul %133, %134, %cst_85 {dimension_numbers = #tpu.dot_dimension_numbers<[2], [1], [1], [2], [0, 0, 0, 1, 1, 2], [0], [0]>} : vector<1x16x16xbf16>, vector<1x16x16xbf16>, vector<1x16x16xf32> -> vector<1x16x16xf32>
    "tpu.trace_stop"() : () -> ()
    %136 = vector.shape_cast %135 : vector<1x16x16xf32> to vector<16x16xf32>
    %137 = arith.truncf %136 : vector<16x16xf32> to vector<16x16xbf16>
    %c1_86 = arith.constant 1 : index
    %c0_87 = arith.constant 0 : index
    %c0_88 = arith.constant 0 : index
    %138 = vector.load %arg8[%c1_86, %c0_87, %c0_88] : memref<4x16x64xf32, #tpu.memory_space<vmem>>, vector<1x16x64xf32>
    %139 = vector.shape_cast %138 : vector<1x16x64xf32> to vector<16x64xf32>
    %140 = arith.truncf %139 : vector<16x64xf32> to vector<16x64xbf16>
    %cst_89 = arith.constant dense<0.000000e+00> : vector<16x64xf32>
    %141 = tpu.matmul %137, %140, %cst_89 {dimension_numbers = #tpu.dot_dimension_numbers<[1], [0], [0], [1], [0, 0, 1, 1], [], []>} : vector<16x16xbf16>, vector<16x64xbf16>, vector<16x64xf32> -> vector<16x64xf32>
    %142 = arith.addf %85, %141 : vector<16x64xf32>
    %c0_90 = arith.constant 0 : index
    %c2_91 = arith.constant 2 : index
    %c0_92 = arith.constant 0 : index
    %c0_93 = arith.constant 0 : index
    %143 = vector.load %arg4[%c0_90, %c2_91, %c0_92, %c0_93] : memref<3x4x64x16xf32, #tpu.memory_space<vmem>>, vector<1x1x64x16xf32>
    %144 = vector.shape_cast %143 : vector<1x1x64x16xf32> to vector<64x16xf32>
    %145 = arith.truncf %144 : vector<64x16xf32> to vector<64x16xbf16>
    %cst_94 = arith.constant dense<0.000000e+00> : vector<16x16xf32>
    %146 = tpu.matmul %26, %145, %cst_94 {dimension_numbers = #tpu.dot_dimension_numbers<[1], [0], [0], [1], [0, 0, 1, 1], [], []>} : vector<16x64xbf16>, vector<64x16xbf16>, vector<16x16xf32> -> vector<16x16xf32>
    %c0_95 = arith.constant 0 : index
    %c2_96 = arith.constant 2 : index
    %c0_97 = arith.constant 0 : index
    %c0_98 = arith.constant 0 : index
    %147 = vector.load %arg5[%c0_95, %c2_96, %c0_97, %c0_98] : memref<3x4x1x16xf32, #tpu.memory_space<vmem>>, vector<1x1x1x16xf32>
    %148 = vector.shape_cast %147 : vector<1x1x1x16xf32> to vector<1x16xf32>
    %149 = vector.broadcast %148 : vector<1x16xf32> to vector<16x16xf32>
    %150 = arith.addf %146, %149 : vector<16x16xf32>
    %c1_99 = arith.constant 1 : index
    %c2_100 = arith.constant 2 : index
    %c0_101 = arith.constant 0 : index
    %c0_102 = arith.constant 0 : index
    %151 = vector.load %arg4[%c1_99, %c2_100, %c0_101, %c0_102] : memref<3x4x64x16xf32, #tpu.memory_space<vmem>>, vector<1x1x64x16xf32>
    %152 = vector.shape_cast %151 : vector<1x1x64x16xf32> to vector<64x16xf32>
    %153 = arith.truncf %152 : vector<64x16xf32> to vector<64x16xbf16>
    %cst_103 = arith.constant dense<0.000000e+00> : vector<16x16xf32>
    %154 = tpu.matmul %26, %153, %cst_103 {dimension_numbers = #tpu.dot_dimension_numbers<[1], [0], [0], [1], [0, 0, 1, 1], [], []>} : vector<16x64xbf16>, vector<64x16xbf16>, vector<16x16xf32> -> vector<16x16xf32>
    %c1_104 = arith.constant 1 : index
    %c2_105 = arith.constant 2 : index
    %c0_106 = arith.constant 0 : index
    %c0_107 = arith.constant 0 : index
    %155 = vector.load %arg5[%c1_104, %c2_105, %c0_106, %c0_107] : memref<3x4x1x16xf32, #tpu.memory_space<vmem>>, vector<1x1x1x16xf32>
    %156 = vector.shape_cast %155 : vector<1x1x1x16xf32> to vector<1x16xf32>
    %157 = vector.broadcast %156 : vector<1x16xf32> to vector<16x16xf32>
    %158 = arith.addf %154, %157 : vector<16x16xf32>
    %c2_108 = arith.constant 2 : index
    %c2_109 = arith.constant 2 : index
    %c0_110 = arith.constant 0 : index
    %c0_111 = arith.constant 0 : index
    %159 = vector.load %arg4[%c2_108, %c2_109, %c0_110, %c0_111] : memref<3x4x64x16xf32, #tpu.memory_space<vmem>>, vector<1x1x64x16xf32>
    %160 = vector.shape_cast %159 : vector<1x1x64x16xf32> to vector<64x16xf32>
    %161 = arith.truncf %160 : vector<64x16xf32> to vector<64x16xbf16>
    %cst_112 = arith.constant dense<0.000000e+00> : vector<16x16xf32>
    %162 = tpu.matmul %26, %161, %cst_112 {dimension_numbers = #tpu.dot_dimension_numbers<[1], [0], [0], [1], [0, 0, 1, 1], [], []>} : vector<16x64xbf16>, vector<64x16xbf16>, vector<16x16xf32> -> vector<16x16xf32>
    %c2_113 = arith.constant 2 : index
    %c2_114 = arith.constant 2 : index
    %c0_115 = arith.constant 0 : index
    %c0_116 = arith.constant 0 : index
    %163 = vector.load %arg5[%c2_113, %c2_114, %c0_115, %c0_116] : memref<3x4x1x16xf32, #tpu.memory_space<vmem>>, vector<1x1x1x16xf32>
    %164 = vector.shape_cast %163 : vector<1x1x1x16xf32> to vector<1x16xf32>
    %165 = vector.broadcast %164 : vector<1x16xf32> to vector<16x16xf32>
    %166 = arith.addf %162, %165 : vector<16x16xf32>
    %167 = vector.shape_cast %150 : vector<16x16xf32> to vector<1x16x16xf32>
    %168 = vector.shape_cast %158 : vector<16x16xf32> to vector<1x16x16xf32>
    %169 = vector.shape_cast %166 : vector<16x16xf32> to vector<1x16x16xf32>
    %170 = arith.truncf %167 : vector<1x16x16xf32> to vector<1x16x16xbf16>
    %171 = arith.truncf %168 : vector<1x16x16xf32> to vector<1x16x16xbf16>
    "tpu.trace_start"() <{level = 10 : i32, message = "wqd,wkd->wqk"}> : () -> ()
    %cst_117 = arith.constant dense<0.000000e+00> : vector<1x16x16xf32>
    %172 = tpu.matmul %170, %171, %cst_117 {dimension_numbers = #tpu.dot_dimension_numbers<[2], [2], [1], [1], [0, 0, 0, 1, 1, 1], [0], [0]>} : vector<1x16x16xbf16>, vector<1x16x16xbf16>, vector<1x16x16xf32> -> vector<1x16x16xf32>
    "tpu.trace_stop"() : () -> ()
    %cst_118 = arith.constant 2.500000e-01 : f32
    %173 = vector.broadcast %cst_118 : f32 to vector<1x16x16xf32>
    %174 = arith.mulf %172, %173 : vector<1x16x16xf32>
    %c2_119 = arith.constant 2 : index
    %c0_120 = arith.constant 0 : index
    %c0_121 = arith.constant 0 : index
    %175 = vector.load %arg6[%c2_119, %c0_120, %c0_121] : memref<4x16x16xf32, #tpu.memory_space<vmem>>, vector<1x16x16xf32>
    %176 = vector.shape_cast %175 : vector<1x16x16xf32> to vector<16x16xf32>
    %177 = vector.shape_cast %176 : vector<16x16xf32> to vector<1x16x16xf32>
    %178 = arith.addf %174, %177 : vector<1x16x16xf32>
    %179 = arith.addf %178, %27 : vector<1x16x16xf32>
    %cst_122 = arith.constant dense<0xFF800000> : vector<1x16xf32>
    %180 = vector.multi_reduction <maximumf>, %179, %cst_122 [2] : vector<1x16x16xf32> to vector<1x16xf32>
    %181 = vector.shape_cast %180 : vector<1x16xf32> to vector<1x16x1xf32>
    %182 = vector.broadcast %181 : vector<1x16x1xf32> to vector<1x16x16xf32>
    %183 = arith.subf %179, %182 : vector<1x16x16xf32>
    %184 = math.exp %183 : vector<1x16x16xf32>
    %cst_123 = arith.constant dense<0.000000e+00> : vector<1x16xf32>
    %185 = vector.multi_reduction <add>, %184, %cst_123 [2] : vector<1x16x16xf32> to vector<1x16xf32>
    %186 = vector.shape_cast %185 : vector<1x16xf32> to vector<1x16x1xf32>
    %187 = tpu.reciprocal %186 {approx = true} : vector<1x16x1xf32> -> vector<1x16x1xf32>
    %188 = vector.broadcast %187 : vector<1x16x1xf32> to vector<1x16x16xf32>
    %189 = arith.mulf %184, %188 : vector<1x16x16xf32>
    %190 = arith.truncf %189 : vector<1x16x16xf32> to vector<1x16x16xbf16>
    %191 = arith.truncf %169 : vector<1x16x16xf32> to vector<1x16x16xbf16>
    "tpu.trace_start"() <{level = 10 : i32, message = "wqk,wkd->wqd"}> : () -> ()
    %cst_124 = arith.constant dense<0.000000e+00> : vector<1x16x16xf32>
    %192 = tpu.matmul %190, %191, %cst_124 {dimension_numbers = #tpu.dot_dimension_numbers<[2], [1], [1], [2], [0, 0, 0, 1, 1, 2], [0], [0]>} : vector<1x16x16xbf16>, vector<1x16x16xbf16>, vector<1x16x16xf32> -> vector<1x16x16xf32>
    "tpu.trace_stop"() : () -> ()
    %193 = vector.shape_cast %192 : vector<1x16x16xf32> to vector<16x16xf32>
    %194 = arith.truncf %193 : vector<16x16xf32> to vector<16x16xbf16>
    %c2_125 = arith.constant 2 : index
    %c0_126 = arith.constant 0 : index
    %c0_127 = arith.constant 0 : index
    %195 = vector.load %arg8[%c2_125, %c0_126, %c0_127] : memref<4x16x64xf32, #tpu.memory_space<vmem>>, vector<1x16x64xf32>
    %196 = vector.shape_cast %195 : vector<1x16x64xf32> to vector<16x64xf32>
    %197 = arith.truncf %196 : vector<16x64xf32> to vector<16x64xbf16>
    %cst_128 = arith.constant dense<0.000000e+00> : vector<16x64xf32>
    %198 = tpu.matmul %194, %197, %cst_128 {dimension_numbers = #tpu.dot_dimension_numbers<[1], [0], [0], [1], [0, 0, 1, 1], [], []>} : vector<16x16xbf16>, vector<16x64xbf16>, vector<16x64xf32> -> vector<16x64xf32>
    %199 = arith.addf %142, %198 : vector<16x64xf32>
    %c0_129 = arith.constant 0 : index
    %c3 = arith.constant 3 : index
    %c0_130 = arith.constant 0 : index
    %c0_131 = arith.constant 0 : index
    %200 = vector.load %arg4[%c0_129, %c3, %c0_130, %c0_131] : memref<3x4x64x16xf32, #tpu.memory_space<vmem>>, vector<1x1x64x16xf32>
    %201 = vector.shape_cast %200 : vector<1x1x64x16xf32> to vector<64x16xf32>
    %202 = arith.truncf %201 : vector<64x16xf32> to vector<64x16xbf16>
    %cst_132 = arith.constant dense<0.000000e+00> : vector<16x16xf32>
    %203 = tpu.matmul %26, %202, %cst_132 {dimension_numbers = #tpu.dot_dimension_numbers<[1], [0], [0], [1], [0, 0, 1, 1], [], []>} : vector<16x64xbf16>, vector<64x16xbf16>, vector<16x16xf32> -> vector<16x16xf32>
    %c0_133 = arith.constant 0 : index
    %c3_134 = arith.constant 3 : index
    %c0_135 = arith.constant 0 : index
    %c0_136 = arith.constant 0 : index
    %204 = vector.load %arg5[%c0_133, %c3_134, %c0_135, %c0_136] : memref<3x4x1x16xf32, #tpu.memory_space<vmem>>, vector<1x1x1x16xf32>
    %205 = vector.shape_cast %204 : vector<1x1x1x16xf32> to vector<1x16xf32>
    %206 = vector.broadcast %205 : vector<1x16xf32> to vector<16x16xf32>
    %207 = arith.addf %203, %206 : vector<16x16xf32>
    %c1_137 = arith.constant 1 : index
    %c3_138 = arith.constant 3 : index
    %c0_139 = arith.constant 0 : index
    %c0_140 = arith.constant 0 : index
    %208 = vector.load %arg4[%c1_137, %c3_138, %c0_139, %c0_140] : memref<3x4x64x16xf32, #tpu.memory_space<vmem>>, vector<1x1x64x16xf32>
    %209 = vector.shape_cast %208 : vector<1x1x64x16xf32> to vector<64x16xf32>
    %210 = arith.truncf %209 : vector<64x16xf32> to vector<64x16xbf16>
    %cst_141 = arith.constant dense<0.000000e+00> : vector<16x16xf32>
    %211 = tpu.matmul %26, %210, %cst_141 {dimension_numbers = #tpu.dot_dimension_numbers<[1], [0], [0], [1], [0, 0, 1, 1], [], []>} : vector<16x64xbf16>, vector<64x16xbf16>, vector<16x16xf32> -> vector<16x16xf32>
    %c1_142 = arith.constant 1 : index
    %c3_143 = arith.constant 3 : index
    %c0_144 = arith.constant 0 : index
    %c0_145 = arith.constant 0 : index
    %212 = vector.load %arg5[%c1_142, %c3_143, %c0_144, %c0_145] : memref<3x4x1x16xf32, #tpu.memory_space<vmem>>, vector<1x1x1x16xf32>
    %213 = vector.shape_cast %212 : vector<1x1x1x16xf32> to vector<1x16xf32>
    %214 = vector.broadcast %213 : vector<1x16xf32> to vector<16x16xf32>
    %215 = arith.addf %211, %214 : vector<16x16xf32>
    %c2_146 = arith.constant 2 : index
    %c3_147 = arith.constant 3 : index
    %c0_148 = arith.constant 0 : index
    %c0_149 = arith.constant 0 : index
    %216 = vector.load %arg4[%c2_146, %c3_147, %c0_148, %c0_149] : memref<3x4x64x16xf32, #tpu.memory_space<vmem>>, vector<1x1x64x16xf32>
    %217 = vector.shape_cast %216 : vector<1x1x64x16xf32> to vector<64x16xf32>
    %218 = arith.truncf %217 : vector<64x16xf32> to vector<64x16xbf16>
    %cst_150 = arith.constant dense<0.000000e+00> : vector<16x16xf32>
    %219 = tpu.matmul %26, %218, %cst_150 {dimension_numbers = #tpu.dot_dimension_numbers<[1], [0], [0], [1], [0, 0, 1, 1], [], []>} : vector<16x64xbf16>, vector<64x16xbf16>, vector<16x16xf32> -> vector<16x16xf32>
    %c2_151 = arith.constant 2 : index
    %c3_152 = arith.constant 3 : index
    %c0_153 = arith.constant 0 : index
    %c0_154 = arith.constant 0 : index
    %220 = vector.load %arg5[%c2_151, %c3_152, %c0_153, %c0_154] : memref<3x4x1x16xf32, #tpu.memory_space<vmem>>, vector<1x1x1x16xf32>
    %221 = vector.shape_cast %220 : vector<1x1x1x16xf32> to vector<1x16xf32>
    %222 = vector.broadcast %221 : vector<1x16xf32> to vector<16x16xf32>
    %223 = arith.addf %219, %222 : vector<16x16xf32>
    %224 = vector.shape_cast %207 : vector<16x16xf32> to vector<1x16x16xf32>
    %225 = vector.shape_cast %215 : vector<16x16xf32> to vector<1x16x16xf32>
    %226 = vector.shape_cast %223 : vector<16x16xf32> to vector<1x16x16xf32>
    %227 = arith.truncf %224 : vector<1x16x16xf32> to vector<1x16x16xbf16>
    %228 = arith.truncf %225 : vector<1x16x16xf32> to vector<1x16x16xbf16>
    "tpu.trace_start"() <{level = 10 : i32, message = "wqd,wkd->wqk"}> : () -> ()
    %cst_155 = arith.constant dense<0.000000e+00> : vector<1x16x16xf32>
    %229 = tpu.matmul %227, %228, %cst_155 {dimension_numbers = #tpu.dot_dimension_numbers<[2], [2], [1], [1], [0, 0, 0, 1, 1, 1], [0], [0]>} : vector<1x16x16xbf16>, vector<1x16x16xbf16>, vector<1x16x16xf32> -> vector<1x16x16xf32>
    "tpu.trace_stop"() : () -> ()
    %cst_156 = arith.constant 2.500000e-01 : f32
    %230 = vector.broadcast %cst_156 : f32 to vector<1x16x16xf32>
    %231 = arith.mulf %229, %230 : vector<1x16x16xf32>
    %c3_157 = arith.constant 3 : index
    %c0_158 = arith.constant 0 : index
    %c0_159 = arith.constant 0 : index
    %232 = vector.load %arg6[%c3_157, %c0_158, %c0_159] : memref<4x16x16xf32, #tpu.memory_space<vmem>>, vector<1x16x16xf32>
    %233 = vector.shape_cast %232 : vector<1x16x16xf32> to vector<16x16xf32>
    %234 = vector.shape_cast %233 : vector<16x16xf32> to vector<1x16x16xf32>
    %235 = arith.addf %231, %234 : vector<1x16x16xf32>
    %236 = arith.addf %235, %27 : vector<1x16x16xf32>
    %cst_160 = arith.constant dense<0xFF800000> : vector<1x16xf32>
    %237 = vector.multi_reduction <maximumf>, %236, %cst_160 [2] : vector<1x16x16xf32> to vector<1x16xf32>
    %238 = vector.shape_cast %237 : vector<1x16xf32> to vector<1x16x1xf32>
    %239 = vector.broadcast %238 : vector<1x16x1xf32> to vector<1x16x16xf32>
    %240 = arith.subf %236, %239 : vector<1x16x16xf32>
    %241 = math.exp %240 : vector<1x16x16xf32>
    %cst_161 = arith.constant dense<0.000000e+00> : vector<1x16xf32>
    %242 = vector.multi_reduction <add>, %241, %cst_161 [2] : vector<1x16x16xf32> to vector<1x16xf32>
    %243 = vector.shape_cast %242 : vector<1x16xf32> to vector<1x16x1xf32>
    %244 = tpu.reciprocal %243 {approx = true} : vector<1x16x1xf32> -> vector<1x16x1xf32>
    %245 = vector.broadcast %244 : vector<1x16x1xf32> to vector<1x16x16xf32>
    %246 = arith.mulf %241, %245 : vector<1x16x16xf32>
    %247 = arith.truncf %246 : vector<1x16x16xf32> to vector<1x16x16xbf16>
    %248 = arith.truncf %226 : vector<1x16x16xf32> to vector<1x16x16xbf16>
    "tpu.trace_start"() <{level = 10 : i32, message = "wqk,wkd->wqd"}> : () -> ()
    %cst_162 = arith.constant dense<0.000000e+00> : vector<1x16x16xf32>
    %249 = tpu.matmul %247, %248, %cst_162 {dimension_numbers = #tpu.dot_dimension_numbers<[2], [1], [1], [2], [0, 0, 0, 1, 1, 2], [0], [0]>} : vector<1x16x16xbf16>, vector<1x16x16xbf16>, vector<1x16x16xf32> -> vector<1x16x16xf32>
    "tpu.trace_stop"() : () -> ()
    %250 = vector.shape_cast %249 : vector<1x16x16xf32> to vector<16x16xf32>
    %251 = arith.truncf %250 : vector<16x16xf32> to vector<16x16xbf16>
    %c3_163 = arith.constant 3 : index
    %c0_164 = arith.constant 0 : index
    %c0_165 = arith.constant 0 : index
    %252 = vector.load %arg8[%c3_163, %c0_164, %c0_165] : memref<4x16x64xf32, #tpu.memory_space<vmem>>, vector<1x16x64xf32>
    %253 = vector.shape_cast %252 : vector<1x16x64xf32> to vector<16x64xf32>
    %254 = arith.truncf %253 : vector<16x64xf32> to vector<16x64xbf16>
    %cst_166 = arith.constant dense<0.000000e+00> : vector<16x64xf32>
    %255 = tpu.matmul %251, %254, %cst_166 {dimension_numbers = #tpu.dot_dimension_numbers<[1], [0], [0], [1], [0, 0, 1, 1], [], []>} : vector<16x16xbf16>, vector<16x64xbf16>, vector<16x64xf32> -> vector<16x64xf32>
    %256 = arith.addf %199, %255 : vector<16x64xf32>
    %257 = arith.addf %1, %256 : vector<16x64xf32>
    %c0_167 = arith.constant 0 : index
    %c0_168 = arith.constant 0 : index
    %258 = vector.load %arg9[%c0_167, %c0_168] : memref<1x64xf32, #tpu.memory_space<vmem>>, vector<1x64xf32>
    %259 = vector.broadcast %258 : vector<1x64xf32> to vector<16x64xf32>
    %260 = arith.addf %257, %259 : vector<16x64xf32>
    %cst_169 = arith.constant dense<0.000000e+00> : vector<16xf32>
    %261 = vector.multi_reduction <add>, %260, %cst_169 [1] : vector<16x64xf32> to vector<16xf32>
    %262 = vector.shape_cast %261 : vector<16xf32> to vector<16x1xf32>
    %cst_170 = arith.constant 6.400000e+01 : f32
    %263 = vector.broadcast %cst_170 : f32 to vector<16x1xf32>
    %264 = arith.divf %262, %263 : vector<16x1xf32>
    %265 = vector.broadcast %264 : vector<16x1xf32> to vector<16x64xf32>
    %266 = arith.subf %260, %265 : vector<16x64xf32>
    %267 = arith.mulf %266, %266 : vector<16x64xf32>
    %cst_171 = arith.constant dense<0.000000e+00> : vector<16xf32>
    %268 = vector.multi_reduction <add>, %267, %cst_171 [1] : vector<16x64xf32> to vector<16xf32>
    %269 = vector.shape_cast %268 : vector<16xf32> to vector<16x1xf32>
    %cst_172 = arith.constant 6.400000e+01 : f32
    %270 = vector.broadcast %cst_172 : f32 to vector<16x1xf32>
    %271 = arith.divf %269, %270 : vector<16x1xf32>
    %272 = vector.broadcast %264 : vector<16x1xf32> to vector<16x64xf32>
    %273 = arith.subf %260, %272 : vector<16x64xf32>
    %cst_173 = arith.constant 9.99999974E-6 : f32
    %274 = vector.broadcast %cst_173 : f32 to vector<16x1xf32>
    %275 = arith.addf %271, %274 : vector<16x1xf32>
    %276 = math.rsqrt %275 : vector<16x1xf32>
    %277 = vector.broadcast %276 : vector<16x1xf32> to vector<16x64xf32>
    %278 = arith.mulf %273, %277 : vector<16x64xf32>
    %c0_174 = arith.constant 0 : index
    %c0_175 = arith.constant 0 : index
    %279 = vector.load %arg10[%c0_174, %c0_175] : memref<1x64xf32, #tpu.memory_space<vmem>>, vector<1x64xf32>
    %280 = vector.broadcast %279 : vector<1x64xf32> to vector<16x64xf32>
    %281 = arith.mulf %278, %280 : vector<16x64xf32>
    %c0_176 = arith.constant 0 : index
    %c0_177 = arith.constant 0 : index
    %282 = vector.load %arg11[%c0_176, %c0_177] : memref<1x64xf32, #tpu.memory_space<vmem>>, vector<1x64xf32>
    %283 = vector.broadcast %282 : vector<1x64xf32> to vector<16x64xf32>
    %284 = arith.addf %281, %283 : vector<16x64xf32>
    %285 = arith.truncf %284 : vector<16x64xf32> to vector<16x64xbf16>
    %c0_178 = arith.constant 0 : index
    %c0_179 = arith.constant 0 : index
    %286 = vector.load %arg12[%c0_178, %c0_179] : memref<64x256xf32, #tpu.memory_space<vmem>>, vector<64x256xf32>
    %287 = arith.truncf %286 : vector<64x256xf32> to vector<64x256xbf16>
    %cst_180 = arith.constant dense<0.000000e+00> : vector<16x256xf32>
    %288 = tpu.matmul %285, %287, %cst_180 {dimension_numbers = #tpu.dot_dimension_numbers<[1], [0], [0], [1], [0, 0, 1, 1], [], []>} : vector<16x64xbf16>, vector<64x256xbf16>, vector<16x256xf32> -> vector<16x256xf32>
    %c0_181 = arith.constant 0 : index
    %c0_182 = arith.constant 0 : index
    %289 = vector.load %arg13[%c0_181, %c0_182] : memref<1x256xf32, #tpu.memory_space<vmem>>, vector<1x256xf32>
    %290 = vector.broadcast %289 : vector<1x256xf32> to vector<16x256xf32>
    %291 = arith.addf %288, %290 : vector<16x256xf32>
    %292 = arith.mulf %291, %291 : vector<16x256xf32>
    %293 = arith.mulf %291, %292 : vector<16x256xf32>
    %cst_183 = arith.constant 4.471500e-02 : f32
    %294 = vector.broadcast %cst_183 : f32 to vector<16x256xf32>
    %295 = arith.mulf %294, %293 : vector<16x256xf32>
    %296 = arith.addf %291, %295 : vector<16x256xf32>
    %cst_184 = arith.constant 0.797884583 : f32
    %297 = vector.broadcast %cst_184 : f32 to vector<16x256xf32>
    %298 = arith.mulf %297, %296 : vector<16x256xf32>
    %299 = math.tanh %298 : vector<16x256xf32>
    %cst_185 = arith.constant 1.000000e+00 : f32
    %300 = vector.broadcast %cst_185 : f32 to vector<16x256xf32>
    %301 = arith.addf %300, %299 : vector<16x256xf32>
    %cst_186 = arith.constant 5.000000e-01 : f32
    %302 = vector.broadcast %cst_186 : f32 to vector<16x256xf32>
    %303 = arith.mulf %302, %301 : vector<16x256xf32>
    %304 = arith.mulf %291, %303 : vector<16x256xf32>
    %305 = arith.truncf %304 : vector<16x256xf32> to vector<16x256xbf16>
    %c0_187 = arith.constant 0 : index
    %c0_188 = arith.constant 0 : index
    %306 = vector.load %arg14[%c0_187, %c0_188] : memref<256x64xf32, #tpu.memory_space<vmem>>, vector<256x64xf32>
    %307 = arith.truncf %306 : vector<256x64xf32> to vector<256x64xbf16>
    %cst_189 = arith.constant dense<0.000000e+00> : vector<16x64xf32>
    %308 = tpu.matmul %305, %307, %cst_189 {dimension_numbers = #tpu.dot_dimension_numbers<[1], [0], [0], [1], [0, 0, 1, 1], [], []>} : vector<16x256xbf16>, vector<256x64xbf16>, vector<16x64xf32> -> vector<16x64xf32>
    %c0_190 = arith.constant 0 : index
    %c0_191 = arith.constant 0 : index
    %309 = vector.load %arg15[%c0_190, %c0_191] : memref<1x64xf32, #tpu.memory_space<vmem>>, vector<1x64xf32>
    %310 = vector.broadcast %309 : vector<1x64xf32> to vector<16x64xf32>
    %311 = arith.addf %308, %310 : vector<16x64xf32>
    %312 = arith.addf %260, %311 : vector<16x64xf32>
    %313 = vector.shape_cast %312 : vector<16x64xf32> to vector<1x16x64xf32>
    %c0_192 = arith.constant 0 : index
    %c0_193 = arith.constant 0 : index
    %c0_194 = arith.constant 0 : index
    %314 = vector.load %arg16[%c0_192, %c0_193, %c0_194] : memref<1x16x64xf32, #tpu.memory_space<vmem>>, vector<1x16x64xf32>
    tpu.vector_store %arg16[%c0_192, %c0_193, %c0_194], %313 {strides = array<i32>} : memref<1x16x64xf32, #tpu.memory_space<vmem>>, vector<1x16x64xf32>,
    return
  }
  func.func @transform_0(%arg0: i32) -> (i32, i32, i32) {
    %c0_i32 = arith.constant 0 : i32
    %c0_i32_0 = arith.constant 0 : i32
    %c0_i32_1 = arith.constant 0 : i32
    return %arg0, %c0_i32, %c0_i32_0 : i32, i32, i32
  }
  func.func @transform_1(%arg0: i32) -> (i32, i32) {
    %c0_i32 = arith.constant 0 : i32
    %c0_i32_0 = arith.constant 0 : i32
    %c0_i32_1 = arith.constant 0 : i32
    return %c0_i32, %c0_i32_0 : i32, i32
  }
  func.func @transform_2(%arg0: i32) -> (i32, i32) {
    %c0_i32 = arith.constant 0 : i32
    %c0_i32_0 = arith.constant 0 : i32
    %c0_i32_1 = arith.constant 0 : i32
    return %c0_i32, %c0_i32_0 : i32, i32
  }
  func.func @transform_3(%arg0: i32) -> (i32, i32, i32, i32) {
    %c0_i32 = arith.constant 0 : i32
    %c0_i32_0 = arith.constant 0 : i32
    %c0_i32_1 = arith.constant 0 : i32
    %c0_i32_2 = arith.constant 0 : i32
    %c0_i32_3 = arith.constant 0 : i32
    return %c0_i32, %c0_i32_0, %c0_i32_1, %c0_i32_2 : i32, i32, i32, i32
  }
  func.func @transform_4(%arg0: i32) -> (i32, i32, i32, i32) {
    %c0_i32 = arith.constant 0 : i32
    %c0_i32_0 = arith.constant 0 : i32
    %c0_i32_1 = arith.constant 0 : i32
    %c0_i32_2 = arith.constant 0 : i32
    %c0_i32_3 = arith.constant 0 : i32
    return %c0_i32, %c0_i32_0, %c0_i32_1, %c0_i32_2 : i32, i32, i32, i32
  }
  func.func @transform_5(%arg0: i32) -> (i32, i32, i32) {
    %c0_i32 = arith.constant 0 : i32
    %c0_i32_0 = arith.constant 0 : i32
    %c0_i32_1 = arith.constant 0 : i32
    %c0_i32_2 = arith.constant 0 : i32
    return %c0_i32, %c0_i32_0, %c0_i32_1 : i32, i32, i32
  }
  func.func @transform_6(%arg0: i32) -> (i32, i32, i32) {
    %c0_i32 = arith.constant 0 : i32
    %c0_i32_0 = arith.constant 0 : i32
    %c0_i32_1 = arith.constant 0 : i32
    %c0_i32_2 = arith.constant 0 : i32
    return %c0_i32, %c0_i32_0, %c0_i32_1 : i32, i32, i32
  }
  func.func @transform_7(%arg0: i32) -> (i32, i32, i32) {
    %c0_i32 = arith.constant 0 : i32
    %c0_i32_0 = arith.constant 0 : i32
    %c0_i32_1 = arith.constant 0 : i32
    %c0_i32_2 = arith.constant 0 : i32
    return %c0_i32, %c0_i32_0, %c0_i32_1 : i32, i32, i32
  }
  func.func @transform_8(%arg0: i32) -> (i32, i32) {
    %c0_i32 = arith.constant 0 : i32
    %c0_i32_0 = arith.constant 0 : i32
    %c0_i32_1 = arith.constant 0 : i32
    return %c0_i32, %c0_i32_0 : i32, i32
  }
  func.func @transform_9(%arg0: i32) -> (i32, i32) {
    %c0_i32 = arith.constant 0 : i32
    %c0_i32_0 = arith.constant 0 : i32
    %c0_i32_1 = arith.constant 0 : i32
    return %c0_i32, %c0_i32_0 : i32, i32
  }
  func.func @transform_10(%arg0: i32) -> (i32, i32) {
    %c0_i32 = arith.constant 0 : i32
    %c0_i32_0 = arith.constant 0 : i32
    %c0_i32_1 = arith.constant 0 : i32
    return %c0_i32, %c0_i32_0 : i32, i32
  }
  func.func @transform_11(%arg0: i32) -> (i32, i32) {
    %c0_i32 = arith.constant 0 : i32
    %c0_i32_0 = arith.constant 0 : i32
    %c0_i32_1 = arith.constant 0 : i32
    return %c0_i32, %c0_i32_0 : i32, i32
  }
  func.func @transform_12(%arg0: i32) -> (i32, i32) {
    %c0_i32 = arith.constant 0 : i32
    %c0_i32_0 = arith.constant 0 : i32
    %c0_i32_1 = arith.constant 0 : i32
    return %c0_i32, %c0_i32_0 : i32, i32
  }
  func.func @transform_13(%arg0: i32) -> (i32, i32) {
    %c0_i32 = arith.constant 0 : i32
    %c0_i32_0 = arith.constant 0 : i32
    %c0_i32_1 = arith.constant 0 : i32
    return %c0_i32, %c0_i32_0 : i32, i32
  }
  func.func @transform_14(%arg0: i32) -> (i32, i32) {
    %c0_i32 = arith.constant 0 : i32
    %c0_i32_0 = arith.constant 0 : i32
    %c0_i32_1 = arith.constant 0 : i32
    return %c0_i32, %c0_i32_0 : i32, i32
  }
  func.func @transform_15(%arg0: i32) -> (i32, i32, i32) {
    %c0_i32 = arith.constant 0 : i32
    %c0_i32_0 = arith.constant 0 : i32
    %c0_i32_1 = arith.constant 0 : i32
    return %arg0, %c0_i32, %c0_i32_0 : i32, i32, i32
  }
}

module attributes {stable_mosaic.version = 11 : i64} {
  func.func @kernel(%arg0: memref<32x64xf32, #tpu.memory_space<vmem>>, %arg1: memref<1x64xf32, #tpu.memory_space<vmem>>, %arg2: memref<1x64xf32, #tpu.memory_space<vmem>>, %arg3: memref<9x64x256xf32, #tpu.memory_space<vmem>>, %arg4: memref<1x256xf32, #tpu.memory_space<vmem>>, %arg5: memref<9x32x1xf32, #tpu.memory_space<vmem>>, %arg6: memref<256x128xf32, #tpu.memory_space<vmem>>, %arg7: memref<1x128xf32, #tpu.memory_space<vmem>>, %arg8: memref<1024x16xf32, #tpu.memory_space<vmem>>, %arg9: memref<2x1024x128xf32, #tpu.memory_space<vmem>>, %arg10: memref<48x64xf32, #tpu.memory_space<vmem>>) attributes {dimension_semantics = [], scalar_prefetch = 0 : i64, scratch_operands = 1 : i64, tpu.core_type = #tpu.core_type<tc>} {
    %c0 = arith.constant 0 : index
    %c0_0 = arith.constant 0 : index
    %0 = vector.load %arg0[%c0, %c0_0] : memref<32x64xf32, #tpu.memory_space<vmem>>, vector<32x64xf32>
    %cst = arith.constant dense<0.000000e+00> : vector<32xf32>
    %1 = vector.multi_reduction <add>, %0, %cst [1] : vector<32x64xf32> to vector<32xf32>
    %2 = vector.shape_cast %1 : vector<32xf32> to vector<32x1xf32>
    %cst_1 = arith.constant 6.400000e+01 : f32
    %3 = vector.broadcast %cst_1 : f32 to vector<32x1xf32>
    %4 = arith.divf %2, %3 : vector<32x1xf32>
    %5 = vector.broadcast %4 : vector<32x1xf32> to vector<32x64xf32>
    %6 = arith.subf %0, %5 : vector<32x64xf32>
    %7 = arith.mulf %6, %6 : vector<32x64xf32>
    %cst_2 = arith.constant dense<0.000000e+00> : vector<32xf32>
    %8 = vector.multi_reduction <add>, %7, %cst_2 [1] : vector<32x64xf32> to vector<32xf32>
    %9 = vector.shape_cast %8 : vector<32xf32> to vector<32x1xf32>
    %cst_3 = arith.constant 6.400000e+01 : f32
    %10 = vector.broadcast %cst_3 : f32 to vector<32x1xf32>
    %11 = arith.divf %9, %10 : vector<32x1xf32>
    %12 = vector.broadcast %4 : vector<32x1xf32> to vector<32x64xf32>
    %13 = arith.subf %0, %12 : vector<32x64xf32>
    %cst_4 = arith.constant 9.99999974E-6 : f32
    %14 = vector.broadcast %cst_4 : f32 to vector<32x1xf32>
    %15 = arith.addf %11, %14 : vector<32x1xf32>
    %16 = math.rsqrt %15 : vector<32x1xf32>
    %17 = vector.broadcast %16 : vector<32x1xf32> to vector<32x64xf32>
    %18 = arith.mulf %13, %17 : vector<32x64xf32>
    %c0_5 = arith.constant 0 : index
    %c0_6 = arith.constant 0 : index
    %19 = vector.load %arg1[%c0_5, %c0_6] : memref<1x64xf32, #tpu.memory_space<vmem>>, vector<1x64xf32>
    %20 = vector.broadcast %19 : vector<1x64xf32> to vector<32x64xf32>
    %21 = arith.mulf %18, %20 : vector<32x64xf32>
    %c0_7 = arith.constant 0 : index
    %c0_8 = arith.constant 0 : index
    %22 = vector.load %arg2[%c0_7, %c0_8] : memref<1x64xf32, #tpu.memory_space<vmem>>, vector<1x64xf32>
    %23 = vector.broadcast %22 : vector<1x64xf32> to vector<32x64xf32>
    %24 = arith.addf %21, %23 : vector<32x64xf32>
    %cst_9 = arith.constant 0.000000e+00 : f32
    %25 = vector.broadcast %cst_9 : f32 to vector<48x64xf32>
    %c0_10 = arith.constant 0 : index
    %c0_11 = arith.constant 0 : index
    %26 = vector.load %arg10[%c0_10, %c0_11] : memref<48x64xf32, #tpu.memory_space<vmem>>, vector<48x64xf32>
    tpu.vector_store %arg10[%c0_10, %c0_11], %25 {strides = array<i32>} : memref<48x64xf32, #tpu.memory_space<vmem>>, vector<48x64xf32>,
    %c8 = arith.constant 8 : index
    %c0_12 = arith.constant 0 : index
    %27 = vector.load %arg10[%c8, %c0_12] : memref<48x64xf32, #tpu.memory_space<vmem>>, vector<32x64xf32>
    tpu.vector_store %arg10[%c8, %c0_12], %24 {strides = array<i32>} : memref<48x64xf32, #tpu.memory_space<vmem>>, vector<32x64xf32>,
    %cst_13 = arith.constant 0.000000e+00 : f32
    %28 = vector.broadcast %cst_13 : f32 to vector<32x256xf32>
    %c3 = arith.constant 3 : index
    %c0_14 = arith.constant 0 : index
    %29 = vector.load %arg10[%c3, %c0_14] : memref<48x64xf32, #tpu.memory_space<vmem>>, vector<32x64xf32>
    %c0_15 = arith.constant 0 : index
    %c0_16 = arith.constant 0 : index
    %c0_17 = arith.constant 0 : index
    %30 = vector.load %arg5[%c0_15, %c0_16, %c0_17] : memref<9x32x1xf32, #tpu.memory_space<vmem>>, vector<1x32x1xf32>
    %31 = vector.shape_cast %30 : vector<1x32x1xf32> to vector<32x1xf32>
    %32 = vector.broadcast %31 : vector<32x1xf32> to vector<32x64xf32>
    %33 = arith.mulf %29, %32 : vector<32x64xf32>
    %34 = arith.truncf %33 : vector<32x64xf32> to vector<32x64xbf16>
    %c0_18 = arith.constant 0 : index
    %c0_19 = arith.constant 0 : index
    %c0_20 = arith.constant 0 : index
    %35 = vector.load %arg3[%c0_18, %c0_19, %c0_20] : memref<9x64x256xf32, #tpu.memory_space<vmem>>, vector<1x64x256xf32>
    %36 = vector.shape_cast %35 : vector<1x64x256xf32> to vector<64x256xf32>
    %37 = arith.truncf %36 : vector<64x256xf32> to vector<64x256xbf16>
    %cst_21 = arith.constant dense<0.000000e+00> : vector<32x256xf32>
    %38 = tpu.matmul %34, %37, %cst_21 {dimension_numbers = #tpu.dot_dimension_numbers<[1], [0], [0], [1], [0, 0, 1, 1], [], []>} : vector<32x64xbf16>, vector<64x256xbf16>, vector<32x256xf32> -> vector<32x256xf32>
    %39 = arith.addf %28, %38 : vector<32x256xf32>
    %c4 = arith.constant 4 : index
    %c0_22 = arith.constant 0 : index
    %40 = vector.load %arg10[%c4, %c0_22] : memref<48x64xf32, #tpu.memory_space<vmem>>, vector<32x64xf32>
    %c1 = arith.constant 1 : index
    %c0_23 = arith.constant 0 : index
    %c0_24 = arith.constant 0 : index
    %41 = vector.load %arg5[%c1, %c0_23, %c0_24] : memref<9x32x1xf32, #tpu.memory_space<vmem>>, vector<1x32x1xf32>
    %42 = vector.shape_cast %41 : vector<1x32x1xf32> to vector<32x1xf32>
    %43 = vector.broadcast %42 : vector<32x1xf32> to vector<32x64xf32>
    %44 = arith.mulf %40, %43 : vector<32x64xf32>
    %45 = arith.truncf %44 : vector<32x64xf32> to vector<32x64xbf16>
    %c1_25 = arith.constant 1 : index
    %c0_26 = arith.constant 0 : index
    %c0_27 = arith.constant 0 : index
    %46 = vector.load %arg3[%c1_25, %c0_26, %c0_27] : memref<9x64x256xf32, #tpu.memory_space<vmem>>, vector<1x64x256xf32>
    %47 = vector.shape_cast %46 : vector<1x64x256xf32> to vector<64x256xf32>
    %48 = arith.truncf %47 : vector<64x256xf32> to vector<64x256xbf16>
    %cst_28 = arith.constant dense<0.000000e+00> : vector<32x256xf32>
    %49 = tpu.matmul %45, %48, %cst_28 {dimension_numbers = #tpu.dot_dimension_numbers<[1], [0], [0], [1], [0, 0, 1, 1], [], []>} : vector<32x64xbf16>, vector<64x256xbf16>, vector<32x256xf32> -> vector<32x256xf32>
    %50 = arith.addf %39, %49 : vector<32x256xf32>
    %c5 = arith.constant 5 : index
    %c0_29 = arith.constant 0 : index
    %51 = vector.load %arg10[%c5, %c0_29] : memref<48x64xf32, #tpu.memory_space<vmem>>, vector<32x64xf32>
    %c2 = arith.constant 2 : index
    %c0_30 = arith.constant 0 : index
    %c0_31 = arith.constant 0 : index
    %52 = vector.load %arg5[%c2, %c0_30, %c0_31] : memref<9x32x1xf32, #tpu.memory_space<vmem>>, vector<1x32x1xf32>
    %53 = vector.shape_cast %52 : vector<1x32x1xf32> to vector<32x1xf32>
    %54 = vector.broadcast %53 : vector<32x1xf32> to vector<32x64xf32>
    %55 = arith.mulf %51, %54 : vector<32x64xf32>
    %56 = arith.truncf %55 : vector<32x64xf32> to vector<32x64xbf16>
    %c2_32 = arith.constant 2 : index
    %c0_33 = arith.constant 0 : index
    %c0_34 = arith.constant 0 : index
    %57 = vector.load %arg3[%c2_32, %c0_33, %c0_34] : memref<9x64x256xf32, #tpu.memory_space<vmem>>, vector<1x64x256xf32>
    %58 = vector.shape_cast %57 : vector<1x64x256xf32> to vector<64x256xf32>
    %59 = arith.truncf %58 : vector<64x256xf32> to vector<64x256xbf16>
    %cst_35 = arith.constant dense<0.000000e+00> : vector<32x256xf32>
    %60 = tpu.matmul %56, %59, %cst_35 {dimension_numbers = #tpu.dot_dimension_numbers<[1], [0], [0], [1], [0, 0, 1, 1], [], []>} : vector<32x64xbf16>, vector<64x256xbf16>, vector<32x256xf32> -> vector<32x256xf32>
    %61 = arith.addf %50, %60 : vector<32x256xf32>
    %c7 = arith.constant 7 : index
    %c0_36 = arith.constant 0 : index
    %62 = vector.load %arg10[%c7, %c0_36] : memref<48x64xf32, #tpu.memory_space<vmem>>, vector<32x64xf32>
    %c3_37 = arith.constant 3 : index
    %c0_38 = arith.constant 0 : index
    %c0_39 = arith.constant 0 : index
    %63 = vector.load %arg5[%c3_37, %c0_38, %c0_39] : memref<9x32x1xf32, #tpu.memory_space<vmem>>, vector<1x32x1xf32>
    %64 = vector.shape_cast %63 : vector<1x32x1xf32> to vector<32x1xf32>
    %65 = vector.broadcast %64 : vector<32x1xf32> to vector<32x64xf32>
    %66 = arith.mulf %62, %65 : vector<32x64xf32>
    %67 = arith.truncf %66 : vector<32x64xf32> to vector<32x64xbf16>
    %c3_40 = arith.constant 3 : index
    %c0_41 = arith.constant 0 : index
    %c0_42 = arith.constant 0 : index
    %68 = vector.load %arg3[%c3_40, %c0_41, %c0_42] : memref<9x64x256xf32, #tpu.memory_space<vmem>>, vector<1x64x256xf32>
    %69 = vector.shape_cast %68 : vector<1x64x256xf32> to vector<64x256xf32>
    %70 = arith.truncf %69 : vector<64x256xf32> to vector<64x256xbf16>
    %cst_43 = arith.constant dense<0.000000e+00> : vector<32x256xf32>
    %71 = tpu.matmul %67, %70, %cst_43 {dimension_numbers = #tpu.dot_dimension_numbers<[1], [0], [0], [1], [0, 0, 1, 1], [], []>} : vector<32x64xbf16>, vector<64x256xbf16>, vector<32x256xf32> -> vector<32x256xf32>
    %72 = arith.addf %61, %71 : vector<32x256xf32>
    %c8_44 = arith.constant 8 : index
    %c0_45 = arith.constant 0 : index
    %73 = vector.load %arg10[%c8_44, %c0_45] : memref<48x64xf32, #tpu.memory_space<vmem>>, vector<32x64xf32>
    %c4_46 = arith.constant 4 : index
    %c0_47 = arith.constant 0 : index
    %c0_48 = arith.constant 0 : index
    %74 = vector.load %arg5[%c4_46, %c0_47, %c0_48] : memref<9x32x1xf32, #tpu.memory_space<vmem>>, vector<1x32x1xf32>
    %75 = vector.shape_cast %74 : vector<1x32x1xf32> to vector<32x1xf32>
    %76 = vector.broadcast %75 : vector<32x1xf32> to vector<32x64xf32>
    %77 = arith.mulf %73, %76 : vector<32x64xf32>
    %78 = arith.truncf %77 : vector<32x64xf32> to vector<32x64xbf16>
    %c4_49 = arith.constant 4 : index
    %c0_50 = arith.constant 0 : index
    %c0_51 = arith.constant 0 : index
    %79 = vector.load %arg3[%c4_49, %c0_50, %c0_51] : memref<9x64x256xf32, #tpu.memory_space<vmem>>, vector<1x64x256xf32>
    %80 = vector.shape_cast %79 : vector<1x64x256xf32> to vector<64x256xf32>
    %81 = arith.truncf %80 : vector<64x256xf32> to vector<64x256xbf16>
    %cst_52 = arith.constant dense<0.000000e+00> : vector<32x256xf32>
    %82 = tpu.matmul %78, %81, %cst_52 {dimension_numbers = #tpu.dot_dimension_numbers<[1], [0], [0], [1], [0, 0, 1, 1], [], []>} : vector<32x64xbf16>, vector<64x256xbf16>, vector<32x256xf32> -> vector<32x256xf32>
    %83 = arith.addf %72, %82 : vector<32x256xf32>
    %c9 = arith.constant 9 : index
    %c0_53 = arith.constant 0 : index
    %84 = vector.load %arg10[%c9, %c0_53] : memref<48x64xf32, #tpu.memory_space<vmem>>, vector<32x64xf32>
    %c5_54 = arith.constant 5 : index
    %c0_55 = arith.constant 0 : index
    %c0_56 = arith.constant 0 : index
    %85 = vector.load %arg5[%c5_54, %c0_55, %c0_56] : memref<9x32x1xf32, #tpu.memory_space<vmem>>, vector<1x32x1xf32>
    %86 = vector.shape_cast %85 : vector<1x32x1xf32> to vector<32x1xf32>
    %87 = vector.broadcast %86 : vector<32x1xf32> to vector<32x64xf32>
    %88 = arith.mulf %84, %87 : vector<32x64xf32>
    %89 = arith.truncf %88 : vector<32x64xf32> to vector<32x64xbf16>
    %c5_57 = arith.constant 5 : index
    %c0_58 = arith.constant 0 : index
    %c0_59 = arith.constant 0 : index
    %90 = vector.load %arg3[%c5_57, %c0_58, %c0_59] : memref<9x64x256xf32, #tpu.memory_space<vmem>>, vector<1x64x256xf32>
    %91 = vector.shape_cast %90 : vector<1x64x256xf32> to vector<64x256xf32>
    %92 = arith.truncf %91 : vector<64x256xf32> to vector<64x256xbf16>
    %cst_60 = arith.constant dense<0.000000e+00> : vector<32x256xf32>
    %93 = tpu.matmul %89, %92, %cst_60 {dimension_numbers = #tpu.dot_dimension_numbers<[1], [0], [0], [1], [0, 0, 1, 1], [], []>} : vector<32x64xbf16>, vector<64x256xbf16>, vector<32x256xf32> -> vector<32x256xf32>
    %94 = arith.addf %83, %93 : vector<32x256xf32>
    %c11 = arith.constant 11 : index
    %c0_61 = arith.constant 0 : index
    %95 = vector.load %arg10[%c11, %c0_61] : memref<48x64xf32, #tpu.memory_space<vmem>>, vector<32x64xf32>
    %c6 = arith.constant 6 : index
    %c0_62 = arith.constant 0 : index
    %c0_63 = arith.constant 0 : index
    %96 = vector.load %arg5[%c6, %c0_62, %c0_63] : memref<9x32x1xf32, #tpu.memory_space<vmem>>, vector<1x32x1xf32>
    %97 = vector.shape_cast %96 : vector<1x32x1xf32> to vector<32x1xf32>
    %98 = vector.broadcast %97 : vector<32x1xf32> to vector<32x64xf32>
    %99 = arith.mulf %95, %98 : vector<32x64xf32>
    %100 = arith.truncf %99 : vector<32x64xf32> to vector<32x64xbf16>
    %c6_64 = arith.constant 6 : index
    %c0_65 = arith.constant 0 : index
    %c0_66 = arith.constant 0 : index
    %101 = vector.load %arg3[%c6_64, %c0_65, %c0_66] : memref<9x64x256xf32, #tpu.memory_space<vmem>>, vector<1x64x256xf32>
    %102 = vector.shape_cast %101 : vector<1x64x256xf32> to vector<64x256xf32>
    %103 = arith.truncf %102 : vector<64x256xf32> to vector<64x256xbf16>
    %cst_67 = arith.constant dense<0.000000e+00> : vector<32x256xf32>
    %104 = tpu.matmul %100, %103, %cst_67 {dimension_numbers = #tpu.dot_dimension_numbers<[1], [0], [0], [1], [0, 0, 1, 1], [], []>} : vector<32x64xbf16>, vector<64x256xbf16>, vector<32x256xf32> -> vector<32x256xf32>
    %105 = arith.addf %94, %104 : vector<32x256xf32>
    %c12 = arith.constant 12 : index
    %c0_68 = arith.constant 0 : index
    %106 = vector.load %arg10[%c12, %c0_68] : memref<48x64xf32, #tpu.memory_space<vmem>>, vector<32x64xf32>
    %c7_69 = arith.constant 7 : index
    %c0_70 = arith.constant 0 : index
    %c0_71 = arith.constant 0 : index
    %107 = vector.load %arg5[%c7_69, %c0_70, %c0_71] : memref<9x32x1xf32, #tpu.memory_space<vmem>>, vector<1x32x1xf32>
    %108 = vector.shape_cast %107 : vector<1x32x1xf32> to vector<32x1xf32>
    %109 = vector.broadcast %108 : vector<32x1xf32> to vector<32x64xf32>
    %110 = arith.mulf %106, %109 : vector<32x64xf32>
    %111 = arith.truncf %110 : vector<32x64xf32> to vector<32x64xbf16>
    %c7_72 = arith.constant 7 : index
    %c0_73 = arith.constant 0 : index
    %c0_74 = arith.constant 0 : index
    %112 = vector.load %arg3[%c7_72, %c0_73, %c0_74] : memref<9x64x256xf32, #tpu.memory_space<vmem>>, vector<1x64x256xf32>
    %113 = vector.shape_cast %112 : vector<1x64x256xf32> to vector<64x256xf32>
    %114 = arith.truncf %113 : vector<64x256xf32> to vector<64x256xbf16>
    %cst_75 = arith.constant dense<0.000000e+00> : vector<32x256xf32>
    %115 = tpu.matmul %111, %114, %cst_75 {dimension_numbers = #tpu.dot_dimension_numbers<[1], [0], [0], [1], [0, 0, 1, 1], [], []>} : vector<32x64xbf16>, vector<64x256xbf16>, vector<32x256xf32> -> vector<32x256xf32>
    %116 = arith.addf %105, %115 : vector<32x256xf32>
    %c13 = arith.constant 13 : index
    %c0_76 = arith.constant 0 : index
    %117 = vector.load %arg10[%c13, %c0_76] : memref<48x64xf32, #tpu.memory_space<vmem>>, vector<32x64xf32>
    %c8_77 = arith.constant 8 : index
    %c0_78 = arith.constant 0 : index
    %c0_79 = arith.constant 0 : index
    %118 = vector.load %arg5[%c8_77, %c0_78, %c0_79] : memref<9x32x1xf32, #tpu.memory_space<vmem>>, vector<1x32x1xf32>
    %119 = vector.shape_cast %118 : vector<1x32x1xf32> to vector<32x1xf32>
    %120 = vector.broadcast %119 : vector<32x1xf32> to vector<32x64xf32>
    %121 = arith.mulf %117, %120 : vector<32x64xf32>
    %122 = arith.truncf %121 : vector<32x64xf32> to vector<32x64xbf16>
    %c8_80 = arith.constant 8 : index
    %c0_81 = arith.constant 0 : index
    %c0_82 = arith.constant 0 : index
    %123 = vector.load %arg3[%c8_80, %c0_81, %c0_82] : memref<9x64x256xf32, #tpu.memory_space<vmem>>, vector<1x64x256xf32>
    %124 = vector.shape_cast %123 : vector<1x64x256xf32> to vector<64x256xf32>
    %125 = arith.truncf %124 : vector<64x256xf32> to vector<64x256xbf16>
    %cst_83 = arith.constant dense<0.000000e+00> : vector<32x256xf32>
    %126 = tpu.matmul %122, %125, %cst_83 {dimension_numbers = #tpu.dot_dimension_numbers<[1], [0], [0], [1], [0, 0, 1, 1], [], []>} : vector<32x64xbf16>, vector<64x256xbf16>, vector<32x256xf32> -> vector<32x256xf32>
    %127 = arith.addf %116, %126 : vector<32x256xf32>
    %c0_84 = arith.constant 0 : index
    %c0_85 = arith.constant 0 : index
    %128 = vector.load %arg4[%c0_84, %c0_85] : memref<1x256xf32, #tpu.memory_space<vmem>>, vector<1x256xf32>
    %129 = vector.broadcast %128 : vector<1x256xf32> to vector<32x256xf32>
    %130 = arith.addf %127, %129 : vector<32x256xf32>
    %cst_86 = arith.constant 0.000000e+00 : f32
    %131 = vector.broadcast %cst_86 : f32 to vector<32x256xf32>
    %132 = arith.maximumf %130, %131 : vector<32x256xf32>
    %133 = arith.truncf %132 : vector<32x256xf32> to vector<32x256xbf16>
    %c0_87 = arith.constant 0 : index
    %c0_88 = arith.constant 0 : index
    %134 = vector.load %arg6[%c0_87, %c0_88] : memref<256x128xf32, #tpu.memory_space<vmem>>, vector<256x128xf32>
    %135 = arith.truncf %134 : vector<256x128xf32> to vector<256x128xbf16>
    %cst_89 = arith.constant dense<0.000000e+00> : vector<32x128xf32>
    %136 = tpu.matmul %133, %135, %cst_89 {dimension_numbers = #tpu.dot_dimension_numbers<[1], [0], [0], [1], [0, 0, 1, 1], [], []>} : vector<32x256xbf16>, vector<256x128xbf16>, vector<32x128xf32> -> vector<32x128xf32>
    %c0_90 = arith.constant 0 : index
    %c0_91 = arith.constant 0 : index
    %137 = vector.load %arg7[%c0_90, %c0_91] : memref<1x128xf32, #tpu.memory_space<vmem>>, vector<1x128xf32>
    %138 = vector.broadcast %137 : vector<1x128xf32> to vector<32x128xf32>
    %139 = arith.addf %136, %138 : vector<32x128xf32>
    %c0_92 = arith.constant 0 : index
    %c0_93 = arith.constant 0 : index
    %140 = vector.load %arg8[%c0_92, %c0_93] : memref<1024x16xf32, #tpu.memory_space<vmem>>, vector<1024x16xf32>
    %141 = vector.extract_strided_slice %139 {offsets = [0, 0], sizes = [16, 128], strides = [1, 1]} : vector<32x128xf32> to vector<16x128xf32>
    %cst_94 = arith.constant dense<0.000000e+00> : vector<1024x128xf32>
    %142 = tpu.matmul %140, %141, %cst_94 {dimension_numbers = #tpu.dot_dimension_numbers<[1], [0], [0], [1], [0, 0, 1, 1], [], []>} : vector<1024x16xf32>, vector<16x128xf32>, vector<1024x128xf32> -> vector<1024x128xf32>
    %c0_95 = arith.constant 0 : index
    %c0_96 = arith.constant 0 : index
    %c0_97 = arith.constant 0 : index
    %143 = vector.load %arg9[%c0_95, %c0_96, %c0_97] : memref<2x1024x128xf32, #tpu.memory_space<vmem>>, vector<1x1024x128xf32>
    %144 = vector.shape_cast %143 : vector<1x1024x128xf32> to vector<1024x128xf32>
    %145 = vector.shape_cast %142 : vector<1024x128xf32> to vector<1x1024x128xf32>
    tpu.vector_store %arg9[%c0_95, %c0_96, %c0_97], %145 {strides = array<i32>} : memref<2x1024x128xf32, #tpu.memory_space<vmem>>, vector<1x1024x128xf32>,
    %146 = vector.extract_strided_slice %139 {offsets = [16, 0], sizes = [16, 128], strides = [1, 1]} : vector<32x128xf32> to vector<16x128xf32>
    %cst_98 = arith.constant dense<0.000000e+00> : vector<1024x128xf32>
    %147 = tpu.matmul %140, %146, %cst_98 {dimension_numbers = #tpu.dot_dimension_numbers<[1], [0], [0], [1], [0, 0, 1, 1], [], []>} : vector<1024x16xf32>, vector<16x128xf32>, vector<1024x128xf32> -> vector<1024x128xf32>
    %c1_99 = arith.constant 1 : index
    %c0_100 = arith.constant 0 : index
    %c0_101 = arith.constant 0 : index
    %148 = vector.load %arg9[%c1_99, %c0_100, %c0_101] : memref<2x1024x128xf32, #tpu.memory_space<vmem>>, vector<1x1024x128xf32>
    %149 = vector.shape_cast %148 : vector<1x1024x128xf32> to vector<1024x128xf32>
    %150 = vector.shape_cast %147 : vector<1024x128xf32> to vector<1x1024x128xf32>
    tpu.vector_store %arg9[%c1_99, %c0_100, %c0_101], %150 {strides = array<i32>} : memref<2x1024x128xf32, #tpu.memory_space<vmem>>, vector<1x1024x128xf32>,
    return
  }
}

</mosaic_0001>

<bundles_post_ra>
// kernel: _lambda_.7
= control target key start
LH: loop header
LB: loop body
LE: loop exit
PB: predicated region body
PF: predicated region fallthrough
CT: control target
= control target key end

     0   :  { %vm61_vm0 = vcmask 392192   ;;  %vm183_vm1 = vcmask 261120   ;;  %s930_s1 = inlined_call_operand.vmem [shape: f32[48,32], index: 1, kind: input, shape index: {}]   ;;  %s931_s0 = inlined_call_operand.vmem [shape: f32[128,48], index: 0, kind: input, shape index: {}]   ;;  %s932_s2 = inlined_call_operand.vmem [shape: f32[1,32], index: 2, kind: input, shape index: {}, may-alias: {2,4}]   ;;  %s933_s3 = inlined_call_operand.vmem [shape: f32[1,32], index: 3, kind: input, shape index: {}]   ;;  %s934_s4 = inlined_call_operand.vmem [shape: f32[1,32], index: 4, kind: input, shape index: {}, may-alias: {2,4}]   ;;  %s935_s5 = inlined_call_operand.vmem [shape: f32[128,32], index: 5, kind: output, shape index: {}]  }
   0x1   :  { %v45_v0 = vld [vmem:[%s930_s1] sm:$0xff]  ;;  %v46_v1 = vld [vmem:[%s930_s1 + $0x8] sm:$0xff]  ;;  %v47_v2 = vld [vmem:[%s930_s1 + $0x10] sm:$0xff] }
   0x2   :  { %v51_v3 = vpack.c.bf16 %v46_v1, %v45_v0  ;;  %v48_v4 = vld [vmem:[%s930_s1 + $0x18] sm:$0xff]  ;;  %v49_v5 = vld [vmem:[%s930_s1 + $0x20] sm:$0xff]  ;;  %v50_v6 = vld [vmem:[%s930_s1 + $0x28] sm:$0xff] }
   0x3   :  { %v52_v7 = vpack.c.bf16 %v48_v4, %v47_v2  ;;  %v21_v8 = vld [vmem:[%s931_s0] sm:$0xff]  ;;  %v22_v9 = vld [vmem:[%s931_s0 + $0x8] sm:$0xff]  ;;  %v53_v14 = vpack.c.bf16 %v50_v6, %v49_v5  ;;  %v23_v15 = vld [vmem:[%s931_s0 + $0x10] sm:$0xff] }
   0x4   :  { %v29_v10 = vld [vmem:[%s931_s0 + $0x40] sm:$0xff]  ;;  %481 = vmatprep.subr.bf16.mxu0 %v51_v3  ;;  %503 = vmatprep.subr.bf16.mxu1 %v51_v3  ;;  %v37_v11 = vpack.c.bf16 %v22_v9, %v21_v8  ;;  %v30_v12 = vld [vmem:[%s931_s0 + $0x48] sm:$0xff]  ;;  %v24_v16 = vld [vmem:[%s931_s0 + $0x18] sm:$0xff] }
   0x5   :  { %482 = vmatpush3.bf16.msra.mxu0 %v51_v3  ;;  %506 = vmatpush3.bf16.msra.mxu1 %v51_v3  ;;  %v41_v13 = vpack.c.bf16 %v30_v12, %v29_v10  ;;  %v31_v17 = vld [vmem:[%s931_s0 + $0x50] sm:$0xff]  ;;  %v32_v18 = vld [vmem:[%s931_s0 + $0x58] sm:$0xff]  ;;  %v25_v19 = vld [vmem:[%s931_s0 + $0x20] sm:$0xff]  ;;  %v38_v23 = vpack.c.bf16 %v24_v16, %v23_v15 }
   0x6   :  { %483 = vmatprep.subr.bf16.mxu0 %v52_v7  ;;  %504 = vmatprep.subr.bf16.mxu1 %v52_v7  ;;  %v26_v20 = vld [vmem:[%s931_s0 + $0x28] sm:$0xff]  ;;  %v33_v21 = vld [vmem:[%s931_s0 + $0x60] sm:$0xff]  ;;  %v42_v24 = vpack.c.bf16 %v32_v18, %v31_v17  ;;  %v27_v27 = vld [vmem:[%s931_s0 + $0x30] sm:$0xff] }
   0x7   :  { %487 = vmatprep.mubr.msk.bf16.mxu0 %vm61_vm0, %v37_v11  ;;  %495 = vmatprep.mubr.msk.bf16.mxu1 %vm61_vm0, %v41_v13  ;;  %v34_v22 = vld [vmem:[%s931_s0 + $0x68] sm:$0xff]  ;;  %v39_v25 = vpack.c.bf16 %v26_v20, %v25_v19  ;;  %v28_v28 = vld [vmem:[%s931_s0 + $0x38] sm:$0xff]  ;;  %v35_v29 = vld [vmem:[%s931_s0 + $0x70] sm:$0xff] }
   0x8   :  { %v43_v26 = vpack.c.bf16 %v34_v22, %v33_v21  ;;  %v36_v30 = vld [vmem:[%s931_s0 + $0x78] sm:$0xff]  ;;  %v40_v31 = vpack.c.bf16 %v28_v28, %v27_v27  ;;  %v459_v33 = vld [vmem:[%s932_s2] ss:$0 sm:$0xff] }
   0x9   :  { %484 = vmatpush3.bf16.msra.mxu0 %v52_v7  ;;  %507 = vmatpush3.bf16.msra.mxu1 %v52_v7  ;;  %v44_v32 = vpack.c.bf16 %v36_v30, %v35_v29 }
   0xa   :  { %485 = vmatprep.subr.bf16.mxu0 %v53_v14  ;;  %505 = vmatprep.subr.bf16.mxu1 %v53_v14 }
   0xd   :  { %486 = vmatpush3.bf16.msra.mxu0 %v53_v14  ;;  %508 = vmatpush3.bf16.msra.mxu1 %v53_v14 }
  0x10   :  { %488 = vmatmul.mubr.msk.bf16.vlgmr.msra.gmra.mrb[0].mxu0 %vm61_vm0, %v38_v23  ;;  %496 = vmatmul.mubr.msk.bf16.vlgmr.msra.gmra.mrb[0].mxu1 %vm61_vm0, %v42_v24 }
  0x11   :  { %491 = vmatprep.mubr.msk.bf16.mxu0 %vm61_vm0, %v39_v25  ;;  %499 = vmatprep.mubr.msk.bf16.mxu1 %vm61_vm0, %v43_v26 }
  0x18   :  { %492 = vmatmul.mubr.msk.bf16.gmra.mrb[4].mxu0 %vm61_vm0, %v40_v31  ;;  %500 = vmatmul.mubr.msk.bf16.gmra.mrb[4].mxu1 %vm61_vm0, %v44_v32 }
  0xe3   :  { %v489_v34 = vpop.f32.mrb[0].mxu0  ;;  %v497_v35 = vpop.f32.mrb[0].mxu1 }
  0xe4   :  { %v648_v36 = vadd.f32 %v489_v34, %v459_v33  ;;  %v650_v37 = vadd.f32 %v497_v35, %v459_v33  ;;  %v120_v38 = vpop.f32.mrb[1].mxu0  ;;  %v152_v39 = vpop.f32.mrb[1].mxu1 }
  0xe5   :  { %v490_v40 = vpop.f32.mrb[2].mxu0  ;;  %v498_v41 = vpop.f32.mrb[2].mxu1  ;;  %v652_v42 = vadd.f32 %v459_v33, %v120_v38  ;;  %v660_v48 = vadd.f32 %v459_v33, %v152_v39 }
  0xe6   :  { %v654_v43 = vadd.f32 %v490_v40, %v459_v33  ;;  %v123_v44 = vpop.f32.mrb[3].mxu0  ;;  %v155_v45 = vpop.f32.mrb[3].mxu1  ;;  %v214_v46 = vsel %vm183_vm1, %v650_v37, 0.0  ;;  %v190_v47 = vsel %vm183_vm1, %v648_v36, 0.0  ;;  %v662_v49 = vadd.f32 %v498_v41, %v459_v33 }
  0xe7   :  { %215 = vadd.xlane.f32.xlu0 %v214_v46  ;;  %191 = vadd.xlane.f32.xlu1 %v190_v47  ;;  %v184_v51 = vsel %vm183_vm1, %v652_v42, 0.0  ;;  %v668_v58 = vadd.f32 %v459_v33, %v123_v44  ;;  %v670_v59 = vadd.f32 %v459_v33, %v155_v45  ;;  %v208_v61 = vsel %vm183_vm1, %v660_v48, 0.0 }
  0xe8   :  { %v193_v50 = vsel %vm183_vm1, %v654_v43, 0.0  ;;  %v217_v60 = vsel %vm183_vm1, %v662_v49, 0.0 }
  0xe9   :  { %v211_v2 = vsel %vm183_vm1, %v670_v59, 0.0  ;;  %v187_v3 = vsel %vm183_vm1, %v668_v58, 0.0 }
  0xeb   :  { %194 = vadd.xlane.f32.xlu1 %v193_v50  ;;  %185 = vadd.xlane.f32.xlu0 %v184_v51  ;;  %v493_v52 = vpop.f32.mrb[4].mxu0  ;;  %v501_v53 = vpop.f32.mrb[4].mxu1 }
  0xec   :  { %v136_v54 = vpop.f32.mrb[5].mxu0  ;;  %v168_v55 = vpop.f32.mrb[5].mxu1  ;;  %v676_v0 = vadd.f32 %v493_v52, %v459_v33  ;;  %v704_v14 = vadd.f32 %v501_v53, %v459_v33 }
  0xed   :  { %v494_v56 = vpop.f32.mrb[6].mxu0  ;;  %v502_v57 = vpop.f32.mrb[6].mxu1  ;;  %v688_v6 = vadd.f32 %v459_v33, %v136_v54  ;;  %v692_v8 = vadd.f32 %v459_v33, %v168_v55 }
  0xee   :  { %v139_v62 = vpop.f32.mrb[7].mxu0  ;;  %v171_v63 = vpop.f32.mrb[7].mxu1  ;;  %v678_v1 = vadd.f32 %v494_v56, %v459_v33  ;;  %v202_v5 = vsel %vm183_vm1, %v676_v0, 0.0  ;;  %v706_v15 = vadd.f32 %v502_v57, %v459_v33  ;;  %v226_v17 = vsel %vm183_vm1, %v704_v14, 0.0 }
  0xef   :  { %218 = vadd.xlane.f32.xlu1 %v217_v60  ;;  %209 = vadd.xlane.f32.xlu0 %v208_v61  ;;  %v690_v7 = vadd.f32 %v459_v33, %v139_v62  ;;  %v694_v9 = vadd.f32 %v459_v33, %v171_v63  ;;  %v196_v11 = vsel %vm183_vm1, %v688_v6, 0.0  ;;  %v220_v13 = vsel %vm183_vm1, %v692_v8, 0.0 }
  0xf0   :  { %v205_v4 = vsel %vm183_vm1, %v678_v1, 0.0  ;;  %v229_v16 = vsel %vm183_vm1, %v706_v15, 0.0 }
  0xf1   :  { %v199_v10 = vsel %vm183_vm1, %v690_v7, 0.0  ;;  %v223_v12 = vsel %vm183_vm1, %v694_v9, 0.0 }
  0xf3   :  { %212 = vadd.xlane.f32.xlu1 %v211_v2  ;;  %188 = vadd.xlane.f32.xlu0 %v187_v3 }
  0xf7   :  { %206 = vadd.xlane.f32.xlu1 %v205_v4  ;;  %203 = vadd.xlane.f32.xlu0 %v202_v5 }
  0xfb   :  { %200 = vadd.xlane.f32.xlu1 %v199_v10  ;;  %197 = vadd.xlane.f32.xlu0 %v196_v11 }
  0xff   :  { %224 = vadd.xlane.f32.xlu1 %v223_v12  ;;  %221 = vadd.xlane.f32.xlu0 %v220_v13 }
 0x103   :  { %230 = vadd.xlane.f32.xlu1 %v229_v16  ;;  %227 = vadd.xlane.f32.xlu0 %v226_v17 }
 0x174   :  { %v216_v18 = vpop.xlane.xlu0 %215  ;;  %v192_v19 = vpop.xlane.xlu1 %191 }
 0x175   :  { %v243_v20 = vmul.f32 0.03125, %v216_v18  ;;  %v235_v21 = vmul.f32 0.03125, %v192_v19 }
 0x177   :  { %v713_v22 = vsub.f32 %v650_v37, %v243_v20  ;;  %v716_v23 = vsub.f32 %v648_v36, %v235_v21 }
 0x178   :  { %v195_v24 = vpop.xlane.xlu1 %194  ;;  %v186_v25 = vpop.xlane.xlu0 %185 }
 0x179   :  { %v236_v26 = vmul.f32 0.03125, %v195_v24  ;;  %v233_v27 = vmul.f32 0.03125, %v186_v25  ;;  %v267_v28 = vmul.f32 %v716_v23, %v716_v23  ;;  %v275_v32 = vmul.f32 %v713_v22, %v713_v22 }
 0x17b   :  { %v721_v29 = vsub.f32 %v654_v43, %v236_v26  ;;  %v724_v30 = vsub.f32 %v652_v42, %v233_v27  ;;  %v287_v31 = vsel %vm183_vm1, %v267_v28, 0.0  ;;  %v311_v42 = vsel %vm183_vm1, %v275_v32, 0.0 }
 0x17c   :  { %v219_v33 = vpop.xlane.xlu1 %218  ;;  %288 = vadd.xlane.f32.xlu0 %v287_v31  ;;  %v210_v34 = vpop.xlane.xlu0 %209 }
 0x17d   :  { %v244_v35 = vmul.f32 0.03125, %v219_v33  ;;  %v241_v36 = vmul.f32 0.03125, %v210_v34  ;;  %v268_v37 = vmul.f32 %v721_v29, %v721_v29  ;;  %v265_v38 = vmul.f32 %v724_v30, %v724_v30 }
 0x17f   :  { %v734_v39 = vsub.f32 %v662_v49, %v244_v35  ;;  %v737_v40 = vsub.f32 %v660_v48, %v241_v36  ;;  %v290_v41 = vsel %vm183_vm1, %v268_v37, 0.0  ;;  %v281_v50 = vsel %vm183_vm1, %v265_v38, 0.0 }
 0x180   :  { %v213_v43 = vpop.xlane.xlu1 %212  ;;  %291 = vadd.xlane.f32.xlu1 %v290_v41  ;;  %312 = vadd.xlane.f32.xlu0 %v311_v42  ;;  %v189_v44 = vpop.xlane.xlu0 %188 }
 0x181   :  { %v242_v45 = vmul.f32 0.03125, %v213_v43  ;;  %v234_v46 = vmul.f32 0.03125, %v189_v44  ;;  %v276_v47 = vmul.f32 %v734_v39, %v734_v39  ;;  %v273_v52 = vmul.f32 %v737_v40, %v737_v40 }
 0x183   :  { %v745_v49 = vsub.f32 %v670_v59, %v242_v45  ;;  %v748_v48 = vsub.f32 %v668_v58, %v234_v46  ;;  %v314_v51 = vsel %vm183_vm1, %v276_v47, 0.0  ;;  %v305_v61 = vsel %vm183_vm1, %v273_v52, 0.0 }
 0x184   :  { %v207_v53 = vpop.xlane.xlu1 %206  ;;  %315 = vadd.xlane.f32.xlu1 %v314_v51  ;;  %282 = vadd.xlane.f32.xlu0 %v281_v50  ;;  %v204_v54 = vpop.xlane.xlu0 %203 }
 0x185   :  { %v240_v55 = vmul.f32 0.03125, %v207_v53  ;;  %v239_v56 = vmul.f32 0.03125, %v204_v54  ;;  %v266_v57 = vmul.f32 %v748_v48, %v748_v48  ;;  %v274_v59 = vmul.f32 %v745_v49, %v745_v49 }
 0x187   :  { %v758_v58 = vsub.f32 %v678_v1, %v240_v55  ;;  %v761_v60 = vsub.f32 %v676_v0, %v239_v56  ;;  %v284_v62 = vsel %vm183_vm1, %v266_v57, 0.0  ;;  %v308_v10 = vsel %vm183_vm1, %v274_v59, 0.0 }
 0x188   :  { %v201_v63 = vpop.xlane.xlu1 %200  ;;  %306 = vadd.xlane.f32.xlu0 %v305_v61  ;;  %285 = vadd.xlane.f32.xlu1 %v284_v62  ;;  %v198_v2 = vpop.xlane.xlu0 %197 }
 0x189   :  { %v238_v3 = vmul.f32 0.03125, %v201_v63  ;;  %v237_v4 = vmul.f32 0.03125, %v198_v2  ;;  %v271_v5 = vmul.f32 %v761_v60, %v761_v60  ;;  %v272_v12 = vmul.f32 %v758_v58, %v758_v58  ;;  %v811_v2 = vld [vmem:[%s933_s3] ss:$0 sm:$0xff] }
 0x18b   :  { %v769_v1 = vsub.f32 %v690_v7, %v238_v3  ;;  %v772_v0 = vsub.f32 %v688_v6, %v237_v4  ;;  %v299_v11 = vsel %vm183_vm1, %v271_v5, 0.0  ;;  %v302_v21 = vsel %vm183_vm1, %v272_v12, 0.0  ;;  %v817_v12 = vld [vmem:[%s934_s4] ss:$0 sm:$0xff] }
 0x18c   :  { %v225_v13 = vpop.xlane.xlu1 %224  ;;  %309 = vadd.xlane.f32.xlu1 %v308_v10  ;;  %300 = vadd.xlane.f32.xlu0 %v299_v11  ;;  %v222_v16 = vpop.xlane.xlu0 %221 }
 0x18d   :  { %v246_v17 = vmul.f32 0.03125, %v225_v13  ;;  %v245_v18 = vmul.f32 0.03125, %v222_v16  ;;  %v269_v19 = vmul.f32 %v772_v0, %v772_v0  ;;  %v270_v7 = vmul.f32 %v769_v1, %v769_v1 }
 0x18f   :  { %v782_v6 = vsub.f32 %v694_v9, %v246_v17  ;;  %v785_v20 = vsub.f32 %v692_v8, %v245_v18  ;;  %v293_v24 = vsel %vm183_vm1, %v269_v19, 0.0  ;;  %v296_v32 = vsel %vm183_vm1, %v270_v7, 0.0 }
 0x190   :  { %v231_v25 = vpop.xlane.xlu1 %230  ;;  %303 = vadd.xlane.f32.xlu1 %v302_v21  ;;  %294 = vadd.xlane.f32.xlu0 %v293_v24  ;;  %v228_v26 = vpop.xlane.xlu0 %227 }
 0x191   :  { %v248_v27 = vmul.f32 0.03125, %v231_v25  ;;  %v247_v28 = vmul.f32 0.03125, %v228_v26  ;;  %v277_v31 = vmul.f32 %v785_v20, %v785_v20  ;;  %v278_v34 = vmul.f32 %v782_v6, %v782_v6 }
 0x193   :  { %v793_v9 = vsub.f32 %v706_v15, %v248_v27  ;;  %v796_v8 = vsub.f32 %v704_v14, %v247_v28  ;;  %v317_v33 = vsel %vm183_vm1, %v277_v31, 0.0  ;;  %v320_v36 = vsel %vm183_vm1, %v278_v34, 0.0 }
 0x194   :  { %297 = vadd.xlane.f32.xlu1 %v296_v32  ;;  %318 = vadd.xlane.f32.xlu0 %v317_v33 }
 0x195   :  { %v279_v35 = vmul.f32 %v796_v8, %v796_v8  ;;  %v280_v15 = vmul.f32 %v793_v9, %v793_v9 }
 0x197   :  { %v323_v37 = vsel %vm183_vm1, %v279_v35, 0.0  ;;  %v326_v14 = vsel %vm183_vm1, %v280_v15, 0.0 }
 0x198   :  { %321 = vadd.xlane.f32.xlu1 %v320_v36  ;;  %324 = vadd.xlane.f32.xlu0 %v323_v37 }
 0x19c   :  { %327 = vadd.xlane.f32.xlu1 %v326_v14 }
 0x209   :  { %v289_v38 = vpop.xlane.xlu0 %288 }
 0x20a   :  { %v331_v41 = vmul.f32 0.03125, %v289_v38 }
 0x20c   :  { %v347_v42 = vadd.f32 1e-05, %v331_v41 }
 0x20d   :  { %v292_v43 = vpop.xlane.xlu1 %291  ;;  %v313_v44 = vpop.xlane.xlu0 %312 }
 0x20e   :  { %509 = vrsqrt.f32 %v347_v42  ;;  %v332_v45 = vmul.f32 0.03125, %v292_v43  ;;  %v339_v46 = vmul.f32 0.03125, %v313_v44 }
 0x210   :  { %v348_v47 = vadd.f32 1e-05, %v332_v45  ;;  %v355_v50 = vadd.f32 1e-05, %v339_v46 }
 0x211   :  { %v316_v51 = vpop.xlane.xlu1 %315  ;;  %v283_v52 = vpop.xlane.xlu0 %282 }
 0x212   :  { %511 = vrsqrt.f32 %v348_v47  ;;  %v340_v53 = vmul.f32 0.03125, %v316_v51  ;;  %v329_v54 = vmul.f32 0.03125, %v283_v52 }
 0x213   :  { %513 = vrsqrt.f32 %v355_v50 }
 0x214   :  { %v356_v55 = vadd.f32 1e-05, %v340_v53  ;;  %v345_v56 = vadd.f32 1e-05, %v329_v54 }
 0x215   :  { %v286_v57 = vpop.xlane.xlu1 %285  ;;  %v307_v59 = vpop.xlane.xlu0 %306 }
 0x216   :  { %515 = vrsqrt.f32 %v356_v55  ;;  %v330_v61 = vmul.f32 0.03125, %v286_v57  ;;  %v337_v62 = vmul.f32 0.03125, %v307_v59 }
 0x217   :  { %517 = vrsqrt.f32 %v345_v56 }
 0x218   :  { %v510_v63 = vpop.eup %509  ;;  %v346_v3 = vadd.f32 1e-05, %v330_v61  ;;  %v353_v4 = vadd.f32 1e-05, %v337_v62 }
 0x219   :  { %v379_v5 = vmul.f32 %v510_v63, %v716_v23  ;;  %v310_v10 = vpop.xlane.xlu1 %309  ;;  %v301_v11 = vpop.xlane.xlu0 %300 }
 0x21a   :  { %519 = vrsqrt.f32 %v346_v3  ;;  %v338_v13 = vmul.f32 0.03125, %v310_v10  ;;  %v335_v16 = vmul.f32 0.03125, %v301_v11 }
 0x21b   :  { %v402_v17 = vmul.f32 %v811_v2, %v379_v5  ;;  %521 = vrsqrt.f32 %v353_v4 }
 0x21c   :  { %v512_v18 = vpop.eup %511  ;;  %v354_v19 = vadd.f32 1e-05, %v338_v13  ;;  %v351_v7 = vadd.f32 1e-05, %v335_v16 }
 0x21d   :  { %v514_v21 = vpop.eup %513  ;;  %v425_v24 = vadd.f32 %v817_v12, %v402_v17  ;;  %v380_v23 = vmul.f32 %v512_v18, %v721_v29  ;;  %v304_v25 = vpop.xlane.xlu1 %303 }
 0x21e   :  { %v295_v26 = vpop.xlane.xlu0 %294  ;;  %v387_v27 = vmul.f32 %v514_v21, %v713_v22  ;;  %523 = vrsqrt.f32 %v354_v19  ;;  %v336_v28 = vmul.f32 0.03125, %v304_v25 }
 0x21f   :  { %v333_v31 = vmul.f32 0.03125, %v295_v26  ;;  %441 = vst.msk [vmem:[%s935_s5 + $0x10] sm:$0xff] %vm183_vm1, %v425_v24  ;;  %v403_v32 = vmul.f32 %v811_v2, %v380_v23  ;;  %525 = vrsqrt.f32 %v351_v7 }
 0x220   :  { %v516_v33 = vpop.eup %515  ;;  %v410_v34 = vmul.f32 %v811_v2, %v387_v27  ;;  %v352_v35 = vadd.f32 1e-05, %v336_v28 }
 0x221   :  { %v349_v29 = vadd.f32 1e-05, %v333_v31  ;;  %v518_v36 = vpop.eup %517  ;;  %v426_v37 = vadd.f32 %v817_v12, %v403_v32  ;;  %v388_v22 = vmul.f32 %v516_v33, %v734_v39  ;;  %v298_v15 = vpop.xlane.xlu1 %297 }
 0x222   :  { %v319_v14 = vpop.xlane.xlu0 %318  ;;  %v433_v38 = vadd.f32 %v817_v12, %v410_v34  ;;  %v377_v41 = vmul.f32 %v518_v36, %v724_v30  ;;  %527 = vrsqrt.f32 %v352_v35  ;;  %v334_v42 = vmul.f32 0.03125, %v298_v15 }
 0x223   :  { %442 = vst.msk [vmem:[%s935_s5 + $0x18] sm:$0xff] %vm183_vm1, %v426_v37  ;;  %v411_v43 = vmul.f32 %v811_v2, %v388_v22  ;;  %529 = vrsqrt.f32 %v349_v29  ;;  %v341_v44 = vmul.f32 0.03125, %v319_v14 }
 0x224   :  { %v520_v45 = vpop.eup %519  ;;  %449 = vst.msk [vmem:[%s935_s5 + $0x50] sm:$0xff] %vm183_vm1, %v433_v38  ;;  %v400_v39 = vmul.f32 %v811_v2, %v377_v41  ;;  %v350_v30 = vadd.f32 1e-05, %v334_v42 }
 0x225   :  { %v522_v46 = vpop.eup %521  ;;  %v434_v47 = vadd.f32 %v817_v12, %v411_v43  ;;  %v378_v50 = vmul.f32 %v520_v45, %v748_v48  ;;  %v357_v51 = vadd.f32 1e-05, %v341_v44  ;;  %v322_v52 = vpop.xlane.xlu1 %321 }
 0x226   :  { %v325_v53 = vpop.xlane.xlu0 %324  ;;  %v423_v54 = vadd.f32 %v817_v12, %v400_v39  ;;  %v385_v55 = vmul.f32 %v522_v46, %v737_v40  ;;  %531 = vrsqrt.f32 %v350_v30  ;;  %v342_v56 = vmul.f32 0.03125, %v322_v52 }
 0x227   :  { %450 = vst.msk [vmem:[%s935_s5 + $0x58] sm:$0xff] %vm183_vm1, %v434_v47  ;;  %v401_v57 = vmul.f32 %v811_v2, %v378_v50  ;;  %533 = vrsqrt.f32 %v357_v51  ;;  %v343_v59 = vmul.f32 0.03125, %v325_v53 }
 0x228   :  { %v524_v61 = vpop.eup %523  ;;  %439 = vst.msk [vmem:[%s935_s5] sm:$0xff] %vm183_vm1, %v423_v54  ;;  %v408_v48 = vmul.f32 %v811_v2, %v385_v55  ;;  %v358_v40 = vadd.f32 1e-05, %v342_v56 }
 0x229   :  { %v526_v62 = vpop.eup %525  ;;  %v424_v63 = vadd.f32 %v817_v12, %v401_v57  ;;  %v386_v3 = vmul.f32 %v524_v61, %v745_v49  ;;  %v359_v4 = vadd.f32 1e-05, %v343_v59  ;;  %v328_v5 = vpop.xlane.xlu1 %327 }
 0x22a   :  { %v431_v10 = vadd.f32 %v817_v12, %v408_v48  ;;  %v383_v11 = vmul.f32 %v526_v62, %v761_v60  ;;  %535 = vrsqrt.f32 %v358_v40  ;;  %v344_v13 = vmul.f32 0.03125, %v328_v5 }
 0x22b   :  { %440 = vst.msk [vmem:[%s935_s5 + $0x8] sm:$0xff] %vm183_vm1, %v424_v63  ;;  %v409_v16 = vmul.f32 %v811_v2, %v386_v3  ;;  %537 = vrsqrt.f32 %v359_v4 }
 0x22c   :  { %v528_v17 = vpop.eup %527  ;;  %447 = vst.msk [vmem:[%s935_s5 + $0x40] sm:$0xff] %vm183_vm1, %v431_v10  ;;  %v406_v49 = vmul.f32 %v811_v2, %v383_v11  ;;  %v360_v18 = vadd.f32 1e-05, %v344_v13 }
 0x22d   :  { %v530_v60 = vpop.eup %529  ;;  %v432_v19 = vadd.f32 %v817_v12, %v409_v16  ;;  %v384_v7 = vmul.f32 %v528_v17, %v758_v58 }
 0x22e   :  { %v429_v21 = vadd.f32 %v817_v12, %v406_v49  ;;  %v381_v24 = vmul.f32 %v530_v60, %v772_v0  ;;  %539 = vrsqrt.f32 %v360_v18 }
 0x22f   :  { %448 = vst.msk [vmem:[%s935_s5 + $0x48] sm:$0xff] %vm183_vm1, %v432_v19  ;;  %v407_v23 = vmul.f32 %v811_v2, %v384_v7 }
 0x230   :  { %v532_v25 = vpop.eup %531  ;;  %445 = vst.msk [vmem:[%s935_s5 + $0x30] sm:$0xff] %vm183_vm1, %v429_v21  ;;  %v404_v58 = vmul.f32 %v811_v2, %v381_v24 }
 0x231   :  { %v534_v26 = vpop.eup %533  ;;  %v430_v27 = vadd.f32 %v817_v12, %v407_v23  ;;  %v382_v0 = vmul.f32 %v532_v25, %v769_v1 }
 0x232   :  { %v427_v28 = vadd.f32 %v817_v12, %v404_v58  ;;  %v389_v31 = vmul.f32 %v534_v26, %v785_v20 }
 0x233   :  { %446 = vst.msk [vmem:[%s935_s5 + $0x38] sm:$0xff] %vm183_vm1, %v430_v27  ;;  %v405_v32 = vmul.f32 %v811_v2, %v382_v0 }
 0x234   :  { %v536_v33 = vpop.eup %535  ;;  %443 = vst.msk [vmem:[%s935_s5 + $0x20] sm:$0xff] %vm183_vm1, %v427_v28  ;;  %v412_v34 = vmul.f32 %v811_v2, %v389_v31 }
 0x235   :  { %v538_v1 = vpop.eup %537  ;;  %v428_v35 = vadd.f32 %v817_v12, %v405_v32  ;;  %v390_v20 = vmul.f32 %v536_v33, %v782_v6 }
 0x236   :  { %v435_v29 = vadd.f32 %v817_v12, %v412_v34  ;;  %v391_v36 = vmul.f32 %v538_v1, %v796_v8 }
 0x237   :  { %444 = vst.msk [vmem:[%s935_s5 + $0x28] sm:$0xff] %vm183_vm1, %v428_v35  ;;  %v413_v37 = vmul.f32 %v811_v2, %v390_v20 }
 0x238   :  { %v540_v22 = vpop.eup %539  ;;  %451 = vst.msk [vmem:[%s935_s5 + $0x60] sm:$0xff] %vm183_vm1, %v435_v29  ;;  %v414_v15 = vmul.f32 %v811_v2, %v391_v36 }
 0x239   :  { %v436_v6 = vadd.f32 %v817_v12, %v413_v37  ;;  %v392_v14 = vmul.f32 %v540_v22, %v793_v9 }
 0x23a   :  { %v437_v8 = vadd.f32 %v817_v12, %v414_v15 }
 0x23b   :  { %452 = vst.msk [vmem:[%s935_s5 + $0x68] sm:$0xff] %vm183_vm1, %v436_v6  ;;  %v415_v38 = vmul.f32 %v811_v2, %v392_v14 }
 0x23c   :  { %453 = vst.msk [vmem:[%s935_s5 + $0x70] sm:$0xff] %vm183_vm1, %v437_v8 }
 0x23d   :  { %v438_v41 = vadd.f32 %v817_v12, %v415_v38 }
 0x23f   :  { %454 = vst.msk [vmem:[%s935_s5 + $0x78] sm:$0xff] %vm183_vm1, %v438_v41 }

// kernel: _lambda_.10
= control target key start
LH: loop header
LB: loop body
LE: loop exit
PB: predicated region body
PF: predicated region fallthrough
CT: control target
= control target key end

     0   :  { %vm164_vm0 = vcmask 523264   ;;  %s336_s0 = inlined_call_operand.vmem [shape: f32[32,128], index: 0, kind: input, shape index: {}]   ;;  %s337_s3 = inlined_call_operand.vmem [shape: f32[128,64], index: 3, kind: input, shape index: {}]   ;;  %s338_s1 = inlined_call_operand.vmem [shape: f32[1,128], index: 1, kind: input, shape index: {}]   ;;  %s339_s2 = inlined_call_operand.vmem [shape: f32[1,128], index: 2, kind: input, shape index: {}]   ;;  %s340_s4 = inlined_call_operand.vmem [shape: f32[32,64], index: 4, kind: output, shape index: {}]  }
   0x1   :  { %v18_v0 = vld [vmem:[%s336_s0] sm:$0xff]  ;;  %v20_v1 = vld [vmem:[%s336_s0 + $0x10] sm:$0xff]  ;;  %v19_v2 = vld [vmem:[%s336_s0 + $0x8] sm:$0xff] }
   0x2   :  { %22 = vadd.xlane.f32.xlu0 %v18_v0  ;;  %26 = vadd.xlane.f32.xlu1 %v20_v1  ;;  %v21_v3 = vld [vmem:[%s336_s0 + $0x18] sm:$0xff]  ;;  %v91_v4 = vld [vmem:[%s337_s3] sm:$0xff]  ;;  %v92_v5 = vld [vmem:[%s337_s3 + $0x8] sm:$0xff] }
   0x3   :  { %v107_v6 = vpack.c.bf16 %v92_v5, %v91_v4  ;;  %v93_v23 = vld [vmem:[%s337_s3 + $0x10] sm:$0xff]  ;;  %v94_v24 = vld [vmem:[%s337_s3 + $0x18] sm:$0xff]  ;;  %v95_v26 = vld [vmem:[%s337_s3 + $0x20] sm:$0xff] }
   0x4   :  { %v108_v25 = vpack.c.bf16 %v94_v24, %v93_v23  ;;  %v96_v27 = vld [vmem:[%s337_s3 + $0x28] sm:$0xff]  ;;  %v97_v29 = vld [vmem:[%s337_s3 + $0x30] sm:$0xff]  ;;  %v98_v30 = vld [vmem:[%s337_s3 + $0x38] sm:$0xff] }
   0x5   :  { %185 = vmatprep.subr.bf16.mxu0 %v107_v6  ;;  %v109_v28 = vpack.c.bf16 %v96_v27, %v95_v26  ;;  %v110_v31 = vpack.c.bf16 %v98_v30, %v97_v29  ;;  %v99_v32 = vld [vmem:[%s337_s3 + $0x40] sm:$0xff]  ;;  %v100_v33 = vld [vmem:[%s337_s3 + $0x48] sm:$0xff]  ;;  %v101_v34 = vld [vmem:[%s337_s3 + $0x50] sm:$0xff] }
   0x6   :  { %24 = vadd.xlane.f32.xlu0 %v19_v2  ;;  %28 = vadd.xlane.f32.xlu1 %v21_v3  ;;  %v111_v35 = vpack.c.bf16 %v100_v33, %v99_v32  ;;  %v102_v36 = vld [vmem:[%s337_s3 + $0x58] sm:$0xff]  ;;  %v103_v38 = vld [vmem:[%s337_s3 + $0x60] sm:$0xff]  ;;  %v104_v39 = vld [vmem:[%s337_s3 + $0x68] sm:$0xff] }
   0x7   :  { %186 = vmatpush3.bf16.msra.mxu0 %v107_v6  ;;  %v112_v37 = vpack.c.bf16 %v102_v36, %v101_v34  ;;  %v113_v40 = vpack.c.bf16 %v104_v39, %v103_v38  ;;  %v105_v41 = vld [vmem:[%s337_s3 + $0x70] sm:$0xff]  ;;  %v106_v42 = vld [vmem:[%s337_s3 + $0x78] sm:$0xff]  ;;  %v173_v58 = vld [vmem:[%s338_s1] ss:$0 sm:$0xff] }
   0x8   :  { %187 = vmatprep.subr.bf16.mxu0 %v108_v25  ;;  %v114_v43 = vpack.c.bf16 %v106_v42, %v105_v41  ;;  %v174_v63 = vld [vmem:[%s339_s2] ss:$0 sm:$0xff] }
   0xb   :  { %188 = vmatpush3.bf16.msra.mxu0 %v108_v25 }
   0xc   :  { %189 = vmatprep.subr.bf16.mxu0 %v109_v28 }
   0xf   :  { %190 = vmatpush3.bf16.msra.mxu0 %v109_v28 }
  0x10   :  { %191 = vmatprep.subr.bf16.mxu0 %v110_v31 }
  0x13   :  { %192 = vmatpush3.bf16.msra.mxu0 %v110_v31 }
  0x14   :  { %193 = vmatprep.subr.bf16.mxu0 %v111_v35 }
  0x17   :  { %194 = vmatpush3.bf16.msra.mxu0 %v111_v35 }
  0x18   :  { %195 = vmatprep.subr.bf16.mxu0 %v112_v37 }
  0x1b   :  { %196 = vmatpush3.bf16.msra.mxu0 %v112_v37 }
  0x1c   :  { %197 = vmatprep.subr.bf16.mxu0 %v113_v40 }
  0x1f   :  { %198 = vmatpush3.bf16.msra.mxu0 %v113_v40 }
  0x20   :  { %199 = vmatprep.subr.bf16.mxu0 %v114_v43 }
  0x23   :  { %200 = vmatpush3.bf16.msra.mxu0 %v114_v43 }
  0x8f   :  { %v23_v7 = vpop.xlane.xlu0 %22  ;;  %v27_v8 = vpop.xlane.xlu1 %26 }
  0x90   :  { %v31_v9 = vmul.f32 0.0078125, %v23_v7  ;;  %v33_v10 = vmul.f32 0.0078125, %v27_v8 }
  0x92   :  { %v256_v11 = vsub.f32 %v18_v0, %v31_v9  ;;  %v258_v12 = vsub.f32 %v20_v1, %v33_v10 }
  0x93   :  { %v25_v13 = vpop.xlane.xlu0 %24  ;;  %v29_v14 = vpop.xlane.xlu1 %28 }
  0x94   :  { %v32_v15 = vmul.f32 0.0078125, %v25_v13  ;;  %v39_v16 = vmul.f32 %v256_v11, %v256_v11  ;;  %v34_v17 = vmul.f32 0.0078125, %v29_v14  ;;  %v41_v20 = vmul.f32 %v258_v12, %v258_v12 }
  0x96   :  { %v262_v18 = vsub.f32 %v19_v2, %v32_v15  ;;  %43 = vadd.xlane.f32.xlu0 %v39_v16  ;;  %v264_v19 = vsub.f32 %v21_v3, %v34_v17 }
  0x98   :  { %v40_v21 = vmul.f32 %v262_v18, %v262_v18  ;;  %v42_v22 = vmul.f32 %v264_v19, %v264_v19 }
  0x9a   :  { %47 = vadd.xlane.f32.xlu0 %v41_v20  ;;  %45 = vadd.xlane.f32.xlu1 %v40_v21 }
  0x9e   :  { %49 = vadd.xlane.f32.xlu1 %v42_v22 }
 0x123   :  { %v44_v44 = vpop.xlane.xlu0 %43 }
 0x124   :  { %v51_v45 = vmul.f32 0.0078125, %v44_v44 }
 0x126   :  { %v55_v46 = vadd.f32 1e-05, %v51_v45 }
 0x127   :  { %v46_v47 = vpop.xlane.xlu1 %45  ;;  %v48_v48 = vpop.xlane.xlu0 %47 }
 0x128   :  { %205 = vrsqrt.f32 %v55_v46  ;;  %v52_v49 = vmul.f32 0.0078125, %v46_v47  ;;  %v53_v50 = vmul.f32 0.0078125, %v48_v48 }
 0x12a   :  { %v56_v51 = vadd.f32 1e-05, %v52_v49  ;;  %v57_v52 = vadd.f32 1e-05, %v53_v50 }
 0x12b   :  { %v50_v53 = vpop.xlane.xlu1 %49 }
 0x12c   :  { %207 = vrsqrt.f32 %v56_v51  ;;  %v54_v54 = vmul.f32 0.0078125, %v50_v53 }
 0x12d   :  { %209 = vrsqrt.f32 %v57_v52 }
 0x12e   :  { %v58_v55 = vadd.f32 1e-05, %v54_v54 }
 0x130   :  { %211 = vrsqrt.f32 %v58_v55 }
 0x132   :  { %v206_v56 = vpop.eup %205 }
 0x133   :  { %v63_v57 = vmul.f32 %v206_v56, %v256_v11 }
 0x135   :  { %v74_v62 = vmul.f32 %v173_v58, %v63_v57 }
 0x136   :  { %v208_v59 = vpop.eup %207 }
 0x137   :  { %v210_v60 = vpop.eup %209  ;;  %v64_v61 = vmul.f32 %v208_v59, %v262_v18  ;;  %v85_v3 = vadd.f32 %v174_v63, %v74_v62 }
 0x138   :  { %v65_v0 = vmul.f32 %v210_v60, %v258_v12 }
 0x139   :  { %v75_v1 = vmul.f32 %v173_v58, %v64_v61 }
 0x13a   :  { %v212_v2 = vpop.eup %211  ;;  %v76_v6 = vmul.f32 %v173_v58, %v65_v0 }
 0x13b   :  { %v86_v4 = vadd.f32 %v174_v63, %v75_v1  ;;  %v66_v5 = vmul.f32 %v212_v2, %v264_v19 }
 0x13c   :  { %v87_v9 = vadd.f32 %v174_v63, %v76_v6 }
 0x13d   :  { %v89_v7 = vpack.c.bf16 %v86_v4, %v85_v3  ;;  %v77_v8 = vmul.f32 %v173_v58, %v66_v5 }
 0x13f   :  { %201 = vmatprep.mubr.bf16.mxu0 %v89_v7  ;;  %v88_v10 = vadd.f32 %v174_v63, %v77_v8 }
 0x141   :  { %v90_v11 = vpack.c.bf16 %v88_v10, %v87_v9 }
 0x143   :  { %202 = vmatmul.mubr.bf16.vlgmr.msra.gmra.mrb[0].mxu0 %v90_v11 }
 0x216   :  { %v203_v13 = vpop.f32.mrb[0].mxu0 }
 0x217   :  { %167 = vst.msk [vmem:[%s340_s4 + $0x10] sm:$0xff] %vm164_vm0, %v203_v13  ;;  %v149_v12 = vpop.f32.mrb[1].mxu0 }
 0x218   :  { %165 = vst.msk [vmem:[%s340_s4] sm:$0xff] %vm164_vm0, %v149_v12  ;;  %v204_v14 = vpop.f32.mrb[2].mxu0 }
 0x219   :  { %168 = vst.msk [vmem:[%s340_s4 + $0x18] sm:$0xff] %vm164_vm0, %v204_v14  ;;  %v152_v15 = vpop.f32.mrb[3].mxu0 }
 0x21a   :  { %166 = vst.msk [vmem:[%s340_s4 + $0x8] sm:$0xff] %vm164_vm0, %v152_v15 }

// kernel: _lambda_.8
= control target key start
LH: loop header
LB: loop body
LE: loop exit
PB: predicated region body
PF: predicated region fallthrough
CT: control target
= control target key end

     0   :  { %s3467_s18 = smov 0   ;;  %s4247_s0 = inlined_call_operand.vmem [shape: f32[8,16,32], index: 0, kind: input, shape index: {}]   ;;  %s4248_s1 = inlined_call_operand.vmem [shape: f32[1,32], index: 1, kind: input, shape index: {}, may-alias: {1,9}]   ;;  %s4249_s2 = inlined_call_operand.vmem [shape: f32[1,32], index: 2, kind: input, shape index: {}, may-alias: {2,8,10,14}]   ;;  %s4250_s3 = inlined_call_operand.vmem [shape: f32[3,2,32,16], index: 3, kind: input, shape index: {}]   ;;  %s4251_s4 = inlined_call_operand.vmem [shape: f32[3,2,1,16], index: 4, kind: input, shape index: {}]   ;;  %s4252_s5 = inlined_call_operand.vmem [shape: f32[2,16,16], index: 5, kind: input, shape index: {}]   ;;  %s4253_s6 = inlined_call_operand.vmem [shape: f32[4,16,16], index: 6, kind: input, shape index: {}]   ;;  %s4254_s7 = inlined_call_operand.vmem [shape: f32[2,16,32], index: 7, kind: input, shape index: {}]   ;;  %s4255_s8 = inlined_call_operand.vmem [shape: f32[1,32], index: 8, kind: input, shape index: {}, may-alias: {2,8,10,14}]   ;;  %s4256_s9 = inlined_call_operand.vmem [shape: f32[1,32], index: 9, kind: input, shape index: {}, may-alias: {1,9}]   ;;  %s4257_s10 = inlined_call_operand.vmem [shape: f32[1,32], index: 10, kind: input, shape index: {}, may-alias: {2,8,10,14}]   ;;  %s4258_s11 = inlined_call_operand.vmem [shape: f32[32,128], index: 11, kind: input, shape index: {}]   ;;  %s4259_s12 = inlined_call_operand.vmem [shape: f32[1,128], index: 12, kind: input, shape index: {}]   ;;  %s4260_s13 = inlined_call_operand.vmem [shape: f32[128,32], index: 13, kind: input, shape index: {}]   ;;  %s4261_s14 = inlined_call_operand.vmem [shape: f32[1,32], index: 14, kind: input, shape index: {}, may-alias: {2,8,10,14}]   ;;  %s4262_s15 = inlined_call_operand.vmem [shape: f32[8,16,32], index: 15, kind: output, shape index: {}]  }
   0x1 LB: > { %s2806_s19 = sadd.s32 4294967295, %s3383_s18   ;;  %p2810_p0 = scmp.ge.s32.totalorder %s3383_s18, 1  ;;  %s3383_s18 = sphi %s3467_s18, %s25_s18  }
   0x2   : > { %p439_p1 = scmp.lt.s32.totalorder %s3383_s18, 3 }
   0x4   : > { %p440_p2 = pnand %p2810_p0, %p439_p1 }
   0x5   : > { %s2811_s20 = sshll.u32 (!%p440_p2), %s2806_s19, 2  ;;  %vm512_vm0 = vcmask (!%p440_p2), 261120   ;;  %v660_v56 = vld [vmem:[%s4250_s3] sm:$0xff] (!%p440_p2)  ;;  %v661_v57 = vld [vmem:[%s4250_s3 + $0x8] sm:$0xff] (!%p440_p2)  ;;  %v662_v59 = vld [vmem:[%s4250_s3 + $0x10] sm:$0xff] (!%p440_p2)  ;;  %vm3386_vm1 = vmmov (!%p440_p2), 0  }
   0x6   : > { %443 = sbr.rel (%p440_p2) target bundleno = 3160 (0xc58), region = 80  ;;  %p490_p3 = scmp.lt.s32.totalorder (!%p440_p2), %s2811_s20, 7  ;;  %v664_v58 = vpack.c.bf16 (!%p440_p2), %v661_v57, %v660_v56  ;;  %v663_v60 = vld [vmem:[%s4250_s3 + $0x18] sm:$0xff] (!%p440_p2)  ;;  %v2824_v62 = vld [vmem:[%s4250_s3 + $0x40] sm:$0xff] (!%p440_p2)  ;;  %v2825_v63 = vld [vmem:[%s4250_s3 + $0x48] sm:$0xff] (!%p440_p2)  ;;  %vm918_vm2 = vcmask (!%p440_p2), 130048  }
   0x7   : > { %v665_v61 = vpack.c.bf16 (!%p440_p2), %v663_v60, %v662_v59 }
   0x8   : > { %3011 = vmatprep.subr.bf16.mxu0 (!%p440_p2), %v664_v58 }
   0x9   : > { %3012 = vmatpush3.bf16.msra.mxu0 (!%p440_p2), %v664_v58 }
   0xa   : > { %3013 = vmatprep.subr.bf16.mxu0 (!%p440_p2), %v665_v61 }
   0xd   : > { %s4264_s20 = smov (!%p490_p3, %s2811_s20), 7  ;;  %3014 = vmatpush3.bf16.msra.mxu0 %v665_v61  ;;  %v2835_v61 = vld [vmem:[%s4250_s3 + $0x88] sm:$0xff] }
   0xe   : > { %s2913_s21 = sshll.u32 %s4264_s20, 4 }
   0xf   : > { %s3483_s24 = scalar_lea.vmem %s4247_s0, %s2913_s21  ;;  %s501_s25 = scalar_lea.vmem %s4262_s15, %s2913_s21 }
  0x10   : > { %v504_v0 = vld [vmem:[%s3483_s24] sm:$0xff]  ;;  %v506_v1 = vld [vmem:[%s3483_s24 + $0x10] sm:$0xff]  ;;  %v505_v2 = vld [vmem:[%s3483_s24 + $0x8] sm:$0xff] }
  0x11   : > { %v513_v3 = vsel %vm512_vm0, %v504_v0, 0.0  ;;  %v519_v4 = vsel %vm512_vm0, %v506_v1, 0.0  ;;  %v507_v5 = vld [vmem:[%s3483_s24 + $0x18] sm:$0xff]  ;;  %v516_v6 = vsel %vm512_vm0, %v505_v2, 0.0  ;;  %v508_v8 = vld [vmem:[%s3483_s24 + $0x20] sm:$0xff]  ;;  %v509_v9 = vld [vmem:[%s3483_s24 + $0x28] sm:$0xff] }
  0x12   : > { %514 = vadd.xlane.f32.xlu0 %v513_v3  ;;  %520 = vadd.xlane.f32.xlu1 %v519_v4  ;;  %v522_v7 = vsel %vm512_vm0, %v507_v5, 0.0  ;;  %v525_v10 = vsel %vm512_vm0, %v508_v8, 0.0  ;;  %v528_v11 = vsel %vm512_vm0, %v509_v9, 0.0  ;;  %v510_v12 = vld [vmem:[%s3483_s24 + $0x30] sm:$0xff]  ;;  %v511_v13 = vld [vmem:[%s3483_s24 + $0x38] sm:$0xff] }
  0x13   : > { %v531_v14 = vsel %vm512_vm0, %v510_v12, 0.0  ;;  %v534_v15 = vsel %vm512_vm0, %v511_v13, 0.0 }
  0x16   : > { %517 = vadd.xlane.f32.xlu0 %v516_v6  ;;  %523 = vadd.xlane.f32.xlu1 %v522_v7 }
  0x1a   : > { %526 = vadd.xlane.f32.xlu0 %v525_v10  ;;  %529 = vadd.xlane.f32.xlu1 %v528_v11 }
  0x1e   : > { %532 = vadd.xlane.f32.xlu0 %v531_v14  ;;  %535 = vadd.xlane.f32.xlu1 %v534_v15 }
  0x9f   : > { %v515_v16 = vpop.xlane.xlu0 %514  ;;  %v521_v17 = vpop.xlane.xlu1 %520 }
  0xa0   : > { %v538_v18 = vmul.f32 0.03125, %v515_v16  ;;  %v540_v19 = vmul.f32 0.03125, %v521_v17 }
  0xa2   : > { %v3501_v20 = vsub.f32 %v504_v0, %v538_v18  ;;  %v3503_v21 = vsub.f32 %v506_v1, %v540_v19  ;;  %v3559_v0 = vpack.c.bf16 %v2825_v63, %v2824_v62  ;;  %v2826_v1 = vld [vmem:[%s4250_s3 + $0x50] sm:$0xff] }
  0xa3   : > { %v518_v22 = vpop.xlane.xlu0 %517  ;;  %v524_v23 = vpop.xlane.xlu1 %523 }
  0xa4   : > { %v539_v24 = vmul.f32 0.03125, %v518_v22  ;;  %v541_v25 = vmul.f32 0.03125, %v524_v23  ;;  %v554_v26 = vmul.f32 %v3501_v20, %v3501_v20  ;;  %v556_v27 = vmul.f32 %v3503_v21, %v3503_v21  ;;  %3235 = vmatprep.subr.bf16.mxu1 %v3559_v0  ;;  %3023 = vmatprep.subr.bf16.mxu0 %v3559_v0 }
  0xa5   : > { %3237 = vmatpush3.bf16.msra.mxu1 %v3559_v0 }
  0xa6   : > { %v3509_v28 = vsub.f32 %v505_v2, %v539_v24  ;;  %v3511_v29 = vsub.f32 %v507_v5, %v541_v25  ;;  %v562_v30 = vsel %vm512_vm0, %v554_v26, 0.0  ;;  %v568_v33 = vsel %vm512_vm0, %v556_v27, 0.0  ;;  %v2827_v2 = vld [vmem:[%s4250_s3 + $0x58] sm:$0xff] }
  0xa7   : > { %563 = vadd.xlane.f32.xlu0 %v562_v30  ;;  %v527_v31 = vpop.xlane.xlu0 %526  ;;  %v530_v32 = vpop.xlane.xlu1 %529  ;;  %v3570_v3 = vpack.c.bf16 %v2827_v2, %v2826_v1 }
  0xa8   : > { %v542_v34 = vmul.f32 0.03125, %v527_v31  ;;  %v543_v35 = vmul.f32 0.03125, %v530_v32  ;;  %v555_v36 = vmul.f32 %v3509_v28, %v3509_v28  ;;  %v557_v37 = vmul.f32 %v3511_v29, %v3511_v29  ;;  %v2817_v32 = vld [vmem:[%s4248_s1] ss:$0 sm:$0xff] }
  0xa9   : > { %3236 = vmatprep.subr.bf16.mxu1 %v3570_v3 }
  0xaa   : > { %v3519_v38 = vsub.f32 %v508_v8, %v542_v34  ;;  %v3521_v39 = vsub.f32 %v509_v9, %v543_v35  ;;  %v565_v40 = vsel %vm512_vm0, %v555_v36, 0.0  ;;  %v571_v43 = vsel %vm512_vm0, %v557_v37, 0.0  ;;  %3238 = vmatpush3.bf16.msra.mxu1 %v3570_v3 }
  0xab   : > { %569 = vadd.xlane.f32.xlu0 %v568_v33  ;;  %566 = vadd.xlane.f32.xlu1 %v565_v40  ;;  %v533_v41 = vpop.xlane.xlu0 %532  ;;  %v536_v42 = vpop.xlane.xlu1 %535 }
  0xac   : > { %v544_v44 = vmul.f32 0.03125, %v533_v41  ;;  %v545_v45 = vmul.f32 0.03125, %v536_v42  ;;  %v558_v46 = vmul.f32 %v3519_v38, %v3519_v38  ;;  %v559_v47 = vmul.f32 %v3521_v39, %v3521_v39  ;;  %v2818_v41 = vld [vmem:[%s4249_s2] ss:$0 sm:$0xff] }
  0xae   : > { %v3529_v48 = vsub.f32 %v510_v12, %v544_v44  ;;  %v3531_v49 = vsub.f32 %v511_v13, %v545_v45  ;;  %v574_v50 = vsel %vm512_vm0, %v558_v46, 0.0  ;;  %v577_v51 = vsel %vm512_vm0, %v559_v47, 0.0 }
  0xaf   : > { %572 = vadd.xlane.f32.xlu1 %v571_v43  ;;  %575 = vadd.xlane.f32.xlu0 %v574_v50 }
  0xb0   : > { %v560_v52 = vmul.f32 %v3529_v48, %v3529_v48  ;;  %v561_v53 = vmul.f32 %v3531_v49, %v3531_v49 }
  0xb2   : > { %v580_v54 = vsel %vm512_vm0, %v560_v52, 0.0  ;;  %v583_v55 = vsel %vm512_vm0, %v561_v53, 0.0 }
  0xb3   : > { %578 = vadd.xlane.f32.xlu1 %v577_v51  ;;  %581 = vadd.xlane.f32.xlu0 %v580_v54 }
  0xb7   : > { %584 = vadd.xlane.f32.xlu1 %v583_v55 }
 0x134   : > { %v564_v4 = vpop.xlane.xlu0 %563 }
 0x135   : > { %v586_v5 = vmul.f32 0.03125, %v564_v4 }
 0x137   : > { %v594_v6 = vadd.f32 1e-05, %v586_v5 }
 0x138   : > { %v567_v7 = vpop.xlane.xlu1 %566  ;;  %v570_v8 = vpop.xlane.xlu0 %569 }
 0x139   : > { %3257 = vrsqrt.f32 %v594_v6  ;;  %v587_v9 = vmul.f32 0.03125, %v567_v7  ;;  %v588_v10 = vmul.f32 0.03125, %v570_v8  ;;  %v3385_v8 = vmov 0.0  }
 0x13a   : > { %3047 = vmatprep.subr.bf16.mxu1 %v3385_v8 }
 0x13b   : > { %v595_v11 = vadd.f32 1e-05, %v587_v9  ;;  %v596_v12 = vadd.f32 1e-05, %v588_v10  ;;  %v2819_v10 = vld [vmem:[%s4251_s4] ss:$0 sm:$0xff] }
 0x13c   : > { %v573_v13 = vpop.xlane.xlu1 %572  ;;  %v576_v14 = vpop.xlane.xlu0 %575 }
 0x13d   : > { %3259 = vrsqrt.f32 %v595_v11  ;;  %v589_v15 = vmul.f32 0.03125, %v573_v13  ;;  %v590_v16 = vmul.f32 0.03125, %v576_v14 }
 0x13e   : > { %3261 = vrsqrt.f32 %v596_v12 }
 0x13f   : > { %v597_v17 = vadd.f32 1e-05, %v589_v15  ;;  %v598_v18 = vadd.f32 1e-05, %v590_v16 }
 0x140   : > { %v579_v19 = vpop.xlane.xlu1 %578  ;;  %v582_v22 = vpop.xlane.xlu0 %581 }
 0x141   : > { %3263 = vrsqrt.f32 %v597_v17  ;;  %v591_v23 = vmul.f32 0.03125, %v579_v19  ;;  %v592_v24 = vmul.f32 0.03125, %v582_v22 }
 0x142   : > { %3265 = vrsqrt.f32 %v598_v18 }
 0x143   : > { %v3258_v25 = vpop.eup %3257  ;;  %v599_v26 = vadd.f32 1e-05, %v591_v23  ;;  %v600_v27 = vadd.f32 1e-05, %v592_v24  ;;  %v2829_v23 = vld [vmem:[%s4251_s4 + $0x2] ss:$0 sm:$0xff] }
 0x144   : > { %v610_v30 = vmul.f32 %v3258_v25, %v3501_v20  ;;  %v585_v31 = vpop.xlane.xlu1 %584 }
 0x145   : > { %3267 = vrsqrt.f32 %v599_v26  ;;  %v593_v33 = vmul.f32 0.03125, %v585_v31 }
 0x146   : > { %3269 = vrsqrt.f32 %v600_v27  ;;  %v625_v37 = vmul.f32 %v2817_v32, %v610_v30 }
 0x147   : > { %v3260_v34 = vpop.eup %3259  ;;  %v601_v35 = vadd.f32 1e-05, %v593_v33 }
 0x148   : > { %v3262_v36 = vpop.eup %3261  ;;  %v611_v40 = vmul.f32 %v3260_v34, %v3509_v28  ;;  %v640_v45 = vadd.f32 %v2818_v41, %v625_v37 }
 0x149   : > { %v612_v20 = vmul.f32 %v3262_v36, %v3503_v21  ;;  %3271 = vrsqrt.f32 %v601_v35 }
 0x14a   : > { %v626_v42 = vmul.f32 %v2817_v32, %v611_v40 }
 0x14b   : > { %v3264_v43 = vpop.eup %3263  ;;  %v627_v47 = vmul.f32 %v2817_v32, %v612_v20 }
 0x14c   : > { %v3266_v44 = vpop.eup %3265  ;;  %v641_v46 = vadd.f32 %v2818_v41, %v626_v42  ;;  %v613_v50 = vmul.f32 %v3264_v43, %v3511_v29 }
 0x14d   : > { %v614_v51 = vmul.f32 %v3266_v44, %v3519_v38  ;;  %v642_v55 = vadd.f32 %v2818_v41, %v627_v47  ;;  %v2834_v38 = vld [vmem:[%s4250_s3 + $0x80] sm:$0xff] }
 0x14e   : > { %v628_v52 = vmul.f32 %v2817_v32, %v613_v50  ;;  %v3585_v53 = vpack.c.bf16 %v641_v46, %v640_v45  ;;  %v835_v4 = vpack.c.bf16 %v2835_v61, %v2834_v38 }
 0x14f   : > { %v3268_v28 = vpop.eup %3267  ;;  %v629_v57 = vmul.f32 %v2817_v32, %v614_v51 }
 0x150   : > { %v3270_v54 = vpop.eup %3269  ;;  %v643_v56 = vadd.f32 %v2818_v41, %v628_v52  ;;  %v615_v21 = vmul.f32 %v3268_v28, %v3521_v39  ;;  %3015 = vmatprep.mubr.msk.bf16.mxu0 %vm512_vm0, %v3585_v53 }
 0x151   : > { %v616_v58 = vmul.f32 %v3270_v54, %v3529_v48  ;;  %v644_v62 = vadd.f32 %v2818_v41, %v629_v57 }
 0x152   : > { %v630_v59 = vmul.f32 %v2817_v32, %v615_v21  ;;  %v3591_v60 = vpack.c.bf16 %v643_v56, %v642_v55 }
 0x153   : > { %v3272_v29 = vpop.eup %3271  ;;  %v631_v39 = vmul.f32 %v2817_v32, %v616_v58 }
 0x154   : > { %v645_v63 = vadd.f32 %v2818_v41, %v630_v59  ;;  %v617_v1 = vmul.f32 %v3272_v29, %v3531_v49  ;;  %3016 = vmatmul.mubr.msk.bf16.vlgmr.msra.gmra.mrb[0].mxu0 %vm512_vm0, %v3591_v60  ;;  %v2839_v59 = vld [vmem:[%s4251_s4 + $0x4] ss:$0 sm:$0xff] }
 0x155   : > { %3024 = vmatpush3.bf16.msra.mxu0 %v3559_v0  ;;  %v646_v5 = vadd.f32 %v2818_v41, %v631_v39  ;;  %v2836_v0 = vld [vmem:[%s4250_s3 + $0x90] sm:$0xff] }
 0x156   : > { %v632_v48 = vmul.f32 %v2817_v32, %v617_v1  ;;  %v3603_v2 = vpack.c.bf16 %v645_v63, %v644_v62  ;;  %3025 = vmatprep.subr.bf16.mxu0 %v3570_v3 }
 0x158   : > { %v647_v6 = vadd.f32 %v2818_v41, %v632_v48  ;;  %3019 = vmatprep.mubr.msk.bf16.mxu0 %vm512_vm0, %v3603_v2  ;;  %3031 = vmatprep.mubr.msk.bf16.mxu1 %vm512_vm0, %v3603_v2 }
 0x159   : > { %3026 = vmatpush3.bf16.msra.mxu0 %v3570_v3  ;;  %v2837_v3 = vld [vmem:[%s4250_s3 + $0x98] sm:$0xff] }
 0x15a   : > { %v3611_v49 = vpack.c.bf16 %v647_v6, %v646_v5  ;;  %3035 = vmatprep.subr.bf16.mxu0 %v835_v4  ;;  %v836_v7 = vpack.c.bf16 %v2837_v3, %v2836_v0 }
 0x15c   : > { %3020 = vmatmul.mubr.msk.bf16.gmra.mrb[4].mxu0 %vm512_vm0, %v3611_v49  ;;  %3032 = vmatmul.mubr.msk.bf16.vlgmr.msra.gmra.mrb[0].mxu1 %vm512_vm0, %v3611_v49 }
 0x15d   : > { %3027 = vmatprep.mubr.msk.bf16.mxu0 %vm512_vm0, %v3585_v53  ;;  %3049 = vmatprep.mubr.msk.bf16.mxu1 %vm3386_vm1, %v3385_v8 }
 0x164   : > { %3028 = vmatmul.mubr.msk.bf16.vlgmr.msra.gmra.mrb[8].mxu0 %vm512_vm0, %v3591_v60 }
 0x165   : > { %3036 = vmatpush3.bf16.msra.mxu0 %v835_v4  ;;  %3039 = vmatprep.mubr.msk.bf16.mxu0 %vm512_vm0, %v3585_v53 }
 0x166   : > { %3037 = vmatprep.subr.bf16.mxu0 %v836_v7 }
 0x169   : > { %3038 = vmatpush3.bf16.msra.mxu0 %v836_v7 }
 0x16a   : > { %3059 = vmatprep.subr.bf16.mxu0 %v3385_v8 }
 0x16c   : > { %3040 = vmatmul.mubr.msk.bf16.vlgmr.msra.gmra.mrb[12].mxu0 %vm512_vm0, %v3591_v60 }
 0x16d   : > { %3043 = vmatprep.mubr.msk.bf16.mxu0 %vm512_vm0, %v3603_v2 }
 0x174   : > { %3044 = vmatmul.mubr.msk.bf16.gmra.mrb[16].mxu0 %vm512_vm0, %v3611_v49 }
 0x175   : > { %3061 = vmatprep.mubr.msk.bf16.mxu0 %vm3386_vm1, %v3385_v8 }
 0x227   : > { %v3017_v9 = vpop.f32.mrb[0].mxu0 }
 0x228   : > { %v719_v11 = vpop.f32.mrb[1].mxu0  ;;  %v3644_v13 = vadd.f32 %v3017_v9, %v2819_v10 }
 0x229   : > { %v3018_v12 = vpop.f32.mrb[2].mxu0  ;;  %v720_v16 = vadd.f32 %v2819_v10, %v719_v11 }
 0x22a   : > { %v3646_v14 = vadd.f32 %v3018_v12, %v2819_v10  ;;  %v722_v15 = vpop.f32.mrb[3].mxu0 }
 0x22b   : > { %v723_v17 = vadd.f32 %v2819_v10, %v722_v15 }
 0x22c   : > { %v911_v18 = vpack.c.bf16 %v3646_v14, %v3644_v13 }
 0x22d   : > { %v910_v19 = vpack.c.bf16 %v723_v17, %v720_v16 }
 0x22f   : > { %v3021_v22 = vpop.f32.mrb[4].mxu0  ;;  %v3033_v24 = vpop.f32.mrb[0].mxu1 }
 0x230   : > { %v735_v25 = vpop.f32.mrb[5].mxu0  ;;  %v815_v26 = vpop.f32.mrb[1].mxu1  ;;  %v3653_v31 = vadd.f32 %v3021_v22, %v2819_v10  ;;  %v824_v32 = vadd.f32 %v3033_v24, %v2829_v23 }
 0x231   : > { %v3022_v27 = vpop.f32.mrb[6].mxu0  ;;  %v3034_v30 = vpop.f32.mrb[2].mxu1  ;;  %v736_v37 = vadd.f32 %v2819_v10, %v735_v25  ;;  %v816_v40 = vadd.f32 %v2829_v23, %v815_v26 }
 0x232   : > { %v3655_v33 = vadd.f32 %v3022_v27, %v2819_v10  ;;  %v827_v34 = vadd.f32 %v3034_v30, %v2829_v23  ;;  %v738_v35 = vpop.f32.mrb[7].mxu0  ;;  %v818_v36 = vpop.f32.mrb[3].mxu1 }
 0x233   : > { %v739_v41 = vadd.f32 %v2819_v10, %v738_v35  ;;  %v819_v20 = vadd.f32 %v2829_v23, %v818_v36  ;;  %v3705_v36 = vld [vmem:[%s4253_s6 + $0x10] sm:$0xff] }
 0x234   : > { %v913_v42 = vpack.c.bf16 %v3655_v33, %v3653_v31  ;;  %v917_v43 = vpack.c.bf16 %v827_v34, %v824_v32  ;;  %v1115_v34 = vld [vmem:[%s4252_s5] sm:$0xff] }
 0x235   : > { %v912_v44 = vpack.c.bf16 %v739_v41, %v736_v37  ;;  %v916_v45 = vpack.c.bf16 %v819_v20, %v816_v40 }
 0x237   : > { %v3029_v46 = vpop.f32.mrb[8].mxu0  ;;  %v1017_v47 = vsel %vm918_vm2, %v916_v45, 0 }
 0x238   : > { %v799_v50 = vpop.f32.mrb[9].mxu0  ;;  %3060 = vmatpush3.bf16.xpose.msra.mxu0 %v1017_v47  ;;  %v808_v52 = vadd.f32 %v3029_v46, %v2829_v23 }
 0x239   : > { %v3030_v51 = vpop.f32.mrb[10].mxu0  ;;  %3071 = vmatprep.subr.bf16.mxu0 %v3385_v8  ;;  %v800_v55 = vadd.f32 %v2829_v23, %v799_v50  ;;  %v3724_v50 = vld [vmem:[%s4253_s6 + $0x8] sm:$0xff] }
 0x23a   : > { %v811_v28 = vadd.f32 %v3030_v51, %v2829_v23  ;;  %v802_v54 = vpop.f32.mrb[11].mxu0 }
 0x23b   : > { %v803_v56 = vadd.f32 %v2829_v23, %v802_v54 }
 0x23c   : > { %v915_v57 = vpack.c.bf16 %v811_v28, %v808_v52 }
 0x23d   : > { %v914_v21 = vpack.c.bf16 %v803_v56, %v800_v55 }
 0x23e   : > { %v970_v0 = vsel %vm918_vm2, %v915_v57, 0 }
 0x23f   : > { %v3041_v58 = vpop.f32.mrb[12].mxu0  ;;  %3062 = vmatmul.mubr.msk.bf16.vlgmr.msra.gmra.mrb[20].mxu0 %vm918_vm2, %v912_v44  ;;  %v923_v29 = vsel %vm918_vm2, %v914_v21, 0  ;;  %v3718_v44 = vld [vmem:[%s4253_s6] sm:$0xff] }
 0x240   : > { %v879_v38 = vpop.f32.mrb[13].mxu0  ;;  %3048 = vmatpush3.bf16.xpose.msra.mxu1 %v923_v29  ;;  %3073 = vmatprep.mubr.msk.bf16.mxu0 %vm3386_vm1, %v3385_v8  ;;  %v888_v62 = vadd.f32 %v3041_v58, %v2839_v59 }
 0x241   : > { %v3042_v61 = vpop.f32.mrb[14].mxu0  ;;  %3053 = vmatprep.subr.bf16.mxu1 %v3385_v8  ;;  %v880_v1 = vadd.f32 %v2839_v59, %v879_v38  ;;  %v3734_v38 = vld [vmem:[%s4253_s6 + $0x30] sm:$0xff] }
 0x242   : > { %v891_v63 = vadd.f32 %v3042_v61, %v2839_v59  ;;  %v882_v39 = vpop.f32.mrb[15].mxu0 }
 0x243   : > { %v883_v48 = vadd.f32 %v2839_v59, %v882_v39 }
 0x244   : > { %v1226_v4 = vpack.c.bf16 %v891_v63, %v888_v62 }
 0x245   : > { %v1225_v5 = vpack.c.bf16 %v883_v48, %v880_v1  ;;  %v3740_v48 = vld [vmem:[%s4253_s6 + $0x38] sm:$0xff] }
 0x247   : > { %v3045_v6 = vpop.f32.mrb[16].mxu0  ;;  %3050 = vmatmul.mubr.msk.bf16.vlgmr.msra.gmra.mrb[4].mxu1 %vm918_vm2, %v910_v19  ;;  %3072 = vmatpush3.bf16.msra.mxu0 %v1225_v5  ;;  %v1064_v19 = vsel %vm918_vm2, %v917_v43, 0  ;;  %v3713_v43 = vld [vmem:[%s4253_s6 + $0x18] sm:$0xff] }
 0x248   : > { %v3671_v3 = vadd.f32 %v3045_v6, %v2839_v59  ;;  %v895_v7 = vpop.f32.mrb[17].mxu0  ;;  %3054 = vmatpush3.bf16.xpose.msra.mxu1 %v970_v0  ;;  %3055 = vmatprep.mubr.msk.bf16.mxu1 %vm3386_vm1, %v3385_v8 }
 0x249   : > { %v3675_v9 = vadd.f32 %v2839_v59, %v895_v7  ;;  %v3046_v10 = vpop.f32.mrb[18].mxu0  ;;  %3065 = vmatprep.subr.bf16.mxu1 %v3385_v8  ;;  %3083 = vmatprep.subr.bf16.mxu0 %v3385_v8 }
 0x24a   : > { %v3679_v11 = vadd.f32 %v3046_v10, %v2839_v59  ;;  %v898_v12 = vpop.f32.mrb[19].mxu0  ;;  %v3752_v10 = vld [vmem:[%s4253_s6 + $0x28] sm:$0xff] }
 0x24b   : > { %v3681_v15 = vadd.f32 %v2839_v59, %v898_v12 }
 0x24c   : > { %v1228_v16 = vpack.c.bf16 %v3679_v11, %v3671_v3 }
 0x24d   : > { %v1227_v17 = vpack.c.bf16 %v3681_v15, %v3675_v9 }
 0x24f   : > { %3056 = vmatmul.mubr.msk.bf16.vlgmr.msra.gmra.mrb[8].mxu1 %vm918_vm2, %v911_v18 }
 0x250   : > { %3066 = vmatpush3.bf16.xpose.msra.mxu1 %v1064_v19  ;;  %3067 = vmatprep.mubr.msk.bf16.mxu1 %vm3386_vm1, %v3385_v8 }
 0x251   : > { %3077 = vmatprep.subr.bf16.mxu1 %v3385_v8 }
 0x257   : > { %3068 = vmatmul.mubr.msk.bf16.vlgmr.msra.gmra.mrb[12].mxu1 %vm918_vm2, %v913_v42  ;;  %v1116_v42 = vld [vmem:[%s4252_s5 + $0x8] sm:$0xff] }
 0x258   : > { %3078 = vmatpush3.bf16.msra.mxu1 %v1226_v4  ;;  %3079 = vmatprep.mubr.msk.bf16.mxu1 %vm3386_vm1, %v3385_v8  ;;  %v3745_v4 = vld [vmem:[%s4253_s6 + $0x20] sm:$0xff] }
 0x259   : > { %3089 = vmatprep.subr.bf16.mxu1 %v3385_v8 }
 0x312   : > { %v1053_v22 = vpop.f32.mrb[20].mxu0 }
 0x313   : > { %v3063_v13 = vpop.f32.mrb[21].mxu0  ;;  %v1111_v51 = vmul.f32 0.25, %v1053_v22 }
 0x314   : > { %v1056_v14 = vpop.f32.mrb[22].mxu0 }
 0x315   : > { %v3064_v18 = vpop.f32.mrb[23].mxu0  ;;  %v1112_v56 = vmul.f32 0.25, %v1056_v14  ;;  %v1121_v61 = vadd.f32 %v1115_v34, %v1111_v51 }
 0x317   : > { %v1122_v5 = vadd.f32 %v1116_v42, %v1112_v56  ;;  %v1129_v22 = vadd.f32 %v1121_v61, %v3745_v4 }
 0x319   : > { %v1130_v14 = vadd.f32 %v1122_v5, %v3752_v10  ;;  %v1145_v18 = vsel %vm918_vm2, %v1129_v22, -inf }
 0x31a   : > { %v959_v23 = vpop.f32.mrb[4].mxu1 }
 0x31b   : > { %v3051_v24 = vpop.f32.mrb[5].mxu1  ;;  %v1107_v27 = vmul.f32 0.25, %v959_v23  ;;  %v1148_v23 = vsel %vm918_vm2, %v1130_v14, -inf }
 0x31c   : > { %v962_v25 = vpop.f32.mrb[6].mxu1 }
 0x31d   : > { %v3052_v26 = vpop.f32.mrb[7].mxu1  ;;  %v1108_v31 = vmul.f32 0.25, %v962_v25  ;;  %v1117_v37 = vadd.f32 %v1115_v34, %v1107_v27 }
 0x31f   : > { %v1118_v45 = vadd.f32 %v1116_v42, %v1108_v31  ;;  %v1125_v54 = vadd.f32 %v1117_v37, %v3718_v44 }
 0x321   : > { %v1126_v59 = vadd.f32 %v1118_v45, %v3724_v50  ;;  %v1133_v1 = vsel %vm918_vm2, %v1125_v54, -inf }
 0x322   : > { %v1006_v30 = vpop.f32.mrb[8].mxu1 }
 0x323   : > { %v1109_v32 = vmul.f32 0.25, %v1006_v30  ;;  %v3057_v33 = vpop.f32.mrb[9].mxu1  ;;  %v1136_v0 = vsel %vm918_vm2, %v1126_v59, -inf }
 0x324   : > { %v1009_v35 = vpop.f32.mrb[10].mxu1 }
 0x325   : > { %v1119_v40 = vadd.f32 %v1115_v34, %v1109_v32  ;;  %v1110_v41 = vmul.f32 0.25, %v1009_v35  ;;  %v3058_v20 = vpop.f32.mrb[11].mxu1 }
 0x327   : > { %v1120_v46 = vadd.f32 %v1116_v42, %v1110_v41  ;;  %v1127_v47 = vadd.f32 %v1119_v40, %v3705_v36 }
 0x329   : > { %v1139_v52 = vsel %vm918_vm2, %v1127_v47, -inf  ;;  %v1128_v28 = vadd.f32 %v1120_v46, %v3713_v43 }
 0x32a   : > { %1140 = vmax.xlane.f32.xlu0 %v1139_v52  ;;  %v1100_v55 = vpop.f32.mrb[12].mxu1 }
 0x32b   : > { %v1113_v57 = vmul.f32 0.25, %v1100_v55  ;;  %v3069_v21 = vpop.f32.mrb[13].mxu1  ;;  %v1142_v58 = vsel %vm918_vm2, %v1128_v28, -inf }
 0x32c   : > { %1143 = vmax.xlane.f32.xlu1 %v1142_v58  ;;  %v1103_v29 = vpop.f32.mrb[14].mxu1 }
 0x32d   : > { %v1123_v62 = vadd.f32 %v1115_v34, %v1113_v57  ;;  %v1114_v63 = vmul.f32 0.25, %v1103_v29  ;;  %v3070_v39 = vpop.f32.mrb[15].mxu1 }
 0x32e   : > { %1134 = vmax.xlane.f32.xlu0 %v1133_v1 }
 0x32f   : > { %v1124_v6 = vadd.f32 %v1116_v42, %v1114_v63  ;;  %v1131_v7 = vadd.f32 %v1123_v62, %v3734_v38 }
 0x330   : > { %1137 = vmax.xlane.f32.xlu1 %v1136_v0 }
 0x331   : > { %v1151_v12 = vsel %vm918_vm2, %v1131_v7, -inf  ;;  %v1132_v19 = vadd.f32 %v1124_v6, %v3740_v48 }
 0x332   : > { %1152 = vmax.xlane.f32.xlu0 %v1151_v12 }
 0x333   : > { %v1154_v13 = vsel %vm918_vm2, %v1132_v19, -inf }
 0x334   : > { %1155 = vmax.xlane.f32.xlu1 %v1154_v13 }
 0x336   : > { %1146 = vmax.xlane.f32.xlu0 %v1145_v18 }
 0x338   : > { %1149 = vmax.xlane.f32.xlu1 %v1148_v23 }
 0x3b7   : > { %v1141_v24 = vpop.xlane.xlu0 %1140 }
 0x3b8   : > { %v1159_v25 = vsub.f32 %v1127_v47, %v1141_v24 }
 0x3b9   : > { %v1144_v26 = vpop.xlane.xlu1 %1143 }
 0x3ba   : > { %v1169_v27 = vmul.f32 1.442695, %v1159_v25  ;;  %v1160_v30 = vsub.f32 %v1128_v28, %v1144_v26 }
 0x3bb   : > { %v1135_v31 = vpop.xlane.xlu0 %1134 }
 0x3bc   : > { %3273 = vpow2.f32 %v1169_v27  ;;  %v1171_v32 = vmul.f32 1.442695, %v1160_v30  ;;  %v1157_v33 = vsub.f32 %v1125_v54, %v1135_v31  ;;  %v2862_v30 = vld [vmem:[%s4250_s3 + $0x60] sm:$0xff]  ;;  %v2863_v31 = vld [vmem:[%s4250_s3 + $0x68] sm:$0xff] }
 0x3bd   : > { %v1138_v34 = vpop.xlane.xlu1 %1137 }
 0x3be   : > { %3275 = vpow2.f32 %v1171_v32  ;;  %v1165_v35 = vmul.f32 1.442695, %v1157_v33  ;;  %v1158_v37 = vsub.f32 %v1126_v59, %v1138_v34 }
 0x3bf   : > { %v1153_v40 = vpop.xlane.xlu0 %1152 }
 0x3c0   : > { %3277 = vpow2.f32 %v1165_v35  ;;  %v1167_v41 = vmul.f32 1.442695, %v1158_v37  ;;  %v1163_v20 = vsub.f32 %v1131_v7, %v1153_v40  ;;  %v1497_v40 = vpack.c.bf16 %v2863_v31, %v2862_v30 }
 0x3c1   : > { %v1156_v42 = vpop.xlane.xlu1 %1155 }
 0x3c2   : > { %3279 = vpow2.f32 %v1167_v41  ;;  %v1177_v45 = vmul.f32 1.442695, %v1163_v20  ;;  %v1164_v46 = vsub.f32 %v1132_v19, %v1156_v42  ;;  %v2852_v20 = vld [vmem:[%s4250_s3 + $0x20] sm:$0xff]  ;;  %v2853_v42 = vld [vmem:[%s4250_s3 + $0x28] sm:$0xff] }
 0x3c3   : > { %v1147_v47 = vpop.xlane.xlu0 %1146 }
 0x3c4   : > { %3281 = vpow2.f32 %v1177_v45  ;;  %v1179_v51 = vmul.f32 1.442695, %v1164_v46  ;;  %v1161_v52 = vsub.f32 %v1129_v22, %v1147_v47 }
 0x3c5   : > { %v1150_v28 = vpop.xlane.xlu1 %1149 }
 0x3c6   : > { %v3274_v55 = vpop.eup %3273  ;;  %3283 = vpow2.f32 %v1179_v51  ;;  %v1173_v54 = vmul.f32 1.442695, %v1161_v52  ;;  %v1162_v56 = vsub.f32 %v1130_v14, %v1150_v28  ;;  %v1417_v52 = vpack.c.bf16 %v2853_v42, %v2852_v20  ;;  %v2857_v42 = vld [vmem:[%s4251_s4 + $0x1] ss:$0 sm:$0xff] }
 0x3c7   : > { %v1187_v57 = vsel %vm918_vm2, %v3274_v55, 0.0 }
 0x3c8   : > { %v3276_v21 = vpop.eup %3275  ;;  %3285 = vpow2.f32 %v1173_v54  ;;  %v1175_v58 = vmul.f32 1.442695, %v1162_v56  ;;  %1188 = vadd.xlane.f32.xlu0 %v1187_v57  ;;  %v2865_v54 = vld [vmem:[%s4250_s3 + $0x78] sm:$0xff] }
 0x3c9   : > { %v1190_v59 = vsel %vm918_vm2, %v3276_v21, 0.0 }
 0x3ca   : > { %v3278_v29 = vpop.eup %3277  ;;  %3287 = vpow2.f32 %v1175_v58  ;;  %1191 = vadd.xlane.f32.xlu1 %v1190_v59  ;;  %v2854_v58 = vld [vmem:[%s4250_s3 + $0x30] sm:$0xff]  ;;  %v2855_v59 = vld [vmem:[%s4250_s3 + $0x38] sm:$0xff] }
 0x3cb   : > { %v1181_v61 = vsel %vm918_vm2, %v3278_v29, 0.0  ;;  %v1418_v15 = vpack.c.bf16 %v2855_v59, %v2854_v58 }
 0x3cc   : > { %v3280_v62 = vpop.eup %3279  ;;  %1182 = vadd.xlane.f32.xlu0 %v1181_v61 }
 0x3cd   : > { %v1184_v63 = vsel %vm918_vm2, %v3280_v62, 0.0 }
 0x3ce   : > { %v3282_v39 = vpop.eup %3281  ;;  %1185 = vadd.xlane.f32.xlu1 %v1184_v63 }
 0x3cf   : > { %v1199_v1 = vsel %vm918_vm2, %v3282_v39, 0.0 }
 0x3d0   : > { %v3284_v5 = vpop.eup %3283  ;;  %1200 = vadd.xlane.f32.xlu0 %v1199_v1  ;;  %v2875_v1 = vld [vmem:[%s4250_s3 + $0xb8] sm:$0xff] }
 0x3d1   : > { %v1202_v6 = vsel %vm918_vm2, %v3284_v5, 0.0 }
 0x3d2   : > { %v3286_v0 = vpop.eup %3285  ;;  %1203 = vadd.xlane.f32.xlu1 %v1202_v6 }
 0x3d3   : > { %v1193_v7 = vsel %vm918_vm2, %v3286_v0, 0.0 }
 0x3d4   : > { %v3288_v12 = vpop.eup %3287  ;;  %1194 = vadd.xlane.f32.xlu0 %v1193_v7 }
 0x3d5   : > { %v1196_v19 = vsel %vm918_vm2, %v3288_v12, 0.0 }
 0x3d6   : > { %1197 = vadd.xlane.f32.xlu1 %v1196_v19 }
 0x455   : > { %v1189_v22 = vpop.xlane.xlu0 %1188 }
 0x456   : > { %3289 = vrcp.f32 %v1189_v22 }
 0x457   : > { %v1192_v13 = vpop.xlane.xlu1 %1191 }
 0x458   : > { %3291 = vrcp.f32 %v1192_v13 }
 0x459   : > { %v1183_v14 = vpop.xlane.xlu0 %1182 }
 0x45a   : > { %3293 = vrcp.f32 %v1183_v14 }
 0x45b   : > { %v1186_v18 = vpop.xlane.xlu1 %1185 }
 0x45c   : > { %3295 = vrcp.f32 %v1186_v18 }
 0x45d   : > { %v1201_v23 = vpop.xlane.xlu0 %1200 }
 0x45e   : > { %3297 = vrcp.f32 %v1201_v23 }
 0x45f   : > { %v1204_v24 = vpop.xlane.xlu1 %1203 }
 0x460   : > { %v3290_v25 = vpop.eup %3289  ;;  %3299 = vrcp.f32 %v1204_v24 }
 0x461   : > { %v1195_v26 = vpop.xlane.xlu0 %1194  ;;  %v1215_v32 = vmul.f32 %v3290_v25, %v3274_v55  ;;  %v2864_v55 = vld [vmem:[%s4250_s3 + $0x70] sm:$0xff] }
 0x462   : > { %v3292_v27 = vpop.eup %3291  ;;  %3301 = vrcp.f32 %v1195_v26 }
 0x463   : > { %v1216_v33 = vmul.f32 %v3292_v27, %v3276_v21  ;;  %v1198_v34 = vpop.xlane.xlu1 %1197 }
 0x464   : > { %v3294_v35 = vpop.eup %3293  ;;  %3303 = vrcp.f32 %v1198_v34 }
 0x465   : > { %v1222_v37 = vpack.c.bf16 %v1216_v33, %v1215_v32  ;;  %v1213_v45 = vmul.f32 %v3294_v35, %v3278_v29  ;;  %v2867_v33 = vld [vmem:[%s4251_s4 + $0x3] ss:$0 sm:$0xff] }
 0x466   : > { %v3296_v41 = vpop.eup %3295 }
 0x467   : > { %v1214_v46 = vmul.f32 %v3296_v41, %v3280_v62  ;;  %3080 = vmatmul.mubr.msk.bf16.vlgmr.msra.gmra.mrb[16].mxu1 %vm918_vm2, %v1222_v37  ;;  %v2873_v62 = vld [vmem:[%s4250_s3 + $0xa8] sm:$0xff] }
 0x468   : > { %v3298_v47 = vpop.eup %3297  ;;  %3090 = vmatpush3.bf16.msra.mxu1 %v1228_v16  ;;  %3091 = vmatprep.mubr.msk.bf16.mxu1 %vm3386_vm1, %v3385_v8  ;;  %v1498_v16 = vpack.c.bf16 %v2865_v54, %v2864_v55 }
 0x469   : > { %v1221_v51 = vpack.c.bf16 %v1214_v46, %v1213_v45  ;;  %3107 = vmatprep.subr.bf16.mxu1 %v1497_v40  ;;  %v1219_v56 = vmul.f32 %v3298_v47, %v3282_v39  ;;  %v2874_v39 = vld [vmem:[%s4250_s3 + $0xb0] sm:$0xff] }
 0x46a   : > { %v3300_v28 = vpop.eup %3299 }
 0x46b   : > { %v1220_v57 = vmul.f32 %v3300_v28, %v3284_v5  ;;  %3074 = vmatmul.mubr.msk.bf16.vlgmr.msra.gmra.mrb[24].mxu0 %vm918_vm2, %v1221_v51  ;;  %v1578_v5 = vpack.c.bf16 %v2875_v1, %v2874_v39 }
 0x46c   : > { %v3302_v3 = vpop.eup %3301  ;;  %3084 = vmatpush3.bf16.msra.mxu0 %v1227_v17  ;;  %3085 = vmatprep.mubr.msk.bf16.mxu0 %vm3386_vm1, %v3385_v8  ;;  %v2872_v17 = vld [vmem:[%s4250_s3 + $0xa0] sm:$0xff] }
 0x46d   : > { %v1224_v11 = vpack.c.bf16 %v1220_v57, %v1219_v56  ;;  %3095 = vmatprep.subr.bf16.mxu0 %v1417_v52  ;;  %v1217_v29 = vmul.f32 %v3302_v3, %v3286_v0  ;;  %v1577_v63 = vpack.c.bf16 %v2873_v62, %v2872_v17 }
 0x46e   : > { %v3304_v21 = vpop.eup %3303 }
 0x46f   : > { %v1218_v61 = vmul.f32 %v3304_v21, %v3288_v12  ;;  %3092 = vmatmul.mubr.msk.bf16.vlgmr.msra.gmra.mrb[20].mxu1 %vm918_vm2, %v1224_v11 }
 0x470   : > { %3108 = vmatpush3.bf16.msra.mxu1 %v1497_v40  ;;  %3111 = vmatprep.mubr.msk.bf16.mxu1 %vm512_vm0, %v3585_v53 }
 0x471   : > { %v1223_v9 = vpack.c.bf16 %v1218_v61, %v1217_v29  ;;  %3109 = vmatprep.subr.bf16.mxu1 %v1498_v16 }
 0x473   : > { %3086 = vmatmul.mubr.msk.bf16.vlgmr.msra.gmra.mrb[28].mxu0 %vm918_vm2, %v1223_v9 }
 0x474   : > { %3096 = vmatpush3.bf16.msra.mxu0 %v1417_v52  ;;  %3099 = vmatprep.mubr.msk.bf16.mxu0 %vm512_vm0, %v3585_v53 }
 0x475   : > { %3110 = vmatpush3.bf16.msra.mxu1 %v1498_v16  ;;  %3097 = vmatprep.subr.bf16.mxu0 %v1418_v15 }
 0x476   : > { %3131 = vmatprep.subr.bf16.mxu1 %v3385_v8 }
 0x478   : > { %3112 = vmatmul.mubr.msk.bf16.vlgmr.msra.gmra.mrb[24].mxu1 %vm512_vm0, %v3591_v60  ;;  %3098 = vmatpush3.bf16.msra.mxu0 %v1418_v15 }
 0x479   : > { %3115 = vmatprep.mubr.msk.bf16.mxu1 %vm512_vm0, %v3603_v2  ;;  %3119 = vmatprep.subr.bf16.mxu0 %v1577_v63 }
 0x47b   : > { %3100 = vmatmul.mubr.msk.bf16.vlgmr.msra.gmra.mrb[32].mxu0 %vm512_vm0, %v3591_v60 }
 0x47c   : > { %3103 = vmatprep.mubr.msk.bf16.mxu0 %vm512_vm0, %v3603_v2  ;;  %3120 = vmatpush3.bf16.msra.mxu0 %v1577_v63 }
 0x47d   : > { %3121 = vmatprep.subr.bf16.mxu0 %v1578_v5 }
 0x480   : > { %3116 = vmatmul.mubr.msk.bf16.gmra.mrb[28].mxu1 %vm512_vm0, %v3611_v49  ;;  %3122 = vmatpush3.bf16.msra.mxu0 %v1578_v5 }
 0x481   : > { %3133 = vmatprep.mubr.msk.bf16.mxu1 %vm3386_vm1, %v3385_v8  ;;  %3143 = vmatprep.subr.bf16.mxu0 %v3385_v8 }
 0x483   : > { %3104 = vmatmul.mubr.msk.bf16.gmra.mrb[36].mxu0 %vm512_vm0, %v3611_v49 }
 0x484   : > { %3123 = vmatprep.mubr.msk.bf16.mxu0 %vm512_vm0, %v3585_v53 }
 0x48b   : > { %3124 = vmatmul.mubr.msk.bf16.vlgmr.msra.gmra.mrb[40].mxu0 %vm512_vm0, %v3591_v60 }
 0x48c   : > { %3127 = vmatprep.mubr.msk.bf16.mxu0 %vm512_vm0, %v3603_v2 }
 0x493   : > { %3128 = vmatmul.mubr.msk.bf16.gmra.mrb[44].mxu0 %vm512_vm0, %v3611_v49 }
 0x494   : > { %3145 = vmatprep.mubr.msk.bf16.mxu0 %vm3386_vm1, %v3385_v8 }
 0x53a   : > { %v3849_v6 = vpop.f32.mrb[16].mxu1 }
 0x53b   : > { %v3081_v0 = vpop.f32.mrb[17].mxu1 }
 0x53c   : > { %v3851_v7 = vpop.f32.mrb[18].mxu1 }
 0x53d   : > { %v1406_v53 = vpack.c.bf16 %v3851_v7, %v3849_v6  ;;  %v3082_v12 = vpop.f32.mrb[19].mxu1  ;;  %v3369_v6 = vld [vmem:[%s3483_s24 + $0x10] sm:$0xff] }
 0x53e   : > { %v3855_v19 = vpop.f32.mrb[24].mxu0 }
 0x53f   : > { %v3075_v60 = vpop.f32.mrb[25].mxu0 }
 0x540   : > { %v3857_v22 = vpop.f32.mrb[26].mxu0 }
 0x541   : > { %v1405_v2 = vpack.c.bf16 %v3857_v22, %v3855_v19  ;;  %v3076_v49 = vpop.f32.mrb[27].mxu0  ;;  %v2902_v19 = vld [vmem:[%s4255_s8] ss:$0 sm:$0xff] }
 0x542   : > { %v3861_v13 = vpop.f32.mrb[20].mxu1 }
 0x543   : > { %v3093_v14 = vpop.f32.mrb[21].mxu1 }
 0x544   : > { %v3863_v18 = vpop.f32.mrb[22].mxu1 }
 0x545   : > { %v1408_v23 = vpack.c.bf16 %v3863_v18, %v3861_v13  ;;  %v3094_v24 = vpop.f32.mrb[23].mxu1  ;;  %v3372_v18 = vld [vmem:[%s3483_s24 + $0x8] sm:$0xff] }
 0x546   : > { %v3867_v25 = vpop.f32.mrb[28].mxu0 }
 0x547   : > { %v3087_v26 = vpop.f32.mrb[29].mxu0 }
 0x548   : > { %v3869_v27 = vpop.f32.mrb[30].mxu0 }
 0x549   : > { %v1407_v30 = vpack.c.bf16 %v3869_v27, %v3867_v25  ;;  %v3088_v31 = vpop.f32.mrb[31].mxu0 }
 0x54b   : > { %v3113_v32 = vpop.f32.mrb[24].mxu1 }
 0x54c   : > { %v1541_v34 = vpop.f32.mrb[25].mxu1  ;;  %v1550_v37 = vadd.f32 %v3113_v32, %v2867_v33 }
 0x54d   : > { %v3114_v35 = vpop.f32.mrb[26].mxu1  ;;  %v1542_v45 = vadd.f32 %v2867_v33, %v1541_v34 }
 0x54e   : > { %v1553_v40 = vadd.f32 %v3114_v35, %v2867_v33  ;;  %v1544_v41 = vpop.f32.mrb[27].mxu1  ;;  %v3101_v20 = vpop.f32.mrb[32].mxu0  ;;  %v2877_v35 = vld [vmem:[%s4251_s4 + $0x5] ss:$0 sm:$0xff] }
 0x54f   : > { %v1545_v46 = vadd.f32 %v2867_v33, %v1544_v41  ;;  %v1461_v47 = vpop.f32.mrb[33].mxu0  ;;  %v1470_v55 = vadd.f32 %v3101_v20, %v2857_v42 }
 0x550   : > { %v1657_v51 = vpack.c.bf16 %v1553_v40, %v1550_v37  ;;  %v3102_v52 = vpop.f32.mrb[34].mxu0  ;;  %v1462_v57 = vadd.f32 %v2857_v42, %v1461_v47 }
 0x551   : > { %v1656_v28 = vpack.c.bf16 %v1545_v46, %v1542_v45  ;;  %v1473_v54 = vadd.f32 %v3102_v52, %v2857_v42  ;;  %v1464_v56 = vpop.f32.mrb[35].mxu0 }
 0x552   : > { %v1465_v3 = vadd.f32 %v2857_v42, %v1464_v56  ;;  %v1711_v31 = vsel %vm918_vm2, %v1657_v51, 0 }
 0x553   : > { %v1653_v11 = vpack.c.bf16 %v1473_v54, %v1470_v55  ;;  %v3117_v16 = vpop.f32.mrb[28].mxu1  ;;  %v1664_v21 = vsel %vm918_vm2, %v1656_v28, 0 }
 0x554   : > { %v1652_v58 = vpack.c.bf16 %v1465_v3, %v1462_v57  ;;  %v1557_v59 = vpop.f32.mrb[29].mxu1  ;;  %3132 = vmatpush3.bf16.xpose.msra.mxu1 %v1664_v21  ;;  %v1566_v61 = vadd.f32 %v3117_v16, %v2867_v33 }
 0x555   : > { %v3118_v29 = vpop.f32.mrb[30].mxu1  ;;  %3137 = vmatprep.subr.bf16.mxu1 %v3385_v8  ;;  %v1558_v62 = vadd.f32 %v2867_v33, %v1557_v59 }
 0x556   : > { %v1569_v9 = vadd.f32 %v3118_v29, %v2867_v33  ;;  %v1560_v15 = vpop.f32.mrb[31].mxu1  ;;  %v3105_v17 = vpop.f32.mrb[36].mxu0  ;;  %v2886_v29 = vld [vmem:[%s4252_s5 + $0x10] sm:$0xff] }
 0x557   : > { %v1561_v63 = vadd.f32 %v2867_v33, %v1560_v15  ;;  %v1477_v39 = vpop.f32.mrb[37].mxu0  ;;  %v1486_v12 = vadd.f32 %v3105_v17, %v2857_v42  ;;  %v2887_v17 = vld [vmem:[%s4252_s5 + $0x18] sm:$0xff] }
 0x558   : > { %v1659_v1 = vpack.c.bf16 %v1569_v9, %v1566_v61  ;;  %v3106_v5 = vpop.f32.mrb[38].mxu0  ;;  %v1478_v14 = vadd.f32 %v2857_v42, %v1477_v39 }
 0x559   : > { %v1658_v0 = vpack.c.bf16 %v1561_v63, %v1558_v62  ;;  %v1489_v60 = vadd.f32 %v3106_v5, %v2857_v42  ;;  %v1480_v49 = vpop.f32.mrb[39].mxu0 }
 0x55a   : > { %v1481_v24 = vadd.f32 %v2857_v42, %v1480_v49  ;;  %v1805_v51 = vsel %vm918_vm2, %v1659_v1, 0 }
 0x55b   : > { %v1655_v26 = vpack.c.bf16 %v1489_v60, %v1486_v12  ;;  %3134 = vmatmul.mubr.msk.bf16.vlgmr.msra.gmra.mrb[32].mxu1 %vm918_vm2, %v1652_v58  ;;  %v1758_v32 = vsel %vm918_vm2, %v1658_v0, 0 }
 0x55c   : > { %v1654_v34 = vpack.c.bf16 %v1481_v24, %v1478_v14  ;;  %3138 = vmatpush3.bf16.xpose.msra.mxu1 %v1711_v31  ;;  %3144 = vmatpush3.bf16.xpose.msra.mxu0 %v1758_v32 }
 0x55d   : > { %3139 = vmatprep.mubr.msk.bf16.mxu1 %vm3386_vm1, %v3385_v8  ;;  %3149 = vmatprep.subr.bf16.mxu1 %v3385_v8 }
 0x55e   : > { %v3125_v33 = vpop.f32.mrb[40].mxu0  ;;  %3155 = vmatprep.subr.bf16.mxu0 %v3385_v8 }
 0x55f   : > { %v1621_v37 = vpop.f32.mrb[41].mxu0  ;;  %v1630_v41 = vadd.f32 %v3125_v33, %v2877_v35 }
 0x560   : > { %v3126_v40 = vpop.f32.mrb[42].mxu0  ;;  %v1622_v45 = vadd.f32 %v2877_v35, %v1621_v37 }
 0x561   : > { %v1633_v20 = vadd.f32 %v3126_v40, %v2877_v35  ;;  %v1624_v42 = vpop.f32.mrb[43].mxu0 }
 0x562   : > { %v1625_v46 = vadd.f32 %v2877_v35, %v1624_v42 }
 0x563   : > { %v1968_v47 = vpack.c.bf16 %v1633_v20, %v1630_v41  ;;  %3140 = vmatmul.mubr.msk.bf16.vlgmr.msra.gmra.mrb[36].mxu1 %vm918_vm2, %v1653_v11  ;;  %3146 = vmatmul.mubr.msk.bf16.vlgmr.msra.gmra.mrb[48].mxu0 %vm918_vm2, %v1654_v34 }
 0x564   : > { %v1967_v52 = vpack.c.bf16 %v1625_v46, %v1622_v45  ;;  %3150 = vmatpush3.bf16.xpose.msra.mxu1 %v1805_v51  ;;  %3151 = vmatprep.mubr.msk.bf16.mxu1 %vm3386_vm1, %v3385_v8 }
 0x565   : > { %3161 = vmatprep.subr.bf16.mxu1 %v3385_v8  ;;  %3157 = vmatprep.mubr.msk.bf16.mxu0 %vm3386_vm1, %v3385_v8 }
 0x566   : > { %v3129_v28 = vpop.f32.mrb[44].mxu0  ;;  %3156 = vmatpush3.bf16.msra.mxu0 %v1967_v52 }
 0x567   : > { %v3899_v55 = vadd.f32 %v3129_v28, %v2877_v35  ;;  %v1637_v54 = vpop.f32.mrb[45].mxu0  ;;  %3167 = vmatprep.subr.bf16.mxu0 %v3385_v8 }
 0x568   : > { %v3902_v56 = vadd.f32 %v2877_v35, %v1637_v54  ;;  %v3130_v57 = vpop.f32.mrb[46].mxu0 }
 0x569   : > { %v3904_v3 = vadd.f32 %v3130_v57, %v2877_v35  ;;  %v1640_v11 = vpop.f32.mrb[47].mxu0 }
 0x56a   : > { %v3906_v16 = vadd.f32 %v2877_v35, %v1640_v11 }
 0x56b   : > { %v1970_v21 = vpack.c.bf16 %v3904_v3, %v3899_v55  ;;  %3152 = vmatmul.mubr.msk.bf16.vlgmr.msra.gmra.mrb[40].mxu1 %vm918_vm2, %v1655_v26  ;;  %v2893_v55 = vld [vmem:[%s4254_s7 + $0x18] sm:$0xff] }
 0x56c   : > { %v1969_v58 = vpack.c.bf16 %v3906_v16, %v3902_v56  ;;  %3162 = vmatpush3.bf16.msra.mxu1 %v1968_v47  ;;  %3163 = vmatprep.mubr.msk.bf16.mxu1 %vm3386_vm1, %v3385_v8 }
 0x56d   : > { %3173 = vmatprep.subr.bf16.mxu1 %v3385_v8 }
 0x62e   : > { %v1700_v59 = vpop.f32.mrb[32].mxu1 }
 0x62f   : > { %v1848_v61 = vmul.f32 0.25, %v1700_v59  ;;  %v3135_v9 = vpop.f32.mrb[33].mxu1 }
 0x630   : > { %v1703_v15 = vpop.f32.mrb[34].mxu1 }
 0x631   : > { %v1859_v62 = vadd.f32 %v2886_v29, %v1848_v61  ;;  %v1849_v63 = vmul.f32 0.25, %v1703_v15  ;;  %v3136_v39 = vpop.f32.mrb[35].mxu1 }
 0x633   : > { %v1860_v1 = vadd.f32 %v2887_v17, %v1849_v63  ;;  %v1867_v5 = vadd.f32 %v1859_v62, %v3718_v44 }
 0x635   : > { %v1875_v0 = vsel %vm918_vm2, %v1867_v5, -inf  ;;  %v1868_v12 = vadd.f32 %v1860_v1, %v3724_v50 }
 0x636   : > { %v1794_v60 = vpop.f32.mrb[48].mxu0  ;;  %1876 = vmax.xlane.f32.xlu0 %v1875_v0  ;;  %v1747_v49 = vpop.f32.mrb[36].mxu1 }
 0x637   : > { %v1852_v14 = vmul.f32 0.25, %v1794_v60  ;;  %v1850_v24 = vmul.f32 0.25, %v1747_v49  ;;  %v3141_v26 = vpop.f32.mrb[37].mxu1  ;;  %v3147_v31 = vpop.f32.mrb[49].mxu0  ;;  %v1878_v32 = vsel %vm918_vm2, %v1868_v12, -inf }
 0x638   : > { %v1797_v34 = vpop.f32.mrb[50].mxu0  ;;  %1879 = vmax.xlane.f32.xlu1 %v1878_v32  ;;  %v1750_v33 = vpop.f32.mrb[38].mxu1 }
 0x639   : > { %v1863_v35 = vadd.f32 %v2886_v29, %v1852_v14  ;;  %v1861_v37 = vadd.f32 %v2886_v29, %v1850_v24  ;;  %v1853_v40 = vmul.f32 0.25, %v1797_v34  ;;  %v1851_v44 = vmul.f32 0.25, %v1750_v33  ;;  %v3142_v41 = vpop.f32.mrb[39].mxu1  ;;  %v3148_v20 = vpop.f32.mrb[51].mxu0 }
 0x63b   : > { %v1864_v42 = vadd.f32 %v2887_v17, %v1853_v40  ;;  %v1862_v50 = vadd.f32 %v2887_v17, %v1851_v44  ;;  %v1869_v45 = vadd.f32 %v1861_v37, %v3705_v36  ;;  %v1871_v51 = vadd.f32 %v1863_v35, %v3745_v4 }
 0x63d   : > { %v1881_v46 = vsel %vm918_vm2, %v1869_v45, -inf  ;;  %v1870_v47 = vadd.f32 %v1862_v50, %v3713_v43  ;;  %v1872_v11 = vadd.f32 %v1864_v42, %v3752_v10  ;;  %v1887_v36 = vsel %vm918_vm2, %v1871_v51, -inf }
 0x63e   : > { %1882 = vmax.xlane.f32.xlu0 %v1881_v46  ;;  %v1841_v52 = vpop.f32.mrb[40].mxu1 }
 0x63f   : > { %v1854_v28 = vmul.f32 0.25, %v1841_v52  ;;  %v3153_v54 = vpop.f32.mrb[41].mxu1  ;;  %v1884_v57 = vsel %vm918_vm2, %v1870_v47, -inf  ;;  %v1890_v43 = vsel %vm918_vm2, %v1872_v11, -inf }
 0x640   : > { %1885 = vmax.xlane.f32.xlu1 %v1884_v57  ;;  %v1844_v59 = vpop.f32.mrb[42].mxu1 }
 0x641   : > { %v1865_v61 = vadd.f32 %v2886_v29, %v1854_v28  ;;  %v1855_v9 = vmul.f32 0.25, %v1844_v59  ;;  %v3154_v15 = vpop.f32.mrb[43].mxu1 }
 0x642   : > { %1888 = vmax.xlane.f32.xlu0 %v1887_v36 }
 0x643   : > { %v1866_v62 = vadd.f32 %v2887_v17, %v1855_v9  ;;  %v1873_v4 = vadd.f32 %v1865_v61, %v3734_v38 }
 0x644   : > { %1891 = vmax.xlane.f32.xlu1 %v1890_v43 }
 0x645   : > { %v1893_v63 = vsel %vm918_vm2, %v1873_v4, -inf  ;;  %v1874_v39 = vadd.f32 %v1866_v62, %v3740_v48 }
 0x646   : > { %1894 = vmax.xlane.f32.xlu0 %v1893_v63 }
 0x647   : > { %v1896_v10 = vsel %vm918_vm2, %v1874_v39, -inf }
 0x648   : > { %1897 = vmax.xlane.f32.xlu1 %v1896_v10 }
 0x6c3   : > { %v1877_v29 = vpop.xlane.xlu0 %1876 }
 0x6c4   : > { %v1899_v1 = vsub.f32 %v1867_v5, %v1877_v29 }
 0x6c5   : > { %v1880_v0 = vpop.xlane.xlu1 %1879 }
 0x6c6   : > { %v1907_v60 = vmul.f32 1.442695, %v1899_v1  ;;  %v1900_v49 = vsub.f32 %v1868_v12, %v1880_v0 }
 0x6c8   : > { %3305 = vpow2.f32 %v1907_v60  ;;  %v1909_v17 = vmul.f32 1.442695, %v1900_v49 }
 0x6ca   : > { %3307 = vpow2.f32 %v1909_v17 }
 0x6cb   : > { %v1883_v14 = vpop.xlane.xlu0 %1882 }
 0x6cc   : > { %v1901_v24 = vsub.f32 %v1869_v45, %v1883_v14 }
 0x6cd   : > { %v1886_v38 = vpop.xlane.xlu1 %1885 }
 0x6ce   : > { %v1911_v26 = vmul.f32 1.442695, %v1901_v24  ;;  %v1902_v31 = vsub.f32 %v1870_v47, %v1886_v38 }
 0x6cf   : > { %v1889_v32 = vpop.xlane.xlu0 %1888 }
 0x6d0   : > { %3309 = vpow2.f32 %v1911_v26  ;;  %v1913_v48 = vmul.f32 1.442695, %v1902_v31  ;;  %v1903_v34 = vsub.f32 %v1871_v51, %v1889_v32 }
 0x6d1   : > { %v1892_v33 = vpop.xlane.xlu1 %1891 }
 0x6d2   : > { %v3306_v35 = vpop.eup %3305  ;;  %3311 = vpow2.f32 %v1913_v48  ;;  %v1915_v37 = vmul.f32 1.442695, %v1903_v34  ;;  %v1904_v5 = vsub.f32 %v1872_v11, %v1892_v33 }
 0x6d3   : > { %v1895_v40 = vpop.xlane.xlu0 %1894  ;;  %v1923_v12 = vsel %vm918_vm2, %v3306_v35, 0.0 }
 0x6d4   : > { %v3308_v44 = vpop.eup %3307  ;;  %3313 = vpow2.f32 %v1915_v37  ;;  %v1917_v41 = vmul.f32 1.442695, %v1904_v5  ;;  %v1905_v20 = vsub.f32 %v1873_v4, %v1895_v40  ;;  %1924 = vadd.xlane.f32.xlu0 %v1923_v12 }
 0x6d5   : > { %v1898_v42 = vpop.xlane.xlu1 %1897  ;;  %v1926_v50 = vsel %vm918_vm2, %v3308_v44, 0.0 }
 0x6d6   : > { %3315 = vpow2.f32 %v1917_v41  ;;  %v1919_v45 = vmul.f32 1.442695, %v1905_v20  ;;  %v1906_v46 = vsub.f32 %v1874_v39, %v1898_v42  ;;  %1927 = vadd.xlane.f32.xlu1 %v1926_v50 }
 0x6d8   : > { %3317 = vpow2.f32 %v1919_v45  ;;  %v1921_v47 = vmul.f32 1.442695, %v1906_v46 }
 0x6da   : > { %v3310_v51 = vpop.eup %3309  ;;  %3319 = vpow2.f32 %v1921_v47 }
 0x6db   : > { %v1929_v52 = vsel %vm918_vm2, %v3310_v51, 0.0 }
 0x6dc   : > { %v3312_v28 = vpop.eup %3311  ;;  %1930 = vadd.xlane.f32.xlu0 %v1929_v52 }
 0x6dd   : > { %v1932_v54 = vsel %vm918_vm2, %v3312_v28, 0.0 }
 0x6de   : > { %v3314_v57 = vpop.eup %3313  ;;  %1933 = vadd.xlane.f32.xlu1 %v1932_v54 }
 0x6df   : > { %v1935_v11 = vsel %vm918_vm2, %v3314_v57, 0.0 }
 0x6e0   : > { %v3316_v59 = vpop.eup %3315  ;;  %1936 = vadd.xlane.f32.xlu0 %v1935_v11 }
 0x6e1   : > { %v1938_v61 = vsel %vm918_vm2, %v3316_v59, 0.0 }
 0x6e2   : > { %v3318_v9 = vpop.eup %3317  ;;  %1939 = vadd.xlane.f32.xlu1 %v1938_v61 }
 0x6e3   : > { %v1941_v15 = vsel %vm918_vm2, %v3318_v9, 0.0 }
 0x6e4   : > { %v3320_v36 = vpop.eup %3319  ;;  %1942 = vadd.xlane.f32.xlu0 %v1941_v15 }
 0x6e5   : > { %v1944_v62 = vsel %vm918_vm2, %v3320_v36, 0.0 }
 0x6e6   : > { %1945 = vadd.xlane.f32.xlu1 %v1944_v62 }
 0x761   : > { %v1925_v43 = vpop.xlane.xlu0 %1924 }
 0x762   : > { %3321 = vrcp.f32 %v1925_v43 }
 0x763   : > { %v1928_v4 = vpop.xlane.xlu1 %1927 }
 0x764   : > { %3323 = vrcp.f32 %v1928_v4 }
 0x769   : > { %v1931_v63 = vpop.xlane.xlu0 %1930 }
 0x76a   : > { %3325 = vrcp.f32 %v1931_v63 }
 0x76b   : > { %v1934_v39 = vpop.xlane.xlu1 %1933 }
 0x76c   : > { %v3322_v10 = vpop.eup %3321  ;;  %3327 = vrcp.f32 %v1934_v39 }
 0x76d   : > { %v1937_v29 = vpop.xlane.xlu0 %1936  ;;  %v1955_v0 = vmul.f32 %v3322_v10, %v3306_v35 }
 0x76e   : > { %v3324_v1 = vpop.eup %3323  ;;  %3329 = vrcp.f32 %v1937_v29 }
 0x76f   : > { %v1956_v60 = vmul.f32 %v3324_v1, %v3308_v44  ;;  %v1940_v49 = vpop.xlane.xlu1 %1939  ;;  %v2892_v44 = vld [vmem:[%s4254_s7 + $0x10] sm:$0xff] }
 0x770   : > { %3331 = vrcp.f32 %v1940_v49  ;;  %v2154_v3 = vpack.c.bf16 %v2893_v55, %v2892_v44 }
 0x771   : > { %v1943_v17 = vpop.xlane.xlu0 %1942  ;;  %v1963_v14 = vpack.c.bf16 %v1956_v60, %v1955_v0 }
 0x772   : > { %3333 = vrcp.f32 %v1943_v17 }
 0x773   : > { %3158 = vmatmul.mubr.msk.bf16.vlgmr.msra.gmra.mrb[52].mxu0 %vm918_vm2, %v1963_v14  ;;  %v1946_v24 = vpop.xlane.xlu1 %1945  ;;  %v3373_v14 = vld [vmem:[%s3483_s24 + $0x30] sm:$0xff] }
 0x774   : > { %v3326_v38 = vpop.eup %3325  ;;  %3168 = vmatpush3.bf16.msra.mxu0 %v1969_v58  ;;  %3335 = vrcp.f32 %v1946_v24  ;;  %3169 = vmatprep.mubr.msk.bf16.mxu0 %vm3386_vm1, %v3385_v8 }
 0x775   : > { %v1957_v31 = vmul.f32 %v3326_v38, %v3310_v51  ;;  %3179 = vmatprep.subr.bf16.mxu0 %v2154_v3  ;;  %v3374_v38 = vld [vmem:[%s3483_s24 + $0x20] sm:$0xff] }
 0x776   : > { %v3328_v26 = vpop.eup %3327 }
 0x777   : > { %v1958_v32 = vmul.f32 %v3328_v26, %v3312_v28 }
 0x778   : > { %v3330_v48 = vpop.eup %3329 }
 0x779   : > { %v1964_v34 = vpack.c.bf16 %v1958_v32, %v1957_v31  ;;  %v1959_v35 = vmul.f32 %v3330_v48, %v3314_v57 }
 0x77a   : > { %v3332_v33 = vpop.eup %3331 }
 0x77b   : > { %v1960_v37 = vmul.f32 %v3332_v33, %v3316_v59  ;;  %3164 = vmatmul.mubr.msk.bf16.vlgmr.msra.gmra.mrb[44].mxu1 %vm918_vm2, %v1964_v34  ;;  %v3375_v33 = vld [vmem:[%s3483_s24 + $0x38] sm:$0xff] }
 0x77c   : > { %v3334_v5 = vpop.eup %3333  ;;  %3174 = vmatpush3.bf16.msra.mxu1 %v1970_v21  ;;  %3175 = vmatprep.mubr.msk.bf16.mxu1 %vm3386_vm1, %v3385_v8  ;;  %v1409_v8 = vld [vmem:[%s4254_s7] sm:$0xff]  ;;  %v1410_v21 = vld [vmem:[%s4254_s7 + $0x8] sm:$0xff] }
 0x77d   : > { %v1965_v56 = vpack.c.bf16 %v1960_v37, %v1959_v35  ;;  %v1961_v58 = vmul.f32 %v3334_v5, %v3318_v9  ;;  %v1411_v41 = vpack.c.bf16 %v1410_v21, %v1409_v8  ;;  %v3376_v37 = vld [vmem:[%s3483_s24 + $0x28] sm:$0xff] }
 0x77e   : > { %v3336_v16 = vpop.eup %3335 }
 0x77f   : > { %v1962_v40 = vmul.f32 %v3336_v16, %v3320_v36  ;;  %3170 = vmatmul.mubr.msk.bf16.vlgmr.msra.gmra.mrb[56].mxu0 %vm918_vm2, %v1965_v56 }
 0x780   : > { %3180 = vmatpush3.bf16.msra.mxu0 %v2154_v3 }
 0x781   : > { %v1966_v12 = vpack.c.bf16 %v1962_v40, %v1961_v58  ;;  %3189 = vmatprep.subr.bf16.mxu0 %v1411_v41 }
 0x783   : > { %3176 = vmatmul.mubr.msk.bf16.vlgmr.msra.gmra.mrb[48].mxu1 %vm918_vm2, %v1966_v12 }
 0x846   : > { %v2008_v20 = vpop.f32.mrb[52].mxu0 }
 0x847   : > { %v3159_v42 = vpop.f32.mrb[53].mxu0 }
 0x848   : > { %v2011_v50 = vpop.f32.mrb[54].mxu0 }
 0x849   : > { %v2147_v45 = vpack.c.bf16 %v2011_v50, %v2008_v20  ;;  %v3160_v46 = vpop.f32.mrb[55].mxu0 }
 0x84b   : > { %3181 = vmatprep.mubr.msk.bf16.mxu0 %vm918_vm2, %v2147_v45 }
 0x84e   : > { %v2052_v47 = vpop.f32.mrb[44].mxu1 }
 0x84f   : > { %v3165_v51 = vpop.f32.mrb[45].mxu1 }
 0x850   : > { %v2055_v52 = vpop.f32.mrb[46].mxu1 }
 0x851   : > { %v2148_v28 = vpack.c.bf16 %v2055_v52, %v2052_v47  ;;  %v3166_v54 = vpop.f32.mrb[47].mxu1 }
 0x852   : > { %v2096_v57 = vpop.f32.mrb[56].mxu0 }
 0x853   : > { %v3171_v11 = vpop.f32.mrb[57].mxu0  ;;  %3182 = vmatmul.mubr.msk.bf16.vlgmr.msra.gmra.mrb[60].mxu0 %vm918_vm2, %v2148_v28 }
 0x854   : > { %v2099_v59 = vpop.f32.mrb[58].mxu0  ;;  %3190 = vmatpush3.bf16.msra.mxu0 %v1411_v41 }
 0x855   : > { %v2149_v61 = vpack.c.bf16 %v2099_v59, %v2096_v57  ;;  %v3172_v9 = vpop.f32.mrb[59].mxu0 }
 0x856   : > { %v2140_v15 = vpop.f32.mrb[48].mxu1 }
 0x857   : > { %v3177_v36 = vpop.f32.mrb[49].mxu1  ;;  %3185 = vmatprep.mubr.msk.bf16.mxu0 %vm918_vm2, %v2149_v61 }
 0x858   : > { %v2143_v62 = vpop.f32.mrb[50].mxu1 }
 0x859   : > { %v2150_v43 = vpack.c.bf16 %v2143_v62, %v2140_v15  ;;  %v3178_v4 = vpop.f32.mrb[51].mxu1 }
 0x85b   : > { %3186 = vmatmul.mubr.msk.bf16.gmra.mrb[64].mxu0 %vm918_vm2, %v2150_v43 }
 0x85c   : > { %3191 = vmatprep.mubr.msk.bf16.mxu0 %vm918_vm2, %v1405_v2  ;;  %v3370_v2 = vld [vmem:[%s3483_s24] sm:$0xff] }
 0x863   : > { %3192 = vmatmul.mubr.msk.bf16.vlgmr.msra.gmra.mrb[60].mxu0 %vm918_vm2, %v1406_v53 }
 0x864   : > { %3195 = vmatprep.mubr.msk.bf16.mxu0 %vm918_vm2, %v1407_v30  ;;  %v3371_v30 = vld [vmem:[%s3483_s24 + $0x18] sm:$0xff] }
 0x86b   : > { %3196 = vmatmul.mubr.msk.bf16.gmra.mrb[64].mxu0 %vm918_vm2, %v1408_v23 }
 0x936   : > { %v3193_v63 = vpop.f32.mrb[60].mxu0 }
 0x937   : > { %v2278_v22 = vpop.f32.mrb[61].mxu0  ;;  %v2311_v7 = vadd.f32 %v3369_v6, %v3193_v63 }
 0x938   : > { %v2309_v53 = vadd.f32 %v3370_v2, %v2278_v22  ;;  %v3194_v39 = vpop.f32.mrb[62].mxu0 }
 0x939   : > { %v2281_v25 = vpop.f32.mrb[63].mxu0  ;;  %v2312_v13 = vadd.f32 %v3371_v30, %v3194_v39  ;;  %v4001_v10 = vadd.f32 %v2902_v19, %v2311_v7 }
 0x93a   : > { %v3997_v27 = vadd.f32 %v2902_v19, %v2309_v53  ;;  %v2310_v23 = vadd.f32 %v3372_v18, %v2281_v25 }
 0x93b   : > { %v4007_v0 = vadd.f32 %v2902_v19, %v2312_v13  ;;  %v2338_v32 = vsel %vm512_vm0, %v4001_v10, 0.0 }
 0x93c   : > { %v4003_v29 = vadd.f32 %v2902_v19, %v2310_v23  ;;  %v2332_v1 = vsel %vm512_vm0, %v3997_v27, 0.0 }
 0x93d   : > { %2333 = vadd.xlane.f32.xlu0 %v2332_v1  ;;  %v2341_v56 = vsel %vm512_vm0, %v4007_v0, 0.0 }
 0x93e   : > { %v3197_v60 = vpop.f32.mrb[64].mxu0  ;;  %v2335_v49 = vsel %vm512_vm0, %v4003_v29, 0.0 }
 0x93f   : > { %2336 = vadd.xlane.f32.xlu1 %v2335_v49  ;;  %v2294_v17 = vpop.f32.mrb[65].mxu0  ;;  %v2315_v24 = vadd.f32 %v3373_v14, %v3197_v60  ;;  %v2470_v14 = vld [vmem:[%s4258_s11] sm:$0xff] }
 0x940   : > { %v2313_v26 = vadd.f32 %v3374_v38, %v2294_v17  ;;  %v3198_v31 = vpop.f32.mrb[66].mxu0 }
 0x941   : > { %2339 = vadd.xlane.f32.xlu0 %v2338_v32  ;;  %v2297_v48 = vpop.f32.mrb[67].mxu0  ;;  %v2316_v35 = vadd.f32 %v3375_v33, %v3198_v31  ;;  %v4021_v16 = vadd.f32 %v2902_v19, %v2315_v24  ;;  %v2471_v24 = vld [vmem:[%s4258_s11 + $0x8] sm:$0xff]  ;;  %v2473_v31 = vld [vmem:[%s4258_s11 + $0x18] sm:$0xff] }
 0x942   : > { %v4015_v34 = vadd.f32 %v2902_v19, %v2313_v26  ;;  %v2314_v5 = vadd.f32 %v3376_v37, %v2297_v48  ;;  %v2474_v38 = vpack.c.bf16 %v2471_v24, %v2470_v14  ;;  %v2472_v26 = vld [vmem:[%s4258_s11 + $0x10] sm:$0xff] }
 0x943   : > { %2342 = vadd.xlane.f32.xlu1 %v2341_v56  ;;  %v4027_v12 = vadd.f32 %v2902_v19, %v2316_v35  ;;  %v2350_v55 = vsel %vm512_vm0, %v4021_v16, 0.0  ;;  %v2475_v32 = vpack.c.bf16 %v2473_v31, %v2472_v26 }
 0x944   : > { %v4023_v58 = vadd.f32 %v2902_v19, %v2314_v5  ;;  %v2344_v40 = vsel %vm512_vm0, %v4015_v34, 0.0  ;;  %3199 = vmatprep.subr.bf16.mxu1 %v2474_v38 }
 0x945   : > { %2345 = vadd.xlane.f32.xlu0 %v2344_v40  ;;  %v2353_v3 = vsel %vm512_vm0, %v4027_v12, 0.0  ;;  %3200 = vmatpush3.bf16.msra.mxu1 %v2474_v38 }
 0x946   : > { %v2347_v44 = vsel %vm512_vm0, %v4023_v58, 0.0  ;;  %3201 = vmatprep.subr.bf16.mxu1 %v2475_v32 }
 0x947   : > { %2348 = vadd.xlane.f32.xlu1 %v2347_v44 }
 0x949   : > { %2351 = vadd.xlane.f32.xlu0 %v2350_v55  ;;  %3202 = vmatpush3.bf16.msra.mxu1 %v2475_v32 }
 0x94b   : > { %2354 = vadd.xlane.f32.xlu1 %v2353_v3 }
 0x9ca   : > { %v2334_v8 = vpop.xlane.xlu0 %2333 }
 0x9cb   : > { %v2356_v21 = vmul.f32 0.03125, %v2334_v8 }
 0x9cc   : > { %v2337_v41 = vpop.xlane.xlu1 %2336 }
 0x9cd   : > { %v4036_v20 = vsub.f32 %v3997_v27, %v2356_v21  ;;  %v2357_v42 = vmul.f32 0.03125, %v2337_v41 }
 0x9ce   : > { %v2340_v50 = vpop.xlane.xlu0 %2339 }
 0x9cf   : > { %v4039_v45 = vsub.f32 %v4003_v29, %v2357_v42  ;;  %v2358_v46 = vmul.f32 0.03125, %v2340_v50  ;;  %v2372_v47 = vmul.f32 %v4036_v20, %v4036_v20 }
 0x9d0   : > { %v2343_v51 = vpop.xlane.xlu1 %2342 }
 0x9d1   : > { %v4044_v52 = vsub.f32 %v4001_v10, %v2358_v46  ;;  %v2359_v28 = vmul.f32 0.03125, %v2343_v51  ;;  %v2380_v54 = vsel %vm512_vm0, %v2372_v47, 0.0  ;;  %v2373_v57 = vmul.f32 %v4039_v45, %v4039_v45 }
 0x9d2   : > { %2381 = vadd.xlane.f32.xlu0 %v2380_v54  ;;  %v2346_v11 = vpop.xlane.xlu0 %2345 }
 0x9d3   : > { %v4050_v59 = vsub.f32 %v4007_v0, %v2359_v28  ;;  %v2360_v61 = vmul.f32 0.03125, %v2346_v11  ;;  %v2383_v9 = vsel %vm512_vm0, %v2373_v57, 0.0  ;;  %v2374_v15 = vmul.f32 %v4044_v52, %v4044_v52 }
 0x9d4   : > { %2384 = vadd.xlane.f32.xlu1 %v2383_v9  ;;  %v2349_v36 = vpop.xlane.xlu1 %2348 }
 0x9d5   : > { %v4056_v62 = vsub.f32 %v4015_v34, %v2360_v61  ;;  %v2361_v43 = vmul.f32 0.03125, %v2349_v36  ;;  %v2386_v4 = vsel %vm512_vm0, %v2374_v15, 0.0  ;;  %v2375_v63 = vmul.f32 %v4050_v59, %v4050_v59  ;;  %v2903_v61 = vld [vmem:[%s4256_s9] ss:$0 sm:$0xff] }
 0x9d6   : > { %2387 = vadd.xlane.f32.xlu0 %v2386_v4  ;;  %v2352_v19 = vpop.xlane.xlu0 %2351 }
 0x9d7   : > { %v4062_v22 = vsub.f32 %v4023_v58, %v2361_v43  ;;  %v2362_v6 = vmul.f32 0.03125, %v2352_v19  ;;  %v2389_v7 = vsel %vm512_vm0, %v2375_v63, 0.0  ;;  %v2376_v2 = vmul.f32 %v4056_v62, %v4056_v62 }
 0x9d8   : > { %2390 = vadd.xlane.f32.xlu1 %v2389_v7  ;;  %v2355_v53 = vpop.xlane.xlu1 %2354  ;;  %v2904_v7 = vld [vmem:[%s4257_s10] ss:$0 sm:$0xff] }
 0x9d9   : > { %v4068_v39 = vsub.f32 %v4021_v16, %v2362_v6  ;;  %v2363_v25 = vmul.f32 0.03125, %v2355_v53  ;;  %v2392_v30 = vsel %vm512_vm0, %v2376_v2, 0.0  ;;  %v2377_v13 = vmul.f32 %v4062_v22, %v4062_v22 }
 0x9da   : > { %2393 = vadd.xlane.f32.xlu0 %v2392_v30 }
 0x9db   : > { %v4074_v18 = vsub.f32 %v4027_v12, %v2363_v25  ;;  %v2395_v23 = vsel %vm512_vm0, %v2377_v13, 0.0  ;;  %v2378_v1 = vmul.f32 %v4068_v39, %v4068_v39 }
 0x9dc   : > { %2396 = vadd.xlane.f32.xlu1 %v2395_v23 }
 0x9dd   : > { %v2398_v60 = vsel %vm512_vm0, %v2378_v1, 0.0  ;;  %v2379_v49 = vmul.f32 %v4074_v18, %v4074_v18 }
 0x9de   : > { %2399 = vadd.xlane.f32.xlu0 %v2398_v60 }
 0x9df   : > { %v2401_v17 = vsel %vm512_vm0, %v2379_v49, 0.0 }
 0x9e0   : > { %2402 = vadd.xlane.f32.xlu1 %v2401_v17 }
 0xa5f   : > { %v2382_v48 = vpop.xlane.xlu0 %2381 }
 0xa60   : > { %v2404_v33 = vmul.f32 0.03125, %v2382_v48 }
 0xa61   : > { %v2385_v35 = vpop.xlane.xlu1 %2384 }
 0xa62   : > { %v2412_v37 = vadd.f32 1e-05, %v2404_v33  ;;  %v2405_v5 = vmul.f32 0.03125, %v2385_v35 }
 0xa63   : > { %v2388_v56 = vpop.xlane.xlu0 %2387 }
 0xa64   : > { %3337 = vrsqrt.f32 %v2412_v37  ;;  %v2413_v40 = vadd.f32 1e-05, %v2405_v5  ;;  %v2406_v44 = vmul.f32 0.03125, %v2388_v56 }
 0xa65   : > { %v2391_v55 = vpop.xlane.xlu1 %2390 }
 0xa66   : > { %3339 = vrsqrt.f32 %v2413_v40  ;;  %v2414_v3 = vadd.f32 1e-05, %v2406_v44  ;;  %v2407_v8 = vmul.f32 0.03125, %v2391_v55 }
 0xa67   : > { %v2394_v21 = vpop.xlane.xlu0 %2393 }
 0xa68   : > { %3341 = vrsqrt.f32 %v2414_v3  ;;  %v2415_v41 = vadd.f32 1e-05, %v2407_v8  ;;  %v2408_v42 = vmul.f32 0.03125, %v2394_v21  ;;  %v2638_v3 = vld [vmem:[%s4260_s13 + $0x10] sm:$0xff]  ;;  %v2639_v8 = vld [vmem:[%s4260_s13 + $0x18] sm:$0xff] }
 0xa69   : > { %v2397_v50 = vpop.xlane.xlu1 %2396  ;;  %v2653_v21 = vpack.c.bf16 %v2639_v8, %v2638_v3 }
 0xa6a   : > { %3343 = vrsqrt.f32 %v2415_v41  ;;  %v2416_v46 = vadd.f32 1e-05, %v2408_v42  ;;  %v2409_v47 = vmul.f32 0.03125, %v2397_v50  ;;  %v2640_v41 = vld [vmem:[%s4260_s13 + $0x20] sm:$0xff]  ;;  %v2641_v42 = vld [vmem:[%s4260_s13 + $0x28] sm:$0xff] }
 0xa6b   : > { %v2400_v51 = vpop.xlane.xlu0 %2399  ;;  %v2654_v50 = vpack.c.bf16 %v2641_v42, %v2640_v41 }
 0xa6c   : > { %3345 = vrsqrt.f32 %v2416_v46  ;;  %v2417_v28 = vadd.f32 1e-05, %v2409_v47  ;;  %v2410_v54 = vmul.f32 0.03125, %v2400_v51  ;;  %v2642_v46 = vld [vmem:[%s4260_s13 + $0x30] sm:$0xff]  ;;  %v2643_v47 = vld [vmem:[%s4260_s13 + $0x38] sm:$0xff] }
 0xa6d   : > { %v2403_v57 = vpop.xlane.xlu1 %2402  ;;  %v2655_v51 = vpack.c.bf16 %v2643_v47, %v2642_v46 }
 0xa6e   : > { %v3338_v11 = vpop.eup %3337  ;;  %3347 = vrsqrt.f32 %v2417_v28  ;;  %v2418_v9 = vadd.f32 1e-05, %v2410_v54  ;;  %v2411_v15 = vmul.f32 0.03125, %v2403_v57  ;;  %v2644_v28 = vld [vmem:[%s4260_s13 + $0x40] sm:$0xff]  ;;  %v2645_v54 = vld [vmem:[%s4260_s13 + $0x48] sm:$0xff] }
 0xa6f   : > { %v2428_v36 = vmul.f32 %v3338_v11, %v4036_v20  ;;  %v2656_v57 = vpack.c.bf16 %v2645_v54, %v2644_v28  ;;  %v2646_v11 = vld [vmem:[%s4260_s13 + $0x50] sm:$0xff] }
 0xa70   : > { %v3340_v43 = vpop.eup %3339  ;;  %3349 = vrsqrt.f32 %v2418_v9  ;;  %v2419_v4 = vadd.f32 1e-05, %v2411_v15  ;;  %v2648_v15 = vld [vmem:[%s4260_s13 + $0x60] sm:$0xff] }
 0xa71   : > { %v2429_v63 = vmul.f32 %v3340_v43, %v4039_v45  ;;  %v2443_v19 = vmul.f32 %v2903_v61, %v2428_v36  ;;  %v2649_v36 = vld [vmem:[%s4260_s13 + $0x68] sm:$0xff] }
 0xa72   : > { %v3342_v6 = vpop.eup %3341  ;;  %3351 = vrsqrt.f32 %v2419_v4  ;;  %v2658_v43 = vpack.c.bf16 %v2649_v36, %v2648_v15  ;;  %v2650_v4 = vld [vmem:[%s4260_s13 + $0x70] sm:$0xff] }
 0xa73   : > { %v2430_v2 = vmul.f32 %v3342_v6, %v4044_v52  ;;  %v2444_v53 = vmul.f32 %v2903_v61, %v2429_v63  ;;  %v2458_v20 = vadd.f32 %v2904_v7, %v2443_v19  ;;  %v2651_v63 = vld [vmem:[%s4260_s13 + $0x78] sm:$0xff]  ;;  %v2905_v6 = vld [vmem:[%s4259_s12] ss:$0 sm:$0xff] }
 0xa74   : > { %v3344_v25 = vpop.eup %3343  ;;  %v2659_v19 = vpack.c.bf16 %v2651_v63, %v2650_v4 }
 0xa75   : > { %v2445_v30 = vmul.f32 %v2903_v61, %v2430_v2  ;;  %v2431_v13 = vmul.f32 %v3344_v25, %v4050_v59  ;;  %v2459_v23 = vadd.f32 %v2904_v7, %v2444_v53 }
 0xa76   : > { %v3346_v1 = vpop.eup %3345 }
 0xa77   : > { %v2446_v60 = vmul.f32 %v2903_v61, %v2431_v13  ;;  %v2432_v45 = vmul.f32 %v3346_v1, %v4056_v62  ;;  %v2466_v49 = vpack.c.bf16 %v2459_v23, %v2458_v20  ;;  %v2460_v24 = vadd.f32 %v2904_v7, %v2445_v30 }
 0xa78   : > { %v3348_v17 = vpop.eup %3347 }
 0xa79   : > { %v2433_v14 = vmul.f32 %v3348_v17, %v4062_v22  ;;  %3203 = vmatprep.mubr.msk.bf16.mxu1 %vm512_vm0, %v2466_v49  ;;  %v2461_v38 = vadd.f32 %v2904_v7, %v2446_v60  ;;  %v2447_v52 = vmul.f32 %v2903_v61, %v2432_v45 }
 0xa7a   : > { %v3350_v26 = vpop.eup %3349 }
 0xa7b   : > { %v2434_v31 = vmul.f32 %v3350_v26, %v4068_v39  ;;  %v2467_v32 = vpack.c.bf16 %v2461_v38, %v2460_v24  ;;  %v2448_v59 = vmul.f32 %v2903_v61, %v2433_v14  ;;  %v2462_v62 = vadd.f32 %v2904_v7, %v2447_v52  ;;  %v2636_v39 = vld [vmem:[%s4260_s13] sm:$0xff] }
 0xa7c   : > { %v3352_v48 = vpop.eup %3351 }
 0xa7d   : > { %v2435_v33 = vmul.f32 %v3352_v48, %v4074_v18  ;;  %3204 = vmatmul.mubr.msk.bf16.vlgmr.msra.gmra.mrb[52].mxu1 %vm512_vm0, %v2467_v32  ;;  %v2463_v35 = vadd.f32 %v2904_v7, %v2448_v59  ;;  %v2449_v37 = vmul.f32 %v2903_v61, %v2434_v31  ;;  %v2637_v18 = vld [vmem:[%s4260_s13 + $0x8] sm:$0xff] }
 0xa7e   : > { %v2652_v55 = vpack.c.bf16 %v2637_v18, %v2636_v39 }
 0xa7f   : > { %v2468_v5 = vpack.c.bf16 %v2463_v35, %v2462_v62  ;;  %v2450_v22 = vmul.f32 %v2903_v61, %v2435_v33  ;;  %v2464_v56 = vadd.f32 %v2904_v7, %v2449_v37  ;;  %v2647_v61 = vld [vmem:[%s4260_s13 + $0x58] sm:$0xff] }
 0xa80   : > { %3211 = vmatprep.subr.bf16.mxu1 %v2652_v55  ;;  %v2657_v9 = vpack.c.bf16 %v2647_v61, %v2646_v11 }
 0xa81   : > { %3207 = vmatprep.mubr.msk.bf16.mxu1 %vm512_vm0, %v2468_v5  ;;  %v2465_v40 = vadd.f32 %v2904_v7, %v2450_v22  ;;  %3212 = vmatpush3.bf16.msra.mxu1 %v2652_v55 }
 0xa82   : > { %3213 = vmatprep.subr.bf16.mxu1 %v2653_v21 }
 0xa83   : > { %v2469_v44 = vpack.c.bf16 %v2465_v40, %v2464_v56 }
 0xa85   : > { %3208 = vmatmul.mubr.msk.bf16.gmra.mrb[56].mxu1 %vm512_vm0, %v2469_v44 }
 0xa86   : > { %3214 = vmatpush3.bf16.msra.mxu1 %v2653_v21 }
 0xa87   : > { %3215 = vmatprep.subr.bf16.mxu1 %v2654_v50 }
 0xa8a   : > { %3216 = vmatpush3.bf16.msra.mxu1 %v2654_v50 }
 0xa8b   : > { %3217 = vmatprep.subr.bf16.mxu1 %v2655_v51 }
 0xa8e   : > { %3218 = vmatpush3.bf16.msra.mxu1 %v2655_v51 }
 0xa8f   : > { %3219 = vmatprep.subr.bf16.mxu1 %v2656_v57 }
 0xa92   : > { %3220 = vmatpush3.bf16.msra.mxu1 %v2656_v57 }
 0xa93   : > { %3221 = vmatprep.subr.bf16.mxu1 %v2657_v9 }
 0xa96   : > { %3222 = vmatpush3.bf16.msra.mxu1 %v2657_v9 }
 0xa97   : > { %3223 = vmatprep.subr.bf16.mxu1 %v2658_v43 }
 0xa9a   : > { %3224 = vmatpush3.bf16.msra.mxu1 %v2658_v43 }
 0xa9b   : > { %3225 = vmatprep.subr.bf16.mxu1 %v2659_v19 }
 0xa9e   : > { %3226 = vmatpush3.bf16.msra.mxu1 %v2659_v19 }
 0xb50   : > { %v3205_v7 = vpop.f32.mrb[52].mxu1 }
 0xb51   : > { %v4164_v2 = vadd.f32 %v3205_v7, %v2905_v6  ;;  %v2529_v53 = vpop.f32.mrb[53].mxu1 }
 0xb52   : > { %v4166_v25 = vadd.f32 %v2905_v6, %v2529_v53  ;;  %v3206_v30 = vpop.f32.mrb[54].mxu1 }
 0xb53   : > { %v2562_v13 = vmul.f32 %v4164_v2, %v4164_v2  ;;  %v4170_v20 = vadd.f32 %v3206_v30, %v2905_v6  ;;  %v2532_v23 = vpop.f32.mrb[55].mxu1 }
 0xb54   : > { %v2560_v1 = vmul.f32 %v4166_v25, %v4166_v25  ;;  %v4174_v60 = vadd.f32 %v2905_v6, %v2532_v23 }
 0xb55   : > { %v2570_v45 = vmul.f32 %v2562_v13, %v4164_v2  ;;  %v2563_v49 = vmul.f32 %v4170_v20, %v4170_v20 }
 0xb56   : > { %v2568_v17 = vmul.f32 %v2560_v1, %v4166_v25  ;;  %v2561_v14 = vmul.f32 %v4174_v60, %v4174_v60 }
 0xb57   : > { %v2578_v24 = vmul.f32 0.044715, %v2570_v45  ;;  %v2571_v38 = vmul.f32 %v2563_v49, %v4170_v20 }
 0xb58   : > { %v2576_v52 = vmul.f32 0.044715, %v2568_v17  ;;  %v2569_v26 = vmul.f32 %v2561_v14, %v4174_v60  ;;  %v3209_v31 = vpop.f32.mrb[56].mxu1 }
 0xb59   : > { %v2586_v32 = vadd.f32 %v2578_v24, %v4164_v2  ;;  %v2579_v59 = vmul.f32 0.044715, %v2571_v38  ;;  %v4185_v48 = vadd.f32 %v3209_v31, %v2905_v6  ;;  %v2545_v33 = vpop.f32.mrb[57].mxu1 }
 0xb5a   : > { %v2584_v62 = vadd.f32 %v2576_v52, %v4166_v25  ;;  %v2577_v35 = vmul.f32 0.044715, %v2569_v26  ;;  %v4188_v37 = vadd.f32 %v2905_v6, %v2545_v33  ;;  %v3210_v5 = vpop.f32.mrb[58].mxu1 }
 0xb5b   : > { %v2594_v22 = vmul.f32 0.7978846, %v2586_v32  ;;  %v2587_v56 = vadd.f32 %v2579_v59, %v4170_v20  ;;  %v2566_v40 = vmul.f32 %v4185_v48, %v4185_v48  ;;  %v4193_v44 = vadd.f32 %v3210_v5, %v2905_v6  ;;  %v2548_v39 = vpop.f32.mrb[59].mxu1 }
 0xb5c   : > { %v2592_v18 = vmul.f32 0.7978846, %v2584_v62  ;;  %v2585_v55 = vadd.f32 %v2577_v35, %v4174_v60  ;;  %v2564_v3 = vmul.f32 %v4188_v37, %v4188_v37  ;;  %v4198_v8 = vadd.f32 %v2905_v6, %v2548_v39 }
 0xb5d   : > { %3353 = vtanh.f32 %v2594_v22  ;;  %v2595_v21 = vmul.f32 0.7978846, %v2587_v56  ;;  %v2574_v41 = vmul.f32 %v2566_v40, %v4185_v48  ;;  %v2567_v42 = vmul.f32 %v4193_v44, %v4193_v44 }
 0xb5e   : > { %3355 = vtanh.f32 %v2592_v18  ;;  %v2593_v50 = vmul.f32 0.7978846, %v2585_v55  ;;  %v2572_v46 = vmul.f32 %v2564_v3, %v4188_v37  ;;  %v2565_v47 = vmul.f32 %v4198_v8, %v4198_v8 }
 0xb5f   : > { %3357 = vtanh.f32 %v2595_v21  ;;  %v2582_v51 = vmul.f32 0.044715, %v2574_v41  ;;  %v2575_v28 = vmul.f32 %v2567_v42, %v4193_v44 }
 0xb60   : > { %3359 = vtanh.f32 %v2593_v50  ;;  %v2580_v54 = vmul.f32 0.044715, %v2572_v46  ;;  %v2573_v57 = vmul.f32 %v2565_v47, %v4198_v8  ;;  %v2910_v46 = vld [vmem:[%s4261_s14] ss:$0 sm:$0xff] }
 0xb61   : > { %v2590_v11 = vadd.f32 %v2582_v51, %v4185_v48  ;;  %v2583_v61 = vmul.f32 0.044715, %v2575_v28 }
 0xb62   : > { %v2588_v9 = vadd.f32 %v2580_v54, %v4188_v37  ;;  %v2581_v15 = vmul.f32 0.044715, %v2573_v57 }
 0xb63   : > { %v2598_v36 = vmul.f32 0.7978846, %v2590_v11  ;;  %v2591_v43 = vadd.f32 %v2583_v61, %v4193_v44 }
 0xb64   : > { %v2596_v4 = vmul.f32 0.7978846, %v2588_v9  ;;  %v2589_v63 = vadd.f32 %v2581_v15, %v4198_v8 }
 0xb65   : > { %3361 = vtanh.f32 %v2598_v36  ;;  %v2599_v19 = vmul.f32 0.7978846, %v2591_v43 }
 0xb66   : > { %3363 = vtanh.f32 %v2596_v4  ;;  %v2597_v6 = vmul.f32 0.7978846, %v2589_v63 }
 0xb67   : > { %v3354_v7 = vpop.eup %3353  ;;  %3365 = vtanh.f32 %v2599_v19 }
 0xb68   : > { %v3356_v53 = vpop.eup %3355  ;;  %v2610_v30 = vadd.f32 1.0, %v3354_v7  ;;  %3367 = vtanh.f32 %v2597_v6 }
 0xb69   : > { %v3358_v13 = vpop.eup %3357  ;;  %v2608_v23 = vadd.f32 1.0, %v3356_v53 }
 0xb6a   : > { %v3360_v1 = vpop.eup %3359  ;;  %v2618_v45 = vmul.f32 0.5, %v2610_v30  ;;  %v2611_v49 = vadd.f32 1.0, %v3358_v13 }
 0xb6b   : > { %v2609_v17 = vadd.f32 1.0, %v3360_v1  ;;  %v2616_v14 = vmul.f32 0.5, %v2608_v23 }
 0xb6c   : > { %v2619_v24 = vmul.f32 0.5, %v2611_v49  ;;  %v2626_v52 = vmul.f32 %v2618_v45, %v4164_v2 }
 0xb6d   : > { %v2617_v38 = vmul.f32 0.5, %v2609_v17  ;;  %v2624_v32 = vmul.f32 %v2616_v14, %v4166_v25 }
 0xb6e   : > { %v2627_v26 = vmul.f32 %v2619_v24, %v4170_v20 }
 0xb6f   : > { %v3362_v31 = vpop.eup %3361  ;;  %v2625_v59 = vmul.f32 %v2617_v38, %v4174_v60 }
 0xb70   : > { %v3364_v33 = vpop.eup %3363  ;;  %v2633_v62 = vpack.c.bf16 %v2627_v26, %v2626_v52  ;;  %v2614_v35 = vadd.f32 1.0, %v3362_v31 }
 0xb71   : > { %v3366_v5 = vpop.eup %3365  ;;  %v2632_v22 = vpack.c.bf16 %v2625_v59, %v2624_v32  ;;  %v2612_v56 = vadd.f32 1.0, %v3364_v33 }
 0xb72   : > { %v3368_v40 = vpop.eup %3367  ;;  %v2615_v39 = vadd.f32 1.0, %v3366_v5  ;;  %v2622_v18 = vmul.f32 0.5, %v2614_v35 }
 0xb73   : > { %3227 = vmatprep.mubr.bf16.mxu1 %v2632_v22  ;;  %v2613_v55 = vadd.f32 1.0, %v3368_v40  ;;  %v2620_v3 = vmul.f32 0.5, %v2612_v56 }
 0xb74   : > { %3228 = vmatmul.mubr.bf16.vlgmr.msra.gmra.mrb[60].mxu1 %v2633_v62  ;;  %v2623_v2 = vmul.f32 0.5, %v2615_v39  ;;  %v2630_v25 = vmul.f32 %v2622_v18, %v4185_v48 }
 0xb75   : > { %v2621_v20 = vmul.f32 0.5, %v2613_v55  ;;  %v2628_v21 = vmul.f32 %v2620_v3, %v4188_v37 }
 0xb76   : > { %v2631_v60 = vmul.f32 %v2623_v2, %v4193_v44 }
 0xb77   : > { %v2629_v41 = vmul.f32 %v2621_v20, %v4198_v8 }
 0xb78   : > { %v2635_v42 = vpack.c.bf16 %v2631_v60, %v2630_v25 }
 0xb79   : > { %v2634_v50 = vpack.c.bf16 %v2629_v41, %v2628_v21 }
 0xb7b   : > { %3231 = vmatprep.mubr.bf16.mxu1 %v2634_v50 }
 0xb7c   : > { %3232 = vmatmul.mubr.bf16.gmra.mrb[64].mxu1 %v2635_v42 }
 0xc47   : > { %v3229_v47 = vpop.f32.mrb[60].mxu1 }
 0xc48   : > { %v2710_v51 = vadd.f32 %v3229_v47, %v2910_v46  ;;  %v2701_v28 = vpop.f32.mrb[61].mxu1 }
 0xc49   : > { %v2702_v54 = vadd.f32 %v2910_v46, %v2701_v28  ;;  %v3230_v57 = vpop.f32.mrb[62].mxu1 }
 0xc4a   : > { %v2713_v48 = vadd.f32 %v3230_v57, %v2910_v46  ;;  %v2704_v37 = vpop.f32.mrb[63].mxu1  ;;  %v2734_v11 = vadd.f32 %v2710_v51, %v4001_v10 }
 0xc4b   : > { %v2732_v44 = vadd.f32 %v2702_v54, %v3997_v27  ;;  %v2705_v8 = vadd.f32 %v2910_v46, %v2704_v37 }
 0xc4c   : > { %2742 = vst.msk [vmem:[%s501_s25 + $0x10] sm:$0xff] %vm512_vm0, %v2734_v11  ;;  %v2735_v9 = vadd.f32 %v2713_v48, %v4007_v0 }
 0xc4d   : > { %2740 = vst.msk [vmem:[%s501_s25] sm:$0xff] %vm512_vm0, %v2732_v44  ;;  %v2733_v61 = vadd.f32 %v2705_v8, %v4003_v29 }
 0xc4e   : > { %2743 = vst.msk [vmem:[%s501_s25 + $0x18] sm:$0xff] %vm512_vm0, %v2735_v9 }
 0xc4f   : > { %2741 = vst.msk [vmem:[%s501_s25 + $0x8] sm:$0xff] %vm512_vm0, %v2733_v61  ;;  %v3233_v15 = vpop.f32.mrb[64].mxu1 }
 0xc50   : > { %v2726_v36 = vadd.f32 %v3233_v15, %v2910_v46  ;;  %v2717_v43 = vpop.f32.mrb[65].mxu1 }
 0xc51   : > { %v2718_v4 = vadd.f32 %v2910_v46, %v2717_v43  ;;  %v3234_v27 = vpop.f32.mrb[66].mxu1 }
 0xc52   : > { %v2729_v63 = vadd.f32 %v3234_v27, %v2910_v46  ;;  %v2720_v19 = vpop.f32.mrb[67].mxu1  ;;  %v2738_v29 = vadd.f32 %v2726_v36, %v4021_v16 }
 0xc53   : > { %v2736_v10 = vadd.f32 %v2718_v4, %v4015_v34  ;;  %v2721_v6 = vadd.f32 %v2910_v46, %v2720_v19 }
 0xc54   : > { %2746 = vst.msk [vmem:[%s501_s25 + $0x30] sm:$0xff] %vm512_vm0, %v2738_v29  ;;  %v2739_v7 = vadd.f32 %v2729_v63, %v4027_v12 }
 0xc55   : > { %2744 = vst.msk [vmem:[%s501_s25 + $0x20] sm:$0xff] %vm512_vm0, %v2736_v10  ;;  %v2737_v0 = vadd.f32 %v2721_v6, %v4023_v58 }
 0xc56   : > { %2747 = vst.msk [vmem:[%s501_s25 + $0x38] sm:$0xff] %vm512_vm0, %v2739_v7 }
 0xc57   : > { %2745 = vst.msk [vmem:[%s501_s25 + $0x28] sm:$0xff] %vm512_vm0, %v2737_v0 }
 0xc58 PF: > { %s25_s18 = sadd.s32 1, %s3383_s18  }
 0xc59   : > { %p22_p4 = scmp.ge.s32.totalorder %s25_s18, 4  }
 0xc5b   :  { %24 = sbr.rel (!%p22_p4) target bundleno = 1 (0x1), region = 122 }

// kernel: _lambda_.11
= control target key start
LH: loop header
LB: loop body
LE: loop exit
PB: predicated region body
PF: predicated region fallthrough
CT: control target
= control target key end

     0   :  { %s2967_s18 = smov 0   ;;  %s3788_s0 = inlined_call_operand.vmem [shape: f32[2,16,64], index: 0, kind: input, shape index: {}]   ;;  %s3789_s1 = inlined_call_operand.vmem [shape: f32[1,64], index: 1, kind: input, shape index: {}, may-alias: {1,9}]   ;;  %s3790_s2 = inlined_call_operand.vmem [shape: f32[1,64], index: 2, kind: input, shape index: {}, may-alias: {2,8,10,14}]   ;;  %s3791_s3 = inlined_call_operand.vmem [shape: f32[3,4,64,16], index: 3, kind: input, shape index: {}]   ;;  %s3792_s4 = inlined_call_operand.vmem [shape: f32[3,4,1,16], index: 4, kind: input, shape index: {}]   ;;  %s3793_s5 = inlined_call_operand.vmem [shape: f32[4,16,16], index: 5, kind: input, shape index: {}]   ;;  %s3794_s6 = inlined_call_operand.vmem [shape: f32[1,16,16], index: 6, kind: input, shape index: {}]   ;;  %s3795_s7 = inlined_call_operand.vmem [shape: f32[4,16,64], index: 7, kind: input, shape index: {}]   ;;  %s3796_s8 = inlined_call_operand.vmem [shape: f32[1,64], index: 8, kind: input, shape index: {}, may-alias: {2,8,10,14}]   ;;  %s3797_s9 = inlined_call_operand.vmem [shape: f32[1,64], index: 9, kind: input, shape index: {}, may-alias: {1,9}]   ;;  %s3798_s10 = inlined_call_operand.vmem [shape: f32[1,64], index: 10, kind: input, shape index: {}, may-alias: {2,8,10,14}]   ;;  %s3799_s11 = inlined_call_operand.vmem [shape: f32[64,256], index: 11, kind: input, shape index: {}]   ;;  %s3800_s12 = inlined_call_operand.vmem [shape: f32[1,256], index: 12, kind: input, shape index: {}]   ;;  %s3801_s13 = inlined_call_operand.vmem [shape: f32[256,64], index: 13, kind: input, shape index: {}]   ;;  %s3802_s14 = inlined_call_operand.vmem [shape: f32[1,64], index: 14, kind: input, shape index: {}, may-alias: {2,8,10,14}]   ;;  %s3803_s15 = inlined_call_operand.vmem [shape: f32[2,16,64], index: 15, kind: output, shape index: {}]  }
   0x1 LB: > { %s2326_s19 = sadd.s32 4294967295, %s2882_s18   ;;  %p2330_p0 = scmp.ge.s32.totalorder %s2882_s18, 1  ;;  %s2882_s18 = sphi %s2967_s18, %s25_s18  }
   0x2   : > { %p437_p1 = scmp.lt.s32.totalorder %s2882_s18, 3 }
   0x4   : > { %p438_p2 = pnand %p2330_p0, %p437_p1 }
   0x5   : > { %p485_p3 = scmp.lt.s32.totalorder (!%p438_p2), %s2326_s19, 1  ;;  %vm498_vm0 = vcmask (!%p438_p2), 523264   ;;  %v547_v14 = vld [vmem:[%s3791_s3] sm:$0xff] (!%p438_p2)  ;;  %v548_v15 = vld [vmem:[%s3791_s3 + $0x8] sm:$0xff] (!%p438_p2)  ;;  %v2884_v19 = vmov (!%p438_p2), 0.0   ;;  %v549_v21 = vld [vmem:[%s3791_s3 + $0x10] sm:$0xff] (!%p438_p2) }
   0x6   : > { %441 = sbr.rel (%p438_p2) target bundleno = 5076 (0x13d4), region = 80  ;;  %v555_v16 = vpack.c.bf16 (!%p438_p2), %v548_v15, %v547_v14  ;;  %v2339_v17 = vld [vmem:[%s3791_s3 + $0x100] sm:$0xff] (!%p438_p2)  ;;  %v2340_v18 = vld [vmem:[%s3791_s3 + $0x108] sm:$0xff] (!%p438_p2)  ;;  %2599 = vmatprep.subr.bf16.mxu0 (!%p438_p2), %v2884_v19  ;;  %2611 = vmatprep.subr.bf16.mxu1 (!%p438_p2), %v2884_v19  ;;  %v550_v22 = vld [vmem:[%s3791_s3 + $0x18] sm:$0xff] (!%p438_p2)  ;;  %vm2885_vm1 = vmmov (!%p438_p2), 0   ;;  %vm736_vm2 = vcmask (!%p438_p2), 130048  }
   0x7   : > { %v619_v20 = vpack.c.bf16 (!%p438_p2), %v2340_v18, %v2339_v17  ;;  %v556_v23 = vpack.c.bf16 (!%p438_p2), %v550_v22, %v549_v21  ;;  %v2341_v24 = vld [vmem:[%s3791_s3 + $0x110] sm:$0xff] (!%p438_p2)  ;;  %v2342_v25 = vld [vmem:[%s3791_s3 + $0x118] sm:$0xff] (!%p438_p2)  ;;  %v551_v27 = vld [vmem:[%s3791_s3 + $0x20] sm:$0xff] (!%p438_p2)  ;;  %2607 = vmatprep.mubr.msk.bf16.mxu0 (!%p438_p2), %vm2885_vm1, %v2884_v19  ;;  %2619 = vmatprep.mubr.msk.bf16.mxu1 (!%p438_p2), %vm2885_vm1, %v2884_v19 }
   0x8   : > { %2600 = vmatpush3.bf16.msra.mxu0 (!%p438_p2), %v555_v16  ;;  %v620_v26 = vpack.c.bf16 (!%p438_p2), %v2342_v25, %v2341_v24  ;;  %v552_v28 = vld [vmem:[%s3791_s3 + $0x28] sm:$0xff] (!%p438_p2)  ;;  %v2343_v30 = vld [vmem:[%s3791_s3 + $0x120] sm:$0xff] (!%p438_p2)  ;;  %v553_v33 = vld [vmem:[%s3791_s3 + $0x30] sm:$0xff] (!%p438_p2) }
   0x9   : > { %2612 = vmatpush3.bf16.msra.mxu1 (!%p438_p2), %v619_v20  ;;  %2601 = vmatprep.subr.bf16.mxu0 (!%p438_p2), %v2884_v19  ;;  %v557_v29 = vpack.c.bf16 (!%p438_p2), %v552_v28, %v551_v27  ;;  %v2344_v31 = vld [vmem:[%s3791_s3 + $0x128] sm:$0xff] (!%p438_p2)  ;;  %v554_v34 = vld [vmem:[%s3791_s3 + $0x38] sm:$0xff] (!%p438_p2)  ;;  %v2345_v36 = vld [vmem:[%s3791_s3 + $0x130] sm:$0xff] (!%p438_p2) }
   0xa   : > { %2613 = vmatprep.subr.bf16.mxu1 (!%p438_p2), %v2884_v19  ;;  %v621_v32 = vpack.c.bf16 (!%p438_p2), %v2344_v31, %v2343_v30  ;;  %v558_v35 = vpack.c.bf16 (!%p438_p2), %v554_v34, %v553_v33  ;;  %v2346_v37 = vld [vmem:[%s3791_s3 + $0x138] sm:$0xff] (!%p438_p2)  ;;  %v2335_v47 = vld [vmem:[%s3789_s1] ss:$0 sm:$0xff] (!%p438_p2)  ;;  %v2351_v54 = vld [vmem:[%s3791_s3 + $0x208] sm:$0xff] (!%p438_p2) }
   0xb   : > { %v622_v38 = vpack.c.bf16 (!%p438_p2), %v2346_v37, %v2345_v36  ;;  %v2336_v51 = vld [vmem:[%s3790_s2] ss:$0 sm:$0xff] (!%p438_p2)  ;;  %v2352_v59 = vld [vmem:[%s3791_s3 + $0x210] sm:$0xff] (!%p438_p2)  ;;  %v2353_v60 = vld [vmem:[%s3791_s3 + $0x218] sm:$0xff] (!%p438_p2) }
   0xc   : > { %2602 = vmatpush3.bf16.msra.mxu0 (!%p438_p2), %v556_v23  ;;  %v2350_v53 = vld [vmem:[%s3791_s3 + $0x200] sm:$0xff] (!%p438_p2)  ;;  %v682_v61 = vpack.c.bf16 (!%p438_p2), %v2353_v60, %v2352_v59  ;;  %v2355_v63 = vld [vmem:[%s3791_s3 + $0x228] sm:$0xff] (!%p438_p2)  ;;  %v2365_v25 = vld [vmem:[%s3791_s3 + $0x50] sm:$0xff] (!%p438_p2) }
   0xd   : > { %s3805_s19 = smov (!%p485_p3, %s2326_s19), 1  ;;  %2614 = vmatpush3.bf16.msra.mxu1 %v620_v26  ;;  %2603 = vmatprep.subr.bf16.mxu0 %v2884_v19  ;;  %v681_v57 = vpack.c.bf16 %v2351_v54, %v2350_v53  ;;  %v2354_v62 = vld [vmem:[%s3791_s3 + $0x220] sm:$0xff]  ;;  %v2364_v23 = vld [vmem:[%s3791_s3 + $0x48] sm:$0xff]  ;;  %v2366_v26 = vld [vmem:[%s3791_s3 + $0x58] sm:$0xff] }
   0xe   : > { %s2491_s20 = sshll.u32 %s3805_s19, 4  ;;  %2615 = vmatprep.subr.bf16.mxu1 %v2884_v19  ;;  %v2363_v22 = vld [vmem:[%s3791_s3 + $0x40] sm:$0xff]  ;;  %v2359_v27 = vld [vmem:[%s3792_s4 + $0x8] ss:$0 sm:$0xff] }
   0xf   : > { %s2983_s23 = scalar_lea.vmem %s3788_s0, %s2491_s20  ;;  %v873_v24 = vpack.c.bf16 %v2364_v23, %v2363_v22  ;;  %v2367_v31 = vld [vmem:[%s3791_s3 + $0x60] sm:$0xff]  ;;  %v787_v60 = vld [vmem:[%s3793_s5 + $0x8] sm:$0xff]  ;;  %s494_s27 = scalar_lea.vmem %s3803_s15, %s2491_s20 }
  0x10   : > { %v496_v0 = vld [vmem:[%s2983_s23] sm:$0xff]  ;;  %v497_v1 = vld [vmem:[%s2983_s23 + $0x8] sm:$0xff]  ;;  %2604 = vmatpush3.bf16.msra.mxu0 %v557_v29  ;;  %v874_v29 = vpack.c.bf16 %v2366_v26, %v2365_v25 }
  0x11   : > { %v499_v2 = vsel %vm498_vm0, %v496_v0, 0.0  ;;  %v502_v3 = vsel %vm498_vm0, %v497_v1, 0.0  ;;  %2616 = vmatpush3.bf16.msra.mxu1 %v621_v32  ;;  %2605 = vmatprep.subr.bf16.mxu0 %v2884_v19  ;;  %v2368_v32 = vld [vmem:[%s3791_s3 + $0x68] sm:$0xff] }
  0x12   : > { %500 = vadd.xlane.f32.xlu0 %v499_v2  ;;  %2617 = vmatprep.subr.bf16.mxu1 %v2884_v19  ;;  %v2357_v2 = vld [vmem:[%s3791_s3 + $0x238] sm:$0xff]  ;;  %v875_v37 = vpack.c.bf16 %v2368_v32, %v2367_v31 }
  0x14   : > { %2606 = vmatpush3.bf16.msra.mxu0 %v558_v35 }
  0x15   : > { %2618 = vmatpush3.bf16.msra.mxu1 %v622_v38  ;;  %2623 = vmatprep.subr.bf16.mxu0 %v2884_v19 }
  0x16   : > { %503 = vadd.xlane.f32.xlu0 %v502_v3  ;;  %2641 = vmatprep.subr.bf16.mxu1 %v2884_v19 }
  0x9f   : > { %v501_v4 = vpop.xlane.xlu0 %500 }
  0xa0   : > { %v506_v5 = vmul.f32 0.015625, %v501_v4  ;;  %v2337_v4 = vld [vmem:[%s3792_s4] ss:$0 sm:$0xff] }
  0xa2   : > { %v2989_v6 = vsub.f32 %v496_v0, %v506_v5  ;;  %v683_v0 = vpack.c.bf16 %v2355_v63, %v2354_v62 }
  0xa3   : > { %v504_v7 = vpop.xlane.xlu0 %503 }
  0xa4   : > { %v507_v8 = vmul.f32 0.015625, %v504_v7  ;;  %v510_v9 = vmul.f32 %v2989_v6, %v2989_v6 }
  0xa6   : > { %v2993_v10 = vsub.f32 %v497_v1, %v507_v8  ;;  %v512_v11 = vsel %vm498_vm0, %v510_v9, 0.0  ;;  %v2356_v1 = vld [vmem:[%s3791_s3 + $0x230] sm:$0xff] }
  0xa7   : > { %513 = vadd.xlane.f32.xlu1 %v512_v11  ;;  %v684_v3 = vpack.c.bf16 %v2357_v2, %v2356_v1  ;;  %v3204_v1 = vld [vmem:[%s3794_s6 + $0x8] sm:$0xff] }
  0xa8   : > { %v511_v12 = vmul.f32 %v2993_v10, %v2993_v10 }
  0xaa   : > { %v515_v13 = vsel %vm498_vm0, %v511_v12, 0.0 }
  0xab   : > { %516 = vadd.xlane.f32.xlu1 %v515_v13 }
 0x134   : > { %v514_v39 = vpop.xlane.xlu1 %513 }
 0x135   : > { %v518_v40 = vmul.f32 0.015625, %v514_v39  ;;  %v2369_v39 = vld [vmem:[%s3791_s3 + $0x70] sm:$0xff] }
 0x137   : > { %v520_v41 = vadd.f32 1e-05, %v518_v40  ;;  %v2370_v40 = vld [vmem:[%s3791_s3 + $0x78] sm:$0xff] }
 0x138   : > { %v517_v42 = vpop.xlane.xlu1 %516 }
 0x139   : > { %2826 = vrsqrt.f32 %v520_v41  ;;  %v519_v43 = vmul.f32 0.015625, %v517_v42  ;;  %v876_v41 = vpack.c.bf16 %v2370_v40, %v2369_v39  ;;  %v2385_v42 = vld [vmem:[%s3791_s3 + $0x240] sm:$0xff] }
 0x13b   : > { %v521_v44 = vadd.f32 1e-05, %v519_v43  ;;  %v2386_v43 = vld [vmem:[%s3791_s3 + $0x248] sm:$0xff] }
 0x13d   : > { %2828 = vrsqrt.f32 %v521_v44  ;;  %v997_v44 = vpack.c.bf16 %v2386_v43, %v2385_v42 }
 0x143   : > { %v2827_v45 = vpop.eup %2826 }
 0x144   : > { %v524_v46 = vmul.f32 %v2827_v45, %v2989_v6  ;;  %v2348_v6 = vld [vmem:[%s3792_s4 + $0x4] ss:$0 sm:$0xff]  ;;  %v2387_v45 = vld [vmem:[%s3791_s3 + $0x250] sm:$0xff] }
 0x146   : > { %v533_v49 = vmul.f32 %v2335_v47, %v524_v46  ;;  %v2388_v46 = vld [vmem:[%s3791_s3 + $0x258] sm:$0xff] }
 0x147   : > { %v2829_v48 = vpop.eup %2828 }
 0x148   : > { %v525_v50 = vmul.f32 %v2829_v48, %v2993_v10  ;;  %v542_v55 = vadd.f32 %v2336_v51, %v533_v49  ;;  %v2389_v48 = vld [vmem:[%s3791_s3 + $0x260] sm:$0xff]  ;;  %v2390_v49 = vld [vmem:[%s3791_s3 + $0x268] sm:$0xff] }
 0x14a   : > { %v534_v52 = vmul.f32 %v2335_v47, %v525_v50  ;;  %v998_v47 = vpack.c.bf16 %v2388_v46, %v2387_v45  ;;  %v999_v50 = vpack.c.bf16 %v2390_v49, %v2389_v48  ;;  %v2377_v45 = vld [vmem:[%s3791_s3 + $0x158] sm:$0xff]  ;;  %v2379_v48 = vld [vmem:[%s3791_s3 + $0x168] sm:$0xff] }
 0x14c   : > { %v543_v56 = vadd.f32 %v2336_v51, %v534_v52  ;;  %v2391_v51 = vld [vmem:[%s3791_s3 + $0x270] sm:$0xff]  ;;  %v2392_v52 = vld [vmem:[%s3791_s3 + $0x278] sm:$0xff] }
 0x14d   : > { %v1000_v53 = vpack.c.bf16 %v2392_v52, %v2391_v51  ;;  %v2381_v51 = vld [vmem:[%s3791_s3 + $0x178] sm:$0xff] }
 0x14e   : > { %v3075_v58 = vpack.c.bf16 %v543_v56, %v542_v55  ;;  %v786_v55 = vld [vmem:[%s3793_s5] sm:$0xff] }
 0x150   : > { %2608 = vmatmul.mubr.msk.bf16.vlgmr.msra.gmra.mrb[0].mxu0 %vm498_vm0, %v3075_v58  ;;  %2620 = vmatmul.mubr.msk.bf16.vlgmr.msra.gmra.mrb[0].mxu1 %vm498_vm0, %v3075_v58 }
 0x151   : > { %2624 = vmatpush3.bf16.msra.mxu0 %v681_v57  ;;  %2631 = vmatprep.mubr.msk.bf16.mxu0 %vm2885_vm1, %v2884_v19 }
 0x152   : > { %2625 = vmatprep.subr.bf16.mxu0 %v2884_v19  ;;  %2643 = vmatprep.mubr.msk.bf16.mxu1 %vm2885_vm1, %v2884_v19 }
 0x155   : > { %2626 = vmatpush3.bf16.msra.mxu0 %v682_v61  ;;  %v3199_v61 = vld [vmem:[%s3794_s6] sm:$0xff] }
 0x156   : > { %2627 = vmatprep.subr.bf16.mxu0 %v2884_v19 }
 0x159   : > { %2628 = vmatpush3.bf16.msra.mxu0 %v683_v0 }
 0x15a   : > { %2629 = vmatprep.subr.bf16.mxu0 %v2884_v19 }
 0x15d   : > { %2630 = vmatpush3.bf16.msra.mxu0 %v684_v3 }
 0x15e   : > { %2635 = vmatprep.subr.bf16.mxu0 %v2884_v19 }
 0x160   : > { %2632 = vmatmul.mubr.msk.bf16.vlgmr.msra.gmra.mrb[4].mxu0 %vm498_vm0, %v3075_v58 }
 0x161   : > { %2637 = vmatprep.mubr.msk.bf16.mxu0 %vm2885_vm1, %v2884_v19 }
 0x223   : > { %v603_v5 = vpop.f32.mrb[0].mxu0  ;;  %v665_v7 = vpop.f32.mrb[0].mxu1 }
 0x224   : > { %v2609_v8 = vpop.f32.mrb[1].mxu0  ;;  %v2621_v9 = vpop.f32.mrb[1].mxu1  ;;  %v604_v12 = vadd.f32 %v2337_v4, %v603_v5  ;;  %v666_v13 = vadd.f32 %v2348_v6, %v665_v7  ;;  %v2372_v7 = vld [vmem:[%s3792_s4 + $0x1] ss:$0 sm:$0xff] }
 0x225   : > { %v606_v10 = vpop.f32.mrb[2].mxu0  ;;  %v668_v11 = vpop.f32.mrb[2].mxu1 }
 0x226   : > { %v607_v14 = vadd.f32 %v2337_v4, %v606_v10  ;;  %v669_v15 = vadd.f32 %v2348_v6, %v668_v11  ;;  %v2610_v16 = vpop.f32.mrb[3].mxu0  ;;  %v2622_v17 = vpop.f32.mrb[3].mxu1 }
 0x228   : > { %v734_v18 = vpack.c.bf16 %v607_v14, %v604_v12  ;;  %v735_v20 = vpack.c.bf16 %v669_v15, %v666_v13  ;;  %v2394_v15 = vld [vmem:[%s3792_s4 + $0x9] ss:$0 sm:$0xff] }
 0x22a   : > { %v741_v21 = vsel %vm736_vm2, %v735_v20, 0 }
 0x22b   : > { %2636 = vmatpush3.bf16.xpose.msra.mxu0 %v741_v21 }
 0x22c   : > { %2647 = vmatprep.subr.bf16.mxu0 %v2884_v19 }
 0x232   : > { %2638 = vmatmul.mubr.msk.bf16.vlgmr.msra.gmra.mrb[8].mxu0 %vm736_vm2, %v734_v18 }
 0x233   : > { %v727_v28 = vpop.f32.mrb[4].mxu0  ;;  %2648 = vmatpush3.bf16.msra.mxu0 %v873_v24  ;;  %2655 = vmatprep.mubr.msk.bf16.mxu0 %vm2885_vm1, %v2884_v19 }
 0x234   : > { %v2633_v30 = vpop.f32.mrb[5].mxu0  ;;  %2649 = vmatprep.subr.bf16.mxu0 %v2884_v19  ;;  %v728_v34 = vadd.f32 %v2359_v27, %v727_v28 }
 0x235   : > { %v730_v33 = vpop.f32.mrb[6].mxu0 }
 0x236   : > { %v731_v35 = vadd.f32 %v2359_v27, %v730_v33  ;;  %v2634_v36 = vpop.f32.mrb[7].mxu0 }
 0x237   : > { %2650 = vmatpush3.bf16.msra.mxu0 %v874_v29 }
 0x238   : > { %v815_v38 = vpack.c.bf16 %v731_v35, %v728_v34  ;;  %2651 = vmatprep.subr.bf16.mxu0 %v2884_v19 }
 0x23a   : > { %2642 = vmatpush3.bf16.msra.mxu1 %v815_v38  ;;  %v2375_v38 = vld [vmem:[%s3791_s3 + $0x148] sm:$0xff] }
 0x23b   : > { %2652 = vmatpush3.bf16.msra.mxu0 %v875_v37  ;;  %2659 = vmatprep.subr.bf16.mxu1 %v2884_v19  ;;  %v2374_v37 = vld [vmem:[%s3791_s3 + $0x140] sm:$0xff] }
 0x23c   : > { %2653 = vmatprep.subr.bf16.mxu0 %v2884_v19  ;;  %v935_v42 = vpack.c.bf16 %v2375_v38, %v2374_v37  ;;  %v861_v37 = vld [vmem:[%s3795_s7] sm:$0xff]  ;;  %v862_v38 = vld [vmem:[%s3795_s7 + $0x8] sm:$0xff] }
 0x23f   : > { %2654 = vmatpush3.bf16.msra.mxu0 %v876_v41 }
 0x240   : > { %2671 = vmatprep.subr.bf16.mxu0 %v2884_v19 }
 0x242   : > { %2656 = vmatmul.mubr.msk.bf16.vlgmr.msra.gmra.mrb[12].mxu0 %vm498_vm0, %v3075_v58 }
 0x243   : > { %2672 = vmatpush3.bf16.msra.mxu0 %v997_v44  ;;  %2679 = vmatprep.mubr.msk.bf16.mxu0 %vm2885_vm1, %v2884_v19  ;;  %v2376_v44 = vld [vmem:[%s3791_s3 + $0x150] sm:$0xff] }
 0x244   : > { %2673 = vmatprep.subr.bf16.mxu0 %v2884_v19  ;;  %v936_v46 = vpack.c.bf16 %v2377_v45, %v2376_v44  ;;  %v2415_v44 = vld [vmem:[%s3791_s3 + $0x180] sm:$0xff]  ;;  %v2416_v45 = vld [vmem:[%s3791_s3 + $0x188] sm:$0xff] }
 0x247   : > { %2674 = vmatpush3.bf16.msra.mxu0 %v998_v47  ;;  %v2378_v47 = vld [vmem:[%s3791_s3 + $0x160] sm:$0xff] }
 0x248   : > { %2675 = vmatprep.subr.bf16.mxu0 %v2884_v19  ;;  %v937_v49 = vpack.c.bf16 %v2379_v48, %v2378_v47  ;;  %v2417_v47 = vld [vmem:[%s3791_s3 + $0x190] sm:$0xff]  ;;  %v2418_v48 = vld [vmem:[%s3791_s3 + $0x198] sm:$0xff] }
 0x24b   : > { %2676 = vmatpush3.bf16.msra.mxu0 %v999_v50  ;;  %v2380_v50 = vld [vmem:[%s3791_s3 + $0x170] sm:$0xff] }
 0x24c   : > { %2677 = vmatprep.subr.bf16.mxu0 %v2884_v19  ;;  %v938_v52 = vpack.c.bf16 %v2381_v51, %v2380_v50  ;;  %v2419_v50 = vld [vmem:[%s3791_s3 + $0x1a0] sm:$0xff]  ;;  %v2420_v51 = vld [vmem:[%s3791_s3 + $0x1a8] sm:$0xff] }
 0x24f   : > { %2678 = vmatpush3.bf16.msra.mxu0 %v1000_v53 }
 0x250   : > { %2695 = vmatprep.subr.bf16.mxu0 %v2884_v19 }
 0x252   : > { %2680 = vmatmul.mubr.msk.bf16.vlgmr.msra.gmra.mrb[16].mxu0 %vm498_vm0, %v3075_v58 }
 0x253   : > { %2697 = vmatprep.mubr.msk.bf16.mxu0 %vm2885_vm1, %v2884_v19 }
 0x305   : > { %v777_v54 = vpop.f32.mrb[8].mxu0 }
 0x306   : > { %v784_v56 = vmul.f32 0.25, %v777_v54  ;;  %v2639_v57 = vpop.f32.mrb[9].mxu0 }
 0x307   : > { %v780_v59 = vpop.f32.mrb[10].mxu0 }
 0x308   : > { %v788_v62 = vadd.f32 %v786_v55, %v784_v56  ;;  %v785_v63 = vmul.f32 0.25, %v780_v59  ;;  %v2640_v0 = vpop.f32.mrb[11].mxu0  ;;  %v2383_v59 = vld [vmem:[%s3792_s4 + $0x5] ss:$0 sm:$0xff] }
 0x30a   : > { %v789_v2 = vadd.f32 %v787_v60, %v785_v63  ;;  %v790_v3 = vadd.f32 %v788_v62, %v3199_v61 }
 0x30c   : > { %v792_v4 = vsel %vm736_vm2, %v790_v3, -inf  ;;  %v791_v5 = vadd.f32 %v789_v2, %v3204_v1 }
 0x30d   : > { %793 = vmax.xlane.f32.xlu0 %v792_v4 }
 0x30e   : > { %v795_v6 = vsel %vm736_vm2, %v791_v5, -inf }
 0x30f   : > { %796 = vmax.xlane.f32.xlu1 %v795_v6 }
 0x315   : > { %v919_v8 = vpop.f32.mrb[12].mxu0 }
 0x316   : > { %v2657_v9 = vpop.f32.mrb[13].mxu0  ;;  %v3213_v11 = vadd.f32 %v2372_v7, %v919_v8 }
 0x317   : > { %v922_v10 = vpop.f32.mrb[14].mxu0 }
 0x318   : > { %v3215_v12 = vadd.f32 %v2372_v7, %v922_v10  ;;  %v2658_v13 = vpop.f32.mrb[15].mxu0  ;;  %v2397_v7 = vld [vmem:[%s3793_s5 + $0x10] sm:$0xff] }
 0x31a   : > { %v1050_v14 = vpack.c.bf16 %v3215_v12, %v3213_v11  ;;  %v2398_v11 = vld [vmem:[%s3793_s5 + $0x18] sm:$0xff] }
 0x325   : > { %v1043_v16 = vpop.f32.mrb[16].mxu0 }
 0x326   : > { %v2681_v17 = vpop.f32.mrb[17].mxu0  ;;  %v3222_v20 = vadd.f32 %v2394_v15, %v1043_v16 }
 0x327   : > { %v1046_v18 = vpop.f32.mrb[18].mxu0 }
 0x328   : > { %v3224_v21 = vadd.f32 %v2394_v15, %v1046_v18  ;;  %v2682_v22 = vpop.f32.mrb[19].mxu0 }
 0x32a   : > { %v1131_v23 = vpack.c.bf16 %v3224_v21, %v3222_v20 }
 0x39a   : > { %v794_v24 = vpop.xlane.xlu0 %793 }
 0x39b   : > { %v798_v25 = vsub.f32 %v790_v3, %v794_v24 }
 0x39c   : > { %v797_v26 = vpop.xlane.xlu1 %796 }
 0x39d   : > { %v800_v27 = vmul.f32 1.442695, %v798_v25  ;;  %v799_v28 = vsub.f32 %v791_v5, %v797_v26 }
 0x39f   : > { %2830 = vpow2.f32 %v800_v27  ;;  %v802_v29 = vmul.f32 1.442695, %v799_v28 }
 0x3a1   : > { %2832 = vpow2.f32 %v802_v29 }
 0x3a9   : > { %v2831_v30 = vpop.eup %2830 }
 0x3aa   : > { %v804_v31 = vsel %vm736_vm2, %v2831_v30, 0.0 }
 0x3ab   : > { %v2833_v32 = vpop.eup %2832  ;;  %805 = vadd.xlane.f32.xlu0 %v804_v31  ;;  %v2400_v31 = vld [vmem:[%s3795_s7 + $0x10] sm:$0xff] }
 0x3ac   : > { %v807_v33 = vsel %vm736_vm2, %v2833_v32, 0.0 }
 0x3ad   : > { %808 = vadd.xlane.f32.xlu1 %v807_v33 }
 0x438   : > { %v806_v34 = vpop.xlane.xlu0 %805 }
 0x439   : > { %2834 = vrcp.f32 %v806_v34 }
 0x43a   : > { %v809_v35 = vpop.xlane.xlu1 %808 }
 0x43b   : > { %2836 = vrcp.f32 %v809_v35 }
 0x443   : > { %v2835_v36 = vpop.eup %2834 }
 0x444   : > { %v812_v40 = vmul.f32 %v2835_v36, %v2831_v30 }
 0x445   : > { %v2837_v39 = vpop.eup %2836 }
 0x446   : > { %v813_v41 = vmul.f32 %v2837_v39, %v2833_v32  ;;  %v2401_v32 = vld [vmem:[%s3795_s7 + $0x18] sm:$0xff] }
 0x447   : > { %v1180_v33 = vpack.c.bf16 %v2401_v32, %v2400_v31 }
 0x448   : > { %v814_v43 = vpack.c.bf16 %v813_v41, %v812_v40 }
 0x449   : > { %2696 = vmatpush3.bf16.msra.mxu0 %v1180_v33  ;;  %v2432_v33 = vld [vmem:[%s3791_s3 + $0x2b0] sm:$0xff] }
 0x44a   : > { %2644 = vmatmul.mubr.msk.bf16.vlgmr.msra.gmra.mrb[4].mxu1 %vm736_vm2, %v814_v43  ;;  %2707 = vmatprep.subr.bf16.mxu0 %v2884_v19 }
 0x44b   : > { %2660 = vmatpush3.bf16.msra.mxu1 %v935_v42  ;;  %2667 = vmatprep.mubr.msk.bf16.mxu1 %vm2885_vm1, %v2884_v19  ;;  %v863_v42 = vpack.c.bf16 %v862_v38, %v861_v37 }
 0x44c   : > { %2661 = vmatprep.subr.bf16.mxu1 %v2884_v19 }
 0x44f   : > { %2662 = vmatpush3.bf16.msra.mxu1 %v936_v46  ;;  %v1340_v46 = vpack.c.bf16 %v2416_v45, %v2415_v44  ;;  %v2413_v44 = vld [vmem:[%s3792_s4 + $0x2] ss:$0 sm:$0xff] }
 0x450   : > { %2663 = vmatprep.subr.bf16.mxu1 %v2884_v19 }
 0x453   : > { %2664 = vmatpush3.bf16.msra.mxu1 %v937_v49  ;;  %v1341_v49 = vpack.c.bf16 %v2418_v48, %v2417_v47 }
 0x454   : > { %2665 = vmatprep.subr.bf16.mxu1 %v2884_v19 }
 0x457   : > { %2666 = vmatpush3.bf16.msra.mxu1 %v938_v52  ;;  %v1342_v52 = vpack.c.bf16 %v2420_v51, %v2419_v50 }
 0x458   : > { %2683 = vmatprep.subr.bf16.mxu1 %v2884_v19 }
 0x45a   : > { %2668 = vmatmul.mubr.msk.bf16.vlgmr.msra.gmra.mrb[8].mxu1 %vm498_vm0, %v3075_v58 }
 0x45b   : > { %2685 = vmatprep.mubr.msk.bf16.mxu1 %vm2885_vm1, %v2884_v19 }
 0x51d   : > { %v3265_v53 = vpop.f32.mrb[4].mxu1 }
 0x51e   : > { %v2645_v54 = vpop.f32.mrb[5].mxu1 }
 0x51f   : > { %v3267_v55 = vpop.f32.mrb[6].mxu1  ;;  %v2422_v54 = vld [vmem:[%s3791_s3 + $0x1b8] sm:$0xff] }
 0x520   : > { %v860_v56 = vpack.c.bf16 %v3267_v55, %v3265_v53  ;;  %v2646_v57 = vpop.f32.mrb[7].mxu1  ;;  %v2421_v53 = vld [vmem:[%s3791_s3 + $0x1b0] sm:$0xff] }
 0x521   : > { %v1343_v55 = vpack.c.bf16 %v2422_v54, %v2421_v53  ;;  %v2405_v57 = vld [vmem:[%s3791_s3 + $0x88] sm:$0xff] }
 0x52d   : > { %v981_v60 = vpop.f32.mrb[8].mxu1 }
 0x52e   : > { %v2669_v62 = vpop.f32.mrb[9].mxu1  ;;  %v982_v0 = vadd.f32 %v2383_v59, %v981_v60 }
 0x52f   : > { %v984_v63 = vpop.f32.mrb[10].mxu1 }
 0x530   : > { %v985_v2 = vadd.f32 %v2383_v59, %v984_v63  ;;  %v2670_v3 = vpop.f32.mrb[11].mxu1 }
 0x531   : > { %v2406_v3 = vld [vmem:[%s3791_s3 + $0x90] sm:$0xff] }
 0x532   : > { %v1051_v4 = vpack.c.bf16 %v985_v2, %v982_v0 }
 0x534   : > { %v1056_v5 = vsel %vm736_vm2, %v1051_v4, 0  ;;  %v2407_v4 = vld [vmem:[%s3791_s3 + $0x98] sm:$0xff] }
 0x535   : > { %2684 = vmatpush3.bf16.xpose.msra.mxu1 %v1056_v5  ;;  %v1279_v5 = vpack.c.bf16 %v2407_v4, %v2406_v3  ;;  %v2439_v4 = vld [vmem:[%s3793_s5 + $0x28] sm:$0xff] }
 0x536   : > { %2689 = vmatprep.subr.bf16.mxu1 %v2884_v19 }
 0x53c   : > { %2686 = vmatmul.mubr.msk.bf16.vlgmr.msra.gmra.mrb[12].mxu1 %vm736_vm2, %v1050_v14 }
 0x53d   : > { %2690 = vmatpush3.bf16.msra.mxu1 %v1131_v23  ;;  %2691 = vmatprep.mubr.msk.bf16.mxu1 %vm2885_vm1, %v2884_v19 }
 0x53e   : > { %2701 = vmatprep.subr.bf16.mxu1 %v2884_v19 }
 0x60f   : > { %v1092_v6 = vpop.f32.mrb[12].mxu1 }
 0x610   : > { %v1099_v8 = vmul.f32 0.25, %v1092_v6  ;;  %v2687_v9 = vpop.f32.mrb[13].mxu1  ;;  %v2408_v6 = vld [vmem:[%s3791_s3 + $0xa0] sm:$0xff] }
 0x611   : > { %v1095_v10 = vpop.f32.mrb[14].mxu1 }
 0x612   : > { %v1104_v12 = vadd.f32 %v2397_v7, %v1099_v8  ;;  %v1100_v13 = vmul.f32 0.25, %v1095_v10  ;;  %v2688_v14 = vpop.f32.mrb[15].mxu1  ;;  %v2409_v7 = vld [vmem:[%s3791_s3 + $0xa8] sm:$0xff] }
 0x613   : > { %v2411_v14 = vld [vmem:[%s3791_s3 + $0xb8] sm:$0xff] }
 0x614   : > { %v1105_v15 = vadd.f32 %v2398_v11, %v1100_v13  ;;  %v1106_v16 = vadd.f32 %v1104_v12, %v3199_v61  ;;  %v1280_v11 = vpack.c.bf16 %v2409_v7, %v2408_v6  ;;  %v2410_v13 = vld [vmem:[%s3791_s3 + $0xb0] sm:$0xff] }
 0x616   : > { %v1108_v17 = vsel %vm736_vm2, %v1106_v16, -inf  ;;  %v1107_v18 = vadd.f32 %v1105_v15, %v3204_v1  ;;  %v1281_v15 = vpack.c.bf16 %v2411_v14, %v2410_v13 }
 0x617   : > { %1109 = vmax.xlane.f32.xlu0 %v1108_v17  ;;  %v2427_v17 = vld [vmem:[%s3791_s3 + $0x288] sm:$0xff] }
 0x618   : > { %v1111_v20 = vsel %vm736_vm2, %v1107_v18, -inf }
 0x619   : > { %1112 = vmax.xlane.f32.xlu1 %v1111_v20  ;;  %v2428_v20 = vld [vmem:[%s3791_s3 + $0x290] sm:$0xff] }
 0x6a4   : > { %v1110_v21 = vpop.xlane.xlu0 %1109 }
 0x6a5   : > { %v1114_v22 = vsub.f32 %v1106_v16, %v1110_v21  ;;  %v2426_v16 = vld [vmem:[%s3791_s3 + $0x280] sm:$0xff]  ;;  %v2429_v21 = vld [vmem:[%s3791_s3 + $0x298] sm:$0xff] }
 0x6a6   : > { %v1113_v23 = vpop.xlane.xlu1 %1112 }
 0x6a7   : > { %v1116_v24 = vmul.f32 1.442695, %v1114_v22  ;;  %v1115_v25 = vsub.f32 %v1107_v18, %v1113_v23  ;;  %v1402_v18 = vpack.c.bf16 %v2427_v17, %v2426_v16  ;;  %v1403_v22 = vpack.c.bf16 %v2429_v21, %v2428_v20  ;;  %v2430_v23 = vld [vmem:[%s3791_s3 + $0x2a0] sm:$0xff] }
 0x6a9   : > { %2838 = vpow2.f32 %v1116_v24  ;;  %v1118_v26 = vmul.f32 1.442695, %v1115_v25  ;;  %v2431_v24 = vld [vmem:[%s3791_s3 + $0x2a8] sm:$0xff]  ;;  %v2424_v25 = vld [vmem:[%s3792_s4 + $0x6] ss:$0 sm:$0xff] }
 0x6ab   : > { %2840 = vpow2.f32 %v1118_v26 }
 0x6b3   : > { %v2839_v27 = vpop.eup %2838 }
 0x6b4   : > { %v1120_v28 = vsel %vm736_vm2, %v2839_v27, 0.0 }
 0x6b5   : > { %v2841_v29 = vpop.eup %2840  ;;  %1121 = vadd.xlane.f32.xlu0 %v1120_v28 }
 0x6b6   : > { %v1123_v30 = vsel %vm736_vm2, %v2841_v29, 0.0 }
 0x6b7   : > { %1124 = vadd.xlane.f32.xlu1 %v1123_v30 }
 0x742   : > { %v1122_v34 = vpop.xlane.xlu0 %1121 }
 0x743   : > { %2842 = vrcp.f32 %v1122_v34  ;;  %v2433_v34 = vld [vmem:[%s3791_s3 + $0x2b8] sm:$0xff] }
 0x744   : > { %v1125_v35 = vpop.xlane.xlu1 %1124 }
 0x745   : > { %2844 = vrcp.f32 %v1125_v35 }
 0x74d   : > { %v2843_v36 = vpop.eup %2842 }
 0x74e   : > { %v1128_v40 = vmul.f32 %v2843_v36, %v2839_v27  ;;  %v1405_v36 = vpack.c.bf16 %v2433_v34, %v2432_v33 }
 0x74f   : > { %v2845_v39 = vpop.eup %2844 }
 0x750   : > { %v1129_v41 = vmul.f32 %v2845_v39, %v2841_v29  ;;  %v1404_v29 = vpack.c.bf16 %v2431_v24, %v2430_v23  ;;  %v2441_v24 = vld [vmem:[%s3795_s7 + $0x20] sm:$0xff] }
 0x752   : > { %v1130_v43 = vpack.c.bf16 %v1129_v41, %v1128_v40 }
 0x754   : > { %2692 = vmatmul.mubr.msk.bf16.vlgmr.msra.gmra.mrb[16].mxu1 %vm736_vm2, %v1130_v43 }
 0x755   : > { %2702 = vmatpush3.bf16.msra.mxu1 %v863_v42  ;;  %2703 = vmatprep.mubr.msk.bf16.mxu1 %vm2885_vm1, %v2884_v19 }
 0x756   : > { %2719 = vmatprep.subr.bf16.mxu1 %v2884_v19 }
 0x75c   : > { %2704 = vmatmul.mubr.msk.bf16.vlgmr.msra.gmra.mrb[20].mxu1 %vm736_vm2, %v860_v56  ;;  %v2404_v56 = vld [vmem:[%s3791_s3 + $0x80] sm:$0xff] }
 0x75d   : > { %2720 = vmatpush3.bf16.msra.mxu1 %v1340_v46  ;;  %2727 = vmatprep.mubr.msk.bf16.mxu1 %vm2885_vm1, %v2884_v19  ;;  %v1278_v63 = vpack.c.bf16 %v2405_v57, %v2404_v56 }
 0x75e   : > { %2721 = vmatprep.subr.bf16.mxu1 %v2884_v19 }
 0x761   : > { %2722 = vmatpush3.bf16.msra.mxu1 %v1341_v49 }
 0x762   : > { %2723 = vmatprep.subr.bf16.mxu1 %v2884_v19 }
 0x765   : > { %2724 = vmatpush3.bf16.msra.mxu1 %v1342_v52  ;;  %v2435_v52 = vld [vmem:[%s3792_s4 + $0xa] ss:$0 sm:$0xff] }
 0x766   : > { %2725 = vmatprep.subr.bf16.mxu1 %v2884_v19 }
 0x769   : > { %2726 = vmatpush3.bf16.msra.mxu1 %v1343_v55 }
 0x76a   : > { %2743 = vmatprep.subr.bf16.mxu1 %v2884_v19 }
 0x76c   : > { %2728 = vmatmul.mubr.msk.bf16.vlgmr.msra.gmra.mrb[24].mxu1 %vm498_vm0, %v3075_v58 }
 0x76d   : > { %2745 = vmatprep.mubr.msk.bf16.mxu1 %vm2885_vm1, %v2884_v19 }
 0x827   : > { %v1169_v59 = vpop.f32.mrb[16].mxu1 }
 0x828   : > { %v2693_v60 = vpop.f32.mrb[17].mxu1 }
 0x829   : > { %v1172_v62 = vpop.f32.mrb[18].mxu1 }
 0x82a   : > { %v1176_v0 = vpack.c.bf16 %v1172_v62, %v1169_v59  ;;  %v2694_v2 = vpop.f32.mrb[19].mxu1 }
 0x82c   : > { %2698 = vmatmul.mubr.msk.bf16.vlgmr.msra.gmra.mrb[20].mxu0 %vm736_vm2, %v1176_v0 }
 0x82d   : > { %2708 = vmatpush3.bf16.msra.mxu0 %v1278_v63  ;;  %2715 = vmatprep.mubr.msk.bf16.mxu0 %vm2885_vm1, %v2884_v19  ;;  %v2438_v63 = vld [vmem:[%s3793_s5 + $0x20] sm:$0xff] }
 0x82e   : > { %2709 = vmatprep.subr.bf16.mxu0 %v2884_v19 }
 0x82f   : > { %v1262_v8 = vpop.f32.mrb[20].mxu1 }
 0x830   : > { %v2705_v9 = vpop.f32.mrb[21].mxu1 }
 0x831   : > { %2710 = vmatpush3.bf16.msra.mxu0 %v1279_v5  ;;  %v1265_v10 = vpop.f32.mrb[22].mxu1 }
 0x832   : > { %v2706_v12 = vpop.f32.mrb[23].mxu1  ;;  %2711 = vmatprep.subr.bf16.mxu0 %v2884_v19 }
 0x835   : > { %2712 = vmatpush3.bf16.msra.mxu0 %v1280_v11 }
 0x836   : > { %2713 = vmatprep.subr.bf16.mxu0 %v2884_v19 }
 0x839   : > { %2714 = vmatpush3.bf16.msra.mxu0 %v1281_v15 }
 0x83a   : > { %2731 = vmatprep.subr.bf16.mxu0 %v2884_v19 }
 0x83c   : > { %2716 = vmatmul.mubr.msk.bf16.vlgmr.msra.gmra.mrb[24].mxu0 %vm498_vm0, %v3075_v58 }
 0x83d   : > { %2732 = vmatpush3.bf16.msra.mxu0 %v1402_v18  ;;  %2739 = vmatprep.mubr.msk.bf16.mxu0 %vm2885_vm1, %v2884_v19 }
 0x83e   : > { %2733 = vmatprep.subr.bf16.mxu0 %v2884_v19 }
 0x83f   : > { %v1386_v26 = vpop.f32.mrb[24].mxu1 }
 0x840   : > { %v2729_v27 = vpop.f32.mrb[25].mxu1  ;;  %v1387_v30 = vadd.f32 %v2424_v25, %v1386_v26 }
 0x841   : > { %v1389_v28 = vpop.f32.mrb[26].mxu1  ;;  %2734 = vmatpush3.bf16.msra.mxu0 %v1403_v22 }
 0x842   : > { %v1390_v31 = vadd.f32 %v2424_v25, %v1389_v28  ;;  %v2730_v32 = vpop.f32.mrb[27].mxu1  ;;  %2735 = vmatprep.subr.bf16.mxu0 %v2884_v19  ;;  %v2442_v25 = vld [vmem:[%s3795_s7 + $0x28] sm:$0xff] }
 0x843   : > { %v1585_v26 = vpack.c.bf16 %v2442_v25, %v2441_v24  ;;  %v2475_v25 = vld [vmem:[%s3792_s4 + $0xb] ss:$0 sm:$0xff] }
 0x844   : > { %v1456_v35 = vpack.c.bf16 %v1390_v31, %v1387_v30  ;;  %v2444_v30 = vld [vmem:[%s3791_s3 + $0xc0] sm:$0xff]  ;;  %v2445_v31 = vld [vmem:[%s3791_s3 + $0xc8] sm:$0xff] }
 0x845   : > { %2736 = vmatpush3.bf16.msra.mxu0 %v1404_v29 }
 0x846   : > { %v1461_v37 = vsel %vm736_vm2, %v1456_v35, 0  ;;  %2737 = vmatprep.subr.bf16.mxu0 %v2884_v19  ;;  %v1641_v35 = vpack.c.bf16 %v2445_v31, %v2444_v30 }
 0x847   : > { %2744 = vmatpush3.bf16.xpose.msra.mxu1 %v1461_v37  ;;  %v2446_v37 = vld [vmem:[%s3791_s3 + $0xd0] sm:$0xff] }
 0x848   : > { %2749 = vmatprep.subr.bf16.mxu1 %v2884_v19 }
 0x849   : > { %2738 = vmatpush3.bf16.msra.mxu0 %v1405_v36 }
 0x84a   : > { %2755 = vmatprep.subr.bf16.mxu0 %v2884_v19 }
 0x84c   : > { %2740 = vmatmul.mubr.msk.bf16.vlgmr.msra.gmra.mrb[28].mxu0 %vm498_vm0, %v3075_v58 }
 0x84d   : > { %2757 = vmatprep.mubr.msk.bf16.mxu0 %vm2885_vm1, %v2884_v19  ;;  %2756 = vmatpush3.bf16.msra.mxu0 %v1585_v26 }
 0x84e   : > { %2773 = vmatprep.subr.bf16.mxu0 %v2884_v19 }
 0x8ff   : > { %v1218_v38 = vpop.f32.mrb[20].mxu0 }
 0x900   : > { %v3425_v39 = vadd.f32 %v1262_v8, %v1218_v38  ;;  %v2699_v40 = vpop.f32.mrb[21].mxu0  ;;  %v2447_v38 = vld [vmem:[%s3791_s3 + $0xd8] sm:$0xff] }
 0x901   : > { %v1221_v41 = vpop.f32.mrb[22].mxu0  ;;  %v1642_v40 = vpack.c.bf16 %v2447_v38, %v2446_v37  ;;  %v2464_v38 = vld [vmem:[%s3792_s4 + $0x7] ss:$0 sm:$0xff] }
 0x902   : > { %v3427_v42 = vadd.f32 %v1265_v10, %v1221_v41  ;;  %v2700_v43 = vpop.f32.mrb[23].mxu0  ;;  %v2448_v41 = vld [vmem:[%s3791_s3 + $0xe0] sm:$0xff] }
 0x903   : > { %v2449_v43 = vld [vmem:[%s3791_s3 + $0xe8] sm:$0xff] }
 0x90f   : > { %v1324_v45 = vpop.f32.mrb[24].mxu0 }
 0x910   : > { %v2717_v46 = vpop.f32.mrb[25].mxu0  ;;  %v1325_v48 = vadd.f32 %v2413_v44, %v1324_v45  ;;  %v2450_v45 = vld [vmem:[%s3791_s3 + $0xf0] sm:$0xff] }
 0x911   : > { %v1327_v47 = vpop.f32.mrb[26].mxu0  ;;  %v2451_v46 = vld [vmem:[%s3791_s3 + $0xf8] sm:$0xff] }
 0x912   : > { %v1328_v49 = vadd.f32 %v2413_v44, %v1327_v47  ;;  %v2718_v50 = vpop.f32.mrb[27].mxu0  ;;  %v1643_v44 = vpack.c.bf16 %v2449_v43, %v2448_v41  ;;  %v1644_v47 = vpack.c.bf16 %v2451_v46, %v2450_v45 }
 0x914   : > { %v1455_v51 = vpack.c.bf16 %v1328_v49, %v1325_v48  ;;  %v2466_v48 = vld [vmem:[%s3791_s3 + $0x2c0] sm:$0xff]  ;;  %v2467_v49 = vld [vmem:[%s3791_s3 + $0x2c8] sm:$0xff] }
 0x915   : > { %v1765_v50 = vpack.c.bf16 %v2467_v49, %v2466_v48  ;;  %v2478_v48 = vld [vmem:[%s3793_s5 + $0x30] sm:$0xff] }
 0x916   : > { %2746 = vmatmul.mubr.msk.bf16.vlgmr.msra.gmra.mrb[28].mxu1 %vm736_vm2, %v1455_v51  ;;  %v2468_v51 = vld [vmem:[%s3791_s3 + $0x2d0] sm:$0xff] }
 0x917   : > { %2751 = vmatprep.mubr.msk.bf16.mxu1 %vm2885_vm1, %v2884_v19 }
 0x91f   : > { %v1448_v53 = vpop.f32.mrb[28].mxu0 }
 0x920   : > { %v2741_v54 = vpop.f32.mrb[29].mxu0  ;;  %v1449_v56 = vadd.f32 %v2435_v52, %v1448_v53 }
 0x921   : > { %v1451_v55 = vpop.f32.mrb[30].mxu0  ;;  %v2470_v54 = vld [vmem:[%s3791_s3 + $0x2e0] sm:$0xff] }
 0x922   : > { %v1452_v57 = vadd.f32 %v2435_v52, %v1451_v55  ;;  %v2742_v59 = vpop.f32.mrb[31].mxu0  ;;  %v2469_v52 = vld [vmem:[%s3791_s3 + $0x2d8] sm:$0xff]  ;;  %v2471_v55 = vld [vmem:[%s3791_s3 + $0x2e8] sm:$0xff] }
 0x923   : > { %v1766_v53 = vpack.c.bf16 %v2469_v52, %v2468_v51  ;;  %v2473_v59 = vld [vmem:[%s3791_s3 + $0x2f8] sm:$0xff] }
 0x924   : > { %v1536_v60 = vpack.c.bf16 %v1452_v57, %v1449_v56  ;;  %v1767_v56 = vpack.c.bf16 %v2471_v55, %v2470_v54  ;;  %v2472_v57 = vld [vmem:[%s3791_s3 + $0x2f0] sm:$0xff]  ;;  %v2479_v52 = vld [vmem:[%s3793_s5 + $0x38] sm:$0xff] }
 0x926   : > { %2750 = vmatpush3.bf16.msra.mxu1 %v1536_v60  ;;  %v1768_v60 = vpack.c.bf16 %v2473_v59, %v2472_v57 }
 0x927   : > { %2761 = vmatprep.subr.bf16.mxu1 %v2884_v19 }
 0x9e9   : > { %v1497_v62 = vpop.f32.mrb[28].mxu1 }
 0x9ea   : > { %v1504_v0 = vmul.f32 0.25, %v1497_v62  ;;  %v2747_v2 = vpop.f32.mrb[29].mxu1  ;;  %v2455_v62 = vld [vmem:[%s3791_s3 + $0x1c0] sm:$0xff] }
 0x9eb   : > { %v1500_v3 = vpop.f32.mrb[30].mxu1 }
 0x9ec   : > { %v1509_v5 = vadd.f32 %v2438_v63, %v1504_v0  ;;  %v1505_v6 = vmul.f32 0.25, %v1500_v3  ;;  %v2748_v7 = vpop.f32.mrb[31].mxu1  ;;  %v2456_v63 = vld [vmem:[%s3791_s3 + $0x1c8] sm:$0xff] }
 0x9ed   : > { %v2457_v7 = vld [vmem:[%s3791_s3 + $0x1d0] sm:$0xff] }
 0x9ee   : > { %v1510_v8 = vadd.f32 %v2439_v4, %v1505_v6  ;;  %v1511_v9 = vadd.f32 %v1509_v5, %v3199_v61  ;;  %v1703_v4 = vpack.c.bf16 %v2456_v63, %v2455_v62 }
 0x9f0   : > { %v1513_v10 = vsel %vm736_vm2, %v1511_v9, -inf  ;;  %v1512_v11 = vadd.f32 %v1510_v8, %v3204_v1  ;;  %v2458_v8 = vld [vmem:[%s3791_s3 + $0x1d8] sm:$0xff] }
 0x9f1   : > { %1514 = vmax.xlane.f32.xlu0 %v1513_v10  ;;  %v2459_v10 = vld [vmem:[%s3791_s3 + $0x1e0] sm:$0xff] }
 0x9f2   : > { %v1516_v12 = vsel %vm736_vm2, %v1512_v11, -inf }
 0x9f3   : > { %1517 = vmax.xlane.f32.xlu1 %v1516_v12 }
 0xa7e   : > { %v1515_v13 = vpop.xlane.xlu0 %1514 }
 0xa7f   : > { %v1519_v14 = vsub.f32 %v1511_v9, %v1515_v13  ;;  %v1704_v9 = vpack.c.bf16 %v2458_v8, %v2457_v7  ;;  %v2461_v13 = vld [vmem:[%s3791_s3 + $0x1f0] sm:$0xff]  ;;  %v2482_v8 = vld [vmem:[%s3795_s7 + $0x38] sm:$0xff] }
 0xa80   : > { %v1518_v15 = vpop.xlane.xlu1 %1517 }
 0xa81   : > { %v1521_v16 = vmul.f32 1.442695, %v1519_v14  ;;  %v1520_v17 = vsub.f32 %v1512_v11, %v1518_v15  ;;  %v2460_v11 = vld [vmem:[%s3791_s3 + $0x1e8] sm:$0xff]  ;;  %v2462_v14 = vld [vmem:[%s3791_s3 + $0x1f8] sm:$0xff] }
 0xa82   : > { %v1705_v12 = vpack.c.bf16 %v2460_v11, %v2459_v10  ;;  %v1706_v15 = vpack.c.bf16 %v2462_v14, %v2461_v13 }
 0xa83   : > { %2846 = vpow2.f32 %v1521_v16  ;;  %v1523_v18 = vmul.f32 1.442695, %v1520_v17  ;;  %v2453_v16 = vld [vmem:[%s3792_s4 + $0x3] ss:$0 sm:$0xff] }
 0xa85   : > { %2848 = vpow2.f32 %v1523_v18 }
 0xa8d   : > { %v2847_v20 = vpop.eup %2846 }
 0xa8e   : > { %v1525_v21 = vsel %vm736_vm2, %v2847_v20, 0.0 }
 0xa8f   : > { %v2849_v22 = vpop.eup %2848  ;;  %1526 = vadd.xlane.f32.xlu0 %v1525_v21 }
 0xa90   : > { %v1528_v23 = vsel %vm736_vm2, %v2849_v22, 0.0 }
 0xa91   : > { %1529 = vadd.xlane.f32.xlu1 %v1528_v23 }
 0xb1c   : > { %v1527_v27 = vpop.xlane.xlu0 %1526 }
 0xb1d   : > { %2850 = vrcp.f32 %v1527_v27 }
 0xb1e   : > { %v1530_v28 = vpop.xlane.xlu1 %1529 }
 0xb1f   : > { %2852 = vrcp.f32 %v1530_v28 }
 0xb27   : > { %v2851_v29 = vpop.eup %2850 }
 0xb28   : > { %v1533_v33 = vmul.f32 %v2851_v29, %v2847_v20 }
 0xb29   : > { %v2853_v32 = vpop.eup %2852 }
 0xb2a   : > { %v1534_v34 = vmul.f32 %v2853_v32, %v2849_v22 }
 0xb2c   : > { %v1535_v36 = vpack.c.bf16 %v1534_v34, %v1533_v33 }
 0xb2e   : > { %2752 = vmatmul.mubr.msk.bf16.vlgmr.msra.gmra.mrb[32].mxu1 %vm736_vm2, %v1535_v36 }
 0xb2f   : > { %2762 = vmatpush3.bf16.msra.mxu1 %v1641_v35  ;;  %2769 = vmatprep.mubr.msk.bf16.mxu1 %vm2885_vm1, %v2884_v19 }
 0xb30   : > { %2763 = vmatprep.subr.bf16.mxu1 %v2884_v19 }
 0xb33   : > { %2764 = vmatpush3.bf16.msra.mxu1 %v1642_v40 }
 0xb34   : > { %2765 = vmatprep.subr.bf16.mxu1 %v2884_v19 }
 0xb37   : > { %2766 = vmatpush3.bf16.msra.mxu1 %v1643_v44 }
 0xb38   : > { %2767 = vmatprep.subr.bf16.mxu1 %v2884_v19 }
 0xb3b   : > { %2768 = vmatpush3.bf16.msra.mxu1 %v1644_v47 }
 0xb3c   : > { %2785 = vmatprep.subr.bf16.mxu1 %v2884_v19 }
 0xb3e   : > { %2770 = vmatmul.mubr.msk.bf16.vlgmr.msra.gmra.mrb[36].mxu1 %vm498_vm0, %v3075_v58 }
 0xb3f   : > { %2786 = vmatpush3.bf16.msra.mxu1 %v1765_v50  ;;  %2793 = vmatprep.mubr.msk.bf16.mxu1 %vm2885_vm1, %v2884_v19 }
 0xb40   : > { %2787 = vmatprep.subr.bf16.mxu1 %v2884_v19 }
 0xb43   : > { %2788 = vmatpush3.bf16.msra.mxu1 %v1766_v53 }
 0xb44   : > { %2789 = vmatprep.subr.bf16.mxu1 %v2884_v19 }
 0xb47   : > { %2790 = vmatpush3.bf16.msra.mxu1 %v1767_v56 }
 0xb48   : > { %2791 = vmatprep.subr.bf16.mxu1 %v2884_v19 }
 0xb4b   : > { %2792 = vmatpush3.bf16.msra.mxu1 %v1768_v60 }
 0xb4c   : > { %2809 = vmatprep.subr.bf16.mxu1 %v2884_v19 }
 0xb4e   : > { %2794 = vmatmul.mubr.msk.bf16.vlgmr.msra.gmra.mrb[40].mxu1 %vm498_vm0, %v3075_v58 }
 0xb4f   : > { %2811 = vmatprep.mubr.msk.bf16.mxu1 %vm2885_vm1, %v2884_v19 }
 0xc01   : > { %v1574_v0 = vpop.f32.mrb[32].mxu1 }
 0xc02   : > { %v2753_v2 = vpop.f32.mrb[33].mxu1 }
 0xc03   : > { %v1577_v3 = vpop.f32.mrb[34].mxu1 }
 0xc04   : > { %v1581_v5 = vpack.c.bf16 %v1577_v3, %v1574_v0  ;;  %v2754_v6 = vpop.f32.mrb[35].mxu1 }
 0xc06   : > { %2758 = vmatmul.mubr.msk.bf16.vlgmr.msra.gmra.mrb[32].mxu0 %vm736_vm2, %v1581_v5 }
 0xc07   : > { %2774 = vmatpush3.bf16.msra.mxu0 %v1703_v4  ;;  %2781 = vmatprep.mubr.msk.bf16.mxu0 %vm2885_vm1, %v2884_v19 }
 0xc08   : > { %2775 = vmatprep.subr.bf16.mxu0 %v2884_v19 }
 0xc0b   : > { %2776 = vmatpush3.bf16.msra.mxu0 %v1704_v9 }
 0xc0c   : > { %2777 = vmatprep.subr.bf16.mxu0 %v2884_v19 }
 0xc0f   : > { %2778 = vmatpush3.bf16.msra.mxu0 %v1705_v12 }
 0xc10   : > { %2779 = vmatprep.subr.bf16.mxu0 %v2884_v19 }
 0xc11   : > { %v1687_v17 = vpop.f32.mrb[36].mxu1 }
 0xc12   : > { %v2771_v18 = vpop.f32.mrb[37].mxu1  ;;  %v1688_v21 = vadd.f32 %v2453_v16, %v1687_v17 }
 0xc13   : > { %v1690_v20 = vpop.f32.mrb[38].mxu1  ;;  %2780 = vmatpush3.bf16.msra.mxu0 %v1706_v15 }
 0xc14   : > { %v1691_v22 = vadd.f32 %v2453_v16, %v1690_v20  ;;  %v2772_v23 = vpop.f32.mrb[39].mxu1  ;;  %2797 = vmatprep.subr.bf16.mxu0 %v2884_v19 }
 0xc16   : > { %v1818_v24 = vpack.c.bf16 %v1691_v22, %v1688_v21  ;;  %2782 = vmatmul.mubr.msk.bf16.vlgmr.msra.gmra.mrb[36].mxu0 %vm498_vm0, %v3075_v58 }
 0xc17   : > { %2799 = vmatprep.mubr.msk.bf16.mxu0 %vm2885_vm1, %v2884_v19 }
 0xc21   : > { %v1811_v26 = vpop.f32.mrb[40].mxu1 }
 0xc22   : > { %v2795_v27 = vpop.f32.mrb[41].mxu1  ;;  %v1812_v29 = vadd.f32 %v2475_v25, %v1811_v26  ;;  %v2484_v26 = vld [vmem:[%s3796_s8] ss:$0 sm:$0xff] }
 0xc23   : > { %v1814_v28 = vpop.f32.mrb[42].mxu1 }
 0xc24   : > { %v1815_v30 = vadd.f32 %v2475_v25, %v1814_v28  ;;  %v2796_v31 = vpop.f32.mrb[43].mxu1  ;;  %v2874_v28 = vld [vmem:[%s2983_s23] sm:$0xff] }
 0xc26   : > { %v1899_v32 = vpack.c.bf16 %v1815_v30, %v1812_v29 }
 0xcd9   : > { %v1623_v33 = vpop.f32.mrb[32].mxu0 }
 0xcda   : > { %v3567_v34 = vadd.f32 %v1623_v33, %v3425_v39  ;;  %v2759_v35 = vpop.f32.mrb[33].mxu0  ;;  %v2875_v33 = vld [vmem:[%s2983_s23 + $0x8] sm:$0xff] }
 0xcdb   : > { %v1626_v58 = vpop.f32.mrb[34].mxu0 }
 0xcdc   : > { %v3570_v36 = vadd.f32 %v1626_v58, %v3427_v42  ;;  %v2760_v37 = vpop.f32.mrb[35].mxu0 }
 0xce9   : > { %v1749_v40 = vpop.f32.mrb[36].mxu0 }
 0xcea   : > { %v2783_v41 = vpop.f32.mrb[37].mxu0  ;;  %v1750_v44 = vadd.f32 %v2464_v38, %v1749_v40 }
 0xceb   : > { %v1752_v43 = vpop.f32.mrb[38].mxu0 }
 0xcec   : > { %v1753_v45 = vadd.f32 %v2464_v38, %v1752_v43  ;;  %v2784_v46 = vpop.f32.mrb[39].mxu0 }
 0xcee   : > { %v1819_v47 = vpack.c.bf16 %v1753_v45, %v1750_v44 }
 0xcf0   : > { %v1824_v39 = vsel %vm736_vm2, %v1819_v47, 0 }
 0xcf1   : > { %2798 = vmatpush3.bf16.xpose.msra.mxu0 %v1824_v39 }
 0xcf2   : > { %2803 = vmatprep.subr.bf16.mxu0 %v2884_v19 }
 0xcf8   : > { %2800 = vmatmul.mubr.msk.bf16.vlgmr.msra.gmra.mrb[40].mxu0 %vm736_vm2, %v1818_v24 }
 0xcf9   : > { %2804 = vmatpush3.bf16.msra.mxu0 %v1899_v32  ;;  %2805 = vmatprep.mubr.msk.bf16.mxu0 %vm2885_vm1, %v2884_v19 }
 0xdcb   : > { %v1860_v42 = vpop.f32.mrb[40].mxu0 }
 0xdcc   : > { %v1867_v49 = vmul.f32 0.25, %v1860_v42  ;;  %v2801_v50 = vpop.f32.mrb[41].mxu0  ;;  %v2052_v42 = vld [vmem:[%s3799_s11 + $0x8] sm:$0xff] }
 0xdcd   : > { %v1863_v51 = vpop.f32.mrb[42].mxu0  ;;  %v2051_v50 = vld [vmem:[%s3799_s11] sm:$0xff] }
 0xdce   : > { %v1872_v53 = vadd.f32 %v2478_v48, %v1867_v49  ;;  %v1868_v54 = vmul.f32 0.25, %v1863_v51  ;;  %v2802_v55 = vpop.f32.mrb[43].mxu0  ;;  %v2054_v48 = vld [vmem:[%s3799_s11 + $0x18] sm:$0xff]  ;;  %v2053_v51 = vld [vmem:[%s3799_s11 + $0x10] sm:$0xff] }
 0xdcf   : > { %v2068_v49 = vpack.c.bf16 %v2054_v48, %v2052_v42  ;;  %v2177_v48 = vld [vmem:[%s3801_s13 + $0x30] sm:$0xff] }
 0xdd0   : > { %v1873_v56 = vadd.f32 %v2479_v52, %v1868_v54  ;;  %v1874_v57 = vadd.f32 %v1872_v53, %v3199_v61  ;;  %v2067_v52 = vpack.c.bf16 %v2053_v51, %v2051_v50  ;;  %v2056_v53 = vld [vmem:[%s3799_s11 + $0x28] sm:$0xff]  ;;  %v2058_v54 = vld [vmem:[%s3799_s11 + $0x38] sm:$0xff]  ;;  %v2195_v51 = vld [vmem:[%s3801_s13 + $0xc0] sm:$0xff] }
 0xdd1   : > { %2090 = vmatprep.subr.bf16.mxu0 %v2068_v49  ;;  %v2070_v55 = vpack.c.bf16 %v2058_v54, %v2056_v53  ;;  %v2178_v49 = vld [vmem:[%s3801_s13 + $0x38] sm:$0xff]  ;;  %v2179_v54 = vld [vmem:[%s3801_s13 + $0x40] sm:$0xff] }
 0xdd2   : > { %v1876_v19 = vsel %vm736_vm2, %v1874_v57, -inf  ;;  %v1875_v59 = vadd.f32 %v1873_v56, %v3204_v1  ;;  %v2481_v1 = vld [vmem:[%s3795_s7 + $0x30] sm:$0xff]  ;;  %v2055_v56 = vld [vmem:[%s3799_s11 + $0x20] sm:$0xff]  ;;  %v2206_v50 = vpack.c.bf16 %v2178_v49, %v2177_v48 }
 0xdd3   : > { %1877 = vmax.xlane.f32.xlu0 %v1876_v19  ;;  %v1948_v9 = vpack.c.bf16 %v2482_v8, %v2481_v1  ;;  %v2886_v1 = vmov 0  }
 0xdd4   : > { %v1879_v60 = vsel %vm736_vm2, %v1875_v59, -inf }
 0xdd5   : > { %1880 = vmax.xlane.f32.xlu1 %v1879_v60  ;;  %2810 = vmatpush3.bf16.msra.mxu1 %v1948_v9  ;;  %v2062_v60 = vld [vmem:[%s3799_s11 + $0x58] sm:$0xff] }
 0xe60   : > { %v1878_v62 = vpop.xlane.xlu0 %1877 }
 0xe61   : > { %v1882_v63 = vsub.f32 %v1874_v57, %v1878_v62  ;;  %v2057_v57 = vld [vmem:[%s3799_s11 + $0x30] sm:$0xff] }
 0xe62   : > { %v1881_v0 = vpop.xlane.xlu1 %1880  ;;  %v2069_v19 = vpack.c.bf16 %v2057_v57, %v2055_v56  ;;  %v2197_v57 = vld [vmem:[%s3801_s13 + $0xd0] sm:$0xff] }
 0xe63   : > { %v1884_v2 = vmul.f32 1.442695, %v1882_v63  ;;  %v1883_v3 = vsub.f32 %v1875_v59, %v1881_v0  ;;  %v2060_v59 = vld [vmem:[%s3799_s11 + $0x48] sm:$0xff]  ;;  %v2059_v63 = vld [vmem:[%s3799_s11 + $0x40] sm:$0xff]  ;;  %v2061_v0 = vld [vmem:[%s3799_s11 + $0x50] sm:$0xff] }
 0xe64   : > { %v2072_v62 = vpack.c.bf16 %v2062_v60, %v2060_v59  ;;  %v2181_v60 = vld [vmem:[%s3801_s13 + $0x50] sm:$0xff] }
 0xe65   : > { %2854 = vpow2.f32 %v1884_v2  ;;  %v1886_v4 = vmul.f32 1.442695, %v1883_v3  ;;  %v2071_v2 = vpack.c.bf16 %v2061_v0, %v2059_v63  ;;  %v2064_v3 = vld [vmem:[%s3799_s11 + $0x68] sm:$0xff]  ;;  %v2199_v0 = vld [vmem:[%s3801_s13 + $0xe0] sm:$0xff] }
 0xe67   : > { %2856 = vpow2.f32 %v1886_v4  ;;  %v2066_v4 = vld [vmem:[%s3799_s11 + $0x78] sm:$0xff] }
 0xe6f   : > { %v2855_v5 = vpop.eup %2854 }
 0xe70   : > { %v1888_v6 = vsel %vm736_vm2, %v2855_v5, 0.0 }
 0xe71   : > { %v2857_v61 = vpop.eup %2856  ;;  %1889 = vadd.xlane.f32.xlu0 %v1888_v6  ;;  %v2063_v6 = vld [vmem:[%s3799_s11 + $0x60] sm:$0xff] }
 0xe72   : > { %v1891_v7 = vsel %vm736_vm2, %v2857_v61, 0.0 }
 0xe73   : > { %1892 = vadd.xlane.f32.xlu1 %v1891_v7 }
 0xefe   : > { %v1890_v10 = vpop.xlane.xlu0 %1889 }
 0xeff   : > { %2858 = vrcp.f32 %v1890_v10 }
 0xf00   : > { %v1893_v11 = vpop.xlane.xlu1 %1892 }
 0xf01   : > { %2860 = vrcp.f32 %v1893_v11 }
 0xf09   : > { %v2859_v12 = vpop.eup %2858 }
 0xf0a   : > { %v1896_v14 = vmul.f32 %v2859_v12, %v2855_v5  ;;  %v2074_v5 = vpack.c.bf16 %v2066_v4, %v2064_v3  ;;  %v2183_v4 = vld [vmem:[%s3801_s13 + $0x60] sm:$0xff] }
 0xf0b   : > { %v2861_v13 = vpop.eup %2860 }
 0xf0c   : > { %v1897_v15 = vmul.f32 %v2861_v13, %v2857_v61  ;;  %v2065_v61 = vld [vmem:[%s3799_s11 + $0x70] sm:$0xff] }
 0xf0d   : > { %v2073_v7 = vpack.c.bf16 %v2065_v61, %v2063_v6  ;;  %v2201_v61 = vld [vmem:[%s3801_s13 + $0xf0] sm:$0xff] }
 0xf0e   : > { %v1898_v16 = vpack.c.bf16 %v1897_v15, %v1896_v14  ;;  %v2485_v15 = vld [vmem:[%s3797_s9] ss:$0 sm:$0xff] }
 0xf10   : > { %2806 = vmatmul.mubr.msk.bf16.vlgmr.msra.gmra.mrb[44].mxu0 %vm736_vm2, %v1898_v16 }
 0xf11   : > { %2091 = vmatpush1.bf16.msra.mxu0 %v2067_v52  ;;  %2122 = vmatprep.mubr.bf16.mxu0 %v2886_v1  ;;  %v2196_v52 = vld [vmem:[%s3801_s13 + $0xc8] sm:$0xff] }
 0xf12   : > { %2092 = vmatprep.subr.bf16.mxu0 %v2070_v55  ;;  %v2215_v53 = vpack.c.bf16 %v2196_v52, %v2195_v51  ;;  %v2180_v55 = vld [vmem:[%s3801_s13 + $0x48] sm:$0xff] }
 0xf13   : > { %v2207_v56 = vpack.c.bf16 %v2180_v55, %v2179_v54 }
 0xf15   : > { %2093 = vmatpush1.bf16.msra.mxu0 %v2069_v19  ;;  %v2198_v19 = vld [vmem:[%s3801_s13 + $0xd8] sm:$0xff] }
 0xf16   : > { %2094 = vmatprep.subr.bf16.mxu0 %v2072_v62  ;;  %v2216_v59 = vpack.c.bf16 %v2198_v19, %v2197_v57  ;;  %v2182_v62 = vld [vmem:[%s3801_s13 + $0x58] sm:$0xff] }
 0xf17   : > { %v2208_v63 = vpack.c.bf16 %v2182_v62, %v2181_v60 }
 0xf19   : > { %2095 = vmatpush1.bf16.msra.mxu0 %v2071_v2  ;;  %v2200_v2 = vld [vmem:[%s3801_s13 + $0xe8] sm:$0xff] }
 0xf1a   : > { %2096 = vmatprep.subr.bf16.mxu0 %v2074_v5  ;;  %v2217_v3 = vpack.c.bf16 %v2200_v2, %v2199_v0  ;;  %v2184_v5 = vld [vmem:[%s3801_s13 + $0x68] sm:$0xff] }
 0xf1b   : > { %v2209_v6 = vpack.c.bf16 %v2184_v5, %v2183_v4  ;;  %v2488_v5 = vld [vmem:[%s3802_s14] ss:$0 sm:$0xff] }
 0xf1d   : > { %2097 = vmatpush1.bf16.msra.mxu0 %v2073_v7  ;;  %v2202_v7 = vld [vmem:[%s3801_s13 + $0xf8] sm:$0xff] }
 0xf1e   : > { %v2218_v1 = vpack.c.bf16 %v2202_v7, %v2201_v61 }
 0xfe3   : > { %v1937_v17 = vpop.f32.mrb[44].mxu0 }
 0xfe4   : > { %v2807_v18 = vpop.f32.mrb[45].mxu0 }
 0xfe5   : > { %v1940_v20 = vpop.f32.mrb[46].mxu0 }
 0xfe6   : > { %v1944_v21 = vpack.c.bf16 %v1940_v20, %v1937_v17  ;;  %v2808_v22 = vpop.f32.mrb[47].mxu0 }
 0xfe8   : > { %2812 = vmatmul.mubr.msk.bf16.vlgmr.msra.gmra.mrb[44].mxu1 %vm736_vm2, %v1944_v21  ;;  %v2486_v21 = vld [vmem:[%s3798_s10] ss:$0 sm:$0xff] }
0x10bb   : > { %v1986_v23 = vpop.f32.mrb[44].mxu1 }
0x10bc   : > { %v1993_v24 = vadd.f32 %v1986_v23, %v3567_v34  ;;  %v2813_v25 = vpop.f32.mrb[45].mxu1 }
0x10bd   : > { %v1989_v27 = vpop.f32.mrb[46].mxu1 }
0x10be   : > { %v1995_v29 = vadd.f32 %v2874_v28, %v1993_v24  ;;  %v1994_v30 = vadd.f32 %v1989_v27, %v3570_v36  ;;  %v2814_v31 = vpop.f32.mrb[47].mxu1  ;;  %v2188_v27 = vld [vmem:[%s3801_s13 + $0x88] sm:$0xff] }
0x10c0   : > { %v3606_v32 = vadd.f32 %v2484_v26, %v1995_v29  ;;  %v1996_v35 = vadd.f32 %v2875_v33, %v1994_v30  ;;  %v2171_v29 = vld [vmem:[%s3801_s13] sm:$0xff]  ;;  %v2172_v30 = vld [vmem:[%s3801_s13 + $0x8] sm:$0xff]  ;;  %v2189_v33 = vld [vmem:[%s3801_s13 + $0x90] sm:$0xff] }
0x10c1   : > { %v2203_v31 = vpack.c.bf16 %v2172_v30, %v2171_v29 }
0x10c2   : > { %v3609_v58 = vadd.f32 %v2484_v26, %v1996_v35  ;;  %v2006_v34 = vsel %vm498_vm0, %v3606_v32, 0.0  ;;  %v2187_v26 = vld [vmem:[%s3801_s13 + $0x80] sm:$0xff]  ;;  %v2190_v35 = vld [vmem:[%s3801_s13 + $0x98] sm:$0xff] }
0x10c3   : > { %2007 = vadd.xlane.f32.xlu0 %v2006_v34  ;;  %v2211_v28 = vpack.c.bf16 %v2188_v27, %v2187_v26  ;;  %v2212_v34 = vpack.c.bf16 %v2190_v35, %v2189_v33 }
0x10c4   : > { %v2009_v37 = vsel %vm498_vm0, %v3609_v58, 0.0 }
0x10c5   : > { %2010 = vadd.xlane.f32.xlu1 %v2009_v37  ;;  %2577 = vmatprep.subr.bf16.mxu1 %v2211_v28  ;;  %v2173_v37 = vld [vmem:[%s3801_s13 + $0x10] sm:$0xff] }
0x10c6   : > { %2578 = vmatpush3.bf16.msra.mxu1 %v2203_v31 }
0x10c7   : > { %2579 = vmatprep.subr.bf16.mxu1 %v2212_v34 }
0x1150   : > { %v2008_v38 = vpop.xlane.xlu0 %2007 }
0x1151   : > { %v2012_v40 = vmul.f32 0.015625, %v2008_v38  ;;  %v2174_v38 = vld [vmem:[%s3801_s13 + $0x18] sm:$0xff] }
0x1152   : > { %v2011_v41 = vpop.xlane.xlu1 %2010 }
0x1153   : > { %v2014_v36 = vsub.f32 %v3606_v32, %v2012_v40  ;;  %v2013_v43 = vmul.f32 0.015625, %v2011_v41  ;;  %v2204_v40 = vpack.c.bf16 %v2174_v38, %v2173_v37  ;;  %v2191_v41 = vld [vmem:[%s3801_s13 + $0xa0] sm:$0xff] }
0x1155   : > { %v2015_v44 = vsub.f32 %v3609_v58, %v2013_v43  ;;  %v2016_v45 = vmul.f32 %v2014_v36, %v2014_v36  ;;  %2580 = vmatpush3.bf16.msra.mxu1 %v2204_v40 }
0x1157   : > { %v2018_v46 = vsel %vm498_vm0, %v2016_v45, 0.0  ;;  %v2017_v47 = vmul.f32 %v2015_v44, %v2015_v44  ;;  %v2176_v45 = vld [vmem:[%s3801_s13 + $0x28] sm:$0xff] }
0x1158   : > { %2019 = vadd.xlane.f32.xlu0 %v2018_v46 }
0x1159   : > { %v2021_v39 = vsel %vm498_vm0, %v2017_v47, 0.0  ;;  %v2193_v47 = vld [vmem:[%s3801_s13 + $0xb0] sm:$0xff] }
0x115a   : > { %2022 = vadd.xlane.f32.xlu1 %v2021_v39  ;;  %v2194_v39 = vld [vmem:[%s3801_s13 + $0xb8] sm:$0xff] }
0x115b   : > { %v2214_v42 = vpack.c.bf16 %v2194_v39, %v2193_v47 }
0x11e5   : > { %v2020_v8 = vpop.xlane.xlu0 %2019 }
0x11e6   : > { %v2024_v9 = vmul.f32 0.015625, %v2020_v8  ;;  %v2185_v8 = vld [vmem:[%s3801_s13 + $0x70] sm:$0xff] }
0x11e7   : > { %v2023_v10 = vpop.xlane.xlu1 %2022 }
0x11e8   : > { %v2026_v11 = vadd.f32 1e-05, %v2024_v9  ;;  %v2025_v12 = vmul.f32 0.015625, %v2023_v10  ;;  %v2186_v9 = vld [vmem:[%s3801_s13 + $0x78] sm:$0xff] }
0x11e9   : > { %v2210_v10 = vpack.c.bf16 %v2186_v9, %v2185_v8 }
0x11ea   : > { %2862 = vrsqrt.f32 %v2026_v11  ;;  %v2027_v13 = vadd.f32 1e-05, %v2025_v12  ;;  %v2077_v11 = vlaneseq }
0x11ec   : > { %2864 = vrsqrt.f32 %v2027_v13  ;;  %v2078_v12 = vshrl.u32 %v2077_v11, 7 }
0x11ee   : > { %v2079_v13 = vsub.s32 0, %v2078_v12 }
0x11f4   : > { %v2863_v14 = vpop.eup %2862 }
0x11f5   : > { %v2030_v16 = vmul.f32 %v2863_v14, %v2014_v36  ;;  %v2192_v36 = vld [vmem:[%s3801_s13 + $0xa8] sm:$0xff]  ;;  %v2075_v14 = vld [vmem:[%s3800_s12] sm:$0x3] }
0x11f6   : > { %v2865_v17 = vpop.eup %2864  ;;  %v2213_v43 = vpack.c.bf16 %v2192_v36, %v2191_v41 }
0x11f7   : > { %v2039_v18 = vmul.f32 %v2485_v15, %v2030_v16  ;;  %v2031_v20 = vmul.f32 %v2865_v17, %v2015_v44  ;;  %v2175_v44 = vld [vmem:[%s3801_s13 + $0x20] sm:$0xff]  ;;  %v2080_v16 = vrot.slane %v2075_v14, %v2079_v13 }
0x11f8   : > { %v2205_v46 = vpack.c.bf16 %v2176_v45, %v2175_v44  ;;  %2581 = vmatprep.subr.bf16.mxu1 %v2213_v43 }
0x11f9   : > { %v2040_v22 = vmul.f32 %v2485_v15, %v2031_v20  ;;  %v2048_v23 = vadd.f32 %v2486_v21, %v2039_v18  ;;  %v2083_v15 = vsub.s32 1, %v2078_v12 }
0x11fa   : > { %2582 = vmatpush3.bf16.msra.mxu1 %v2205_v46 }
0x11fb   : > { %v2049_v24 = vadd.f32 %v2486_v21, %v2040_v22  ;;  %2583 = vmatprep.subr.bf16.mxu1 %v2214_v42  ;;  %v2084_v17 = vrot.slane %v2075_v14, %v2083_v15 }
0x11fd   : > { %v2050_v25 = vpack.c.bf16 %v2049_v24, %v2048_v23 }
0x11fe   : > { %2584 = vmatpush3.bf16.msra.mxu1 %v2206_v50 }
0x11ff   : > { %2487 = vmatmul.mubr.msk.bf16.vlgmr.msra.gmra.mrb[48].mxu0 %vm498_vm0, %v2050_v25  ;;  %2585 = vmatprep.subr.bf16.mxu1 %v2215_v53 }
0x1202   : > { %2586 = vmatpush3.bf16.msra.mxu1 %v2207_v56 }
0x1203   : > { %2587 = vmatprep.subr.bf16.mxu1 %v2216_v59 }
0x1206   : > { %2588 = vmatpush3.bf16.msra.mxu1 %v2208_v63 }
0x1207   : > { %2589 = vmatprep.subr.bf16.mxu1 %v2217_v3 }
0x120a   : > { %2590 = vmatpush3.bf16.msra.mxu1 %v2209_v6 }
0x120b   : > { %2591 = vmatprep.subr.bf16.mxu1 %v2218_v1 }
0x120e   : > { %2592 = vmatpush3.bf16.msra.mxu1 %v2210_v10 }
0x12d2   : > { %v2124_v18 = vpop.f32.mrb[48].mxu0 }
0x12d3   : > { %v2125_v20 = vadd.f32 %v2124_v18, %v2080_v16  ;;  %v2126_v21 = vpop.f32.mrb[49].mxu0 }
0x12d4   : > { %v2127_v22 = vadd.f32 %v2126_v21, %v2084_v17  ;;  %v2128_v23 = vpop.f32.mrb[50].mxu0 }
0x12d5   : > { %v2133_v24 = vmul.f32 %v2125_v20, %v2125_v20  ;;  %v2129_v25 = vadd.f32 %v2128_v23, %v2080_v16  ;;  %v2130_v26 = vpop.f32.mrb[51].mxu0 }
0x12d6   : > { %v2134_v27 = vmul.f32 %v2127_v22, %v2127_v22  ;;  %v2131_v28 = vadd.f32 %v2130_v26, %v2084_v17 }
0x12d7   : > { %v2137_v29 = vmul.f32 %v2133_v24, %v2125_v20  ;;  %v2135_v30 = vmul.f32 %v2129_v25, %v2129_v25 }
0x12d8   : > { %v2138_v31 = vmul.f32 %v2134_v27, %v2127_v22  ;;  %v2136_v33 = vmul.f32 %v2131_v28, %v2131_v28 }
0x12d9   : > { %v2141_v35 = vmul.f32 0.044715, %v2137_v29  ;;  %v2139_v34 = vmul.f32 %v2135_v30, %v2129_v25 }
0x12da   : > { %v2142_v37 = vmul.f32 0.044715, %v2138_v31  ;;  %v2140_v38 = vmul.f32 %v2136_v33, %v2131_v28 }
0x12db   : > { %v2145_v40 = vadd.f32 %v2141_v35, %v2125_v20  ;;  %v2143_v41 = vmul.f32 0.044715, %v2139_v34 }
0x12dc   : > { %v2146_v36 = vadd.f32 %v2142_v37, %v2127_v22  ;;  %v2144_v43 = vmul.f32 0.044715, %v2140_v38 }
0x12dd   : > { %v2149_v44 = vmul.f32 0.7978846, %v2145_v40  ;;  %v2147_v45 = vadd.f32 %v2143_v41, %v2129_v25 }
0x12de   : > { %v2150_v46 = vmul.f32 0.7978846, %v2146_v36  ;;  %v2148_v47 = vadd.f32 %v2144_v43, %v2131_v28 }
0x12df   : > { %2866 = vtanh.f32 %v2149_v44  ;;  %v2151_v39 = vmul.f32 0.7978846, %v2147_v45 }
0x12e0   : > { %2868 = vtanh.f32 %v2150_v46  ;;  %v2152_v42 = vmul.f32 0.7978846, %v2148_v47 }
0x12e1   : > { %2870 = vtanh.f32 %v2151_v39 }
0x12e2   : > { %2872 = vtanh.f32 %v2152_v42 }
0x12e9   : > { %v2867_v48 = vpop.eup %2866 }
0x12ea   : > { %v2869_v49 = vpop.eup %2868  ;;  %v2157_v50 = vadd.f32 1.0, %v2867_v48 }
0x12eb   : > { %v2871_v51 = vpop.eup %2870  ;;  %v2158_v52 = vadd.f32 1.0, %v2869_v49 }
0x12ec   : > { %v2873_v53 = vpop.eup %2872  ;;  %v2161_v54 = vmul.f32 0.5, %v2157_v50  ;;  %v2159_v55 = vadd.f32 1.0, %v2871_v51 }
0x12ed   : > { %v2160_v56 = vadd.f32 1.0, %v2873_v53  ;;  %v2162_v57 = vmul.f32 0.5, %v2158_v52 }
0x12ee   : > { %v2163_v19 = vmul.f32 0.5, %v2159_v55  ;;  %v2165_v60 = vmul.f32 %v2161_v54, %v2125_v20 }
0x12ef   : > { %v2164_v59 = vmul.f32 0.5, %v2160_v56  ;;  %v2166_v63 = vmul.f32 %v2162_v57, %v2127_v22 }
0x12f0   : > { %v2167_v62 = vmul.f32 %v2163_v19, %v2129_v25 }
0x12f1   : > { %v2168_v0 = vmul.f32 %v2164_v59, %v2131_v28 }
0x12f2   : > { %v2169_v2 = vpack.c.bf16 %v2167_v62, %v2165_v60 }
0x12f3   : > { %v2170_v3 = vpack.c.bf16 %v2168_v0, %v2166_v63 }
0x12f5   : > { %2258 = vmatprep.mubr.bf16.mxu1 %v2170_v3 }
0x12f6   : > { %2259 = vmatmul.mubr.bf16.vlgmr.msra.gmra.mrb[48].mxu1 %v2169_v2 }
0x13c9   : > { %v2593_v4 = vpop.f32.mrb[48].mxu1 }
0x13ca   : > { %v2594_v6 = vpop.f32.mrb[49].mxu1 }
0x13cb   : > { %v2595_v61 = vadd.f32 %v2594_v6, %v2593_v4  ;;  %v2596_v7 = vpop.f32.mrb[50].mxu1 }
0x13cc   : > { %v2597_v1 = vpop.f32.mrb[51].mxu1 }
0x13cd   : > { %v2261_v8 = vadd.f32 %v2595_v61, %v2488_v5  ;;  %v2598_v9 = vadd.f32 %v2597_v1, %v2596_v7 }
0x13cf   : > { %v2267_v10 = vadd.f32 %v2261_v8, %v3606_v32  ;;  %v2264_v11 = vadd.f32 %v2598_v9, %v2488_v5 }
0x13d1   : > { %2269 = vst.msk [vmem:[%s494_s27] sm:$0xff] %vm498_vm0, %v2267_v10  ;;  %v2268_v12 = vadd.f32 %v2264_v11, %v3609_v58 }
0x13d3   : > { %2270 = vst.msk [vmem:[%s494_s27 + $0x8] sm:$0xff] %vm498_vm0, %v2268_v12 }
0x13d4 PF: > { %s25_s18 = sadd.s32 1, %s2882_s18  }
0x13d5   : > { %p22_p4 = scmp.ge.s32.totalorder %s25_s18, 4  }
0x13d7   :  { %24 = sbr.rel (!%p22_p4) target bundleno = 1 (0x1), region = 138 }

// kernel: _lambda_.13
= control target key start
LH: loop header
LB: loop body
LE: loop exit
PB: predicated region body
PF: predicated region fallthrough
CT: control target
= control target key end

     0   :  { %vm37_vm0 = vcmask 523264   ;;  %v4899_v8 = vmov 0   ;;  %v4900_v24 = vmov 0.0   ;;  %vm1512_vm1 = vcmask 130048   ;;  %s7315_s0 = inlined_call_operand.vmem [shape: f32[32,64], index: 0, kind: input, shape index: {}]   ;;  %s7316_s5 = inlined_call_operand.vmem [shape: f32[9,32,1], index: 5, kind: input, shape index: {}]   ;;  %s7317_s3 = inlined_call_operand.vmem [shape: f32[9,64,256], index: 3, kind: input, shape index: {}]   ;;  %s7318_s1 = inlined_call_operand.vmem [shape: f32[1,64], index: 1, kind: input, shape index: {}]   ;;  %s7319_s2 = inlined_call_operand.vmem [shape: f32[1,64], index: 2, kind: input, shape index: {}]   ;;  %s7320_s6 = inlined_call_operand.vmem [shape: f32[256,128], index: 6, kind: input, shape index: {}]   ;;  %s7321_s4 = inlined_call_operand.vmem [shape: f32[1,256], index: 4, kind: input, shape index: {}]   ;;  %s7322_s8 = inlined_call_operand.vmem [shape: f32[1024,16], index: 8, kind: input, shape index: {}]   ;;  %s7323_s7 = inlined_call_operand.vmem [shape: f32[1,128], index: 7, kind: input, shape index: {}]   ;;  %s7324_s9 = inlined_call_operand.vmem [shape: f32[2,1024,128], index: 9, kind: output, shape index: {}]  }
   0x1   :  { %v33_v0 = vld [vmem:[%s7315_s0] sm:$0xff]  ;;  %v35_v1 = vld [vmem:[%s7315_s0 + $0x10] sm:$0xff]  ;;  %v34_v2 = vld [vmem:[%s7315_s0 + $0x8] sm:$0xff]  ;;  %4890 = vset.pattern.permute.xlu1 %v4899_v8  ;;  %4889 = vset.pattern.permute.xlu0 %v4899_v8  ;;  %114 = vst.msk [vmem:[#allocation2 + $0x8] sm:$0xff] %vm37_vm0, %v4900_v24 }
   0x2   :  { %v38_v3 = vsel %vm37_vm0, %v33_v0, 0.0  ;;  %v44_v4 = vsel %vm37_vm0, %v35_v1, 0.0  ;;  %v4965_v5 = vld [vmem:[%s7315_s0 + $0x18] sm:$0xff]  ;;  %v41_v6 = vsel %vm37_vm0, %v34_v2, 0.0  ;;  %279 = vmatprep.mubr.bf16.mxu0 %v4899_v8  ;;  %113 = vst.msk [vmem:[#allocation2] sm:$0xff] %vm37_vm0, %v4900_v24  ;;  %115 = vst.msk [vmem:[#allocation2 + $0x10] sm:$0xff] %vm37_vm0, %v4900_v24 }
   0x3   :  { %39 = vadd.xlane.f32.xlu0 %v38_v3  ;;  %45 = vadd.xlane.f32.xlu1 %v44_v4  ;;  %v47_v7 = vsel %vm37_vm0, %v4965_v5, 0.0  ;;  %116 = vst.msk [vmem:[#allocation2 + $0x18] sm:$0xff] %vm37_vm0, %v4900_v24  ;;  %117 = vst.msk [vmem:[#allocation2 + $0x20] sm:$0xff] %vm37_vm0, %v4900_v24  ;;  %v3571_v25 = vld [vmem:[%s7316_s5 + $0x28] sm:$0xff]  ;;  %v3572_v26 = vld [vmem:[%s7316_s5 + $0x30] sm:$0xff] }
   0x4   :  { %118 = vst.msk [vmem:[#allocation2 + $0x28] sm:$0xff] %vm37_vm0, %v4900_v24  ;;  %v3570_v27 = vld [vmem:[%s7316_s5 + $0x20] sm:$0xff]  ;;  %v3595_v28 = vld [vmem:[%s7316_s5 + $0x48] sm:$0xff]  ;;  %v3597_v29 = vld [vmem:[%s7316_s5 + $0x58] sm:$0xff] }
   0x5   :  { %v3575_v30 = vld [vmem:[%s7317_s3 + $0x88] sm:$0xff]  ;;  %v3577_v31 = vld [vmem:[%s7317_s3 + $0x98] sm:$0xff]  ;;  %v3574_v33 = vld [vmem:[%s7317_s3 + $0x80] sm:$0xff] }
   0x6   :  { %v234_v32 = vpack.c.bf16 %v3577_v31, %v3575_v30  ;;  %v3576_v34 = vld [vmem:[%s7317_s3 + $0x90] sm:$0xff]  ;;  %v3617_v35 = vld [vmem:[%s7316_s5 + $0x68] sm:$0xff]  ;;  %v3581_v38 = vld [vmem:[%s7317_s3 + $0xb8] sm:$0xff] }
   0x7   :  { %42 = vadd.xlane.f32.xlu0 %v41_v6  ;;  %48 = vadd.xlane.f32.xlu1 %v47_v7  ;;  %v233_v36 = vpack.c.bf16 %v3576_v34, %v3574_v33  ;;  %v3579_v37 = vld [vmem:[%s7317_s3 + $0xa8] sm:$0xff]  ;;  %v3578_v40 = vld [vmem:[%s7317_s3 + $0xa0] sm:$0xff]  ;;  %v3580_v41 = vld [vmem:[%s7317_s3 + $0xb0] sm:$0xff] }
   0x8   :  { %247 = vmatprep.subr.bf16.mxu0 %v234_v32  ;;  %v236_v39 = vpack.c.bf16 %v3581_v38, %v3579_v37  ;;  %v3619_v42 = vld [vmem:[%s7316_s5 + $0x78] sm:$0xff]  ;;  %v235_v43 = vpack.c.bf16 %v3580_v41, %v3578_v40  ;;  %v3583_v44 = vld [vmem:[%s7317_s3 + $0xc8] sm:$0xff]  ;;  %v3582_v47 = vld [vmem:[%s7317_s3 + $0xc0] sm:$0xff] }
   0x9   :  { %248 = vmatpush1.bf16.msra.mxu0 %v233_v36  ;;  %v3585_v45 = vld [vmem:[%s7317_s3 + $0xd8] sm:$0xff]  ;;  %v3584_v48 = vld [vmem:[%s7317_s3 + $0xd0] sm:$0xff]  ;;  %v3639_v49 = vld [vmem:[%s7316_s5 + $0x88] sm:$0xff] }
   0xa   :  { %249 = vmatprep.subr.bf16.mxu0 %v236_v39  ;;  %v238_v46 = vpack.c.bf16 %v3585_v45, %v3583_v44  ;;  %v237_v51 = vpack.c.bf16 %v3584_v48, %v3582_v47  ;;  %v3587_v52 = vld [vmem:[%s7317_s3 + $0xe8] sm:$0xff]  ;;  %v3589_v53 = vld [vmem:[%s7317_s3 + $0xf8] sm:$0xff]  ;;  %v3586_v56 = vld [vmem:[%s7317_s3 + $0xe0] sm:$0xff] }
   0xb   :  { %v240_v55 = vpack.c.bf16 %v3589_v53, %v3587_v52  ;;  %v3588_v57 = vld [vmem:[%s7317_s3 + $0xf0] sm:$0xff]  ;;  %v3641_v58 = vld [vmem:[%s7316_s5 + $0x98] sm:$0xff]  ;;  %v3661_v61 = vld [vmem:[%s7316_s5 + $0xa8] sm:$0xff] }
   0xc   :  { %v239_v59 = vpack.c.bf16 %v3588_v57, %v3586_v56  ;;  %v3663_v63 = vld [vmem:[%s7316_s5 + $0xb8] sm:$0xff]  ;;  %v3705_v3 = vld [vmem:[%s7316_s5 + $0xe8] sm:$0xff]  ;;  %v127_v7 = vld [vmem:[%s7316_s5] sm:$0xff] }
   0xd   :  { %250 = vmatpush1.bf16.msra.mxu0 %v235_v43  ;;  %v3707_v4 = vld [vmem:[%s7316_s5 + $0xf8] sm:$0xff]  ;;  %v3640_v24 = vld [vmem:[%s7316_s5 + $0x90] sm:$0xff]  ;;  %v3726_v33 = vld [vmem:[%s7316_s5 + $0x100] sm:$0xff] }
   0xe   :  { %251 = vmatprep.subr.bf16.mxu0 %v238_v46  ;;  %v3573_v6 = vld [vmem:[%s7316_s5 + $0x38] sm:$0xff]  ;;  %v3706_v30 = vld [vmem:[%s7316_s5 + $0xf0] sm:$0xff]  ;;  %v5165_v43 = vld [vmem:[%s7318_s1] ss:$0 sm:$0xff] }
   0xf   :  { %v3728_v39 = vld [vmem:[%s7316_s5 + $0x110] sm:$0xff]  ;;  %v5171_v45 = vld [vmem:[%s7319_s2] ss:$0 sm:$0xff] }
  0x11   :  { %252 = vmatpush1.bf16.msra.mxu0 %v237_v51 }
  0x12   :  { %253 = vmatprep.subr.bf16.mxu0 %v240_v55 }
  0x15   :  { %254 = vmatpush1.bf16.msra.mxu0 %v239_v59  ;;  %v162_v59 = vld [vmem:[%s7317_s3 + $0x28] sm:$0xff] }
  0x90   :  { %v40_v9 = vpop.xlane.xlu0 %39  ;;  %v46_v10 = vpop.xlane.xlu1 %45 }
  0x91   :  { %v51_v11 = vmul.f32 0.015625, %v40_v9  ;;  %v53_v12 = vmul.f32 0.015625, %v46_v10  ;;  %v3729_v9 = vld [vmem:[%s7316_s5 + $0x118] sm:$0xff]  ;;  %v128_v10 = vld [vmem:[%s7316_s5 + $0x8] sm:$0xff] }
  0x93   :  { %v4973_v13 = vsub.f32 %v33_v0, %v51_v11  ;;  %v4975_v14 = vsub.f32 %v35_v1, %v53_v12  ;;  %v3683_v1 = vld [vmem:[%s7316_s5 + $0xc8] sm:$0xff]  ;;  %v129_v11 = vld [vmem:[%s7316_s5 + $0x10] sm:$0xff]  ;;  %v130_v12 = vld [vmem:[%s7316_s5 + $0x18] sm:$0xff] }
  0x94   :  { %v43_v15 = vpop.xlane.xlu0 %42  ;;  %v49_v50 = vpop.xlane.xlu1 %48 }
  0x95   :  { %v52_v16 = vmul.f32 0.015625, %v43_v15  ;;  %v59_v17 = vmul.f32 %v4973_v13, %v4973_v13  ;;  %v61_v18 = vmul.f32 %v4975_v14, %v4975_v14  ;;  %v54_v54 = vmul.f32 0.015625, %v49_v50  ;;  %v3594_v15 = vld [vmem:[%s7316_s5 + $0x40] sm:$0xff] }
  0x97   :  { %v4981_v19 = vsub.f32 %v34_v2, %v52_v16  ;;  %v63_v20 = vsel %vm37_vm0, %v59_v17, 0.0  ;;  %v69_v21 = vsel %vm37_vm0, %v61_v18, 0.0  ;;  %v5070_v60 = vsub.f32 %v4965_v5, %v54_v54  ;;  %v3685_v2 = vld [vmem:[%s7316_s5 + $0xd8] sm:$0xff]  ;;  %v3727_v5 = vld [vmem:[%s7316_s5 + $0x108] sm:$0xff]  ;;  %v3596_v16 = vld [vmem:[%s7316_s5 + $0x50] sm:$0xff] }
  0x98   :  { %64 = vadd.xlane.f32.xlu0 %v63_v20  ;;  %v158_v17 = vld [vmem:[%s7317_s3 + $0x8] sm:$0xff]  ;;  %v160_v18 = vld [vmem:[%s7317_s3 + $0x18] sm:$0xff] }
  0x99   :  { %v60_v22 = vmul.f32 %v4981_v19, %v4981_v19  ;;  %v62_v62 = vmul.f32 %v5070_v60, %v5070_v60  ;;  %v174_v20 = vpack.c.bf16 %v160_v18, %v158_v17  ;;  %v169_v18 = vld [vmem:[%s7317_s3 + $0x60] sm:$0xff] }
  0x9b   :  { %v66_v23 = vsel %vm37_vm0, %v60_v22, 0.0  ;;  %v72_v0 = vsel %vm37_vm0, %v62_v62, 0.0  ;;  %306 = vmatprep.subr.bf16.mxu0 %v174_v20  ;;  %v3618_v22 = vld [vmem:[%s7316_s5 + $0x70] sm:$0xff] }
  0x9c   :  { %70 = vadd.xlane.f32.xlu0 %v69_v21  ;;  %67 = vadd.xlane.f32.xlu1 %v66_v23  ;;  %v3616_v21 = vld [vmem:[%s7316_s5 + $0x60] sm:$0xff]  ;;  %v171_v20 = vld [vmem:[%s7317_s3 + $0x70] sm:$0xff] }
  0x9d   :  { %v3638_v23 = vld [vmem:[%s7316_s5 + $0x80] sm:$0xff] }
  0xad   :  { %197 = vperm.xlu1 %4890, %v3571_v25   ;;  %v3660_v25 = vld [vmem:[%s7316_s5 + $0xa0] sm:$0xff] }
  0xb1   :  { %202 = vperm.xlu1 %4890, %v3572_v26   ;;  %v3662_v26 = vld [vmem:[%s7316_s5 + $0xb0] sm:$0xff] }
  0xb2   :  { %192 = vperm.xlu0 %4889, %v3570_v27   ;;  %v3682_v27 = vld [vmem:[%s7316_s5 + $0xc0] sm:$0xff] }
  0xb6   :  { %375 = vperm.xlu0 %4889, %v3595_v28   ;;  %v3684_v28 = vld [vmem:[%s7316_s5 + $0xd0] sm:$0xff] }
  0xba   :  { %385 = vperm.xlu0 %4889, %v3597_v29   ;;  %v3704_v29 = vld [vmem:[%s7316_s5 + $0xe0] sm:$0xff] }
  0xbe   :  { %502 = vperm.xlu0 %4889, %v3617_v35  }
  0xc2   :  { %512 = vperm.xlu0 %4889, %v3619_v42  }
  0xc6   :  { %629 = vperm.xlu0 %4889, %v3639_v49  }
  0xca   :  { %639 = vperm.xlu0 %4889, %v3641_v58  }
  0xce   :  { %756 = vperm.xlu0 %4889, %v3661_v61   ;;  %v164_v61 = vld [vmem:[%s7317_s3 + $0x38] sm:$0xff] }
  0xd2   :  { %766 = vperm.xlu0 %4889, %v3663_v63  }
  0xd5   :  { %73 = vadd.xlane.f32.xlu1 %v72_v0 }
  0xd6   :  { %883 = vperm.xlu0 %4889, %v3683_v1  }
  0xda   :  { %893 = vperm.xlu0 %4889, %v3685_v2   ;;  %v176_v2 = vpack.c.bf16 %v164_v61, %v162_v59  ;;  %v1281_v61 = vld [vmem:[%s7320_s6 + $0x8] sm:$0xff] }
  0xde   :  { %1010 = vperm.xlu0 %4889, %v3705_v3   ;;  %v161_v3 = vld [vmem:[%s7317_s3 + $0x20] sm:$0xff] }
  0xe2   :  { %1020 = vperm.xlu0 %4889, %v3707_v4   ;;  %v163_v4 = vld [vmem:[%s7317_s3 + $0x30] sm:$0xff] }
  0xe6   :  { %1137 = vperm.xlu0 %4889, %v3727_v5   ;;  %207 = vperm.xlu1 %4890, %v3573_v6   ;;  %v166_v5 = vld [vmem:[%s7317_s3 + $0x48] sm:$0xff]  ;;  %v168_v6 = vld [vmem:[%s7317_s3 + $0x58] sm:$0xff] }
  0xea   :  { %133 = vperm.xlu1 %4890, %v127_v7   ;;  %1147 = vperm.xlu0 %4889, %v3729_v9   ;;  %v175_v7 = vpack.c.bf16 %v163_v4, %v161_v3  ;;  %v178_v9 = vpack.c.bf16 %v168_v6, %v166_v5  ;;  %v1282_v3 = vld [vmem:[%s7320_s6 + $0x10] sm:$0xff]  ;;  %v1283_v4 = vld [vmem:[%s7320_s6 + $0x18] sm:$0xff]  ;;  %v1300_v6 = vld [vmem:[%s7320_s6 + $0xa0] sm:$0xff] }
  0xee   :  { %138 = vperm.xlu1 %4890, %v128_v10   ;;  %v165_v10 = vld [vmem:[%s7317_s3 + $0x40] sm:$0xff] }
  0xf2   :  { %143 = vperm.xlu1 %4890, %v129_v11   ;;  %v167_v11 = vld [vmem:[%s7317_s3 + $0x50] sm:$0xff] }
  0xf6   :  { %148 = vperm.xlu1 %4890, %v130_v12   ;;  %v170_v12 = vld [vmem:[%s7317_s3 + $0x68] sm:$0xff] }
  0xfa   :  { %370 = vperm.xlu1 %4890, %v3594_v15   ;;  %v172_v15 = vld [vmem:[%s7317_s3 + $0x78] sm:$0xff] }
  0xfb   :  { %v180_v17 = vpack.c.bf16 %v172_v15, %v170_v12 }
  0xfe   :  { %380 = vperm.xlu1 %4890, %v3596_v16   ;;  %v177_v16 = vpack.c.bf16 %v167_v11, %v165_v10  ;;  %v3602_v10 = vld [vmem:[%s7317_s3 + $0x120] sm:$0xff] }
 0x102   :  { %497 = vperm.xlu1 %4890, %v3616_v21   ;;  %v3599_v21 = vld [vmem:[%s7317_s3 + $0x108] sm:$0xff] }
 0x106   :  { %507 = vperm.xlu1 %4890, %v3618_v22   ;;  %v3601_v22 = vld [vmem:[%s7317_s3 + $0x118] sm:$0xff] }
 0x10a   :  { %624 = vperm.xlu1 %4890, %v3638_v23   ;;  %v179_v23 = vpack.c.bf16 %v171_v20, %v169_v18  ;;  %v3609_v18 = vld [vmem:[%s7317_s3 + $0x158] sm:$0xff]  ;;  %v1313_v20 = vpack.c.bf16 %v1283_v4, %v1282_v3  ;;  %v1289_v3 = vld [vmem:[%s7320_s6 + $0x48] sm:$0xff]  ;;  %v1306_v4 = vld [vmem:[%s7320_s6 + $0xd0] sm:$0xff] }
 0x10e   :  { %634 = vperm.xlu1 %4890, %v3640_v24   ;;  %v412_v24 = vpack.c.bf16 %v3601_v22, %v3599_v21 }
 0x112   :  { %751 = vperm.xlu1 %4890, %v3660_v25  }
 0x116   :  { %761 = vperm.xlu1 %4890, %v3662_v26  }
 0x11a   :  { %878 = vperm.xlu1 %4890, %v3682_v27  }
 0x11e   :  { %888 = vperm.xlu1 %4890, %v3684_v28  }
 0x122   :  { %1005 = vperm.xlu1 %4890, %v3704_v29  }
 0x125   :  { %v65_v31 = vpop.xlane.xlu0 %64 }
 0x126   :  { %v75_v32 = vmul.f32 0.015625, %v65_v31  ;;  %1015 = vperm.xlu1 %4890, %v3706_v30  }
 0x128   :  { %v79_v34 = vadd.f32 1e-05, %v75_v32 }
 0x129   :  { %v68_v35 = vpop.xlane.xlu1 %67  ;;  %v71_v36 = vpop.xlane.xlu0 %70 }
 0x12a   :  { %4891 = vrsqrt.f32 %v79_v34  ;;  %v76_v37 = vmul.f32 0.015625, %v68_v35  ;;  %v77_v38 = vmul.f32 0.015625, %v71_v36  ;;  %1132 = vperm.xlu1 %4890, %v3726_v33  }
 0x12c   :  { %v80_v40 = vadd.f32 1e-05, %v76_v37  ;;  %v81_v41 = vadd.f32 1e-05, %v77_v38 }
 0x12d   :  { %v198_v56 = vpop.permute.xlu1 %197 }
 0x12e   :  { %4893 = vrsqrt.f32 %v80_v40  ;;  %1142 = vperm.xlu1 %4890, %v3728_v39  }
 0x12f   :  { %4895 = vrsqrt.f32 %v81_v41 }
 0x131   :  { %v193_v58 = vpop.permute.xlu0 %192  ;;  %v203_v25 = vpop.permute.xlu1 %202 }
 0x134   :  { %v4892_v42 = vpop.eup %4891 }
 0x135   :  { %v87_v44 = vmul.f32 %v4892_v42, %v4973_v13  ;;  %v5237_v30 = vpop.permute.xlu0 %375 }
 0x137   :  { %v98_v46 = vmul.f32 %v5165_v43, %v87_v44 }
 0x138   :  { %v4894_v47 = vpop.eup %4893 }
 0x139   :  { %v4896_v48 = vpop.eup %4895  ;;  %v109_v49 = vadd.f32 %v5171_v45, %v98_v46  ;;  %v88_v50 = vmul.f32 %v4894_v47, %v4981_v19  ;;  %v157_v19 = vld [vmem:[%s7317_s3] sm:$0xff]  ;;  %v5239_v32 = vpop.permute.xlu0 %385 }
 0x13a   :  { %v89_v51 = vmul.f32 %v4896_v48, %v4975_v14  ;;  %v159_v14 = vld [vmem:[%s7317_s3 + $0x10] sm:$0xff] }
 0x13b   :  { %119 = vst.msk [vmem:[#allocation2 + $0x8] sm:$0xff] %vm37_vm0, %v109_v49  ;;  %v99_v52 = vmul.f32 %v5165_v43, %v88_v50  ;;  %v173_v0 = vpack.c.bf16 %v159_v14, %v157_v19  ;;  %v1280_v19 = vld [vmem:[%s7320_s6] sm:$0xff] }
 0x13c   :  { %v100_v13 = vmul.f32 %v5165_v43, %v89_v51  ;;  %v3598_v51 = vld [vmem:[%s7317_s3 + $0x100] sm:$0xff] }
 0x13d   :  { %v110_v53 = vadd.f32 %v5171_v45, %v99_v52  ;;  %v5244_v37 = vpop.permute.xlu0 %502  ;;  %v3600_v52 = vld [vmem:[%s7317_s3 + $0x110] sm:$0xff] }
 0x13e   :  { %v111_v54 = vadd.f32 %v5171_v45, %v100_v13  ;;  %v3603_v13 = vld [vmem:[%s7317_s3 + $0x128] sm:$0xff] }
 0x13f   :  { %120 = vst.msk [vmem:[#allocation2 + $0x10] sm:$0xff] %vm37_vm0, %v110_v53  ;;  %v3605_v53 = vld [vmem:[%s7317_s3 + $0x138] sm:$0xff] }
 0x140   :  { %121 = vst.msk [vmem:[#allocation2 + $0x18] sm:$0xff] %vm37_vm0, %v111_v54  ;;  %v1296_v54 = vld [vmem:[%s7320_s6 + $0x80] sm:$0xff]  ;;  %v414_v15 = vpack.c.bf16 %v3605_v53, %v3603_v13  ;;  %v1305_v53 = vld [vmem:[%s7320_s6 + $0xc8] sm:$0xff] }
 0x141   :  { %v5249_v41 = vpop.permute.xlu0 %512  ;;  %v1304_v13 = vld [vmem:[%s7320_s6 + $0xc0] sm:$0xff] }
 0x142   :  { %v181_v55 = vld [vmem:[#allocation2 + $0x4] sm:$0xff] }
 0x143   :  { %v210_v63 = vmul.f32 %v193_v58, %v181_v55  ;;  %v1297_v55 = vld [vmem:[%s7320_s6 + $0x88] sm:$0xff] }
 0x144   :  { %v1320_v59 = vpack.c.bf16 %v1297_v55, %v1296_v54 }
 0x145   :  { %v5260_v48 = vpop.permute.xlu0 %629 }
 0x146   :  { %v5190_v57 = vld [vmem:[#allocation2 + $0xc] sm:$0xff]  ;;  %4133 = vmatprep.subr.bf16.mxu1 %v1320_v59 }
 0x147   :  { %v211_v62 = vmul.f32 %v198_v56, %v5190_v57  ;;  %v5253_v44 = vld [vmem:[#allocation2 + $0x14] sm:$0xff]  ;;  %v5265_v50 = vld [vmem:[#allocation2 + $0xb] sm:$0xff] }
 0x148   :  { %v212_v47 = vmul.f32 %v203_v25, %v5253_v44 }
 0x149   :  { %v214_v1 = vpack.c.bf16 %v211_v62, %v210_v63  ;;  %v5290_v14 = vpop.permute.xlu0 %639  ;;  %v1298_v62 = vld [vmem:[%s7320_s6 + $0x90] sm:$0xff]  ;;  %v1299_v63 = vld [vmem:[%s7320_s6 + $0x98] sm:$0xff] }
 0x14b   :  { %3590 = vmatmul.mubr.msk.bf16.vlgmr.msra.gmra.mrb[0].mxu0 %vm37_vm0, %v214_v1  ;;  %v1312_v1 = vpack.c.bf16 %v1281_v61, %v1280_v19  ;;  %v3612_v61 = vld [vmem:[%s7317_s3 + $0x170] sm:$0xff] }
 0x14c   :  { %307 = vmatpush1.bf16.msra.mxu0 %v173_v0  ;;  %289 = vmatprep.mubr.bf16.mxu0 %v4899_v8  ;;  %v123_v0 = vld [vmem:[#allocation2 + $0x3] sm:$0xff] }
 0x14d   :  { %308 = vmatprep.subr.bf16.mxu0 %v176_v2  ;;  %v1321_v2 = vpack.c.bf16 %v1299_v63, %v1298_v62  ;;  %4134 = vmatpush3.bf16.msra.mxu1 %v1312_v1  ;;  %v5338_v25 = vpop.permute.xlu0 %756  ;;  %v3621_v62 = vld [vmem:[%s7317_s3 + $0x188] sm:$0xff]  ;;  %v1324_v1 = vpack.c.bf16 %v1305_v53, %v1304_v13  ;;  %v3628_v13 = vld [vmem:[%s7317_s3 + $0x1c0] sm:$0xff]  ;;  %v3630_v53 = vld [vmem:[%s7317_s3 + $0x1d0] sm:$0xff] }
 0x14f   :  { %4135 = vmatprep.subr.bf16.mxu1 %v1321_v2  ;;  %v1288_v2 = vld [vmem:[%s7320_s6 + $0x40] sm:$0xff] }
 0x150   :  { %309 = vmatpush1.bf16.msra.mxu0 %v175_v7  ;;  %v1301_v7 = vld [vmem:[%s7320_s6 + $0xa8] sm:$0xff] }
 0x151   :  { %310 = vmatprep.subr.bf16.mxu0 %v178_v9  ;;  %v411_v9 = vpack.c.bf16 %v3600_v52, %v3598_v51  ;;  %v1322_v22 = vpack.c.bf16 %v1301_v7, %v1300_v6  ;;  %4136 = vmatpush3.bf16.msra.mxu1 %v1313_v20  ;;  %v1287_v51 = vld [vmem:[%s7320_s6 + $0x38] sm:$0xff]  ;;  %v5376_v55 = vpop.permute.xlu0 %766  ;;  %v5405_v6 = vld [vmem:[#allocation2 + $0xd] sm:$0xff]  ;;  %v359_v7 = vld [vmem:[#allocation2 + $0x5] sm:$0xff] }
 0x152   :  { %v3625_v20 = vld [vmem:[%s7317_s3 + $0x1a8] sm:$0xff] }
 0x153   :  { %4137 = vmatprep.subr.bf16.mxu1 %v1322_v22 }
 0x154   :  { %311 = vmatpush1.bf16.msra.mxu0 %v177_v16  ;;  %v3604_v16 = vld [vmem:[%s7317_s3 + $0x130] sm:$0xff] }
 0x155   :  { %312 = vmatprep.subr.bf16.mxu0 %v180_v17  ;;  %v3607_v17 = vld [vmem:[%s7317_s3 + $0x148] sm:$0xff] }
 0x158   :  { %313 = vmatpush1.bf16.msra.mxu0 %v179_v23  ;;  %v1284_v23 = vld [vmem:[%s7320_s6 + $0x20] sm:$0xff] }
 0x159   :  { %425 = vmatprep.subr.bf16.mxu0 %v412_v24  ;;  %v1285_v24 = vld [vmem:[%s7320_s6 + $0x28] sm:$0xff] }
 0x162   :  { %v74_v26 = vpop.xlane.xlu1 %73 }
 0x163   :  { %v78_v27 = vmul.f32 0.015625, %v74_v26  ;;  %v1302_v26 = vld [vmem:[%s7320_s6 + $0xb0] sm:$0xff] }
 0x165   :  { %v82_v28 = vadd.f32 1e-05, %v78_v27  ;;  %v1303_v27 = vld [vmem:[%s7320_s6 + $0xb8] sm:$0xff] }
 0x166   :  { %v208_v29 = vpop.permute.xlu1 %207 }
 0x167   :  { %4897 = vrsqrt.f32 %v82_v28  ;;  %v413_v28 = vpack.c.bf16 %v3604_v16, %v3602_v10  ;;  %v3620_v16 = vld [vmem:[%s7317_s3 + $0x180] sm:$0xff] }
 0x16a   :  { %v134_v31 = vpop.permute.xlu1 %133 }
 0x16b   :  { %v151_v5 = vmul.f32 %v134_v31, %v123_v0  ;;  %v3623_v0 = vld [vmem:[%s7317_s3 + $0x198] sm:$0xff] }
 0x16e   :  { %v139_v33 = vpop.permute.xlu1 %138 }
 0x16f   :  { %v152_v56 = vmul.f32 %v139_v33, %v5265_v50 }
 0x171   :  { %v4898_v34 = vpop.eup %4897  ;;  %v155_v11 = vpack.c.bf16 %v152_v56, %v151_v5  ;;  %v1307_v5 = vld [vmem:[%s7320_s6 + $0xd8] sm:$0xff] }
 0x172   :  { %v90_v35 = vmul.f32 %v4898_v34, %v5070_v60  ;;  %v5242_v36 = vpop.permute.xlu1 %143  ;;  %v416_v34 = vpack.c.bf16 %v3609_v18, %v3607_v17  ;;  %v3622_v17 = vld [vmem:[%s7317_s3 + $0x190] sm:$0xff]  ;;  %v1316_v18 = vpack.c.bf16 %v1289_v3, %v1288_v2  ;;  %v1325_v22 = vpack.c.bf16 %v1307_v5, %v1306_v4  ;;  %v3642_v5 = vld [vmem:[%s7317_s3 + $0x200] sm:$0xff] }
 0x174   :  { %v101_v38 = vmul.f32 %v5165_v43, %v90_v35  ;;  %v3608_v35 = vld [vmem:[%s7317_s3 + $0x150] sm:$0xff] }
 0x176   :  { %v112_v39 = vadd.f32 %v5171_v45, %v101_v38  ;;  %v149_v40 = vpop.permute.xlu1 %148  ;;  %v3611_v38 = vld [vmem:[%s7317_s3 + $0x168] sm:$0xff] }
 0x178   :  { %122 = vst.msk [vmem:[#allocation2 + $0x20] sm:$0xff] %vm37_vm0, %v112_v39  ;;  %v3613_v39 = vld [vmem:[%s7317_s3 + $0x178] sm:$0xff] }
 0x179   :  { %v418_v59 = vpack.c.bf16 %v3613_v39, %v3611_v38  ;;  %v3629_v39 = vld [vmem:[%s7317_s3 + $0x1c8] sm:$0xff] }
 0x17a   :  { %v5251_v42 = vpop.permute.xlu1 %370 }
 0x17b   :  { %v388_v10 = vmul.f32 %v5251_v42, %v359_v7  ;;  %v3627_v42 = vld [vmem:[%s7317_s3 + $0x1b8] sm:$0xff]  ;;  %v3644_v7 = vld [vmem:[%s7317_s3 + $0x210] sm:$0xff] }
 0x17e   :  { %v5255_v46 = vpop.permute.xlu1 %380 }
 0x17f   :  { %v5257_v60 = vld [vmem:[#allocation2 + $0x1c] sm:$0xff] }
 0x180   :  { %v213_v43 = vmul.f32 %v208_v29, %v5257_v60  ;;  %v5330_v21 = vld [vmem:[#allocation2 + $0x1b] sm:$0xff] }
 0x181   :  { %v3606_v29 = vld [vmem:[%s7317_s3 + $0x140] sm:$0xff]  ;;  %v154_v31 = vmul.f32 %v149_v40, %v5330_v21  ;;  %v1323_v40 = vpack.c.bf16 %v1303_v27, %v1302_v26  ;;  %v538_v26 = vpack.c.bf16 %v3622_v17, %v3620_v16 }
 0x182   :  { %v215_v45 = vpack.c.bf16 %v213_v43, %v212_v47  ;;  %v5263_v49 = vpop.permute.xlu1 %497  ;;  %v1314_v47 = vpack.c.bf16 %v1285_v24, %v1284_v23  ;;  %v868_v43 = vld [vmem:[#allocation2 + $0x13] sm:$0xff]  ;;  %v415_v54 = vpack.c.bf16 %v3608_v35, %v3606_v29  ;;  %v389_v23 = vmul.f32 %v5237_v30, %v5405_v6  ;;  %v884_v24 = vpop.permute.xlu0 %883  ;;  %v5433_v38 = vld [vmem:[#allocation2 + $0x1d] sm:$0xff] }
 0x183   :  { %v153_v52 = vmul.f32 %v868_v43, %v5242_v36  ;;  %v3610_v36 = vld [vmem:[%s7317_s3 + $0x160] sm:$0xff]  ;;  %v541_v29 = vpack.c.bf16 %v3627_v42, %v3625_v20  ;;  %v5431_v35 = vmul.f32 %v884_v24, %v868_v43  ;;  %v3648_v20 = vld [vmem:[%s7317_s3 + $0x230] sm:$0xff]  ;;  %v3651_v42 = vld [vmem:[%s7317_s3 + $0x248] sm:$0xff] }
 0x184   :  { %3591 = vmatmul.mubr.msk.bf16.gmra.mrb[4].mxu0 %vm37_vm0, %v215_v45  ;;  %v1286_v45 = vld [vmem:[%s7320_s6 + $0x30] sm:$0xff]  ;;  %4138 = vmatpush3.bf16.msra.mxu1 %v1314_v47  ;;  %v392_v27 = vpack.c.bf16 %v389_v23, %v388_v10  ;;  %v3631_v47 = vld [vmem:[%s7317_s3 + $0x1d8] sm:$0xff] }
 0x185   :  { %338 = vmatprep.mubr.bf16.mxu0 %v4899_v8  ;;  %v156_v19 = vpack.c.bf16 %v154_v31, %v153_v52  ;;  %v1315_v63 = vpack.c.bf16 %v1287_v51, %v1286_v45  ;;  %4139 = vmatprep.subr.bf16.mxu1 %v1323_v40  ;;  %v3624_v31 = vld [vmem:[%s7317_s3 + $0x1a0] sm:$0xff]  ;;  %v5445_v40 = vld [vmem:[#allocation2 + $0x15] sm:$0xff]  ;;  %v391_v51 = vmul.f32 %v5239_v32, %v5433_v38 }
 0x186   :  { %v5293_v58 = vpop.permute.xlu1 %507  ;;  %v543_v52 = vpack.c.bf16 %v3631_v47, %v3629_v39  ;;  %v542_v32 = vpack.c.bf16 %v3630_v53, %v3628_v13  ;;  %v3649_v10 = vld [vmem:[%s7317_s3 + $0x238] sm:$0xff]  ;;  %v614_v13 = vld [vmem:[#allocation2 + $0x10] sm:$0xff]  ;;  %v613_v53 = vld [vmem:[#allocation2 + $0x8] sm:$0xff] }
 0x187   :  { %v489_v23 = vld [vmem:[#allocation2 + $0x1f] sm:$0xff] }
 0x188   :  { %4140 = vmatpush3.bf16.msra.mxu1 %v1315_v63  ;;  %v3645_v63 = vld [vmem:[%s7317_s3 + $0x218] sm:$0xff] }
 0x189   :  { %4141 = vmatprep.subr.bf16.mxu1 %v1324_v1  ;;  %v486_v1 = vld [vmem:[#allocation2 + $0x7] sm:$0xff] }
 0x18a   :  { %v5319_v12 = vpop.permute.xlu1 %624  ;;  %v515_v3 = vmul.f32 %v5263_v49, %v486_v1  ;;  %v3668_v1 = vld [vmem:[%s7317_s3 + $0x2a0] sm:$0xff] }
 0x18c   :  { %3592 = vmatmul.mubr.msk.bf16.vlgmr.msra.gmra.mrb[0].mxu0 %vm37_vm0, %v155_v11  ;;  %4142 = vmatpush3.bf16.msra.mxu1 %v1316_v18  ;;  %v3646_v18 = vld [vmem:[%s7317_s3 + $0x220] sm:$0xff] }
 0x18d   :  { %426 = vmatpush1.bf16.msra.mxu0 %v411_v9  ;;  %348 = vmatprep.mubr.bf16.mxu0 %v4899_v8  ;;  %v417_v9 = vpack.c.bf16 %v3612_v61, %v3610_v36  ;;  %v3632_v36 = vld [vmem:[%s7317_s3 + $0x1e0] sm:$0xff]  ;;  %v3634_v61 = vld [vmem:[%s7317_s3 + $0x1f0] sm:$0xff]  ;;  %v667_v24 = vpack.c.bf16 %v3648_v20, %v3646_v18 }
 0x18e   :  { %v5352_v33 = vpop.permute.xlu1 %634  ;;  %427 = vmatprep.subr.bf16.mxu0 %v414_v15  ;;  %v539_v15 = vpack.c.bf16 %v3623_v0, %v3621_v62  ;;  %4143 = vmatprep.subr.bf16.mxu1 %v1325_v22  ;;  %v3643_v62 = vld [vmem:[%s7317_s3 + $0x208] sm:$0xff]  ;;  %v544_v2 = vpack.c.bf16 %v3634_v61, %v3632_v36  ;;  %v488_v22 = vld [vmem:[#allocation2 + $0x17] sm:$0xff] }
 0x18f   :  { %v487_v0 = vld [vmem:[#allocation2 + $0xf] sm:$0xff]  ;;  %v666_v4 = vpack.c.bf16 %v3645_v63, %v3643_v62  ;;  %v3671_v61 = vld [vmem:[%s7317_s3 + $0x2b8] sm:$0xff] }
 0x190   :  { %v516_v49 = vmul.f32 %v5244_v37, %v487_v0  ;;  %v3653_v37 = vld [vmem:[%s7317_s3 + $0x258] sm:$0xff]  ;;  %v3669_v36 = vld [vmem:[%s7317_s3 + $0x2a8] sm:$0xff] }
 0x191   :  { %428 = vmatpush1.bf16.msra.mxu0 %v413_v28  ;;  %v795_v0 = vpack.c.bf16 %v3671_v61, %v3669_v36  ;;  %v3699_v36 = vld [vmem:[%s7317_s3 + $0x368] sm:$0xff]  ;;  %v3701_v61 = vld [vmem:[%s7317_s3 + $0x378] sm:$0xff] }
 0x192   :  { %v5378_v56 = vpop.permute.xlu1 %751  ;;  %429 = vmatprep.subr.bf16.mxu0 %v416_v34  ;;  %v3626_v34 = vld [vmem:[%s7317_s3 + $0x1b0] sm:$0xff]  ;;  %v519_v16 = vpack.c.bf16 %v516_v49, %v515_v3  ;;  %v3673_v3 = vld [vmem:[%s7317_s3 + $0x2c8] sm:$0xff]  ;;  %v3672_v49 = vld [vmem:[%s7317_s3 + $0x2c0] sm:$0xff] }
 0x193   :  { %v540_v45 = vpack.c.bf16 %v3626_v34, %v3624_v31  ;;  %v3655_v31 = vld [vmem:[%s7317_s3 + $0x268] sm:$0xff]  ;;  %v3657_v34 = vld [vmem:[%s7317_s3 + $0x278] sm:$0xff] }
 0x194   :  { %3593 = vmatmul.mubr.msk.bf16.gmra.mrb[4].mxu0 %vm37_vm0, %v156_v19 }
 0x195   :  { %430 = vmatpush1.bf16.msra.mxu0 %v415_v54  ;;  %457 = vmatprep.mubr.bf16.mxu0 %v4899_v8  ;;  %v3633_v54 = vld [vmem:[%s7317_s3 + $0x1e8] sm:$0xff] }
 0x196   :  { %v5409_v11 = vpop.permute.xlu1 %761  ;;  %431 = vmatprep.subr.bf16.mxu0 %v418_v59 }
 0x199   :  { %432 = vmatpush1.bf16.msra.mxu0 %v417_v9  ;;  %v3647_v9 = vld [vmem:[%s7317_s3 + $0x228] sm:$0xff] }
 0x19a   :  { %v879_v28 = vpop.permute.xlu1 %878  ;;  %552 = vmatprep.subr.bf16.mxu0 %v539_v15  ;;  %v665_v15 = vpack.c.bf16 %v3644_v7, %v3642_v5  ;;  %v668_v17 = vpack.c.bf16 %v3649_v10, %v3647_v9  ;;  %v615_v5 = vld [vmem:[#allocation2 + $0x18] sm:$0xff] }
 0x19b   :  { %v5436_v30 = vmul.f32 %v879_v28, %v5265_v50  ;;  %v390_v50 = vmul.f32 %v5445_v40, %v5255_v46  ;;  %v3635_v46 = vld [vmem:[%s7317_s3 + $0x1f8] sm:$0xff]  ;;  %v3650_v28 = vld [vmem:[%s7317_s3 + $0x240] sm:$0xff]  ;;  %v644_v9 = vmul.f32 %v5352_v33, %v615_v5  ;;  %v3710_v5 = vld [vmem:[%s7317_s3 + $0x390] sm:$0xff] }
 0x19c   :  { %3614 = vmatmul.mubr.msk.bf16.vlgmr.msra.gmra.mrb[0].mxu0 %vm37_vm0, %v392_v27  ;;  %v545_v59 = vpack.c.bf16 %v3635_v46, %v3633_v54  ;;  %v670_v27 = vpack.c.bf16 %v3653_v37, %v3651_v42  ;;  %v642_v46 = vmul.f32 %v5319_v12, %v613_v53  ;;  %v643_v12 = vmul.f32 %v5260_v48, %v614_v13  ;;  %v3675_v48 = vld [vmem:[%s7317_s3 + $0x2d8] sm:$0xff]  ;;  %v3676_v37 = vld [vmem:[%s7317_s3 + $0x2e0] sm:$0xff] }
 0x19d   :  { %v900_v43 = vpack.c.bf16 %v5431_v35, %v5436_v30  ;;  %553 = vmatpush1.bf16.msra.mxu0 %v538_v26  ;;  %467 = vmatprep.mubr.bf16.mxu0 %v4899_v8  ;;  %v393_v19 = vpack.c.bf16 %v391_v51, %v390_v50  ;;  %v517_v26 = vmul.f32 %v5293_v58, %v488_v22  ;;  %v3654_v50 = vld [vmem:[%s7317_s3 + $0x260] sm:$0xff]  ;;  %v3656_v51 = vld [vmem:[%s7317_s3 + $0x270] sm:$0xff]  ;;  %v894_v35 = vpop.permute.xlu0 %893  ;;  %v3721_v30 = vld [vmem:[%s7317_s3 + $0x3e8] sm:$0xff] }
 0x19e   :  { %554 = vmatprep.subr.bf16.mxu0 %v541_v29  ;;  %v3652_v29 = vld [vmem:[%s7317_s3 + $0x250] sm:$0xff]  ;;  %v518_v58 = vmul.f32 %v5249_v41, %v489_v23  ;;  %v3667_v41 = vld [vmem:[%s7317_s3 + $0x298] sm:$0xff]  ;;  %v671_v54 = vpack.c.bf16 %v3656_v51, %v3654_v50  ;;  %v646_v63 = vpack.c.bf16 %v643_v12, %v642_v46  ;;  %v797_v10 = vpack.c.bf16 %v3675_v48, %v3673_v3  ;;  %v3687_v23 = vld [vmem:[%s7317_s3 + $0x308] sm:$0xff] }
 0x19f   :  { %v669_v39 = vpack.c.bf16 %v3652_v29, %v3650_v28  ;;  %v3678_v22 = vld [vmem:[%s7317_s3 + $0x2f0] sm:$0xff]  ;;  %v3686_v29 = vld [vmem:[%s7317_s3 + $0x300] sm:$0xff] }
 0x1a0   :  { %v520_v47 = vpack.c.bf16 %v518_v58, %v517_v26  ;;  %v798_v26 = vpack.c.bf16 %v3678_v22, %v3676_v37  ;;  %v3691_v58 = vld [vmem:[%s7317_s3 + $0x328] sm:$0xff]  ;;  %v3690_v51 = vld [vmem:[%s7317_s3 + $0x320] sm:$0xff] }
 0x1a1   :  { %555 = vmatpush1.bf16.msra.mxu0 %v540_v45  ;;  %v672_v45 = vpack.c.bf16 %v3657_v34, %v3655_v31  ;;  %v3688_v31 = vld [vmem:[%s7317_s3 + $0x310] sm:$0xff]  ;;  %v743_v13 = vld [vmem:[#allocation2 + $0x21] sm:$0xff]  ;;  %v742_v53 = vld [vmem:[#allocation2 + $0x19] sm:$0xff] }
 0x1a2   :  { %556 = vmatprep.subr.bf16.mxu0 %v543_v52  ;;  %v3665_v52 = vld [vmem:[%s7317_s3 + $0x288] sm:$0xff]  ;;  %v741_v34 = vld [vmem:[#allocation2 + $0x11] sm:$0xff]  ;;  %v771_v46 = vmul.f32 %v5409_v11, %v742_v53  ;;  %v772_v11 = vmul.f32 %v5376_v55, %v743_v13 }
 0x1a3   :  { %v3711_v55 = vld [vmem:[%s7317_s3 + $0x398] sm:$0xff] }
 0x1a4   :  { %3615 = vmatmul.mubr.msk.bf16.gmra.mrb[4].mxu0 %vm37_vm0, %v393_v19  ;;  %v3664_v19 = vld [vmem:[%s7317_s3 + $0x280] sm:$0xff] }
 0x1a5   :  { %557 = vmatpush1.bf16.msra.mxu0 %v542_v32  ;;  %584 = vmatprep.mubr.bf16.mxu0 %v4899_v8  ;;  %v793_v32 = vpack.c.bf16 %v3667_v41, %v3665_v52  ;;  %v3692_v52 = vld [vmem:[%s7317_s3 + $0x330] sm:$0xff]  ;;  %v3695_v41 = vld [vmem:[%s7317_s3 + $0x348] sm:$0xff] }
 0x1a6   :  { %558 = vmatprep.subr.bf16.mxu0 %v545_v59  ;;  %v3666_v59 = vld [vmem:[%s7317_s3 + $0x290] sm:$0xff] }
 0x1a7   :  { %v792_v62 = vpack.c.bf16 %v3666_v59, %v3664_v19  ;;  %v3694_v19 = vld [vmem:[%s7317_s3 + $0x340] sm:$0xff]  ;;  %v3696_v59 = vld [vmem:[%s7317_s3 + $0x350] sm:$0xff] }
 0x1a8   :  { %v923_v12 = vpack.c.bf16 %v3696_v59, %v3694_v19  ;;  %v3739_v19 = vld [vmem:[%s7317_s3 + $0x448] sm:$0xff] }
 0x1a9   :  { %559 = vmatpush1.bf16.msra.mxu0 %v544_v2  ;;  %v3670_v2 = vld [vmem:[%s7317_s3 + $0x2b0] sm:$0xff]  ;;  %v997_v59 = vld [vmem:[#allocation2 + $0x24] sm:$0xff] }
 0x1aa   :  { %679 = vmatprep.subr.bf16.mxu0 %v666_v4  ;;  %v616_v4 = vld [vmem:[#allocation2 + $0x20] sm:$0xff]  ;;  %v794_v7 = vpack.c.bf16 %v3670_v2, %v3668_v1  ;;  %v3700_v1 = vld [vmem:[%s7317_s3 + $0x370] sm:$0xff]  ;;  %v3709_v2 = vld [vmem:[%s7317_s3 + $0x388] sm:$0xff] }
 0x1ab   :  { %v645_v33 = vmul.f32 %v5290_v14, %v616_v4  ;;  %v3689_v14 = vld [vmem:[%s7317_s3 + $0x318] sm:$0xff]  ;;  %v1047_v48 = vpack.c.bf16 %v3711_v55, %v3709_v2  ;;  %v3708_v4 = vld [vmem:[%s7317_s3 + $0x380] sm:$0xff] }
 0x1ac   :  { %3636 = vmatmul.mubr.msk.bf16.vlgmr.msra.gmra.mrb[0].mxu0 %vm37_vm0, %v519_v16  ;;  %v3677_v16 = vld [vmem:[%s7317_s3 + $0x2e8] sm:$0xff]  ;;  %v920_v28 = vpack.c.bf16 %v3689_v14, %v3687_v23  ;;  %v3716_v23 = vld [vmem:[%s7317_s3 + $0x3c0] sm:$0xff]  ;;  %v3718_v14 = vld [vmem:[%s7317_s3 + $0x3d0] sm:$0xff] }
 0x1ad   :  { %680 = vmatpush1.bf16.msra.mxu0 %v665_v15  ;;  %594 = vmatprep.mubr.bf16.mxu0 %v4899_v8  ;;  %v3674_v15 = vld [vmem:[%s7317_s3 + $0x2d0] sm:$0xff]  ;;  %v647_v20 = vpack.c.bf16 %v645_v33, %v644_v9  ;;  %v3715_v9 = vld [vmem:[%s7317_s3 + $0x3b8] sm:$0xff]  ;;  %v3717_v33 = vld [vmem:[%s7317_s3 + $0x3c8] sm:$0xff] }
 0x1ae   :  { %681 = vmatprep.subr.bf16.mxu0 %v668_v17  ;;  %v3679_v17 = vld [vmem:[%s7317_s3 + $0x2f8] sm:$0xff]  ;;  %v796_v18 = vpack.c.bf16 %v3674_v15, %v3672_v49  ;;  %v3712_v15 = vld [vmem:[%s7317_s3 + $0x3a0] sm:$0xff] }
 0x1af   :  { %v799_v42 = vpack.c.bf16 %v3679_v17, %v3677_v16  ;;  %v3714_v16 = vld [vmem:[%s7317_s3 + $0x3b0] sm:$0xff]  ;;  %v889_v17 = vpop.permute.xlu1 %888 }
 0x1b0   :  { %v898_v37 = vmul.f32 %v889_v17, %v5330_v21  ;;  %v1124_v17 = vld [vmem:[#allocation2 + $0x25] sm:$0xff] }
 0x1b1   :  { %682 = vmatpush1.bf16.msra.mxu0 %v667_v24  ;;  %v740_v24 = vld [vmem:[#allocation2 + $0x9] sm:$0xff] }
 0x1b2   :  { %683 = vmatprep.subr.bf16.mxu0 %v670_v27  ;;  %v769_v27 = vmul.f32 %v5378_v56, %v740_v24  ;;  %v770_v56 = vmul.f32 %v5338_v25, %v741_v34  ;;  %v3697_v25 = vld [vmem:[%s7317_s3 + $0x358] sm:$0xff]  ;;  %v1050_v24 = vpack.c.bf16 %v3718_v14, %v3716_v23  ;;  %v3731_v34 = vld [vmem:[%s7317_s3 + $0x408] sm:$0xff]  ;;  %v1292_v23 = vld [vmem:[%s7320_s6 + $0x60] sm:$0xff] }
 0x1b3   :  { %v1293_v14 = vld [vmem:[%s7320_s6 + $0x68] sm:$0xff] }
 0x1b4   :  { %3637 = vmatmul.mubr.msk.bf16.gmra.mrb[4].mxu0 %vm37_vm0, %v520_v47  ;;  %v919_v47 = vpack.c.bf16 %v3688_v31, %v3686_v29  ;;  %v3722_v29 = vld [vmem:[%s7317_s3 + $0x3f0] sm:$0xff]  ;;  %v1006_v31 = vpop.permute.xlu1 %1005 }
 0x1b5   :  { %684 = vmatpush1.bf16.msra.mxu0 %v669_v39  ;;  %711 = vmatprep.mubr.bf16.mxu0 %v4899_v8  ;;  %v3693_v39 = vld [vmem:[%s7317_s3 + $0x338] sm:$0xff] }
 0x1b6   :  { %685 = vmatprep.subr.bf16.mxu0 %v672_v45  ;;  %v773_v45 = vpack.c.bf16 %v770_v56, %v769_v27  ;;  %v922_v50 = vpack.c.bf16 %v3693_v39, %v3691_v58  ;;  %v3733_v58 = vld [vmem:[%s7317_s3 + $0x418] sm:$0xff]  ;;  %v1011_v39 = vpop.permute.xlu0 %1010 }
 0x1b9   :  { %686 = vmatpush1.bf16.msra.mxu0 %v671_v54  ;;  %v921_v54 = vpack.c.bf16 %v3692_v52, %v3690_v51  ;;  %v3732_v51 = vld [vmem:[%s7317_s3 + $0x410] sm:$0xff]  ;;  %v3735_v52 = vld [vmem:[%s7317_s3 + $0x428] sm:$0xff] }
 0x1ba   :  { %806 = vmatprep.subr.bf16.mxu0 %v793_v32  ;;  %v924_v32 = vpack.c.bf16 %v3697_v25, %v3695_v41  ;;  %v3737_v41 = vld [vmem:[%s7317_s3 + $0x438] sm:$0xff] }
 0x1bb   :  { %v1176_v53 = vpack.c.bf16 %v3737_v41, %v3735_v52 }
 0x1bc   :  { %3658 = vmatmul.mubr.msk.bf16.vlgmr.msra.gmra.mrb[0].mxu0 %vm37_vm0, %v646_v63  ;;  %v926_v63 = vpack.c.bf16 %v3701_v61, %v3699_v36 }
 0x1bd   :  { %807 = vmatpush1.bf16.msra.mxu0 %v792_v62  ;;  %721 = vmatprep.mubr.bf16.mxu0 %v4899_v8  ;;  %v774_v62 = vpack.c.bf16 %v772_v11, %v771_v46  ;;  %v3736_v46 = vld [vmem:[%s7317_s3 + $0x430] sm:$0xff] }
 0x1be   :  { %808 = vmatprep.subr.bf16.mxu0 %v795_v0  ;;  %v3698_v0 = vld [vmem:[%s7317_s3 + $0x360] sm:$0xff] }
 0x1bf   :  { %v925_v3 = vpack.c.bf16 %v3700_v1, %v3698_v0  ;;  %v3743_v0 = vld [vmem:[%s7317_s3 + $0x468] sm:$0xff]  ;;  %v3745_v1 = vld [vmem:[%s7317_s3 + $0x478] sm:$0xff] }
 0x1c1   :  { %809 = vmatpush1.bf16.msra.mxu0 %v794_v7  ;;  %v3713_v7 = vld [vmem:[%s7317_s3 + $0x3a8] sm:$0xff] }
 0x1c2   :  { %810 = vmatprep.subr.bf16.mxu0 %v797_v10  ;;  %v1046_v10 = vpack.c.bf16 %v3710_v5, %v3708_v4  ;;  %v1049_v49 = vpack.c.bf16 %v3715_v9, %v3713_v7  ;;  %v3744_v4 = vld [vmem:[%s7317_s3 + $0x470] sm:$0xff] }
 0x1c4   :  { %3659 = vmatmul.mubr.msk.bf16.gmra.mrb[4].mxu0 %vm37_vm0, %v647_v20  ;;  %v870_v20 = vld [vmem:[#allocation2 + $0x23] sm:$0xff] }
 0x1c5   :  { %811 = vmatpush1.bf16.msra.mxu0 %v796_v18  ;;  %838 = vmatprep.mubr.bf16.mxu0 %v4899_v8  ;;  %v3719_v18 = vld [vmem:[%s7317_s3 + $0x3d8] sm:$0xff]  ;;  %v899_v21 = vmul.f32 %v894_v35, %v870_v20  ;;  %v1318_v35 = vpack.c.bf16 %v1293_v14, %v1292_v23 }
 0x1c6   :  { %812 = vmatprep.subr.bf16.mxu0 %v799_v42  ;;  %v1048_v42 = vpack.c.bf16 %v3714_v16, %v3712_v15  ;;  %v1051_v22 = vpack.c.bf16 %v3719_v18, %v3717_v33 }
 0x1c9   :  { %813 = vmatpush1.bf16.msra.mxu0 %v798_v26  ;;  %v901_v26 = vpack.c.bf16 %v899_v21, %v898_v37 }
 0x1ca   :  { %933 = vmatprep.subr.bf16.mxu0 %v920_v28  ;;  %v3720_v28 = vld [vmem:[%s7317_s3 + $0x3e0] sm:$0xff] }
 0x1cb   :  { %v1052_v56 = vpack.c.bf16 %v3722_v29, %v3720_v28  ;;  %v1250_v28 = vlaneseq }
 0x1cc   :  { %3680 = vmatmul.mubr.msk.bf16.vlgmr.msra.gmra.mrb[0].mxu0 %vm37_vm0, %v773_v45  ;;  %v1174_v45 = vpack.c.bf16 %v3733_v58, %v3731_v34  ;;  %v1248_v34 = vld [vmem:[%s7321_s4] sm:$0x3] }
 0x1cd   :  { %934 = vmatpush1.bf16.msra.mxu0 %v919_v47  ;;  %848 = vmatprep.mubr.bf16.mxu0 %v4899_v8  ;;  %v1023_v47 = vmul.f32 %v1006_v31, %v5190_v57  ;;  %v1024_v57 = vmul.f32 %v1011_v39, %v5253_v44  ;;  %v3741_v44 = vld [vmem:[%s7317_s3 + $0x458] sm:$0xff]  ;;  %v1251_v29 = vshrl.u32 %v1250_v28, 7  ;;  %v1394_v28 = vld [vmem:[%s7322_s8 + $0x50] sm:$0xff] }
 0x1ce   :  { %935 = vmatprep.subr.bf16.mxu0 %v922_v50  ;;  %v3730_v50 = vld [vmem:[%s7317_s3 + $0x400] sm:$0xff]  ;;  %v1178_v11 = vpack.c.bf16 %v3741_v44, %v3739_v19 }
 0x1cf   :  { %v1173_v25 = vpack.c.bf16 %v3732_v51, %v3730_v50  ;;  %v1027_v13 = vpack.c.bf16 %v1024_v57, %v1023_v47  ;;  %v1252_v31 = vsub.s32 0, %v1251_v29  ;;  %v1256_v58 = vsub.s32 1, %v1251_v29  ;;  %v1395_v29 = vld [vmem:[%s7322_s8 + $0x58] sm:$0xff] }
 0x1d1   :  { %936 = vmatpush1.bf16.msra.mxu0 %v921_v54  ;;  %v3734_v54 = vld [vmem:[%s7317_s3 + $0x420] sm:$0xff]  ;;  %v1253_v39 = vrot.slane %v1248_v34, %v1252_v31 }
 0x1d2   :  { %937 = vmatprep.subr.bf16.mxu0 %v924_v32  ;;  %v1016_v32 = vpop.permute.xlu1 %1015  ;;  %v1175_v36 = vpack.c.bf16 %v3736_v46, %v3734_v54  ;;  %v1396_v31 = vld [vmem:[%s7322_s8 + $0x60] sm:$0xff] }
 0x1d3   :  { %v1025_v61 = vmul.f32 %v1016_v32, %v5257_v60 }
 0x1d4   :  { %3681 = vmatmul.mubr.msk.bf16.gmra.mrb[4].mxu0 %vm37_vm0, %v774_v62  ;;  %v3740_v62 = vld [vmem:[%s7317_s3 + $0x450] sm:$0xff] }
 0x1d5   :  { %938 = vmatpush1.bf16.msra.mxu0 %v923_v12  ;;  %965 = vmatprep.mubr.bf16.mxu0 %v4899_v8  ;;  %v3738_v12 = vld [vmem:[%s7317_s3 + $0x440] sm:$0xff] }
 0x1d6   :  { %939 = vmatprep.subr.bf16.mxu0 %v926_v63  ;;  %v1021_v63 = vpop.permute.xlu0 %1020  ;;  %v1177_v2 = vpack.c.bf16 %v3740_v62, %v3738_v12  ;;  %v1133_v5 = vpop.permute.xlu1 %1132 }
 0x1d7   :  { %v1026_v60 = vmul.f32 %v1021_v63, %v997_v59 }
 0x1d9   :  { %940 = vmatpush1.bf16.msra.mxu0 %v925_v3  ;;  %v1028_v55 = vpack.c.bf16 %v1026_v60, %v1025_v61  ;;  %v1180_v3 = vpack.c.bf16 %v3745_v1, %v3743_v0 }
 0x1da   :  { %1060 = vmatprep.subr.bf16.mxu0 %v1047_v48  ;;  %v3742_v48 = vld [vmem:[%s7317_s3 + $0x460] sm:$0xff]  ;;  %v1138_v7 = vpop.permute.xlu0 %1137  ;;  %v1143_v16 = vpop.permute.xlu1 %1142 }
 0x1db   :  { %v1179_v9 = vpack.c.bf16 %v3744_v4, %v3742_v48  ;;  %v1152_v33 = vmul.f32 %v1143_v16, %v5433_v38  ;;  %v1309_v38 = vld [vmem:[%s7320_s6 + $0xe8] sm:$0xff]  ;;  %v1384_v48 = vld [vmem:[%s7322_s8] sm:$0xff] }
 0x1dc   :  { %3702 = vmatmul.mubr.msk.bf16.vlgmr.msra.gmra.mrb[0].mxu0 %vm37_vm0, %v900_v43  ;;  %v3723_v43 = vld [vmem:[%s7317_s3 + $0x3f8] sm:$0xff] }
 0x1dd   :  { %1061 = vmatpush1.bf16.msra.mxu0 %v1046_v10  ;;  %975 = vmatprep.mubr.bf16.mxu0 %v4899_v8  ;;  %v1053_v27 = vpack.c.bf16 %v3723_v43, %v3721_v30  ;;  %v1150_v10 = vmul.f32 %v1133_v5, %v5405_v6  ;;  %v1290_v6 = vld [vmem:[%s7320_s6 + $0x50] sm:$0xff]  ;;  %v1311_v43 = vld [vmem:[%s7320_s6 + $0xf8] sm:$0xff] }
 0x1de   :  { %1062 = vmatprep.subr.bf16.mxu0 %v1049_v49  ;;  %v1151_v49 = vmul.f32 %v1138_v7, %v5445_v40  ;;  %v1148_v18 = vpop.permute.xlu0 %1147  ;;  %v1291_v40 = vld [vmem:[%s7320_s6 + $0x58] sm:$0xff]  ;;  %v1310_v30 = vld [vmem:[%s7320_s6 + $0xf0] sm:$0xff] }
 0x1df   :  { %v1153_v20 = vmul.f32 %v1148_v18, %v1124_v17  ;;  %v1317_v37 = vpack.c.bf16 %v1291_v40, %v1290_v6  ;;  %v1327_v21 = vpack.c.bf16 %v1311_v43, %v1310_v30  ;;  %v1388_v30 = vld [vmem:[%s7322_s8 + $0x20] sm:$0xff]  ;;  %v1389_v43 = vld [vmem:[%s7322_s8 + $0x28] sm:$0xff] }
 0x1e0   :  { %v1154_v15 = vpack.c.bf16 %v1151_v49, %v1150_v10  ;;  %v3748_v10 = vld [vmem:[%s7323_s7] ss:$0 sm:$0xff] }
 0x1e1   :  { %1063 = vmatpush1.bf16.msra.mxu0 %v1048_v42  ;;  %v1155_v42 = vpack.c.bf16 %v1153_v20, %v1152_v33  ;;  %4144 = vmatpush3.bf16.msra.mxu1 %v1317_v37  ;;  %v1385_v37 = vld [vmem:[%s7322_s8 + $0x8] sm:$0xff] }
 0x1e2   :  { %1064 = vmatprep.subr.bf16.mxu0 %v1051_v22 }
 0x1e4   :  { %3703 = vmatmul.mubr.msk.bf16.gmra.mrb[4].mxu0 %vm37_vm0, %v901_v26  ;;  %v1295_v26 = vld [vmem:[%s7320_s6 + $0x78] sm:$0xff] }
 0x1e5   :  { %1065 = vmatpush1.bf16.msra.mxu0 %v1050_v24  ;;  %1092 = vmatprep.mubr.bf16.mxu0 %v4899_v8  ;;  %v1294_v24 = vld [vmem:[%s7320_s6 + $0x70] sm:$0xff] }
 0x1e6   :  { %1066 = vmatprep.subr.bf16.mxu0 %v1053_v27  ;;  %v1319_v27 = vpack.c.bf16 %v1295_v26, %v1294_v24  ;;  %v1391_v24 = vld [vmem:[%s7322_s8 + $0x38] sm:$0xff]  ;;  %v1392_v26 = vld [vmem:[%s7322_s8 + $0x40] sm:$0xff] }
 0x1e9   :  { %1067 = vmatpush1.bf16.msra.mxu0 %v1052_v56  ;;  %v1257_v56 = vrot.slane %v1248_v34, %v1256_v58  ;;  %v1397_v34 = vld [vmem:[%s7322_s8 + $0x68] sm:$0xff]  ;;  %v1398_v58 = vld [vmem:[%s7322_s8 + $0x70] sm:$0xff] }
 0x1ea   :  { %1187 = vmatprep.subr.bf16.mxu0 %v1174_v45 }
 0x1ec   :  { %3724 = vmatmul.mubr.msk.bf16.vlgmr.msra.gmra.mrb[0].mxu0 %vm37_vm0, %v1027_v13 }
 0x1ed   :  { %1188 = vmatpush1.bf16.msra.mxu0 %v1173_v25  ;;  %1102 = vmatprep.mubr.bf16.mxu0 %v4899_v8 }
 0x1ee   :  { %1189 = vmatprep.subr.bf16.mxu0 %v1176_v53 }
 0x1f1   :  { %1190 = vmatpush1.bf16.msra.mxu0 %v1175_v36 }
 0x1f2   :  { %1191 = vmatprep.subr.bf16.mxu0 %v1178_v11 }
 0x1f4   :  { %3725 = vmatmul.mubr.msk.bf16.gmra.mrb[4].mxu0 %vm37_vm0, %v1028_v55 }
 0x1f5   :  { %1192 = vmatpush1.bf16.msra.mxu0 %v1177_v2  ;;  %1219 = vmatprep.mubr.bf16.mxu0 %v4899_v8 }
 0x1f6   :  { %1193 = vmatprep.subr.bf16.mxu0 %v1180_v3 }
 0x1f9   :  { %1194 = vmatpush1.bf16.msra.mxu0 %v1179_v9 }
 0x1fc   :  { %3746 = vmatmul.mubr.msk.bf16.vlgmr.msra.gmra.mrb[0].mxu0 %vm37_vm0, %v1154_v15 }
 0x1fd   :  { %1229 = vmatprep.mubr.bf16.mxu0 %v4899_v8  ;;  %v1308_v8 = vld [vmem:[%s7320_s6 + $0xe0] sm:$0xff] }
 0x1fe   :  { %v1326_v22 = vpack.c.bf16 %v1309_v38, %v1308_v8  ;;  %v1386_v38 = vld [vmem:[%s7322_s8 + $0x10] sm:$0xff] }
 0x200   :  { %4145 = vmatprep.subr.bf16.mxu1 %v1326_v22 }
 0x201   :  { %4146 = vmatpush3.bf16.msra.mxu1 %v1318_v35  ;;  %v1387_v35 = vld [vmem:[%s7322_s8 + $0x18] sm:$0xff] }
 0x202   :  { %4147 = vmatprep.subr.bf16.mxu1 %v1327_v21  ;;  %v1390_v21 = vld [vmem:[%s7322_s8 + $0x30] sm:$0xff] }
 0x204   :  { %3747 = vmatmul.mubr.msk.bf16.gmra.mrb[4].mxu0 %vm37_vm0, %v1155_v42 }
 0x205   :  { %4148 = vmatpush3.bf16.msra.mxu1 %v1319_v27  ;;  %4621 = vmatprep.mubr.msk.f32.mxu0 %vm1512_vm1, %v1384_v48  ;;  %v1393_v27 = vld [vmem:[%s7322_s8 + $0x48] sm:$0xff] }
 0x2cf   :  { %v1221_v47 = vpop.f32.mrb[0].mxu0 }
 0x2d0   :  { %v1260_v45 = vadd.f32 %v1253_v39, %v1221_v47  ;;  %v1223_v50 = vpop.f32.mrb[1].mxu0  ;;  %v1401_v47 = vld [vmem:[%s7322_s8 + $0x88] sm:$0xff] }
 0x2d1   :  { %v1261_v51 = vadd.f32 %v1257_v56, %v1223_v50  ;;  %v1225_v52 = vpop.f32.mrb[2].mxu0  ;;  %v1403_v50 = vld [vmem:[%s7322_s8 + $0x98] sm:$0xff] }
 0x2d2   :  { %v1262_v41 = vadd.f32 %v1253_v39, %v1225_v52  ;;  %v1227_v57 = vpop.f32.mrb[3].mxu0  ;;  %v1268_v13 = vmax.f32 %v1260_v45, 0.0  ;;  %v1402_v45 = vld [vmem:[%s7322_s8 + $0x90] sm:$0xff]  ;;  %v1405_v52 = vld [vmem:[%s7322_s8 + $0xa8] sm:$0xff] }
 0x2d3   :  { %v1263_v25 = vadd.f32 %v1257_v56, %v1227_v57  ;;  %v1269_v54 = vmax.f32 %v1261_v51, 0.0  ;;  %v1404_v51 = vld [vmem:[%s7322_s8 + $0xa0] sm:$0xff]  ;;  %v1407_v57 = vld [vmem:[%s7322_s8 + $0xb8] sm:$0xff] }
 0x2d4   :  { %v1270_v53 = vmax.f32 %v1262_v41, 0.0  ;;  %v1406_v41 = vld [vmem:[%s7322_s8 + $0xb0] sm:$0xff] }
 0x2d5   :  { %v1271_v46 = vmax.f32 %v1263_v25, 0.0  ;;  %v1408_v25 = vld [vmem:[%s7322_s8 + $0xc0] sm:$0xff] }
 0x2d6   :  { %v1276_v32 = vpack.c.bf16 %v1270_v53, %v1268_v13  ;;  %v1409_v13 = vld [vmem:[%s7322_s8 + $0xc8] sm:$0xff]  ;;  %v1410_v53 = vld [vmem:[%s7322_s8 + $0xd0] sm:$0xff] }
 0x2d7   :  { %v1231_v19 = vpop.f32.mrb[4].mxu0  ;;  %v1277_v44 = vpack.c.bf16 %v1271_v46, %v1269_v54  ;;  %v1411_v54 = vld [vmem:[%s7322_s8 + $0xd8] sm:$0xff]  ;;  %v1412_v46 = vld [vmem:[%s7322_s8 + $0xe0] sm:$0xff] }
 0x2d8   :  { %v1264_v59 = vadd.f32 %v1253_v39, %v1231_v19  ;;  %v1233_v36 = vpop.f32.mrb[5].mxu0  ;;  %v1414_v19 = vld [vmem:[%s7322_s8 + $0xf0] sm:$0xff] }
 0x2d9   :  { %v1265_v61 = vadd.f32 %v1257_v56, %v1233_v36  ;;  %v1235_v11 = vpop.f32.mrb[6].mxu0  ;;  %1367 = vmatprep.mubr.bf16.mxu1 %v1277_v44  ;;  %v1415_v44 = vld [vmem:[%s7322_s8 + $0xf8] sm:$0xff]  ;;  %v1417_v36 = vld [vmem:[%s7322_s8 + $0x108] sm:$0xff] }
 0x2da   :  { %v1266_v12 = vadd.f32 %v1253_v39, %v1235_v11  ;;  %v1237_v62 = vpop.f32.mrb[7].mxu0  ;;  %1368 = vmatmul.mubr.bf16.vlgmr.msra.gmra.mrb[0].mxu1 %v1276_v32  ;;  %v1272_v0 = vmax.f32 %v1264_v59, 0.0  ;;  %v1399_v39 = vld [vmem:[%s7322_s8 + $0x78] sm:$0xff]  ;;  %v1413_v32 = vld [vmem:[%s7322_s8 + $0xe8] sm:$0xff]  ;;  %v1416_v59 = vld [vmem:[%s7322_s8 + $0x100] sm:$0xff] }
 0x2db   :  { %v1267_v63 = vadd.f32 %v1257_v56, %v1237_v62  ;;  %v1273_v60 = vmax.f32 %v1265_v61, 0.0  ;;  %v1400_v56 = vld [vmem:[%s7322_s8 + $0x80] sm:$0xff]  ;;  %v1418_v61 = vld [vmem:[%s7322_s8 + $0x110] sm:$0xff]  ;;  %v1419_v11 = vld [vmem:[%s7322_s8 + $0x118] sm:$0xff] }
 0x2dc   :  { %v1274_v1 = vmax.f32 %v1266_v12, 0.0  ;;  %v1420_v12 = vld [vmem:[%s7322_s8 + $0x120] sm:$0xff]  ;;  %v1421_v62 = vld [vmem:[%s7322_s8 + $0x128] sm:$0xff] }
 0x2dd   :  { %v1275_v2 = vmax.f32 %v1267_v63, 0.0  ;;  %v1422_v63 = vld [vmem:[%s7322_s8 + $0x130] sm:$0xff] }
 0x2de   :  { %v1278_v55 = vpack.c.bf16 %v1274_v1, %v1272_v0  ;;  %v1423_v0 = vld [vmem:[%s7322_s8 + $0x138] sm:$0xff]  ;;  %v1424_v1 = vld [vmem:[%s7322_s8 + $0x140] sm:$0xff] }
 0x2df   :  { %v1279_v3 = vpack.c.bf16 %v1275_v2, %v1273_v60  ;;  %v1425_v60 = vld [vmem:[%s7322_s8 + $0x148] sm:$0xff]  ;;  %v1426_v2 = vld [vmem:[%s7322_s8 + $0x150] sm:$0xff] }
 0x2e1   :  { %1375 = vmatprep.mubr.bf16.mxu1 %v1279_v3  ;;  %v1428_v3 = vld [vmem:[%s7322_s8 + $0x160] sm:$0xff] }
 0x2e2   :  { %1376 = vmatmul.mubr.bf16.gmra.mrb[4].mxu1 %v1278_v55  ;;  %v1427_v55 = vld [vmem:[%s7322_s8 + $0x158] sm:$0xff] }
 0x2e3   :  { %4425 = vmatprep.mubr.msk.f32.mxu1 %vm1512_vm1, %v1384_v48  ;;  %v1429_v48 = vld [vmem:[%s7322_s8 + $0x168] sm:$0xff] }
 0x3ad   :  { %v4149_v4 = vpop.f32.mrb[0].mxu1 }
 0x3ae   :  { %v4150_v5 = vpop.f32.mrb[1].mxu1 }
 0x3af   :  { %v4151_v7 = vadd.f32 %v4150_v5, %v4149_v4  ;;  %v4152_v9 = vpop.f32.mrb[2].mxu1  ;;  %v1430_v4 = vld [vmem:[%s7322_s8 + $0x170] sm:$0xff]  ;;  %v1431_v5 = vld [vmem:[%s7322_s8 + $0x178] sm:$0xff] }
 0x3b0   :  { %v4153_v49 = vpop.f32.mrb[3].mxu1 }
 0x3b1   :  { %v4154_v15 = vadd.f32 %v4153_v49, %v4152_v9  ;;  %v1370_v16 = vadd.f32 %v4151_v7, %v3748_v10  ;;  %v1432_v7 = vld [vmem:[%s7322_s8 + $0x180] sm:$0xff]  ;;  %v1433_v9 = vld [vmem:[%s7322_s8 + $0x188] sm:$0xff]  ;;  %v1435_v49 = vld [vmem:[%s7322_s8 + $0x198] sm:$0xff] }
 0x3b3   :  { %v1373_v17 = vadd.f32 %v4154_v15, %v3748_v10  ;;  %v1436_v15 = vld [vmem:[%s7322_s8 + $0x1a0] sm:$0xff] }
 0x3b5   :  { %v4155_v33 = vpop.f32.mrb[4].mxu1  ;;  %v4813_v18 = vpack.c.bf16 %v1373_v17, %v1370_v16  ;;  %v1437_v16 = vld [vmem:[%s7322_s8 + $0x1a8] sm:$0xff]  ;;  %v1438_v17 = vld [vmem:[%s7322_s8 + $0x1b0] sm:$0xff] }
 0x3b6   :  { %v4156_v20 = vpop.f32.mrb[5].mxu1 }
 0x3b7   :  { %v4157_v42 = vadd.f32 %v4156_v20, %v4155_v33  ;;  %v4158_v6 = vpop.f32.mrb[6].mxu1  ;;  %4814 = vmatprep.subr.bf16.mxu1 %v4813_v18  ;;  %v1439_v33 = vld [vmem:[%s7322_s8 + $0x1b8] sm:$0xff]  ;;  %v1441_v20 = vld [vmem:[%s7322_s8 + $0x1c8] sm:$0xff] }
 0x3b8   :  { %v4159_v40 = vpop.f32.mrb[7].mxu1  ;;  %4816 = vmatpush3.bf16.msra.mxu1 %v4813_v18  ;;  %v1440_v18 = vld [vmem:[%s7322_s8 + $0x1c0] sm:$0xff] }
 0x3b9   :  { %v4160_v8 = vadd.f32 %v4159_v40, %v4158_v6  ;;  %v1378_v22 = vadd.f32 %v4157_v42, %v3748_v10  ;;  %v1442_v42 = vld [vmem:[%s7322_s8 + $0x1d0] sm:$0xff]  ;;  %v1443_v6 = vld [vmem:[%s7322_s8 + $0x1d8] sm:$0xff]  ;;  %v1444_v40 = vld [vmem:[%s7322_s8 + $0x1e0] sm:$0xff] }
 0x3bb   :  { %v1381_v23 = vadd.f32 %v4160_v8, %v3748_v10  ;;  %4426 = vmatmul.mubr.msk.f32.vlgmr.msra.gmra.mrb[8].mxu1 %vm1512_vm1, %v1385_v37  ;;  %v1434_v10 = vld [vmem:[%s7322_s8 + $0x190] sm:$0xff] }
 0x3bc   :  { %4428 = vmatprep.mubr.msk.f32.mxu1 %vm1512_vm1, %v1386_v38  ;;  %v1446_v8 = vld [vmem:[%s7322_s8 + $0x1f0] sm:$0xff] }
 0x3bd   :  { %v4817_v14 = vpack.c.bf16 %v1381_v23, %v1378_v22  ;;  %v1448_v22 = vld [vmem:[%s7322_s8 + $0x200] sm:$0xff]  ;;  %v1449_v23 = vld [vmem:[%s7322_s8 + $0x208] sm:$0xff] }
 0x3bf   :  { %4818 = vmatprep.subr.bf16.mxu0 %v4817_v14  ;;  %4821 = vmatprep.subr.bf16.mxu1 %v4817_v14 }
 0x3c0   :  { %4820 = vmatpush3.bf16.msra.mxu0 %v4817_v14  ;;  %4822 = vmatpush3.bf16.msra.mxu1 %v4817_v14  ;;  %v1450_v14 = vld [vmem:[%s7322_s8 + $0x210] sm:$0xff] }
 0x3c1   :  { %4429 = vmatmul.mubr.msk.f32.gmra.mrb[10].mxu1 %vm1512_vm1, %v1387_v35 }
 0x3c2   :  { %4431 = vmatprep.mubr.msk.f32.mxu1 %vm1512_vm1, %v1388_v30 }
 0x3c3   :  { %4622 = vmatmul.mubr.msk.f32.vlgmr.msra.gmra.mrb[8].mxu0 %vm1512_vm1, %v1385_v37  ;;  %v1445_v37 = vld [vmem:[%s7322_s8 + $0x1e8] sm:$0xff] }
 0x3c4   :  { %4624 = vmatprep.mubr.msk.f32.mxu0 %vm1512_vm1, %v1386_v38  ;;  %v1447_v38 = vld [vmem:[%s7322_s8 + $0x1f8] sm:$0xff] }
 0x3c5   :  { %4432 = vmatmul.mubr.msk.f32.gmra.mrb[12].mxu1 %vm1512_vm1, %v1389_v43 }
 0x3c6   :  { %4434 = vmatprep.mubr.msk.f32.mxu1 %vm1512_vm1, %v1390_v21 }
 0x3c7   :  { %4625 = vmatmul.mubr.msk.f32.gmra.mrb[10].mxu0 %vm1512_vm1, %v1387_v35  ;;  %v1451_v35 = vld [vmem:[%s7322_s8 + $0x218] sm:$0xff] }
 0x3c8   :  { %4627 = vmatprep.mubr.msk.f32.mxu0 %vm1512_vm1, %v1388_v30  ;;  %v1452_v30 = vld [vmem:[%s7322_s8 + $0x220] sm:$0xff] }
 0x3c9   :  { %4435 = vmatmul.mubr.msk.f32.gmra.mrb[14].mxu1 %vm1512_vm1, %v1391_v24 }
 0x3ca   :  { %4437 = vmatprep.mubr.msk.f32.mxu1 %vm1512_vm1, %v1392_v26 }
 0x3cb   :  { %4628 = vmatmul.mubr.msk.f32.gmra.mrb[12].mxu0 %vm1512_vm1, %v1389_v43  ;;  %v1453_v43 = vld [vmem:[%s7322_s8 + $0x228] sm:$0xff] }
 0x3cc   :  { %4630 = vmatprep.mubr.msk.f32.mxu0 %vm1512_vm1, %v1390_v21  ;;  %v1454_v21 = vld [vmem:[%s7322_s8 + $0x230] sm:$0xff] }
 0x3cd   :  { %4438 = vmatmul.mubr.msk.f32.gmra.mrb[16].mxu1 %vm1512_vm1, %v1393_v27 }
 0x3ce   :  { %4440 = vmatprep.mubr.msk.f32.mxu1 %vm1512_vm1, %v1394_v28 }
 0x3cf   :  { %4631 = vmatmul.mubr.msk.f32.gmra.mrb[14].mxu0 %vm1512_vm1, %v1391_v24  ;;  %v1455_v24 = vld [vmem:[%s7322_s8 + $0x238] sm:$0xff] }
 0x3d0   :  { %4633 = vmatprep.mubr.msk.f32.mxu0 %vm1512_vm1, %v1392_v26  ;;  %v1456_v26 = vld [vmem:[%s7322_s8 + $0x240] sm:$0xff] }
 0x3d1   :  { %4441 = vmatmul.mubr.msk.f32.gmra.mrb[18].mxu1 %vm1512_vm1, %v1395_v29 }
 0x3d2   :  { %4443 = vmatprep.mubr.msk.f32.mxu1 %vm1512_vm1, %v1396_v31 }
 0x3d3   :  { %4634 = vmatmul.mubr.msk.f32.gmra.mrb[16].mxu0 %vm1512_vm1, %v1393_v27  ;;  %v1457_v27 = vld [vmem:[%s7322_s8 + $0x248] sm:$0xff] }
 0x3d4   :  { %4636 = vmatprep.mubr.msk.f32.mxu0 %vm1512_vm1, %v1394_v28  ;;  %v1458_v28 = vld [vmem:[%s7322_s8 + $0x250] sm:$0xff] }
 0x3d5   :  { %4444 = vmatmul.mubr.msk.f32.gmra.mrb[20].mxu1 %vm1512_vm1, %v1397_v34 }
 0x3d6   :  { %4446 = vmatprep.mubr.msk.f32.mxu1 %vm1512_vm1, %v1398_v58 }
 0x3d7   :  { %4637 = vmatmul.mubr.msk.f32.gmra.mrb[18].mxu0 %vm1512_vm1, %v1395_v29  ;;  %v1459_v29 = vld [vmem:[%s7322_s8 + $0x258] sm:$0xff] }
 0x3d8   :  { %4639 = vmatprep.mubr.msk.f32.mxu0 %vm1512_vm1, %v1396_v31  ;;  %v1460_v31 = vld [vmem:[%s7322_s8 + $0x260] sm:$0xff] }
 0x3d9   :  { %4447 = vmatmul.mubr.msk.f32.gmra.mrb[22].mxu1 %vm1512_vm1, %v1399_v39 }
 0x3da   :  { %4449 = vmatprep.mubr.msk.f32.mxu1 %vm1512_vm1, %v1400_v56 }
 0x3db   :  { %4640 = vmatmul.mubr.msk.f32.gmra.mrb[20].mxu0 %vm1512_vm1, %v1397_v34  ;;  %v1461_v34 = vld [vmem:[%s7322_s8 + $0x268] sm:$0xff] }
 0x3dc   :  { %4642 = vmatprep.mubr.msk.f32.mxu0 %vm1512_vm1, %v1398_v58  ;;  %v1462_v58 = vld [vmem:[%s7322_s8 + $0x270] sm:$0xff] }
 0x3dd   :  { %4450 = vmatmul.mubr.msk.f32.gmra.mrb[24].mxu1 %vm1512_vm1, %v1401_v47 }
 0x3de   :  { %4452 = vmatprep.mubr.msk.f32.mxu1 %vm1512_vm1, %v1402_v45 }
 0x3df   :  { %4643 = vmatmul.mubr.msk.f32.gmra.mrb[22].mxu0 %vm1512_vm1, %v1399_v39  ;;  %v1463_v39 = vld [vmem:[%s7322_s8 + $0x278] sm:$0xff] }
 0x3e0   :  { %4645 = vmatprep.mubr.msk.f32.mxu0 %vm1512_vm1, %v1400_v56  ;;  %v1464_v56 = vld [vmem:[%s7322_s8 + $0x280] sm:$0xff] }
 0x3e1   :  { %4453 = vmatmul.mubr.msk.f32.gmra.mrb[26].mxu1 %vm1512_vm1, %v1403_v50 }
 0x3e2   :  { %4455 = vmatprep.mubr.msk.f32.mxu1 %vm1512_vm1, %v1404_v51 }
 0x3e3   :  { %4646 = vmatmul.mubr.msk.f32.gmra.mrb[24].mxu0 %vm1512_vm1, %v1401_v47  ;;  %v1465_v47 = vld [vmem:[%s7322_s8 + $0x288] sm:$0xff] }
 0x3e4   :  { %4648 = vmatprep.mubr.msk.f32.mxu0 %vm1512_vm1, %v1402_v45  ;;  %v1466_v45 = vld [vmem:[%s7322_s8 + $0x290] sm:$0xff] }
 0x3e5   :  { %4456 = vmatmul.mubr.msk.f32.gmra.mrb[28].mxu1 %vm1512_vm1, %v1405_v52 }
 0x3e6   :  { %4458 = vmatprep.mubr.msk.f32.mxu1 %vm1512_vm1, %v1406_v41 }
 0x3e7   :  { %4649 = vmatmul.mubr.msk.f32.gmra.mrb[26].mxu0 %vm1512_vm1, %v1403_v50  ;;  %v1467_v50 = vld [vmem:[%s7322_s8 + $0x298] sm:$0xff] }
 0x3e8   :  { %4651 = vmatprep.mubr.msk.f32.mxu0 %vm1512_vm1, %v1404_v51  ;;  %v1468_v51 = vld [vmem:[%s7322_s8 + $0x2a0] sm:$0xff] }
 0x3e9   :  { %4459 = vmatmul.mubr.msk.f32.gmra.mrb[30].mxu1 %vm1512_vm1, %v1407_v57 }
 0x3ea   :  { %4461 = vmatprep.mubr.msk.f32.mxu1 %vm1512_vm1, %v1408_v25 }
 0x3eb   :  { %4652 = vmatmul.mubr.msk.f32.gmra.mrb[28].mxu0 %vm1512_vm1, %v1405_v52  ;;  %v1469_v52 = vld [vmem:[%s7322_s8 + $0x2a8] sm:$0xff] }
 0x3ec   :  { %4654 = vmatprep.mubr.msk.f32.mxu0 %vm1512_vm1, %v1406_v41  ;;  %v1470_v41 = vld [vmem:[%s7322_s8 + $0x2b0] sm:$0xff] }
 0x3ed   :  { %4462 = vmatmul.mubr.msk.f32.gmra.mrb[32].mxu1 %vm1512_vm1, %v1409_v13 }
 0x3ee   :  { %4464 = vmatprep.mubr.msk.f32.mxu1 %vm1512_vm1, %v1410_v53 }
 0x3ef   :  { %4655 = vmatmul.mubr.msk.f32.gmra.mrb[30].mxu0 %vm1512_vm1, %v1407_v57  ;;  %v1471_v57 = vld [vmem:[%s7322_s8 + $0x2b8] sm:$0xff] }
 0x3f0   :  { %4657 = vmatprep.mubr.msk.f32.mxu0 %vm1512_vm1, %v1408_v25  ;;  %v1472_v25 = vld [vmem:[%s7322_s8 + $0x2c0] sm:$0xff] }
 0x3f1   :  { %4465 = vmatmul.mubr.msk.f32.gmra.mrb[34].mxu1 %vm1512_vm1, %v1411_v54 }
 0x3f2   :  { %4467 = vmatprep.mubr.msk.f32.mxu1 %vm1512_vm1, %v1412_v46 }
 0x3f3   :  { %4658 = vmatmul.mubr.msk.f32.gmra.mrb[32].mxu0 %vm1512_vm1, %v1409_v13  ;;  %v1473_v13 = vld [vmem:[%s7322_s8 + $0x2c8] sm:$0xff] }
 0x3f4   :  { %4660 = vmatprep.mubr.msk.f32.mxu0 %vm1512_vm1, %v1410_v53  ;;  %v1474_v53 = vld [vmem:[%s7322_s8 + $0x2d0] sm:$0xff] }
 0x3f5   :  { %4468 = vmatmul.mubr.msk.f32.gmra.mrb[36].mxu1 %vm1512_vm1, %v1413_v32 }
 0x3f6   :  { %4470 = vmatprep.mubr.msk.f32.mxu1 %vm1512_vm1, %v1414_v19 }
 0x3f7   :  { %4661 = vmatmul.mubr.msk.f32.gmra.mrb[34].mxu0 %vm1512_vm1, %v1411_v54  ;;  %v1475_v54 = vld [vmem:[%s7322_s8 + $0x2d8] sm:$0xff] }
 0x3f8   :  { %4663 = vmatprep.mubr.msk.f32.mxu0 %vm1512_vm1, %v1412_v46  ;;  %v1476_v46 = vld [vmem:[%s7322_s8 + $0x2e0] sm:$0xff] }
 0x3f9   :  { %4471 = vmatmul.mubr.msk.f32.gmra.mrb[38].mxu1 %vm1512_vm1, %v1415_v44 }
 0x3fa   :  { %4473 = vmatprep.mubr.msk.f32.mxu1 %vm1512_vm1, %v1416_v59 }
 0x3fb   :  { %4664 = vmatmul.mubr.msk.f32.gmra.mrb[36].mxu0 %vm1512_vm1, %v1413_v32  ;;  %v1477_v32 = vld [vmem:[%s7322_s8 + $0x2e8] sm:$0xff] }
 0x3fc   :  { %4666 = vmatprep.mubr.msk.f32.mxu0 %vm1512_vm1, %v1414_v19  ;;  %v1478_v19 = vld [vmem:[%s7322_s8 + $0x2f0] sm:$0xff] }
 0x3fd   :  { %4474 = vmatmul.mubr.msk.f32.gmra.mrb[40].mxu1 %vm1512_vm1, %v1417_v36 }
 0x3fe   :  { %4476 = vmatprep.mubr.msk.f32.mxu1 %vm1512_vm1, %v1418_v61 }
 0x3ff   :  { %4667 = vmatmul.mubr.msk.f32.gmra.mrb[38].mxu0 %vm1512_vm1, %v1415_v44  ;;  %v1479_v44 = vld [vmem:[%s7322_s8 + $0x2f8] sm:$0xff] }
 0x400   :  { %4669 = vmatprep.mubr.msk.f32.mxu0 %vm1512_vm1, %v1416_v59  ;;  %v1480_v59 = vld [vmem:[%s7322_s8 + $0x300] sm:$0xff] }
 0x401   :  { %4477 = vmatmul.mubr.msk.f32.gmra.mrb[42].mxu1 %vm1512_vm1, %v1419_v11 }
 0x402   :  { %4479 = vmatprep.mubr.msk.f32.mxu1 %vm1512_vm1, %v1420_v12 }
 0x403   :  { %4670 = vmatmul.mubr.msk.f32.gmra.mrb[40].mxu0 %vm1512_vm1, %v1417_v36  ;;  %v1481_v36 = vld [vmem:[%s7322_s8 + $0x308] sm:$0xff] }
 0x404   :  { %4672 = vmatprep.mubr.msk.f32.mxu0 %vm1512_vm1, %v1418_v61  ;;  %v1482_v61 = vld [vmem:[%s7322_s8 + $0x310] sm:$0xff] }
 0x405   :  { %4480 = vmatmul.mubr.msk.f32.gmra.mrb[44].mxu1 %vm1512_vm1, %v1421_v62 }
 0x406   :  { %4482 = vmatprep.mubr.msk.f32.mxu1 %vm1512_vm1, %v1422_v63 }
 0x407   :  { %4673 = vmatmul.mubr.msk.f32.gmra.mrb[42].mxu0 %vm1512_vm1, %v1419_v11  ;;  %v1483_v11 = vld [vmem:[%s7322_s8 + $0x318] sm:$0xff] }
 0x408   :  { %4675 = vmatprep.mubr.msk.f32.mxu0 %vm1512_vm1, %v1420_v12  ;;  %v6292_v12 = vld [vmem:[%s7322_s8 + $0x320] sm:$0xff] }
 0x409   :  { %4483 = vmatmul.mubr.msk.f32.gmra.mrb[46].mxu1 %vm1512_vm1, %v1423_v0 }
 0x40a   :  { %4485 = vmatprep.mubr.msk.f32.mxu1 %vm1512_vm1, %v1424_v1 }
 0x40b   :  { %4676 = vmatmul.mubr.msk.f32.gmra.mrb[44].mxu0 %vm1512_vm1, %v1421_v62  ;;  %v6302_v62 = vld [vmem:[%s7322_s8 + $0x328] sm:$0xff] }
 0x40c   :  { %4678 = vmatprep.mubr.msk.f32.mxu0 %vm1512_vm1, %v1422_v63  ;;  %v6307_v63 = vld [vmem:[%s7322_s8 + $0x330] sm:$0xff] }
 0x40d   :  { %4486 = vmatmul.mubr.msk.f32.gmra.mrb[48].mxu1 %vm1512_vm1, %v1425_v60 }
 0x40e   :  { %4488 = vmatprep.mubr.msk.f32.mxu1 %vm1512_vm1, %v1426_v2 }
 0x40f   :  { %4679 = vmatmul.mubr.msk.f32.gmra.mrb[46].mxu0 %vm1512_vm1, %v1423_v0  ;;  %v6318_v0 = vld [vmem:[%s7322_s8 + $0x338] sm:$0xff] }
 0x410   :  { %4681 = vmatprep.mubr.msk.f32.mxu0 %vm1512_vm1, %v1424_v1  ;;  %v6323_v1 = vld [vmem:[%s7322_s8 + $0x340] sm:$0xff] }
 0x411   :  { %4489 = vmatmul.mubr.msk.f32.gmra.mrb[50].mxu1 %vm1512_vm1, %v1427_v55 }
 0x412   :  { %4491 = vmatprep.mubr.msk.f32.mxu1 %vm1512_vm1, %v1428_v3 }
 0x413   :  { %4682 = vmatmul.mubr.msk.f32.gmra.mrb[48].mxu0 %vm1512_vm1, %v1425_v60  ;;  %v6333_v60 = vld [vmem:[%s7322_s8 + $0x348] sm:$0xff] }
 0x414   :  { %4684 = vmatprep.mubr.msk.f32.mxu0 %vm1512_vm1, %v1426_v2  ;;  %v6338_v2 = vld [vmem:[%s7322_s8 + $0x350] sm:$0xff] }
 0x415   :  { %4492 = vmatmul.mubr.msk.f32.gmra.mrb[52].mxu1 %vm1512_vm1, %v1429_v48 }
 0x416   :  { %4494 = vmatprep.mubr.msk.f32.mxu1 %vm1512_vm1, %v1430_v4 }
 0x417   :  { %4685 = vmatmul.mubr.msk.f32.gmra.mrb[50].mxu0 %vm1512_vm1, %v1427_v55 }
 0x418   :  { %4687 = vmatprep.mubr.msk.f32.mxu0 %vm1512_vm1, %v1428_v3  ;;  %v6347_v3 = vld [vmem:[%s7322_s8 + $0x358] sm:$0xff] }
 0x419   :  { %4495 = vmatmul.mubr.msk.f32.gmra.mrb[54].mxu1 %vm1512_vm1, %v1431_v5 }
 0x41a   :  { %4497 = vmatprep.mubr.msk.f32.mxu1 %vm1512_vm1, %v1432_v7 }
 0x41b   :  { %4688 = vmatmul.mubr.msk.f32.gmra.mrb[52].mxu0 %vm1512_vm1, %v1429_v48 }
 0x41c   :  { %4690 = vmatprep.mubr.msk.f32.mxu0 %vm1512_vm1, %v1430_v4  ;;  %v6355_v4 = vld [vmem:[%s7322_s8 + $0x360] sm:$0xff] }
 0x41d   :  { %4498 = vmatmul.mubr.msk.f32.gmra.mrb[56].mxu1 %vm1512_vm1, %v1433_v9 }
 0x41e   :  { %4500 = vmatprep.mubr.msk.f32.mxu1 %vm1512_vm1, %v1434_v10 }
 0x41f   :  { %4691 = vmatmul.mubr.msk.f32.gmra.mrb[54].mxu0 %vm1512_vm1, %v1431_v5  ;;  %v6367_v5 = vld [vmem:[%s7322_s8 + $0x368] sm:$0xff] }
 0x420   :  { %4693 = vmatprep.mubr.msk.f32.mxu0 %vm1512_vm1, %v1432_v7  ;;  %v6372_v7 = vld [vmem:[%s7322_s8 + $0x370] sm:$0xff] }
 0x421   :  { %4501 = vmatmul.mubr.msk.f32.gmra.mrb[58].mxu1 %vm1512_vm1, %v1435_v49 }
 0x422   :  { %4503 = vmatprep.mubr.msk.f32.mxu1 %vm1512_vm1, %v1436_v15 }
 0x423   :  { %4694 = vmatmul.mubr.msk.f32.gmra.mrb[56].mxu0 %vm1512_vm1, %v1433_v9 }
 0x424   :  { %4696 = vmatprep.mubr.msk.f32.mxu0 %vm1512_vm1, %v1434_v10 }
 0x425   :  { %4504 = vmatmul.mubr.msk.f32.gmra.mrb[60].mxu1 %vm1512_vm1, %v1437_v16 }
 0x426   :  { %4506 = vmatprep.mubr.msk.f32.mxu1 %vm1512_vm1, %v1438_v17 }
 0x427   :  { %4697 = vmatmul.mubr.msk.f32.gmra.mrb[58].mxu0 %vm1512_vm1, %v1435_v49  ;;  %v6387_v49 = vld [vmem:[%s7322_s8 + $0x378] sm:$0xff] }
 0x428   :  { %4699 = vmatprep.mubr.msk.f32.mxu0 %vm1512_vm1, %v1436_v15 }
 0x429   :  { %4507 = vmatmul.mubr.msk.f32.gmra.mrb[62].mxu1 %vm1512_vm1, %v1439_v33 }
 0x42a   :  { %4509 = vmatprep.mubr.msk.f32.mxu1 %vm1512_vm1, %v1440_v18 }
 0x42b   :  { %4700 = vmatmul.mubr.msk.f32.gmra.mrb[60].mxu0 %vm1512_vm1, %v1437_v16  ;;  %v6392_v16 = vld [vmem:[%s7322_s8 + $0x380] sm:$0xff] }
 0x42c   :  { %4702 = vmatprep.mubr.msk.f32.mxu0 %vm1512_vm1, %v1438_v17 }
 0x42d   :  { %4510 = vmatmul.mubr.msk.f32.gmra.mrb[64].mxu1 %vm1512_vm1, %v1441_v20 }
 0x42e   :  { %4512 = vmatprep.mubr.msk.f32.mxu1 %vm1512_vm1, %v1442_v42 }
 0x42f   :  { %4703 = vmatmul.mubr.msk.f32.gmra.mrb[62].mxu0 %vm1512_vm1, %v1439_v33 }
 0x430   :  { %4705 = vmatprep.mubr.msk.f32.mxu0 %vm1512_vm1, %v1440_v18 }
 0x431   :  { %4513 = vmatmul.mubr.msk.f32.gmra.mrb[66].mxu1 %vm1512_vm1, %v1443_v6 }
 0x432   :  { %4515 = vmatprep.mubr.msk.f32.mxu1 %vm1512_vm1, %v1444_v40 }
 0x433   :  { %4706 = vmatmul.mubr.msk.f32.gmra.mrb[64].mxu0 %vm1512_vm1, %v1441_v20  ;;  %v6413_v20 = vld [vmem:[%s7322_s8 + $0x388] sm:$0xff] }
 0x434   :  { %4708 = vmatprep.mubr.msk.f32.mxu0 %vm1512_vm1, %v1442_v42 }
 0x435   :  { %4516 = vmatmul.mubr.msk.f32.gmra.mrb[68].mxu1 %vm1512_vm1, %v1445_v37 }
 0x436   :  { %4518 = vmatprep.mubr.msk.f32.mxu1 %vm1512_vm1, %v1446_v8 }
 0x437   :  { %4709 = vmatmul.mubr.msk.f32.gmra.mrb[66].mxu0 %vm1512_vm1, %v1443_v6  ;;  %v6418_v6 = vld [vmem:[%s7322_s8 + $0x390] sm:$0xff] }
 0x438   :  { %4711 = vmatprep.mubr.msk.f32.mxu0 %vm1512_vm1, %v1444_v40 }
 0x439   :  { %4519 = vmatmul.mubr.msk.f32.gmra.mrb[70].mxu1 %vm1512_vm1, %v1447_v38 }
 0x43a   :  { %4521 = vmatprep.mubr.msk.f32.mxu1 %vm1512_vm1, %v1448_v22 }
 0x43b   :  { %4712 = vmatmul.mubr.msk.f32.gmra.mrb[68].mxu0 %vm1512_vm1, %v1445_v37 }
 0x43c   :  { %4714 = vmatprep.mubr.msk.f32.mxu0 %vm1512_vm1, %v1446_v8 }
 0x43d   :  { %4522 = vmatmul.mubr.msk.f32.gmra.mrb[72].mxu1 %vm1512_vm1, %v1449_v23 }
 0x43e   :  { %4524 = vmatprep.mubr.msk.f32.mxu1 %vm1512_vm1, %v1450_v14 }
 0x43f   :  { %4715 = vmatmul.mubr.msk.f32.gmra.mrb[70].mxu0 %vm1512_vm1, %v1447_v38  ;;  %v6439_v38 = vld [vmem:[%s7322_s8 + $0x398] sm:$0xff] }
 0x440   :  { %4717 = vmatprep.mubr.msk.f32.mxu0 %vm1512_vm1, %v1448_v22 }
 0x441   :  { %4525 = vmatmul.mubr.msk.f32.gmra.mrb[74].mxu1 %vm1512_vm1, %v1451_v35 }
 0x442   :  { %4527 = vmatprep.mubr.msk.f32.mxu1 %vm1512_vm1, %v1452_v30 }
 0x443   :  { %4718 = vmatmul.mubr.msk.f32.gmra.mrb[72].mxu0 %vm1512_vm1, %v1449_v23  ;;  %v6444_v23 = vld [vmem:[%s7322_s8 + $0x3a0] sm:$0xff] }
 0x444   :  { %4720 = vmatprep.mubr.msk.f32.mxu0 %vm1512_vm1, %v1450_v14 }
 0x445   :  { %4528 = vmatmul.mubr.msk.f32.gmra.mrb[76].mxu1 %vm1512_vm1, %v1453_v43 }
 0x446   :  { %4530 = vmatprep.mubr.msk.f32.mxu1 %vm1512_vm1, %v1454_v21 }
 0x447   :  { %4721 = vmatmul.mubr.msk.f32.gmra.mrb[74].mxu0 %vm1512_vm1, %v1451_v35 }
 0x448   :  { %4723 = vmatprep.mubr.msk.f32.mxu0 %vm1512_vm1, %v1452_v30 }
 0x449   :  { %4531 = vmatmul.mubr.msk.f32.gmra.mrb[78].mxu1 %vm1512_vm1, %v1455_v24 }
 0x44a   :  { %4533 = vmatprep.mubr.msk.f32.mxu1 %vm1512_vm1, %v1456_v26 }
 0x44b   :  { %4724 = vmatmul.mubr.msk.f32.gmra.mrb[76].mxu0 %vm1512_vm1, %v1453_v43  ;;  %v6465_v43 = vld [vmem:[%s7322_s8 + $0x3a8] sm:$0xff] }
 0x44c   :  { %4726 = vmatprep.mubr.msk.f32.mxu0 %vm1512_vm1, %v1454_v21 }
 0x44d   :  { %4534 = vmatmul.mubr.msk.f32.gmra.mrb[80].mxu1 %vm1512_vm1, %v1457_v27 }
 0x44e   :  { %4536 = vmatprep.mubr.msk.f32.mxu1 %vm1512_vm1, %v1458_v28 }
 0x44f   :  { %4727 = vmatmul.mubr.msk.f32.gmra.mrb[78].mxu0 %vm1512_vm1, %v1455_v24  ;;  %v6470_v24 = vld [vmem:[%s7322_s8 + $0x3b0] sm:$0xff] }
 0x450   :  { %4729 = vmatprep.mubr.msk.f32.mxu0 %vm1512_vm1, %v1456_v26 }
 0x451   :  { %4537 = vmatmul.mubr.msk.f32.gmra.mrb[82].mxu1 %vm1512_vm1, %v1459_v29 }
 0x452   :  { %4539 = vmatprep.mubr.msk.f32.mxu1 %vm1512_vm1, %v1460_v31 }
 0x453   :  { %4730 = vmatmul.mubr.msk.f32.gmra.mrb[80].mxu0 %vm1512_vm1, %v1457_v27 }
 0x454   :  { %4732 = vmatprep.mubr.msk.f32.mxu0 %vm1512_vm1, %v1458_v28 }
 0x455   :  { %4540 = vmatmul.mubr.msk.f32.gmra.mrb[84].mxu1 %vm1512_vm1, %v1461_v34 }
 0x456   :  { %4542 = vmatprep.mubr.msk.f32.mxu1 %vm1512_vm1, %v1462_v58 }
 0x457   :  { %4733 = vmatmul.mubr.msk.f32.gmra.mrb[82].mxu0 %vm1512_vm1, %v1459_v29  ;;  %v6491_v29 = vld [vmem:[%s7322_s8 + $0x3b8] sm:$0xff] }
 0x458   :  { %4735 = vmatprep.mubr.msk.f32.mxu0 %vm1512_vm1, %v1460_v31 }
 0x459   :  { %4543 = vmatmul.mubr.msk.f32.gmra.mrb[86].mxu1 %vm1512_vm1, %v1463_v39 }
 0x45a   :  { %4545 = vmatprep.mubr.msk.f32.mxu1 %vm1512_vm1, %v1464_v56 }
 0x45b   :  { %4736 = vmatmul.mubr.msk.f32.gmra.mrb[84].mxu0 %vm1512_vm1, %v1461_v34  ;;  %v6496_v34 = vld [vmem:[%s7322_s8 + $0x3c0] sm:$0xff] }
 0x45c   :  { %4738 = vmatprep.mubr.msk.f32.mxu0 %vm1512_vm1, %v1462_v58 }
 0x45d   :  { %4546 = vmatmul.mubr.msk.f32.gmra.mrb[88].mxu1 %vm1512_vm1, %v1465_v47 }
 0x45e   :  { %4548 = vmatprep.mubr.msk.f32.mxu1 %vm1512_vm1, %v1466_v45 }
 0x45f   :  { %4739 = vmatmul.mubr.msk.f32.gmra.mrb[86].mxu0 %vm1512_vm1, %v1463_v39 }
 0x460   :  { %4741 = vmatprep.mubr.msk.f32.mxu0 %vm1512_vm1, %v1464_v56 }
 0x461   :  { %4549 = vmatmul.mubr.msk.f32.gmra.mrb[90].mxu1 %vm1512_vm1, %v1467_v50 }
 0x462   :  { %4551 = vmatprep.mubr.msk.f32.mxu1 %vm1512_vm1, %v1468_v51 }
 0x463   :  { %4742 = vmatmul.mubr.msk.f32.gmra.mrb[88].mxu0 %vm1512_vm1, %v1465_v47  ;;  %v6517_v47 = vld [vmem:[%s7322_s8 + $0x3c8] sm:$0xff] }
 0x464   :  { %4744 = vmatprep.mubr.msk.f32.mxu0 %vm1512_vm1, %v1466_v45 }
 0x465   :  { %4552 = vmatmul.mubr.msk.f32.gmra.mrb[92].mxu1 %vm1512_vm1, %v1469_v52 }
 0x466   :  { %4554 = vmatprep.mubr.msk.f32.mxu1 %vm1512_vm1, %v1470_v41 }
 0x467   :  { %4745 = vmatmul.mubr.msk.f32.gmra.mrb[90].mxu0 %vm1512_vm1, %v1467_v50  ;;  %v6522_v50 = vld [vmem:[%s7322_s8 + $0x3d0] sm:$0xff] }
 0x468   :  { %4747 = vmatprep.mubr.msk.f32.mxu0 %vm1512_vm1, %v1468_v51 }
 0x469   :  { %4555 = vmatmul.mubr.msk.f32.gmra.mrb[94].mxu1 %vm1512_vm1, %v1471_v57 }
 0x46a   :  { %4557 = vmatprep.mubr.msk.f32.mxu1 %vm1512_vm1, %v1472_v25 }
 0x46b   :  { %4748 = vmatmul.mubr.msk.f32.gmra.mrb[92].mxu0 %vm1512_vm1, %v1469_v52 }
 0x46c   :  { %4750 = vmatprep.mubr.msk.f32.mxu0 %vm1512_vm1, %v1470_v41 }
 0x46d   :  { %4558 = vmatmul.mubr.msk.f32.gmra.mrb[96].mxu1 %vm1512_vm1, %v1473_v13 }
 0x46e   :  { %4560 = vmatprep.mubr.msk.f32.mxu1 %vm1512_vm1, %v1474_v53 }
 0x46f   :  { %4751 = vmatmul.mubr.msk.f32.gmra.mrb[94].mxu0 %vm1512_vm1, %v1471_v57  ;;  %v6543_v57 = vld [vmem:[%s7322_s8 + $0x3d8] sm:$0xff] }
 0x470   :  { %4753 = vmatprep.mubr.msk.f32.mxu0 %vm1512_vm1, %v1472_v25 }
 0x471   :  { %4561 = vmatmul.mubr.msk.f32.gmra.mrb[98].mxu1 %vm1512_vm1, %v1475_v54 }
 0x472   :  { %4563 = vmatprep.mubr.msk.f32.mxu1 %vm1512_vm1, %v1476_v46 }
 0x473   :  { %4754 = vmatmul.mubr.msk.f32.gmra.mrb[96].mxu0 %vm1512_vm1, %v1473_v13  ;;  %v6548_v13 = vld [vmem:[%s7322_s8 + $0x3e0] sm:$0xff] }
 0x474   :  { %4756 = vmatprep.mubr.msk.f32.mxu0 %vm1512_vm1, %v1474_v53 }
 0x475   :  { %4564 = vmatmul.mubr.msk.f32.gmra.mrb[100].mxu1 %vm1512_vm1, %v1477_v32 }
 0x476   :  { %4566 = vmatprep.mubr.msk.f32.mxu1 %vm1512_vm1, %v1478_v19 }
 0x477   :  { %4757 = vmatmul.mubr.msk.f32.gmra.mrb[98].mxu0 %vm1512_vm1, %v1475_v54 }
 0x478   :  { %4759 = vmatprep.mubr.msk.f32.mxu0 %vm1512_vm1, %v1476_v46 }
 0x479   :  { %4567 = vmatmul.mubr.msk.f32.gmra.mrb[102].mxu1 %vm1512_vm1, %v1479_v44 }
 0x47a   :  { %4569 = vmatprep.mubr.msk.f32.mxu1 %vm1512_vm1, %v1480_v59 }
 0x47b   :  { %4760 = vmatmul.mubr.msk.f32.gmra.mrb[100].mxu0 %vm1512_vm1, %v1477_v32  ;;  %v6569_v32 = vld [vmem:[%s7322_s8 + $0x3e8] sm:$0xff] }
 0x47c   :  { %4762 = vmatprep.mubr.msk.f32.mxu0 %vm1512_vm1, %v1478_v19 }
 0x47d   :  { %4570 = vmatmul.mubr.msk.f32.gmra.mrb[104].mxu1 %vm1512_vm1, %v1481_v36 }
 0x47e   :  { %4572 = vmatprep.mubr.msk.f32.mxu1 %vm1512_vm1, %v1482_v61 }
 0x47f   :  { %4763 = vmatmul.mubr.msk.f32.gmra.mrb[102].mxu0 %vm1512_vm1, %v1479_v44  ;;  %v6574_v44 = vld [vmem:[%s7322_s8 + $0x3f0] sm:$0xff] }
 0x480   :  { %4765 = vmatprep.mubr.msk.f32.mxu0 %vm1512_vm1, %v1480_v59 }
 0x481   :  { %4573 = vmatmul.mubr.msk.f32.gmra.mrb[106].mxu1 %vm1512_vm1, %v1483_v11 }
 0x482   :  { %4575 = vmatprep.mubr.msk.f32.mxu1 %vm1512_vm1, %v6292_v12 }
 0x483   :  { %4766 = vmatmul.mubr.msk.f32.gmra.mrb[104].mxu0 %vm1512_vm1, %v1481_v36 }
 0x484   :  { %4768 = vmatprep.mubr.msk.f32.mxu0 %vm1512_vm1, %v1482_v61 }
 0x485   :  { %4576 = vmatmul.mubr.msk.f32.gmra.mrb[108].mxu1 %vm1512_vm1, %v6302_v62 }
 0x486   :  { %4578 = vmatprep.mubr.msk.f32.mxu1 %vm1512_vm1, %v6307_v63 }
 0x487   :  { %4769 = vmatmul.mubr.msk.f32.gmra.mrb[106].mxu0 %vm1512_vm1, %v1483_v11  ;;  %v6595_v11 = vld [vmem:[%s7322_s8 + $0x3f8] sm:$0xff] }
 0x489   :  { %4579 = vmatmul.mubr.msk.f32.gmra.mrb[110].mxu1 %vm1512_vm1, %v6318_v0 }
 0x48a   :  { %4581 = vmatprep.mubr.msk.f32.mxu1 %vm1512_vm1, %v6323_v1 }
 0x48d   :  { %4582 = vmatmul.mubr.msk.f32.gmra.mrb[112].mxu1 %vm1512_vm1, %v6333_v60 }
 0x48e   :  { %v4427_v55 = vpop.f32.mrb[8].mxu1  ;;  %4584 = vmatprep.mubr.msk.f32.mxu1 %vm1512_vm1, %v6338_v2 }
 0x48f   :  { %2603 = vst [vmem:[%s7324_s9 + $0x8] sm:$0xff] %v4427_v55  ;;  %v1963_v48 = vpop.f32.mrb[9].mxu1 }
 0x490   :  { %2602 = vst [vmem:[%s7324_s9] sm:$0xff] %v1963_v48 }
 0x491   :  { %4585 = vmatmul.mubr.msk.f32.gmra.mrb[114].mxu1 %vm1512_vm1, %v6347_v3 }
 0x492   :  { %4587 = vmatprep.mubr.msk.f32.mxu1 %vm1512_vm1, %v6355_v4 }
 0x494   :  { %v4430_v9 = vpop.f32.mrb[10].mxu1 }
 0x495   :  { %2605 = vst [vmem:[%s7324_s9 + $0x18] sm:$0xff] %v4430_v9  ;;  %v1973_v10 = vpop.f32.mrb[11].mxu1  ;;  %4588 = vmatmul.mubr.msk.f32.gmra.mrb[116].mxu1 %vm1512_vm1, %v6367_v5 }
 0x496   :  { %2604 = vst [vmem:[%s7324_s9 + $0x10] sm:$0xff] %v1973_v10  ;;  %4590 = vmatprep.mubr.msk.f32.mxu1 %vm1512_vm1, %v6372_v7  ;;  %v4623_v15 = vpop.f32.mrb[8].mxu0 }
 0x497   :  { %4006 = vst [vmem:[%s7324_s9 + $0x408] sm:$0xff] %v4623_v15  ;;  %v2796_v17 = vpop.f32.mrb[9].mxu0 }
 0x498   :  { %v4433_v33 = vpop.f32.mrb[12].mxu1  ;;  %4005 = vst [vmem:[%s7324_s9 + $0x400] sm:$0xff] %v2796_v17 }
 0x499   :  { %2607 = vst [vmem:[%s7324_s9 + $0x28] sm:$0xff] %v4433_v33  ;;  %v1983_v18 = vpop.f32.mrb[13].mxu1  ;;  %4591 = vmatmul.mubr.msk.f32.gmra.mrb[118].mxu1 %vm1512_vm1, %v6387_v49 }
 0x49a   :  { %2606 = vst [vmem:[%s7324_s9 + $0x20] sm:$0xff] %v1983_v18  ;;  %4593 = vmatprep.mubr.msk.f32.mxu1 %vm1512_vm1, %v6392_v16  ;;  %v4626_v42 = vpop.f32.mrb[10].mxu0 }
 0x49b   :  { %4008 = vst [vmem:[%s7324_s9 + $0x418] sm:$0xff] %v4626_v42  ;;  %v2806_v40 = vpop.f32.mrb[11].mxu0 }
 0x49c   :  { %v4436_v37 = vpop.f32.mrb[14].mxu1  ;;  %4007 = vst [vmem:[%s7324_s9 + $0x410] sm:$0xff] %v2806_v40 }
 0x49d   :  { %2609 = vst [vmem:[%s7324_s9 + $0x38] sm:$0xff] %v4436_v37  ;;  %v1993_v8 = vpop.f32.mrb[15].mxu1  ;;  %4594 = vmatmul.mubr.msk.f32.gmra.mrb[120].mxu1 %vm1512_vm1, %v6413_v20 }
 0x49e   :  { %2608 = vst [vmem:[%s7324_s9 + $0x30] sm:$0xff] %v1993_v8  ;;  %4596 = vmatprep.mubr.msk.f32.mxu1 %vm1512_vm1, %v6418_v6  ;;  %v4629_v22 = vpop.f32.mrb[12].mxu0 }
 0x49f   :  { %4010 = vst [vmem:[%s7324_s9 + $0x428] sm:$0xff] %v4629_v22  ;;  %v2816_v14 = vpop.f32.mrb[13].mxu0 }
 0x4a0   :  { %v4439_v35 = vpop.f32.mrb[16].mxu1  ;;  %4009 = vst [vmem:[%s7324_s9 + $0x420] sm:$0xff] %v2816_v14 }
 0x4a1   :  { %2611 = vst [vmem:[%s7324_s9 + $0x48] sm:$0xff] %v4439_v35  ;;  %v2003_v30 = vpop.f32.mrb[17].mxu1  ;;  %4597 = vmatmul.mubr.msk.f32.gmra.mrb[122].mxu1 %vm1512_vm1, %v6439_v38 }
 0x4a2   :  { %2610 = vst [vmem:[%s7324_s9 + $0x40] sm:$0xff] %v2003_v30  ;;  %4599 = vmatprep.mubr.msk.f32.mxu1 %vm1512_vm1, %v6444_v23  ;;  %v4632_v21 = vpop.f32.mrb[14].mxu0 }
 0x4a3   :  { %4012 = vst [vmem:[%s7324_s9 + $0x438] sm:$0xff] %v4632_v21  ;;  %v2826_v26 = vpop.f32.mrb[15].mxu0 }
 0x4a4   :  { %v4442_v27 = vpop.f32.mrb[18].mxu1  ;;  %4011 = vst [vmem:[%s7324_s9 + $0x430] sm:$0xff] %v2826_v26 }
 0x4a5   :  { %2613 = vst [vmem:[%s7324_s9 + $0x58] sm:$0xff] %v4442_v27  ;;  %v2013_v28 = vpop.f32.mrb[19].mxu1  ;;  %4600 = vmatmul.mubr.msk.f32.gmra.mrb[124].mxu1 %vm1512_vm1, %v6465_v43 }
 0x4a6   :  { %2612 = vst [vmem:[%s7324_s9 + $0x50] sm:$0xff] %v2013_v28  ;;  %4602 = vmatprep.mubr.msk.f32.mxu1 %vm1512_vm1, %v6470_v24  ;;  %v4635_v31 = vpop.f32.mrb[16].mxu0 }
 0x4a7   :  { %4014 = vst [vmem:[%s7324_s9 + $0x448] sm:$0xff] %v4635_v31  ;;  %v2836_v58 = vpop.f32.mrb[17].mxu0 }
 0x4a8   :  { %v4445_v39 = vpop.f32.mrb[20].mxu1  ;;  %4013 = vst [vmem:[%s7324_s9 + $0x440] sm:$0xff] %v2836_v58 }
 0x4a9   :  { %2615 = vst [vmem:[%s7324_s9 + $0x68] sm:$0xff] %v4445_v39  ;;  %v2023_v56 = vpop.f32.mrb[21].mxu1  ;;  %4603 = vmatmul.mubr.msk.f32.gmra.mrb[126].mxu1 %vm1512_vm1, %v6491_v29 }
 0x4aa   :  { %2614 = vst [vmem:[%s7324_s9 + $0x60] sm:$0xff] %v2023_v56  ;;  %4605 = vmatprep.mubr.msk.f32.mxu1 %vm1512_vm1, %v6496_v34  ;;  %v4638_v45 = vpop.f32.mrb[18].mxu0 }
 0x4ab   :  { %4016 = vst [vmem:[%s7324_s9 + $0x458] sm:$0xff] %v4638_v45  ;;  %v2846_v51 = vpop.f32.mrb[19].mxu0 }
 0x4ac   :  { %v4448_v52 = vpop.f32.mrb[22].mxu1  ;;  %4015 = vst [vmem:[%s7324_s9 + $0x450] sm:$0xff] %v2846_v51 }
 0x4ad   :  { %2617 = vst [vmem:[%s7324_s9 + $0x78] sm:$0xff] %v4448_v52  ;;  %v2033_v41 = vpop.f32.mrb[23].mxu1  ;;  %4606 = vmatmul.mubr.msk.f32.gmra.mrb[128].mxu1 %vm1512_vm1, %v6517_v47 }
 0x4ae   :  { %2616 = vst [vmem:[%s7324_s9 + $0x70] sm:$0xff] %v2033_v41  ;;  %4608 = vmatprep.mubr.msk.f32.mxu1 %vm1512_vm1, %v6522_v50  ;;  %v4641_v25 = vpop.f32.mrb[20].mxu0 }
 0x4af   :  { %4018 = vst [vmem:[%s7324_s9 + $0x468] sm:$0xff] %v4641_v25  ;;  %v2856_v53 = vpop.f32.mrb[21].mxu0 }
 0x4b0   :  { %v4451_v54 = vpop.f32.mrb[24].mxu1  ;;  %4017 = vst [vmem:[%s7324_s9 + $0x460] sm:$0xff] %v2856_v53 }
 0x4b1   :  { %2619 = vst [vmem:[%s7324_s9 + $0x88] sm:$0xff] %v4451_v54  ;;  %v2043_v46 = vpop.f32.mrb[25].mxu1  ;;  %4609 = vmatmul.mubr.msk.f32.gmra.mrb[130].mxu1 %vm1512_vm1, %v6543_v57 }
 0x4b2   :  { %2618 = vst [vmem:[%s7324_s9 + $0x80] sm:$0xff] %v2043_v46  ;;  %4611 = vmatprep.mubr.msk.f32.mxu1 %vm1512_vm1, %v6548_v13  ;;  %v4644_v19 = vpop.f32.mrb[22].mxu0 }
 0x4b3   :  { %4020 = vst [vmem:[%s7324_s9 + $0x478] sm:$0xff] %v4644_v19  ;;  %v2866_v59 = vpop.f32.mrb[23].mxu0 }
 0x4b4   :  { %v4454_v36 = vpop.f32.mrb[26].mxu1  ;;  %4019 = vst [vmem:[%s7324_s9 + $0x470] sm:$0xff] %v2866_v59 }
 0x4b5   :  { %2621 = vst [vmem:[%s7324_s9 + $0x98] sm:$0xff] %v4454_v36  ;;  %v2053_v61 = vpop.f32.mrb[27].mxu1  ;;  %4612 = vmatmul.mubr.msk.f32.gmra.mrb[132].mxu1 %vm1512_vm1, %v6569_v32 }
 0x4b6   :  { %2620 = vst [vmem:[%s7324_s9 + $0x90] sm:$0xff] %v2053_v61  ;;  %4614 = vmatprep.mubr.msk.f32.mxu1 %vm1512_vm1, %v6574_v44  ;;  %v4647_v55 = vpop.f32.mrb[24].mxu0 }
 0x4b7   :  { %4022 = vst [vmem:[%s7324_s9 + $0x488] sm:$0xff] %v4647_v55  ;;  %v2876_v48 = vpop.f32.mrb[25].mxu0 }
 0x4b8   :  { %v4457_v9 = vpop.f32.mrb[28].mxu1  ;;  %4021 = vst [vmem:[%s7324_s9 + $0x480] sm:$0xff] %v2876_v48 }
 0x4b9   :  { %2623 = vst [vmem:[%s7324_s9 + $0xa8] sm:$0xff] %v4457_v9  ;;  %v2063_v10 = vpop.f32.mrb[29].mxu1  ;;  %4615 = vmatmul.mubr.msk.f32.gmra.mrb[134].mxu1 %vm1512_vm1, %v6595_v11 }
 0x4ba   :  { %2622 = vst [vmem:[%s7324_s9 + $0xa0] sm:$0xff] %v2063_v10  ;;  %4771 = vmatprep.mubr.msk.f32.mxu1 %vm1512_vm1, %v6292_v12  ;;  %v4650_v15 = vpop.f32.mrb[26].mxu0 }
 0x4bb   :  { %4024 = vst [vmem:[%s7324_s9 + $0x498] sm:$0xff] %v4650_v15  ;;  %v2886_v17 = vpop.f32.mrb[27].mxu0 }
 0x4bc   :  { %v4460_v33 = vpop.f32.mrb[30].mxu1  ;;  %4023 = vst [vmem:[%s7324_s9 + $0x490] sm:$0xff] %v2886_v17 }
 0x4bd   :  { %2625 = vst [vmem:[%s7324_s9 + $0xb8] sm:$0xff] %v4460_v33  ;;  %v2073_v18 = vpop.f32.mrb[31].mxu1  ;;  %4772 = vmatmul.mubr.msk.f32.vlgmr.msra.gmra.mrb[136].mxu1 %vm1512_vm1, %v6302_v62 }
 0x4be   :  { %2624 = vst [vmem:[%s7324_s9 + $0xb0] sm:$0xff] %v2073_v18  ;;  %4774 = vmatprep.mubr.msk.f32.mxu1 %vm1512_vm1, %v6307_v63  ;;  %v4653_v12 = vpop.f32.mrb[28].mxu0 }
 0x4bf   :  { %4026 = vst [vmem:[%s7324_s9 + $0x4a8] sm:$0xff] %v4653_v12  ;;  %v2896_v42 = vpop.f32.mrb[29].mxu0 }
 0x4c0   :  { %v4463_v40 = vpop.f32.mrb[32].mxu1  ;;  %4025 = vst [vmem:[%s7324_s9 + $0x4a0] sm:$0xff] %v2896_v42 }
 0x4c1   :  { %2627 = vst [vmem:[%s7324_s9 + $0xc8] sm:$0xff] %v4463_v40  ;;  %v2083_v62 = vpop.f32.mrb[33].mxu1  ;;  %4775 = vmatmul.mubr.msk.f32.gmra.mrb[138].mxu1 %vm1512_vm1, %v6318_v0 }
 0x4c2   :  { %2626 = vst [vmem:[%s7324_s9 + $0xc0] sm:$0xff] %v2083_v62  ;;  %4777 = vmatprep.mubr.msk.f32.mxu1 %vm1512_vm1, %v6323_v1  ;;  %v4656_v63 = vpop.f32.mrb[30].mxu0 }
 0x4c3   :  { %4028 = vst [vmem:[%s7324_s9 + $0x4b8] sm:$0xff] %v4656_v63  ;;  %v2906_v37 = vpop.f32.mrb[31].mxu0 }
 0x4c4   :  { %v4466_v8 = vpop.f32.mrb[34].mxu1  ;;  %4027 = vst [vmem:[%s7324_s9 + $0x4b0] sm:$0xff] %v2906_v37 }
 0x4c5   :  { %2629 = vst [vmem:[%s7324_s9 + $0xd8] sm:$0xff] %v4466_v8  ;;  %v2093_v0 = vpop.f32.mrb[35].mxu1  ;;  %4778 = vmatmul.mubr.msk.f32.gmra.mrb[140].mxu1 %vm1512_vm1, %v6333_v60 }
 0x4c6   :  { %2628 = vst [vmem:[%s7324_s9 + $0xd0] sm:$0xff] %v2093_v0  ;;  %4780 = vmatprep.mubr.msk.f32.mxu1 %vm1512_vm1, %v6338_v2  ;;  %v4659_v1 = vpop.f32.mrb[32].mxu0 }
 0x4c7   :  { %4030 = vst [vmem:[%s7324_s9 + $0x4c8] sm:$0xff] %v4659_v1  ;;  %v2916_v22 = vpop.f32.mrb[33].mxu0 }
 0x4c8   :  { %v4469_v14 = vpop.f32.mrb[36].mxu1  ;;  %4029 = vst [vmem:[%s7324_s9 + $0x4c0] sm:$0xff] %v2916_v22 }
 0x4c9   :  { %2631 = vst [vmem:[%s7324_s9 + $0xe8] sm:$0xff] %v4469_v14  ;;  %v2103_v60 = vpop.f32.mrb[37].mxu1  ;;  %4781 = vmatmul.mubr.msk.f32.gmra.mrb[142].mxu1 %vm1512_vm1, %v6347_v3 }
 0x4ca   :  { %2630 = vst [vmem:[%s7324_s9 + $0xe0] sm:$0xff] %v2103_v60  ;;  %4783 = vmatprep.mubr.msk.f32.mxu1 %vm1512_vm1, %v6355_v4  ;;  %v4662_v2 = vpop.f32.mrb[34].mxu0 }
 0x4cb   :  { %4032 = vst [vmem:[%s7324_s9 + $0x4d8] sm:$0xff] %v4662_v2  ;;  %v2926_v35 = vpop.f32.mrb[35].mxu0 }
 0x4cc   :  { %v4472_v30 = vpop.f32.mrb[38].mxu1  ;;  %4031 = vst [vmem:[%s7324_s9 + $0x4d0] sm:$0xff] %v2926_v35 }
 0x4cd   :  { %2633 = vst [vmem:[%s7324_s9 + $0xf8] sm:$0xff] %v4472_v30  ;;  %v2113_v3 = vpop.f32.mrb[39].mxu1  ;;  %4784 = vmatmul.mubr.msk.f32.gmra.mrb[144].mxu1 %vm1512_vm1, %v6367_v5 }
 0x4ce   :  { %2632 = vst [vmem:[%s7324_s9 + $0xf0] sm:$0xff] %v2113_v3  ;;  %4786 = vmatprep.mubr.msk.f32.mxu1 %vm1512_vm1, %v6372_v7  ;;  %v4665_v4 = vpop.f32.mrb[36].mxu0 }
 0x4cf   :  { %4034 = vst [vmem:[%s7324_s9 + $0x4e8] sm:$0xff] %v4665_v4  ;;  %v2936_v21 = vpop.f32.mrb[37].mxu0 }
 0x4d0   :  { %v4475_v26 = vpop.f32.mrb[40].mxu1  ;;  %4033 = vst [vmem:[%s7324_s9 + $0x4e0] sm:$0xff] %v2936_v21 }
 0x4d1   :  { %2635 = vst [vmem:[%s7324_s9 + $0x108] sm:$0xff] %v4475_v26  ;;  %v2123_v5 = vpop.f32.mrb[41].mxu1  ;;  %4787 = vmatmul.mubr.msk.f32.gmra.mrb[146].mxu1 %vm1512_vm1, %v6387_v49 }
 0x4d2   :  { %2634 = vst [vmem:[%s7324_s9 + $0x100] sm:$0xff] %v2123_v5  ;;  %4789 = vmatprep.mubr.msk.f32.mxu1 %vm1512_vm1, %v6392_v16  ;;  %v4668_v7 = vpop.f32.mrb[38].mxu0 }
 0x4d3   :  { %4036 = vst [vmem:[%s7324_s9 + $0x4f8] sm:$0xff] %v4668_v7  ;;  %v2946_v27 = vpop.f32.mrb[39].mxu0 }
 0x4d4   :  { %v4478_v28 = vpop.f32.mrb[42].mxu1  ;;  %4035 = vst [vmem:[%s7324_s9 + $0x4f0] sm:$0xff] %v2946_v27 }
 0x4d5   :  { %2637 = vst [vmem:[%s7324_s9 + $0x118] sm:$0xff] %v4478_v28  ;;  %v2133_v49 = vpop.f32.mrb[43].mxu1  ;;  %4790 = vmatmul.mubr.msk.f32.gmra.mrb[148].mxu1 %vm1512_vm1, %v6413_v20 }
 0x4d6   :  { %2636 = vst [vmem:[%s7324_s9 + $0x110] sm:$0xff] %v2133_v49  ;;  %4792 = vmatprep.mubr.msk.f32.mxu1 %vm1512_vm1, %v6418_v6  ;;  %v4671_v16 = vpop.f32.mrb[40].mxu0 }
 0x4d7   :  { %4038 = vst [vmem:[%s7324_s9 + $0x508] sm:$0xff] %v4671_v16  ;;  %v2956_v31 = vpop.f32.mrb[41].mxu0 }
 0x4d8   :  { %v4481_v58 = vpop.f32.mrb[44].mxu1  ;;  %4037 = vst [vmem:[%s7324_s9 + $0x500] sm:$0xff] %v2956_v31 }
 0x4d9   :  { %2639 = vst [vmem:[%s7324_s9 + $0x128] sm:$0xff] %v4481_v58  ;;  %v2143_v20 = vpop.f32.mrb[45].mxu1  ;;  %4793 = vmatmul.mubr.msk.f32.gmra.mrb[150].mxu1 %vm1512_vm1, %v6439_v38 }
 0x4da   :  { %2638 = vst [vmem:[%s7324_s9 + $0x120] sm:$0xff] %v2143_v20  ;;  %4795 = vmatprep.mubr.msk.f32.mxu1 %vm1512_vm1, %v6444_v23  ;;  %v4674_v6 = vpop.f32.mrb[42].mxu0 }
 0x4db   :  { %4040 = vst [vmem:[%s7324_s9 + $0x518] sm:$0xff] %v4674_v6  ;;  %v2966_v39 = vpop.f32.mrb[43].mxu0 }
 0x4dc   :  { %v4484_v56 = vpop.f32.mrb[46].mxu1  ;;  %4039 = vst [vmem:[%s7324_s9 + $0x510] sm:$0xff] %v2966_v39 }
 0x4dd   :  { %2641 = vst [vmem:[%s7324_s9 + $0x138] sm:$0xff] %v4484_v56  ;;  %v2153_v38 = vpop.f32.mrb[47].mxu1  ;;  %4796 = vmatmul.mubr.msk.f32.gmra.mrb[152].mxu1 %vm1512_vm1, %v6465_v43 }
 0x4de   :  { %2640 = vst [vmem:[%s7324_s9 + $0x130] sm:$0xff] %v2153_v38  ;;  %4798 = vmatprep.mubr.msk.f32.mxu1 %vm1512_vm1, %v6470_v24  ;;  %v4677_v23 = vpop.f32.mrb[44].mxu0 }
 0x4df   :  { %4042 = vst [vmem:[%s7324_s9 + $0x528] sm:$0xff] %v4677_v23  ;;  %v2976_v45 = vpop.f32.mrb[45].mxu0 }
 0x4e0   :  { %v4487_v51 = vpop.f32.mrb[48].mxu1  ;;  %4041 = vst [vmem:[%s7324_s9 + $0x520] sm:$0xff] %v2976_v45 }
 0x4e1   :  { %2643 = vst [vmem:[%s7324_s9 + $0x148] sm:$0xff] %v4487_v51  ;;  %v2163_v43 = vpop.f32.mrb[49].mxu1  ;;  %4799 = vmatmul.mubr.msk.f32.gmra.mrb[154].mxu1 %vm1512_vm1, %v6491_v29 }
 0x4e2   :  { %2642 = vst [vmem:[%s7324_s9 + $0x140] sm:$0xff] %v2163_v43  ;;  %4801 = vmatprep.mubr.msk.f32.mxu1 %vm1512_vm1, %v6496_v34  ;;  %v4680_v24 = vpop.f32.mrb[46].mxu0 }
 0x4e3   :  { %4044 = vst [vmem:[%s7324_s9 + $0x538] sm:$0xff] %v4680_v24  ;;  %v2986_v52 = vpop.f32.mrb[47].mxu0 }
 0x4e4   :  { %v4490_v41 = vpop.f32.mrb[50].mxu1  ;;  %4043 = vst [vmem:[%s7324_s9 + $0x530] sm:$0xff] %v2986_v52 }
 0x4e5   :  { %2645 = vst [vmem:[%s7324_s9 + $0x158] sm:$0xff] %v4490_v41  ;;  %v2173_v29 = vpop.f32.mrb[51].mxu1  ;;  %4802 = vmatmul.mubr.msk.f32.gmra.mrb[156].mxu1 %vm1512_vm1, %v6517_v47 }
 0x4e6   :  { %2644 = vst [vmem:[%s7324_s9 + $0x150] sm:$0xff] %v2173_v29  ;;  %4804 = vmatprep.mubr.msk.f32.mxu1 %vm1512_vm1, %v6522_v50  ;;  %v4683_v34 = vpop.f32.mrb[48].mxu0 }
 0x4e7   :  { %4046 = vst [vmem:[%s7324_s9 + $0x548] sm:$0xff] %v4683_v34  ;;  %v2996_v25 = vpop.f32.mrb[49].mxu0 }
 0x4e8   :  { %v4493_v53 = vpop.f32.mrb[52].mxu1  ;;  %4045 = vst [vmem:[%s7324_s9 + $0x540] sm:$0xff] %v2996_v25 }
 0x4e9   :  { %2647 = vst [vmem:[%s7324_s9 + $0x168] sm:$0xff] %v4493_v53  ;;  %v2183_v47 = vpop.f32.mrb[53].mxu1  ;;  %4805 = vmatmul.mubr.msk.f32.gmra.mrb[158].mxu1 %vm1512_vm1, %v6543_v57 }
 0x4ea   :  { %2646 = vst [vmem:[%s7324_s9 + $0x160] sm:$0xff] %v2183_v47  ;;  %4807 = vmatprep.mubr.msk.f32.mxu1 %vm1512_vm1, %v6548_v13  ;;  %v4686_v50 = vpop.f32.mrb[50].mxu0 }
 0x4eb   :  { %4048 = vst [vmem:[%s7324_s9 + $0x558] sm:$0xff] %v4686_v50  ;;  %v3006_v54 = vpop.f32.mrb[51].mxu0 }
 0x4ec   :  { %v4496_v46 = vpop.f32.mrb[54].mxu1  ;;  %4047 = vst [vmem:[%s7324_s9 + $0x550] sm:$0xff] %v3006_v54 }
 0x4ed   :  { %2649 = vst [vmem:[%s7324_s9 + $0x178] sm:$0xff] %v4496_v46  ;;  %v2193_v57 = vpop.f32.mrb[55].mxu1  ;;  %4808 = vmatmul.mubr.msk.f32.gmra.mrb[160].mxu1 %vm1512_vm1, %v6569_v32 }
 0x4ee   :  { %2648 = vst [vmem:[%s7324_s9 + $0x170] sm:$0xff] %v2193_v57  ;;  %4810 = vmatprep.mubr.msk.f32.mxu1 %vm1512_vm1, %v6574_v44  ;;  %v4689_v13 = vpop.f32.mrb[52].mxu0 }
 0x4ef   :  { %4050 = vst [vmem:[%s7324_s9 + $0x568] sm:$0xff] %v4689_v13  ;;  %v3016_v19 = vpop.f32.mrb[53].mxu0 }
 0x4f0   :  { %v4499_v59 = vpop.f32.mrb[56].mxu1  ;;  %4049 = vst [vmem:[%s7324_s9 + $0x560] sm:$0xff] %v3016_v19 }
 0x4f1   :  { %2651 = vst [vmem:[%s7324_s9 + $0x188] sm:$0xff] %v4499_v59  ;;  %v2203_v32 = vpop.f32.mrb[57].mxu1  ;;  %4811 = vmatmul.mubr.msk.f32.gmra.mrb[162].mxu1 %vm1512_vm1, %v6595_v11 }
 0x4f2   :  { %2650 = vst [vmem:[%s7324_s9 + $0x180] sm:$0xff] %v2203_v32  ;;  %v4692_v44 = vpop.f32.mrb[54].mxu0 }
 0x4f3   :  { %4052 = vst [vmem:[%s7324_s9 + $0x578] sm:$0xff] %v4692_v44  ;;  %v3026_v36 = vpop.f32.mrb[55].mxu0 }
 0x4f4   :  { %v4502_v61 = vpop.f32.mrb[58].mxu1  ;;  %4051 = vst [vmem:[%s7324_s9 + $0x570] sm:$0xff] %v3026_v36 }
 0x4f5   :  { %2653 = vst [vmem:[%s7324_s9 + $0x198] sm:$0xff] %v4502_v61  ;;  %v2213_v11 = vpop.f32.mrb[59].mxu1 }
 0x4f6   :  { %2652 = vst [vmem:[%s7324_s9 + $0x190] sm:$0xff] %v2213_v11  ;;  %v4695_v55 = vpop.f32.mrb[56].mxu0 }
 0x4f7   :  { %4054 = vst [vmem:[%s7324_s9 + $0x588] sm:$0xff] %v4695_v55  ;;  %v3036_v48 = vpop.f32.mrb[57].mxu0 }
 0x4f8   :  { %v4505_v9 = vpop.f32.mrb[60].mxu1  ;;  %4053 = vst [vmem:[%s7324_s9 + $0x580] sm:$0xff] %v3036_v48 }
 0x4f9   :  { %2655 = vst [vmem:[%s7324_s9 + $0x1a8] sm:$0xff] %v4505_v9  ;;  %v2223_v10 = vpop.f32.mrb[61].mxu1 }
 0x4fa   :  { %2654 = vst [vmem:[%s7324_s9 + $0x1a0] sm:$0xff] %v2223_v10  ;;  %v4698_v15 = vpop.f32.mrb[58].mxu0 }
 0x4fb   :  { %4056 = vst [vmem:[%s7324_s9 + $0x598] sm:$0xff] %v4698_v15  ;;  %v3046_v17 = vpop.f32.mrb[59].mxu0 }
 0x4fc   :  { %v4508_v33 = vpop.f32.mrb[62].mxu1  ;;  %4055 = vst [vmem:[%s7324_s9 + $0x590] sm:$0xff] %v3046_v17 }
 0x4fd   :  { %2657 = vst [vmem:[%s7324_s9 + $0x1b8] sm:$0xff] %v4508_v33  ;;  %v2233_v18 = vpop.f32.mrb[63].mxu1 }
 0x4fe   :  { %2656 = vst [vmem:[%s7324_s9 + $0x1b0] sm:$0xff] %v2233_v18  ;;  %v4701_v12 = vpop.f32.mrb[60].mxu0 }
 0x4ff   :  { %4058 = vst [vmem:[%s7324_s9 + $0x5a8] sm:$0xff] %v4701_v12  ;;  %v3056_v42 = vpop.f32.mrb[61].mxu0 }
 0x500   :  { %v4511_v40 = vpop.f32.mrb[64].mxu1  ;;  %4057 = vst [vmem:[%s7324_s9 + $0x5a0] sm:$0xff] %v3056_v42 }
 0x501   :  { %2659 = vst [vmem:[%s7324_s9 + $0x1c8] sm:$0xff] %v4511_v40  ;;  %v2243_v62 = vpop.f32.mrb[65].mxu1 }
 0x502   :  { %2658 = vst [vmem:[%s7324_s9 + $0x1c0] sm:$0xff] %v2243_v62  ;;  %v4704_v63 = vpop.f32.mrb[62].mxu0 }
 0x503   :  { %4060 = vst [vmem:[%s7324_s9 + $0x5b8] sm:$0xff] %v4704_v63  ;;  %v3066_v37 = vpop.f32.mrb[63].mxu0 }
 0x504   :  { %v4514_v8 = vpop.f32.mrb[66].mxu1  ;;  %4059 = vst [vmem:[%s7324_s9 + $0x5b0] sm:$0xff] %v3066_v37 }
 0x505   :  { %2661 = vst [vmem:[%s7324_s9 + $0x1d8] sm:$0xff] %v4514_v8  ;;  %v2253_v0 = vpop.f32.mrb[67].mxu1 }
 0x506   :  { %2660 = vst [vmem:[%s7324_s9 + $0x1d0] sm:$0xff] %v2253_v0  ;;  %v4707_v1 = vpop.f32.mrb[64].mxu0 }
 0x507   :  { %4062 = vst [vmem:[%s7324_s9 + $0x5c8] sm:$0xff] %v4707_v1  ;;  %v3076_v22 = vpop.f32.mrb[65].mxu0 }
 0x508   :  { %v4517_v14 = vpop.f32.mrb[68].mxu1  ;;  %4061 = vst [vmem:[%s7324_s9 + $0x5c0] sm:$0xff] %v3076_v22 }
 0x509   :  { %2663 = vst [vmem:[%s7324_s9 + $0x1e8] sm:$0xff] %v4517_v14  ;;  %v2263_v60 = vpop.f32.mrb[69].mxu1 }
 0x50a   :  { %2662 = vst [vmem:[%s7324_s9 + $0x1e0] sm:$0xff] %v2263_v60  ;;  %v4710_v2 = vpop.f32.mrb[66].mxu0 }
 0x50b   :  { %4064 = vst [vmem:[%s7324_s9 + $0x5d8] sm:$0xff] %v4710_v2  ;;  %v3086_v35 = vpop.f32.mrb[67].mxu0 }
 0x50c   :  { %v4520_v30 = vpop.f32.mrb[70].mxu1  ;;  %4063 = vst [vmem:[%s7324_s9 + $0x5d0] sm:$0xff] %v3086_v35 }
 0x50d   :  { %2665 = vst [vmem:[%s7324_s9 + $0x1f8] sm:$0xff] %v4520_v30  ;;  %v2273_v3 = vpop.f32.mrb[71].mxu1 }
 0x50e   :  { %2664 = vst [vmem:[%s7324_s9 + $0x1f0] sm:$0xff] %v2273_v3  ;;  %v4713_v4 = vpop.f32.mrb[68].mxu0 }
 0x50f   :  { %4066 = vst [vmem:[%s7324_s9 + $0x5e8] sm:$0xff] %v4713_v4  ;;  %v3096_v21 = vpop.f32.mrb[69].mxu0 }
 0x510   :  { %v4523_v26 = vpop.f32.mrb[72].mxu1  ;;  %4065 = vst [vmem:[%s7324_s9 + $0x5e0] sm:$0xff] %v3096_v21 }
 0x511   :  { %2667 = vst [vmem:[%s7324_s9 + $0x208] sm:$0xff] %v4523_v26  ;;  %v2283_v5 = vpop.f32.mrb[73].mxu1 }
 0x512   :  { %2666 = vst [vmem:[%s7324_s9 + $0x200] sm:$0xff] %v2283_v5  ;;  %v4716_v7 = vpop.f32.mrb[70].mxu0 }
 0x513   :  { %4068 = vst [vmem:[%s7324_s9 + $0x5f8] sm:$0xff] %v4716_v7  ;;  %v3106_v27 = vpop.f32.mrb[71].mxu0 }
 0x514   :  { %v4526_v28 = vpop.f32.mrb[74].mxu1  ;;  %4067 = vst [vmem:[%s7324_s9 + $0x5f0] sm:$0xff] %v3106_v27 }
 0x515   :  { %2669 = vst [vmem:[%s7324_s9 + $0x218] sm:$0xff] %v4526_v28  ;;  %v2293_v49 = vpop.f32.mrb[75].mxu1 }
 0x516   :  { %2668 = vst [vmem:[%s7324_s9 + $0x210] sm:$0xff] %v2293_v49  ;;  %v4719_v16 = vpop.f32.mrb[72].mxu0 }
 0x517   :  { %4070 = vst [vmem:[%s7324_s9 + $0x608] sm:$0xff] %v4719_v16  ;;  %v3116_v31 = vpop.f32.mrb[73].mxu0 }
 0x518   :  { %v4529_v58 = vpop.f32.mrb[76].mxu1  ;;  %4069 = vst [vmem:[%s7324_s9 + $0x600] sm:$0xff] %v3116_v31 }
 0x519   :  { %2671 = vst [vmem:[%s7324_s9 + $0x228] sm:$0xff] %v4529_v58  ;;  %v2303_v20 = vpop.f32.mrb[77].mxu1 }
 0x51a   :  { %2670 = vst [vmem:[%s7324_s9 + $0x220] sm:$0xff] %v2303_v20  ;;  %v4722_v6 = vpop.f32.mrb[74].mxu0 }
 0x51b   :  { %4072 = vst [vmem:[%s7324_s9 + $0x618] sm:$0xff] %v4722_v6  ;;  %v3126_v39 = vpop.f32.mrb[75].mxu0 }
 0x51c   :  { %v4532_v56 = vpop.f32.mrb[78].mxu1  ;;  %4071 = vst [vmem:[%s7324_s9 + $0x610] sm:$0xff] %v3126_v39 }
 0x51d   :  { %2673 = vst [vmem:[%s7324_s9 + $0x238] sm:$0xff] %v4532_v56  ;;  %v2313_v38 = vpop.f32.mrb[79].mxu1 }
 0x51e   :  { %2672 = vst [vmem:[%s7324_s9 + $0x230] sm:$0xff] %v2313_v38  ;;  %v4725_v23 = vpop.f32.mrb[76].mxu0 }
 0x51f   :  { %4074 = vst [vmem:[%s7324_s9 + $0x628] sm:$0xff] %v4725_v23  ;;  %v3136_v45 = vpop.f32.mrb[77].mxu0 }
 0x520   :  { %v4535_v51 = vpop.f32.mrb[80].mxu1  ;;  %4073 = vst [vmem:[%s7324_s9 + $0x620] sm:$0xff] %v3136_v45 }
 0x521   :  { %2675 = vst [vmem:[%s7324_s9 + $0x248] sm:$0xff] %v4535_v51  ;;  %v2323_v43 = vpop.f32.mrb[81].mxu1 }
 0x522   :  { %2674 = vst [vmem:[%s7324_s9 + $0x240] sm:$0xff] %v2323_v43  ;;  %v4728_v24 = vpop.f32.mrb[78].mxu0 }
 0x523   :  { %4076 = vst [vmem:[%s7324_s9 + $0x638] sm:$0xff] %v4728_v24  ;;  %v3146_v52 = vpop.f32.mrb[79].mxu0 }
 0x524   :  { %v4538_v41 = vpop.f32.mrb[82].mxu1  ;;  %4075 = vst [vmem:[%s7324_s9 + $0x630] sm:$0xff] %v3146_v52 }
 0x525   :  { %2677 = vst [vmem:[%s7324_s9 + $0x258] sm:$0xff] %v4538_v41  ;;  %v2333_v29 = vpop.f32.mrb[83].mxu1 }
 0x526   :  { %2676 = vst [vmem:[%s7324_s9 + $0x250] sm:$0xff] %v2333_v29  ;;  %v4731_v34 = vpop.f32.mrb[80].mxu0 }
 0x527   :  { %4078 = vst [vmem:[%s7324_s9 + $0x648] sm:$0xff] %v4731_v34  ;;  %v3156_v25 = vpop.f32.mrb[81].mxu0 }
 0x528   :  { %v4541_v53 = vpop.f32.mrb[84].mxu1  ;;  %4077 = vst [vmem:[%s7324_s9 + $0x640] sm:$0xff] %v3156_v25 }
 0x529   :  { %2679 = vst [vmem:[%s7324_s9 + $0x268] sm:$0xff] %v4541_v53  ;;  %v2343_v47 = vpop.f32.mrb[85].mxu1 }
 0x52a   :  { %2678 = vst [vmem:[%s7324_s9 + $0x260] sm:$0xff] %v2343_v47  ;;  %v4734_v50 = vpop.f32.mrb[82].mxu0 }
 0x52b   :  { %4080 = vst [vmem:[%s7324_s9 + $0x658] sm:$0xff] %v4734_v50  ;;  %v3166_v54 = vpop.f32.mrb[83].mxu0 }
 0x52c   :  { %v4544_v46 = vpop.f32.mrb[86].mxu1  ;;  %4079 = vst [vmem:[%s7324_s9 + $0x650] sm:$0xff] %v3166_v54 }
 0x52d   :  { %2681 = vst [vmem:[%s7324_s9 + $0x278] sm:$0xff] %v4544_v46  ;;  %v2353_v57 = vpop.f32.mrb[87].mxu1 }
 0x52e   :  { %2680 = vst [vmem:[%s7324_s9 + $0x270] sm:$0xff] %v2353_v57  ;;  %v4737_v13 = vpop.f32.mrb[84].mxu0 }
 0x52f   :  { %4082 = vst [vmem:[%s7324_s9 + $0x668] sm:$0xff] %v4737_v13  ;;  %v3176_v19 = vpop.f32.mrb[85].mxu0 }
 0x530   :  { %v4547_v59 = vpop.f32.mrb[88].mxu1  ;;  %4081 = vst [vmem:[%s7324_s9 + $0x660] sm:$0xff] %v3176_v19 }
 0x531   :  { %2683 = vst [vmem:[%s7324_s9 + $0x288] sm:$0xff] %v4547_v59  ;;  %v2363_v32 = vpop.f32.mrb[89].mxu1 }
 0x532   :  { %2682 = vst [vmem:[%s7324_s9 + $0x280] sm:$0xff] %v2363_v32  ;;  %v4740_v44 = vpop.f32.mrb[86].mxu0 }
 0x533   :  { %4084 = vst [vmem:[%s7324_s9 + $0x678] sm:$0xff] %v4740_v44  ;;  %v3186_v36 = vpop.f32.mrb[87].mxu0 }
 0x534   :  { %v4550_v61 = vpop.f32.mrb[90].mxu1  ;;  %4083 = vst [vmem:[%s7324_s9 + $0x670] sm:$0xff] %v3186_v36 }
 0x535   :  { %2685 = vst [vmem:[%s7324_s9 + $0x298] sm:$0xff] %v4550_v61  ;;  %v2373_v11 = vpop.f32.mrb[91].mxu1 }
 0x536   :  { %2684 = vst [vmem:[%s7324_s9 + $0x290] sm:$0xff] %v2373_v11  ;;  %v4743_v55 = vpop.f32.mrb[88].mxu0 }
 0x537   :  { %4086 = vst [vmem:[%s7324_s9 + $0x688] sm:$0xff] %v4743_v55  ;;  %v3196_v48 = vpop.f32.mrb[89].mxu0 }
 0x538   :  { %v4553_v9 = vpop.f32.mrb[92].mxu1  ;;  %4085 = vst [vmem:[%s7324_s9 + $0x680] sm:$0xff] %v3196_v48 }
 0x539   :  { %2687 = vst [vmem:[%s7324_s9 + $0x2a8] sm:$0xff] %v4553_v9  ;;  %v2383_v10 = vpop.f32.mrb[93].mxu1 }
 0x53a   :  { %2686 = vst [vmem:[%s7324_s9 + $0x2a0] sm:$0xff] %v2383_v10  ;;  %v4746_v15 = vpop.f32.mrb[90].mxu0 }
 0x53b   :  { %4088 = vst [vmem:[%s7324_s9 + $0x698] sm:$0xff] %v4746_v15  ;;  %v3206_v17 = vpop.f32.mrb[91].mxu0 }
 0x53c   :  { %v4556_v33 = vpop.f32.mrb[94].mxu1  ;;  %4087 = vst [vmem:[%s7324_s9 + $0x690] sm:$0xff] %v3206_v17 }
 0x53d   :  { %2689 = vst [vmem:[%s7324_s9 + $0x2b8] sm:$0xff] %v4556_v33  ;;  %v2393_v18 = vpop.f32.mrb[95].mxu1 }
 0x53e   :  { %2688 = vst [vmem:[%s7324_s9 + $0x2b0] sm:$0xff] %v2393_v18  ;;  %v4749_v12 = vpop.f32.mrb[92].mxu0 }
 0x53f   :  { %4090 = vst [vmem:[%s7324_s9 + $0x6a8] sm:$0xff] %v4749_v12  ;;  %v3216_v42 = vpop.f32.mrb[93].mxu0 }
 0x540   :  { %v4559_v40 = vpop.f32.mrb[96].mxu1  ;;  %4089 = vst [vmem:[%s7324_s9 + $0x6a0] sm:$0xff] %v3216_v42 }
 0x541   :  { %2691 = vst [vmem:[%s7324_s9 + $0x2c8] sm:$0xff] %v4559_v40  ;;  %v2403_v62 = vpop.f32.mrb[97].mxu1 }
 0x542   :  { %2690 = vst [vmem:[%s7324_s9 + $0x2c0] sm:$0xff] %v2403_v62  ;;  %v4752_v63 = vpop.f32.mrb[94].mxu0 }
 0x543   :  { %4092 = vst [vmem:[%s7324_s9 + $0x6b8] sm:$0xff] %v4752_v63  ;;  %v3226_v37 = vpop.f32.mrb[95].mxu0 }
 0x544   :  { %v4562_v8 = vpop.f32.mrb[98].mxu1  ;;  %4091 = vst [vmem:[%s7324_s9 + $0x6b0] sm:$0xff] %v3226_v37 }
 0x545   :  { %2693 = vst [vmem:[%s7324_s9 + $0x2d8] sm:$0xff] %v4562_v8  ;;  %v2413_v0 = vpop.f32.mrb[99].mxu1 }
 0x546   :  { %2692 = vst [vmem:[%s7324_s9 + $0x2d0] sm:$0xff] %v2413_v0  ;;  %v4755_v1 = vpop.f32.mrb[96].mxu0 }
 0x547   :  { %4094 = vst [vmem:[%s7324_s9 + $0x6c8] sm:$0xff] %v4755_v1  ;;  %v3236_v22 = vpop.f32.mrb[97].mxu0 }
 0x548   :  { %v4565_v14 = vpop.f32.mrb[100].mxu1  ;;  %4093 = vst [vmem:[%s7324_s9 + $0x6c0] sm:$0xff] %v3236_v22 }
 0x549   :  { %2695 = vst [vmem:[%s7324_s9 + $0x2e8] sm:$0xff] %v4565_v14  ;;  %v2423_v60 = vpop.f32.mrb[101].mxu1 }
 0x54a   :  { %2694 = vst [vmem:[%s7324_s9 + $0x2e0] sm:$0xff] %v2423_v60  ;;  %v4758_v2 = vpop.f32.mrb[98].mxu0 }
 0x54b   :  { %4096 = vst [vmem:[%s7324_s9 + $0x6d8] sm:$0xff] %v4758_v2  ;;  %v3246_v35 = vpop.f32.mrb[99].mxu0 }
 0x54c   :  { %v4568_v30 = vpop.f32.mrb[102].mxu1  ;;  %4095 = vst [vmem:[%s7324_s9 + $0x6d0] sm:$0xff] %v3246_v35 }
 0x54d   :  { %2697 = vst [vmem:[%s7324_s9 + $0x2f8] sm:$0xff] %v4568_v30  ;;  %v2433_v3 = vpop.f32.mrb[103].mxu1 }
 0x54e   :  { %2696 = vst [vmem:[%s7324_s9 + $0x2f0] sm:$0xff] %v2433_v3  ;;  %v4761_v4 = vpop.f32.mrb[100].mxu0 }
 0x54f   :  { %4098 = vst [vmem:[%s7324_s9 + $0x6e8] sm:$0xff] %v4761_v4  ;;  %v3256_v21 = vpop.f32.mrb[101].mxu0 }
 0x550   :  { %v4571_v26 = vpop.f32.mrb[104].mxu1  ;;  %4097 = vst [vmem:[%s7324_s9 + $0x6e0] sm:$0xff] %v3256_v21 }
 0x551   :  { %2699 = vst [vmem:[%s7324_s9 + $0x308] sm:$0xff] %v4571_v26  ;;  %v2443_v5 = vpop.f32.mrb[105].mxu1 }
 0x552   :  { %2698 = vst [vmem:[%s7324_s9 + $0x300] sm:$0xff] %v2443_v5  ;;  %v4764_v7 = vpop.f32.mrb[102].mxu0 }
 0x553   :  { %4100 = vst [vmem:[%s7324_s9 + $0x6f8] sm:$0xff] %v4764_v7  ;;  %v3266_v27 = vpop.f32.mrb[103].mxu0 }
 0x554   :  { %v4574_v28 = vpop.f32.mrb[106].mxu1  ;;  %4099 = vst [vmem:[%s7324_s9 + $0x6f0] sm:$0xff] %v3266_v27 }
 0x555   :  { %2701 = vst [vmem:[%s7324_s9 + $0x318] sm:$0xff] %v4574_v28  ;;  %v2453_v49 = vpop.f32.mrb[107].mxu1 }
 0x556   :  { %2700 = vst [vmem:[%s7324_s9 + $0x310] sm:$0xff] %v2453_v49  ;;  %v4767_v16 = vpop.f32.mrb[104].mxu0 }
 0x557   :  { %4102 = vst [vmem:[%s7324_s9 + $0x708] sm:$0xff] %v4767_v16  ;;  %v3276_v31 = vpop.f32.mrb[105].mxu0 }
 0x558   :  { %v4577_v58 = vpop.f32.mrb[108].mxu1  ;;  %4101 = vst [vmem:[%s7324_s9 + $0x700] sm:$0xff] %v3276_v31 }
 0x559   :  { %2703 = vst [vmem:[%s7324_s9 + $0x328] sm:$0xff] %v4577_v58  ;;  %v2463_v20 = vpop.f32.mrb[109].mxu1 }
 0x55a   :  { %2702 = vst [vmem:[%s7324_s9 + $0x320] sm:$0xff] %v2463_v20  ;;  %v4770_v6 = vpop.f32.mrb[106].mxu0 }
 0x55b   :  { %4104 = vst [vmem:[%s7324_s9 + $0x718] sm:$0xff] %v4770_v6  ;;  %v3286_v39 = vpop.f32.mrb[107].mxu0 }
 0x55c   :  { %v4580_v56 = vpop.f32.mrb[110].mxu1  ;;  %4103 = vst [vmem:[%s7324_s9 + $0x710] sm:$0xff] %v3286_v39 }
 0x55d   :  { %2705 = vst [vmem:[%s7324_s9 + $0x338] sm:$0xff] %v4580_v56  ;;  %v2473_v38 = vpop.f32.mrb[111].mxu1 }
 0x55e   :  { %2704 = vst [vmem:[%s7324_s9 + $0x330] sm:$0xff] %v2473_v38 }
 0x560   :  { %v4583_v23 = vpop.f32.mrb[112].mxu1 }
 0x561   :  { %2707 = vst [vmem:[%s7324_s9 + $0x348] sm:$0xff] %v4583_v23  ;;  %v2483_v45 = vpop.f32.mrb[113].mxu1 }
 0x562   :  { %2706 = vst [vmem:[%s7324_s9 + $0x340] sm:$0xff] %v2483_v45 }
 0x564   :  { %v4586_v51 = vpop.f32.mrb[114].mxu1 }
 0x565   :  { %2709 = vst [vmem:[%s7324_s9 + $0x358] sm:$0xff] %v4586_v51  ;;  %v2493_v43 = vpop.f32.mrb[115].mxu1 }
 0x566   :  { %2708 = vst [vmem:[%s7324_s9 + $0x350] sm:$0xff] %v2493_v43 }
 0x568   :  { %v4589_v24 = vpop.f32.mrb[116].mxu1 }
 0x569   :  { %2711 = vst [vmem:[%s7324_s9 + $0x368] sm:$0xff] %v4589_v24  ;;  %v2503_v52 = vpop.f32.mrb[117].mxu1 }
 0x56a   :  { %2710 = vst [vmem:[%s7324_s9 + $0x360] sm:$0xff] %v2503_v52 }
 0x56c   :  { %v4592_v41 = vpop.f32.mrb[118].mxu1 }
 0x56d   :  { %2713 = vst [vmem:[%s7324_s9 + $0x378] sm:$0xff] %v4592_v41  ;;  %v2513_v29 = vpop.f32.mrb[119].mxu1 }
 0x56e   :  { %2712 = vst [vmem:[%s7324_s9 + $0x370] sm:$0xff] %v2513_v29 }
 0x570   :  { %v4595_v34 = vpop.f32.mrb[120].mxu1 }
 0x571   :  { %2715 = vst [vmem:[%s7324_s9 + $0x388] sm:$0xff] %v4595_v34  ;;  %v2523_v25 = vpop.f32.mrb[121].mxu1 }
 0x572   :  { %2714 = vst [vmem:[%s7324_s9 + $0x380] sm:$0xff] %v2523_v25 }
 0x574   :  { %v4598_v53 = vpop.f32.mrb[122].mxu1 }
 0x575   :  { %2717 = vst [vmem:[%s7324_s9 + $0x398] sm:$0xff] %v4598_v53  ;;  %v2533_v47 = vpop.f32.mrb[123].mxu1 }
 0x576   :  { %2716 = vst [vmem:[%s7324_s9 + $0x390] sm:$0xff] %v2533_v47 }
 0x578   :  { %v4601_v50 = vpop.f32.mrb[124].mxu1 }
 0x579   :  { %2719 = vst [vmem:[%s7324_s9 + $0x3a8] sm:$0xff] %v4601_v50  ;;  %v2543_v54 = vpop.f32.mrb[125].mxu1 }
 0x57a   :  { %2718 = vst [vmem:[%s7324_s9 + $0x3a0] sm:$0xff] %v2543_v54 }
 0x57c   :  { %v4604_v46 = vpop.f32.mrb[126].mxu1 }
 0x57d   :  { %2721 = vst [vmem:[%s7324_s9 + $0x3b8] sm:$0xff] %v4604_v46  ;;  %v2553_v57 = vpop.f32.mrb[127].mxu1 }
 0x57e   :  { %2720 = vst [vmem:[%s7324_s9 + $0x3b0] sm:$0xff] %v2553_v57 }
 0x580   :  { %v4607_v13 = vpop.f32.mrb[128].mxu1 }
 0x581   :  { %2723 = vst [vmem:[%s7324_s9 + $0x3c8] sm:$0xff] %v4607_v13  ;;  %v2563_v19 = vpop.f32.mrb[129].mxu1 }
 0x582   :  { %2722 = vst [vmem:[%s7324_s9 + $0x3c0] sm:$0xff] %v2563_v19 }
 0x584   :  { %v4610_v59 = vpop.f32.mrb[130].mxu1 }
 0x585   :  { %2725 = vst [vmem:[%s7324_s9 + $0x3d8] sm:$0xff] %v4610_v59  ;;  %v2573_v32 = vpop.f32.mrb[131].mxu1 }
 0x586   :  { %2724 = vst [vmem:[%s7324_s9 + $0x3d0] sm:$0xff] %v2573_v32 }
 0x588   :  { %v4613_v44 = vpop.f32.mrb[132].mxu1 }
 0x589   :  { %2727 = vst [vmem:[%s7324_s9 + $0x3e8] sm:$0xff] %v4613_v44  ;;  %v2583_v36 = vpop.f32.mrb[133].mxu1 }
 0x58a   :  { %2726 = vst [vmem:[%s7324_s9 + $0x3e0] sm:$0xff] %v2583_v36 }
 0x58c   :  { %v4616_v61 = vpop.f32.mrb[134].mxu1 }
 0x58d   :  { %2729 = vst [vmem:[%s7324_s9 + $0x3f8] sm:$0xff] %v4616_v61  ;;  %v2593_v11 = vpop.f32.mrb[135].mxu1 }
 0x58e   :  { %2728 = vst [vmem:[%s7324_s9 + $0x3f0] sm:$0xff] %v2593_v11 }
 0x590   :  { %v4773_v55 = vpop.f32.mrb[136].mxu1 }
 0x591   :  { %4106 = vst [vmem:[%s7324_s9 + $0x728] sm:$0xff] %v4773_v55  ;;  %v3296_v48 = vpop.f32.mrb[137].mxu1 }
 0x592   :  { %4105 = vst [vmem:[%s7324_s9 + $0x720] sm:$0xff] %v3296_v48 }
 0x594   :  { %v4776_v9 = vpop.f32.mrb[138].mxu1 }
 0x595   :  { %4108 = vst [vmem:[%s7324_s9 + $0x738] sm:$0xff] %v4776_v9  ;;  %v3306_v10 = vpop.f32.mrb[139].mxu1 }
 0x596   :  { %4107 = vst [vmem:[%s7324_s9 + $0x730] sm:$0xff] %v3306_v10 }
 0x598   :  { %v4779_v15 = vpop.f32.mrb[140].mxu1 }
 0x599   :  { %4110 = vst [vmem:[%s7324_s9 + $0x748] sm:$0xff] %v4779_v15  ;;  %v3316_v17 = vpop.f32.mrb[141].mxu1 }
 0x59a   :  { %4109 = vst [vmem:[%s7324_s9 + $0x740] sm:$0xff] %v3316_v17 }
 0x59c   :  { %v4782_v33 = vpop.f32.mrb[142].mxu1 }
 0x59d   :  { %4112 = vst [vmem:[%s7324_s9 + $0x758] sm:$0xff] %v4782_v33  ;;  %v3326_v18 = vpop.f32.mrb[143].mxu1 }
 0x59e   :  { %4111 = vst [vmem:[%s7324_s9 + $0x750] sm:$0xff] %v3326_v18 }
 0x5a0   :  { %v4785_v12 = vpop.f32.mrb[144].mxu1 }
 0x5a1   :  { %4114 = vst [vmem:[%s7324_s9 + $0x768] sm:$0xff] %v4785_v12  ;;  %v3336_v42 = vpop.f32.mrb[145].mxu1 }
 0x5a2   :  { %4113 = vst [vmem:[%s7324_s9 + $0x760] sm:$0xff] %v3336_v42 }
 0x5a4   :  { %v4788_v40 = vpop.f32.mrb[146].mxu1 }
 0x5a5   :  { %4116 = vst [vmem:[%s7324_s9 + $0x778] sm:$0xff] %v4788_v40  ;;  %v3346_v62 = vpop.f32.mrb[147].mxu1 }
 0x5a6   :  { %4115 = vst [vmem:[%s7324_s9 + $0x770] sm:$0xff] %v3346_v62 }
 0x5a8   :  { %v4791_v63 = vpop.f32.mrb[148].mxu1 }
 0x5a9   :  { %4118 = vst [vmem:[%s7324_s9 + $0x788] sm:$0xff] %v4791_v63  ;;  %v3356_v37 = vpop.f32.mrb[149].mxu1 }
 0x5aa   :  { %4117 = vst [vmem:[%s7324_s9 + $0x780] sm:$0xff] %v3356_v37 }
 0x5ac   :  { %v4794_v8 = vpop.f32.mrb[150].mxu1 }
 0x5ad   :  { %4120 = vst [vmem:[%s7324_s9 + $0x798] sm:$0xff] %v4794_v8  ;;  %v3366_v0 = vpop.f32.mrb[151].mxu1 }
 0x5ae   :  { %4119 = vst [vmem:[%s7324_s9 + $0x790] sm:$0xff] %v3366_v0 }
 0x5b0   :  { %v4797_v1 = vpop.f32.mrb[152].mxu1 }
 0x5b1   :  { %4122 = vst [vmem:[%s7324_s9 + $0x7a8] sm:$0xff] %v4797_v1  ;;  %v3376_v22 = vpop.f32.mrb[153].mxu1 }
 0x5b2   :  { %4121 = vst [vmem:[%s7324_s9 + $0x7a0] sm:$0xff] %v3376_v22 }
 0x5b4   :  { %v4800_v14 = vpop.f32.mrb[154].mxu1 }
 0x5b5   :  { %4124 = vst [vmem:[%s7324_s9 + $0x7b8] sm:$0xff] %v4800_v14  ;;  %v3386_v60 = vpop.f32.mrb[155].mxu1 }
 0x5b6   :  { %4123 = vst [vmem:[%s7324_s9 + $0x7b0] sm:$0xff] %v3386_v60 }
 0x5b8   :  { %v4803_v2 = vpop.f32.mrb[156].mxu1 }
 0x5b9   :  { %4126 = vst [vmem:[%s7324_s9 + $0x7c8] sm:$0xff] %v4803_v2  ;;  %v3396_v35 = vpop.f32.mrb[157].mxu1 }
 0x5ba   :  { %4125 = vst [vmem:[%s7324_s9 + $0x7c0] sm:$0xff] %v3396_v35 }
 0x5bc   :  { %v4806_v30 = vpop.f32.mrb[158].mxu1 }
 0x5bd   :  { %4128 = vst [vmem:[%s7324_s9 + $0x7d8] sm:$0xff] %v4806_v30  ;;  %v3406_v3 = vpop.f32.mrb[159].mxu1 }
 0x5be   :  { %4127 = vst [vmem:[%s7324_s9 + $0x7d0] sm:$0xff] %v3406_v3 }
 0x5c0   :  { %v4809_v4 = vpop.f32.mrb[160].mxu1 }
 0x5c1   :  { %4130 = vst [vmem:[%s7324_s9 + $0x7e8] sm:$0xff] %v4809_v4  ;;  %v3416_v21 = vpop.f32.mrb[161].mxu1 }
 0x5c2   :  { %4129 = vst [vmem:[%s7324_s9 + $0x7e0] sm:$0xff] %v3416_v21 }
 0x5c4   :  { %v4812_v26 = vpop.f32.mrb[162].mxu1 }
 0x5c5   :  { %4132 = vst [vmem:[%s7324_s9 + $0x7f8] sm:$0xff] %v4812_v26  ;;  %v3426_v5 = vpop.f32.mrb[163].mxu1 }
 0x5c6   :  { %4131 = vst [vmem:[%s7324_s9 + $0x7f0] sm:$0xff] %v3426_v5 }

</bundles_post_ra>
